<compile_context>
chip_gen: v5e
topology: v5e:2x2
jax: 0.10.0
libtpu: 0.0.40
codegen_flags: <defaults>
</compile_context>

<pallas_src>
import jax
import jax.numpy as jnp
from jax.experimental import pallas as pl
from jax.experimental.pallas import tpu as pltpu


# ---------------------------------------------------------------------------
# Fused kernel factory.
# Args (L = num_layers):
#   x2d(bf16), wih0_t(bf16), whh0_t(bf16), b0(f32),
#   [wcat(bf16, HBM), bcat(f32)]   (only if L > 1)
#   wfc(f32), bfc(f32)
# Outputs: logits (BP, out) f32
# Scratch: g0_sc (T*BP, 4H) f32, [wcat_vmem (L-1,2H,4H) bf16, DMA sem (L-1,)]
# ---------------------------------------------------------------------------
def _make_ozon_kernel(T, B, H, num_layers):
    L = num_layers
    n_in = 4 + (2 if L > 1 else 0) + 2

    def kernel(*refs):
        x_ref, wih0_ref, whh0_ref, b0_ref = refs[0:4]
        idx = 4
        if L > 1:
            wcat_hbm, bcat_ref = refs[4:6]
            idx = 6
        wfc_ref, bfc_ref = refs[idx:idx + 2]
        o_ref = refs[n_in]
        g0_sc = refs[n_in + 1]
        if L > 1:
            wcat_vmem = refs[n_in + 2]
            dma_sem = refs[n_in + 3]

        # 1) Kick off DMA of the fused layer>=1 weights (HBM -> VMEM) so the
        #    copy overlaps layer-0's hoisted projection and first step(s).
        copies = []
        if L > 1:
            for l in range(1, L):
                cp = pltpu.make_async_copy(
                    wcat_hbm.at[l - 1], wcat_vmem.at[l - 1], dma_sem.at[l - 1])
                cp.start()
                copies.append(cp)

        # 2) Hoisted layer-0 input projection for the whole sequence
        #    (bias folded, bf16 operands, f32 accumulation).
        g0_sc[...] = (jnp.dot(x_ref[...], wih0_ref[...],
                              preferred_element_type=jnp.float32)
                      + b0_ref[...])

        def gates_to_state(g, c):
            i_g = jax.nn.sigmoid(g[:, 0 * H:1 * H])
            f_g = jax.nn.sigmoid(g[:, 1 * H:2 * H])
            g_g = jnp.tanh(g[:, 2 * H:3 * H])
            o_g = jax.nn.sigmoid(g[:, 3 * H:4 * H])
            c_new = f_g * c + i_g * g_g
            h_new = o_g * jnp.tanh(c_new)
            return h_new, c_new

        h = [jnp.zeros((B, H), jnp.float32) for _ in range(L)]
        c = [jnp.zeros((B, H), jnp.float32) for _ in range(L)]
        bcat_vals = [bcat_ref[i] for i in range(L - 1)] if L > 1 else []
        waited = False

        # 3) Wavefront over (time, layer): layer l runs time step t = s - l.
        #    Within one iteration every layer only reads the PREVIOUS
        #    iteration's state (h_prev snapshot), so the matmul/EUP chains of
        #    different layers are independent and get interleaved.
        for s in range(T + L - 1):
            h_prev = list(h)
            for l in range(L):
                t = s - l
                if not (0 <= t < T):
                    continue
                if l == 0:
                    g = (g0_sc[t * B:(t + 1) * B, :]
                         + jnp.dot(h_prev[0].astype(jnp.bfloat16),
                                   whh0_ref[...],
                                   preferred_element_type=jnp.float32))
                else:
                    if not waited:
                        for cp in copies:
                            cp.wait()
                        waited = True
                    # Fused input+recurrent matmul: [h_{l-1,t}, h_{l,t-1}] (B,2H)
                    inp = jnp.concatenate([h_prev[l - 1], h_prev[l]],
                                          axis=1).astype(jnp.bfloat16)
                    g = (jnp.dot(inp, wcat_vmem[l - 1],
                                 preferred_element_type=jnp.float32)
                         + bcat_vals[l - 1])
                h[l], c[l] = gates_to_state(g, c[l])

        # 4) Collapsed affine FC head on the last layer's final hidden state
        #    (fc has no nonlinearity; dropouts are eval-mode identity).
        o_ref[...] = (jnp.dot(h[L - 1], wfc_ref[...],
                              preferred_element_type=jnp.float32)
                      + bfc_ref[...])

    return kernel


# ---------------------------------------------------------------------------
# Parameter construction (deterministic), mirroring PyTorch shapes.
# ---------------------------------------------------------------------------
def init_params(key, input_size, hidden_size, output_size, num_layers):
    H = hidden_size * 4                      # LSTM hidden size in the module
    params = {"lstm": [], "fc": []}
    k = 1.0 / jnp.sqrt(jnp.float32(H))

    def uni(key, shape, scale):
        return jax.random.uniform(key, shape, jnp.float32, -scale, scale)

    for l in range(num_layers):
        din = input_size if l == 0 else H
        key, k1, k2, k3, k4 = jax.random.split(key, 5)
        params["lstm"].append(dict(
            w_ih=uni(k1, (4 * H, din), k),   # PyTorch weight_ih_l{l}, gates [i,f,g,o]
            w_hh=uni(k2, (4 * H, H), k),     # PyTorch weight_hh_l{l}
            b_ih=uni(k3, (4 * H,), k),
            b_hh=uni(k4, (4 * H,), k)))

    fc_dims = [(H, hidden_size // 2),
               (hidden_size // 2, hidden_size // 8),
               (hidden_size // 8, output_size)]
    for din, dout in fc_dims:
        key, k1, k2 = jax.random.split(key, 3)
        s = 1.0 / jnp.sqrt(jnp.float32(din))
        params["fc"].append(dict(w=uni(k1, (dout, din), s),   # PyTorch Linear
                                 b=uni(k2, (dout,), s)))
    return params


# ---------------------------------------------------------------------------
# Full forward pass (PyTorch-equivalent: x is batch_first (B, T, input_size)).
# ---------------------------------------------------------------------------
@jax.jit
def ozon_lstm_forward(x_btd, params):
    B, T, Din = x_btd.shape
    L = len(params["lstm"])
    H = params["lstm"][0]["w_hh"].shape[1]            # (4H, H) -> H
    BP = ((B + 15) // 16) * 16                        # bf16 sublane packing

    # ---- pack inputs / weights for the kernel ----
    x = jnp.transpose(x_btd.astype(jnp.float32), (1, 0, 2))   # (T, B, Din)
    if BP != B:
        x = jnp.pad(x, ((0, 0), (0, BP - B), (0, 0)))
    x2d = x.reshape(T * BP, Din).astype(jnp.bfloat16)

    l0 = params["lstm"][0]
    wih0_t = l0["w_ih"].T.astype(jnp.bfloat16)                 # (Din, 4H)
    whh0_t = l0["w_hh"].T.astype(jnp.bfloat16)                 # (H, 4H)
    b0 = (l0["b_ih"] + l0["b_hh"]).reshape(1, 4 * H)           # f32

    args = [x2d, wih0_t, whh0_t, b0]
    if L > 1:
        wcat = jnp.stack([
            jnp.concatenate([params["lstm"][l]["w_ih"].T,      # (H, 4H)
                             params["lstm"][l]["w_hh"].T],     # (H, 4H)
                            axis=0)                            # (2H, 4H)
            for l in range(1, L)]).astype(jnp.bfloat16)        # (L-1, 2H, 4H)
        bcat = jnp.stack([
            (params["lstm"][l]["b_ih"] + params["lstm"][l]["b_hh"]).reshape(1, 4 * H)
            for l in range(1, L)])                             # (L-1, 1, 4H)
        args += [wcat, bcat]

    # Collapse the affine FC head (Linear/Dropout/Linear/Dropout/Linear, eval).
    w1t, b1 = params["fc"][0]["w"].T, params["fc"][0]["b"]
    w2t, b2 = params["fc"][1]["w"].T, params["fc"][1]["b"]
    w3t, b3 = params["fc"][2]["w"].T, params["fc"][2]["b"]
    wfc = w1t @ w2t @ w3t                                      # (4H, out)
    bfc = ((b1 @ w2t + b2) @ w3t + b3).reshape(1, -1)          # (1, out)
    out_dim = wfc.shape[1]
    args += [wfc, bfc]

    # ---- specs / scratch ----
    vmem = pltpu.MemorySpace.VMEM
    in_specs = [pl.BlockSpec(memory_space=vmem)] * 4
    if L > 1:
        in_specs += [pl.BlockSpec(memory_space=pl.ANY),        # wcat stays in HBM
                     pl.BlockSpec(memory_space=vmem)]
    in_specs += [pl.BlockSpec(memory_space=vmem)] * 2

    scratch = [pltpu.VMEM((T * BP, 4 * H), jnp.float32)]       # hoisted gate pre-acts
    if L > 1:
        scratch += [pltpu.VMEM((L - 1, 2 * H, 4 * H), jnp.bfloat16),
                    pltpu.SemaphoreType.DMA((L - 1,))]

    # Advisory cost estimate.
    flops = 2 * T * BP * Din * 4 * H                           # layer-0 projection
    flops += 2 * T * BP * H * 4 * H                            # layer-0 recurrent
    flops += (L - 1) * 2 * T * BP * (2 * H) * 4 * H            # fused layer>=1 steps
    flops += 2 * BP * H * out_dim                              # collapsed FC head
    transcendentals = L * T * BP * 5 * H
    bytes_accessed = sum(int(a.size) * a.dtype.itemsize for a in args) \
        + BP * out_dim * 4

    kernel = _make_ozon_kernel(T, BP, H, L)

    out = pl.pallas_call(
        kernel,
        out_shape=jax.ShapeDtypeStruct((BP, out_dim), jnp.float32),
        in_specs=in_specs,
        out_specs=pl.BlockSpec(memory_space=vmem),
        scratch_shapes=scratch,
        compiler_params=pltpu.CompilerParams(
            vmem_limit_bytes=32 * 1024 * 1024),
        cost_estimate=pl.CostEstimate(
            flops=int(flops),
            transcendentals=int(transcendentals),
            bytes_accessed=int(bytes_accessed)),
    )(*args)

    return out[:B]


if __name__ == "__main__":
    # input_size=16, hidden_size=32 -> LSTM hidden 128, fc: 128 -> 16 -> 4 -> 2,
    # num_layers=2; batch=4; seq=8.
    INPUT_SIZE, HIDDEN_SIZE, OUTPUT_SIZE, NUM_LAYERS = 16, 32, 2, 2
    B, T = 4, 8

    key = jax.random.PRNGKey(0)
    key, pkey, xkey = jax.random.split(key, 3)
    params = init_params(pkey, INPUT_SIZE, HIDDEN_SIZE, OUTPUT_SIZE, NUM_LAYERS)
    x = jax.random.normal(xkey, (B, T, INPUT_SIZE), jnp.float32)

    out = ozon_lstm_forward(x, params)
    jax.block_until_ready(out)
    assert out.shape == (B, OUTPUT_SIZE), out.shape
    assert bool(jnp.all(jnp.isfinite(out)))
    print("KERNEL_OK")
</pallas_src>

<mosaic_0001>
module attributes {stable_mosaic.version = 11 : i64} {
  func.func @kernel(%arg0: memref<128x16xbf16, #tpu.memory_space<vmem>>, %arg1: memref<16x512xbf16, #tpu.memory_space<vmem>>, %arg2: memref<128x512xbf16, #tpu.memory_space<vmem>>, %arg3: memref<1x512xf32, #tpu.memory_space<vmem>>, %arg4: memref<1x256x512xbf16, #tpu.memory_space<any>>, %arg5: memref<1x1x512xf32, #tpu.memory_space<vmem>>, %arg6: memref<128x2xf32, #tpu.memory_space<vmem>>, %arg7: memref<1x2xf32, #tpu.memory_space<vmem>>, %arg8: memref<16x2xf32, #tpu.memory_space<vmem>>, %arg9: memref<128x512xf32, #tpu.memory_space<vmem>>, %arg10: memref<1x256x512xbf16, #tpu.memory_space<vmem>>, %arg11: memref<1x!tpu.dma_semaphore, #tpu.memory_space<semaphore_mem>>) attributes {dimension_semantics = [], scalar_prefetch = 0 : i64, scratch_operands = 3 : i64, tpu.core_type = #tpu.core_type<tc>} {
    %c0_i32 = arith.constant 0 : i32
    %c0_i32_0 = arith.constant 0 : i32
    %c0_i32_1 = arith.constant 0 : i32
    %c0_i32_2 = arith.constant 0 : i32
    %c0_i32_3 = arith.constant 0 : i32
    %0 = tpu.memref_slice %arg4[%c0_i32, %c0_i32_2, %c0_i32_3] : memref<1x256x512xbf16, #tpu.memory_space<any>> -> memref<1x256x512xbf16, #tpu.memory_space<any>>
    %1 = tpu.memref_squeeze %0 : memref<1x256x512xbf16, #tpu.memory_space<any>> -> memref<256x512xbf16, #tpu.memory_space<any>>
    %c0_i32_4 = arith.constant 0 : i32
    %c0_i32_5 = arith.constant 0 : i32
    %2 = tpu.memref_slice %arg10[%c0_i32_0, %c0_i32_4, %c0_i32_5] : memref<1x256x512xbf16, #tpu.memory_space<vmem>> -> memref<1x256x512xbf16, #tpu.memory_space<vmem>>
    %3 = tpu.memref_squeeze %2 : memref<1x256x512xbf16, #tpu.memory_space<vmem>> -> memref<256x512xbf16, #tpu.memory_space<vmem>>
    %4 = tpu.memref_slice %arg11[%c0_i32_1] : memref<1x!tpu.dma_semaphore, #tpu.memory_space<semaphore_mem>> -> memref<1x!tpu.dma_semaphore, #tpu.memory_space<semaphore_mem>>
    %5 = tpu.memref_squeeze %4 : memref<1x!tpu.dma_semaphore, #tpu.memory_space<semaphore_mem>> -> memref<!tpu.dma_semaphore, #tpu.memory_space<semaphore_mem>>
    tpu.enqueue_dma source(%1 : memref<256x512xbf16, #tpu.memory_space<any>>) target(%3 : memref<256x512xbf16, #tpu.memory_space<vmem>>) target_semaphore(%5 : memref<!tpu.dma_semaphore, #tpu.memory_space<semaphore_mem>>)
    %c0 = arith.constant 0 : index
    %c0_6 = arith.constant 0 : index
    %6 = vector.load %arg0[%c0, %c0_6] : memref<128x16xbf16, #tpu.memory_space<vmem>>, vector<128x16xbf16>
    %c0_7 = arith.constant 0 : index
    %c0_8 = arith.constant 0 : index
    %7 = vector.load %arg1[%c0_7, %c0_8] : memref<16x512xbf16, #tpu.memory_space<vmem>>, vector<16x512xbf16>
    %cst = arith.constant dense<0.000000e+00> : vector<128x512xf32>
    %8 = tpu.matmul %6, %7, %cst {dimension_numbers = #tpu.dot_dimension_numbers<[1], [0], [0], [1], [0, 0, 1, 1], [], []>} : vector<128x16xbf16>, vector<16x512xbf16>, vector<128x512xf32> -> vector<128x512xf32>
    %c0_9 = arith.constant 0 : index
    %c0_10 = arith.constant 0 : index
    %9 = vector.load %arg3[%c0_9, %c0_10] : memref<1x512xf32, #tpu.memory_space<vmem>>, vector<1x512xf32>
    %10 = vector.broadcast %9 : vector<1x512xf32> to vector<128x512xf32>
    %11 = arith.addf %8, %10 : vector<128x512xf32>
    %c0_11 = arith.constant 0 : index
    %c0_12 = arith.constant 0 : index
    %12 = vector.load %arg9[%c0_11, %c0_12] : memref<128x512xf32, #tpu.memory_space<vmem>>, vector<128x512xf32>
    tpu.vector_store %arg9[%c0_11, %c0_12], %11 {strides = array<i32>} : memref<128x512xf32, #tpu.memory_space<vmem>>, vector<128x512xf32>,
    %cst_13 = arith.constant 0.000000e+00 : f32
    %13 = vector.broadcast %cst_13 : f32 to vector<16x128xf32>
    %cst_14 = arith.constant 0.000000e+00 : f32
    %14 = vector.broadcast %cst_14 : f32 to vector<16x128xf32>
    %cst_15 = arith.constant 0.000000e+00 : f32
    %15 = vector.broadcast %cst_15 : f32 to vector<16x128xf32>
    %cst_16 = arith.constant 0.000000e+00 : f32
    %16 = vector.broadcast %cst_16 : f32 to vector<16x128xf32>
    %c0_17 = arith.constant 0 : index
    %c0_18 = arith.constant 0 : index
    %c0_19 = arith.constant 0 : index
    %17 = vector.load %arg5[%c0_17, %c0_18, %c0_19] : memref<1x1x512xf32, #tpu.memory_space<vmem>>, vector<1x1x512xf32>
    %18 = vector.shape_cast %17 : vector<1x1x512xf32> to vector<1x512xf32>
    %c0_20 = arith.constant 0 : index
    %c0_21 = arith.constant 0 : index
    %19 = vector.load %arg9[%c0_20, %c0_21] : memref<128x512xf32, #tpu.memory_space<vmem>>, vector<16x512xf32>
    %20 = arith.truncf %13 : vector<16x128xf32> to vector<16x128xbf16>
    %c0_22 = arith.constant 0 : index
    %c0_23 = arith.constant 0 : index
    %21 = vector.load %arg2[%c0_22, %c0_23] : memref<128x512xbf16, #tpu.memory_space<vmem>>, vector<128x512xbf16>
    %cst_24 = arith.constant dense<0.000000e+00> : vector<16x512xf32>
    %22 = tpu.matmul %20, %21, %cst_24 {dimension_numbers = #tpu.dot_dimension_numbers<[1], [0], [0], [1], [0, 0, 1, 1], [], []>} : vector<16x128xbf16>, vector<128x512xbf16>, vector<16x512xf32> -> vector<16x512xf32>
    %23 = arith.addf %19, %22 : vector<16x512xf32>
    %24 = vector.extract_strided_slice %23 {offsets = [0, 0], sizes = [16, 128], strides = [1, 1]} : vector<16x512xf32> to vector<16x128xf32>
    %25 = arith.negf %24 : vector<16x128xf32>
    %26 = math.exp %25 : vector<16x128xf32>
    %cst_25 = arith.constant 1.000000e+00 : f32
    %27 = vector.broadcast %cst_25 : f32 to vector<16x128xf32>
    %28 = arith.addf %27, %26 : vector<16x128xf32>
    %29 = arith.divf %27, %28 : vector<16x128xf32>
    %30 = vector.extract_strided_slice %23 {offsets = [0, 128], sizes = [16, 128], strides = [1, 1]} : vector<16x512xf32> to vector<16x128xf32>
    %31 = arith.negf %30 : vector<16x128xf32>
    %32 = math.exp %31 : vector<16x128xf32>
    %cst_26 = arith.constant 1.000000e+00 : f32
    %33 = vector.broadcast %cst_26 : f32 to vector<16x128xf32>
    %34 = arith.addf %33, %32 : vector<16x128xf32>
    %35 = arith.divf %33, %34 : vector<16x128xf32>
    %36 = vector.extract_strided_slice %23 {offsets = [0, 256], sizes = [16, 128], strides = [1, 1]} : vector<16x512xf32> to vector<16x128xf32>
    %37 = math.tanh %36 : vector<16x128xf32>
    %38 = vector.extract_strided_slice %23 {offsets = [0, 384], sizes = [16, 128], strides = [1, 1]} : vector<16x512xf32> to vector<16x128xf32>
    %39 = arith.negf %38 : vector<16x128xf32>
    %40 = math.exp %39 : vector<16x128xf32>
    %cst_27 = arith.constant 1.000000e+00 : f32
    %41 = vector.broadcast %cst_27 : f32 to vector<16x128xf32>
    %42 = arith.addf %41, %40 : vector<16x128xf32>
    %43 = arith.divf %41, %42 : vector<16x128xf32>
    %44 = arith.mulf %35, %15 : vector<16x128xf32>
    %45 = arith.mulf %29, %37 : vector<16x128xf32>
    %46 = arith.addf %44, %45 : vector<16x128xf32>
    %47 = math.tanh %46 : vector<16x128xf32>
    %48 = arith.mulf %43, %47 : vector<16x128xf32>
    %c16 = arith.constant 16 : index
    %c0_28 = arith.constant 0 : index
    %49 = vector.load %arg9[%c16, %c0_28] : memref<128x512xf32, #tpu.memory_space<vmem>>, vector<16x512xf32>
    %50 = arith.truncf %48 : vector<16x128xf32> to vector<16x128xbf16>
    %c0_29 = arith.constant 0 : index
    %c0_30 = arith.constant 0 : index
    %51 = vector.load %arg2[%c0_29, %c0_30] : memref<128x512xbf16, #tpu.memory_space<vmem>>, vector<128x512xbf16>
    %cst_31 = arith.constant dense<0.000000e+00> : vector<16x512xf32>
    %52 = tpu.matmul %50, %51, %cst_31 {dimension_numbers = #tpu.dot_dimension_numbers<[1], [0], [0], [1], [0, 0, 1, 1], [], []>} : vector<16x128xbf16>, vector<128x512xbf16>, vector<16x512xf32> -> vector<16x512xf32>
    %53 = arith.addf %49, %52 : vector<16x512xf32>
    %54 = vector.extract_strided_slice %53 {offsets = [0, 0], sizes = [16, 128], strides = [1, 1]} : vector<16x512xf32> to vector<16x128xf32>
    %55 = arith.negf %54 : vector<16x128xf32>
    %56 = math.exp %55 : vector<16x128xf32>
    %cst_32 = arith.constant 1.000000e+00 : f32
    %57 = vector.broadcast %cst_32 : f32 to vector<16x128xf32>
    %58 = arith.addf %57, %56 : vector<16x128xf32>
    %59 = arith.divf %57, %58 : vector<16x128xf32>
    %60 = vector.extract_strided_slice %53 {offsets = [0, 128], sizes = [16, 128], strides = [1, 1]} : vector<16x512xf32> to vector<16x128xf32>
    %61 = arith.negf %60 : vector<16x128xf32>
    %62 = math.exp %61 : vector<16x128xf32>
    %cst_33 = arith.constant 1.000000e+00 : f32
    %63 = vector.broadcast %cst_33 : f32 to vector<16x128xf32>
    %64 = arith.addf %63, %62 : vector<16x128xf32>
    %65 = arith.divf %63, %64 : vector<16x128xf32>
    %66 = vector.extract_strided_slice %53 {offsets = [0, 256], sizes = [16, 128], strides = [1, 1]} : vector<16x512xf32> to vector<16x128xf32>
    %67 = math.tanh %66 : vector<16x128xf32>
    %68 = vector.extract_strided_slice %53 {offsets = [0, 384], sizes = [16, 128], strides = [1, 1]} : vector<16x512xf32> to vector<16x128xf32>
    %69 = arith.negf %68 : vector<16x128xf32>
    %70 = math.exp %69 : vector<16x128xf32>
    %cst_34 = arith.constant 1.000000e+00 : f32
    %71 = vector.broadcast %cst_34 : f32 to vector<16x128xf32>
    %72 = arith.addf %71, %70 : vector<16x128xf32>
    %73 = arith.divf %71, %72 : vector<16x128xf32>
    %74 = arith.mulf %65, %46 : vector<16x128xf32>
    %75 = arith.mulf %59, %67 : vector<16x128xf32>
    %76 = arith.addf %74, %75 : vector<16x128xf32>
    %77 = math.tanh %76 : vector<16x128xf32>
    %78 = arith.mulf %73, %77 : vector<16x128xf32>
    %c0_i32_35 = arith.constant 0 : i32
    %c0_i32_36 = arith.constant 0 : i32
    %c0_i32_37 = arith.constant 0 : i32
    %c0_i32_38 = arith.constant 0 : i32
    %c0_i32_39 = arith.constant 0 : i32
    %79 = tpu.memref_slice %arg4[%c0_i32_35, %c0_i32_38, %c0_i32_39] : memref<1x256x512xbf16, #tpu.memory_space<any>> -> memref<1x256x512xbf16, #tpu.memory_space<any>>
    %80 = tpu.memref_squeeze %79 : memref<1x256x512xbf16, #tpu.memory_space<any>> -> memref<256x512xbf16, #tpu.memory_space<any>>
    %c0_i32_40 = arith.constant 0 : i32
    %c0_i32_41 = arith.constant 0 : i32
    %81 = tpu.memref_slice %arg10[%c0_i32_36, %c0_i32_40, %c0_i32_41] : memref<1x256x512xbf16, #tpu.memory_space<vmem>> -> memref<1x256x512xbf16, #tpu.memory_space<vmem>>
    %82 = tpu.memref_squeeze %81 : memref<1x256x512xbf16, #tpu.memory_space<vmem>> -> memref<256x512xbf16, #tpu.memory_space<vmem>>
    %83 = tpu.memref_slice %arg11[%c0_i32_37] : memref<1x!tpu.dma_semaphore, #tpu.memory_space<semaphore_mem>> -> memref<1x!tpu.dma_semaphore, #tpu.memory_space<semaphore_mem>>
    %84 = tpu.memref_squeeze %83 : memref<1x!tpu.dma_semaphore, #tpu.memory_space<semaphore_mem>> -> memref<!tpu.dma_semaphore, #tpu.memory_space<semaphore_mem>>
    tpu.wait_dma2 semaphore(%84 : memref<!tpu.dma_semaphore, #tpu.memory_space<semaphore_mem>>) src(%80 : memref<256x512xbf16, #tpu.memory_space<any>>) dst(%82 : memref<256x512xbf16, #tpu.memory_space<vmem>>)
    %85 = tpu.concatenate %48, %14 in 1 : vector<16x128xf32>, vector<16x128xf32> -> vector<16x256xf32>
    %86 = arith.truncf %85 : vector<16x256xf32> to vector<16x256xbf16>
    %c0_42 = arith.constant 0 : index
    %c0_43 = arith.constant 0 : index
    %c0_44 = arith.constant 0 : index
    %87 = vector.load %arg10[%c0_42, %c0_43, %c0_44] : memref<1x256x512xbf16, #tpu.memory_space<vmem>>, vector<1x256x512xbf16>
    %88 = vector.shape_cast %87 : vector<1x256x512xbf16> to vector<256x512xbf16>
    %cst_45 = arith.constant dense<0.000000e+00> : vector<16x512xf32>
    %89 = tpu.matmul %86, %88, %cst_45 {dimension_numbers = #tpu.dot_dimension_numbers<[1], [0], [0], [1], [0, 0, 1, 1], [], []>} : vector<16x256xbf16>, vector<256x512xbf16>, vector<16x512xf32> -> vector<16x512xf32>
    %90 = vector.broadcast %18 : vector<1x512xf32> to vector<16x512xf32>
    %91 = arith.addf %89, %90 : vector<16x512xf32>
    %92 = vector.extract_strided_slice %91 {offsets = [0, 0], sizes = [16, 128], strides = [1, 1]} : vector<16x512xf32> to vector<16x128xf32>
    %93 = arith.negf %92 : vector<16x128xf32>
    %94 = math.exp %93 : vector<16x128xf32>
    %cst_46 = arith.constant 1.000000e+00 : f32
    %95 = vector.broadcast %cst_46 : f32 to vector<16x128xf32>
    %96 = arith.addf %95, %94 : vector<16x128xf32>
    %97 = arith.divf %95, %96 : vector<16x128xf32>
    %98 = vector.extract_strided_slice %91 {offsets = [0, 128], sizes = [16, 128], strides = [1, 1]} : vector<16x512xf32> to vector<16x128xf32>
    %99 = arith.negf %98 : vector<16x128xf32>
    %100 = math.exp %99 : vector<16x128xf32>
    %cst_47 = arith.constant 1.000000e+00 : f32
    %101 = vector.broadcast %cst_47 : f32 to vector<16x128xf32>
    %102 = arith.addf %101, %100 : vector<16x128xf32>
    %103 = arith.divf %101, %102 : vector<16x128xf32>
    %104 = vector.extract_strided_slice %91 {offsets = [0, 256], sizes = [16, 128], strides = [1, 1]} : vector<16x512xf32> to vector<16x128xf32>
    %105 = math.tanh %104 : vector<16x128xf32>
    %106 = vector.extract_strided_slice %91 {offsets = [0, 384], sizes = [16, 128], strides = [1, 1]} : vector<16x512xf32> to vector<16x128xf32>
    %107 = arith.negf %106 : vector<16x128xf32>
    %108 = math.exp %107 : vector<16x128xf32>
    %cst_48 = arith.constant 1.000000e+00 : f32
    %109 = vector.broadcast %cst_48 : f32 to vector<16x128xf32>
    %110 = arith.addf %109, %108 : vector<16x128xf32>
    %111 = arith.divf %109, %110 : vector<16x128xf32>
    %112 = arith.mulf %103, %16 : vector<16x128xf32>
    %113 = arith.mulf %97, %105 : vector<16x128xf32>
    %114 = arith.addf %112, %113 : vector<16x128xf32>
    %115 = math.tanh %114 : vector<16x128xf32>
    %116 = arith.mulf %111, %115 : vector<16x128xf32>
    %c32 = arith.constant 32 : index
    %c0_49 = arith.constant 0 : index
    %117 = vector.load %arg9[%c32, %c0_49] : memref<128x512xf32, #tpu.memory_space<vmem>>, vector<16x512xf32>
    %118 = arith.truncf %78 : vector<16x128xf32> to vector<16x128xbf16>
    %c0_50 = arith.constant 0 : index
    %c0_51 = arith.constant 0 : index
    %119 = vector.load %arg2[%c0_50, %c0_51] : memref<128x512xbf16, #tpu.memory_space<vmem>>, vector<128x512xbf16>
    %cst_52 = arith.constant dense<0.000000e+00> : vector<16x512xf32>
    %120 = tpu.matmul %118, %119, %cst_52 {dimension_numbers = #tpu.dot_dimension_numbers<[1], [0], [0], [1], [0, 0, 1, 1], [], []>} : vector<16x128xbf16>, vector<128x512xbf16>, vector<16x512xf32> -> vector<16x512xf32>
    %121 = arith.addf %117, %120 : vector<16x512xf32>
    %122 = vector.extract_strided_slice %121 {offsets = [0, 0], sizes = [16, 128], strides = [1, 1]} : vector<16x512xf32> to vector<16x128xf32>
    %123 = arith.negf %122 : vector<16x128xf32>
    %124 = math.exp %123 : vector<16x128xf32>
    %cst_53 = arith.constant 1.000000e+00 : f32
    %125 = vector.broadcast %cst_53 : f32 to vector<16x128xf32>
    %126 = arith.addf %125, %124 : vector<16x128xf32>
    %127 = arith.divf %125, %126 : vector<16x128xf32>
    %128 = vector.extract_strided_slice %121 {offsets = [0, 128], sizes = [16, 128], strides = [1, 1]} : vector<16x512xf32> to vector<16x128xf32>
    %129 = arith.negf %128 : vector<16x128xf32>
    %130 = math.exp %129 : vector<16x128xf32>
    %cst_54 = arith.constant 1.000000e+00 : f32
    %131 = vector.broadcast %cst_54 : f32 to vector<16x128xf32>
    %132 = arith.addf %131, %130 : vector<16x128xf32>
    %133 = arith.divf %131, %132 : vector<16x128xf32>
    %134 = vector.extract_strided_slice %121 {offsets = [0, 256], sizes = [16, 128], strides = [1, 1]} : vector<16x512xf32> to vector<16x128xf32>
    %135 = math.tanh %134 : vector<16x128xf32>
    %136 = vector.extract_strided_slice %121 {offsets = [0, 384], sizes = [16, 128], strides = [1, 1]} : vector<16x512xf32> to vector<16x128xf32>
    %137 = arith.negf %136 : vector<16x128xf32>
    %138 = math.exp %137 : vector<16x128xf32>
    %cst_55 = arith.constant 1.000000e+00 : f32
    %139 = vector.broadcast %cst_55 : f32 to vector<16x128xf32>
    %140 = arith.addf %139, %138 : vector<16x128xf32>
    %141 = arith.divf %139, %140 : vector<16x128xf32>
    %142 = arith.mulf %133, %76 : vector<16x128xf32>
    %143 = arith.mulf %127, %135 : vector<16x128xf32>
    %144 = arith.addf %142, %143 : vector<16x128xf32>
    %145 = math.tanh %144 : vector<16x128xf32>
    %146 = arith.mulf %141, %145 : vector<16x128xf32>
    %147 = tpu.concatenate %78, %116 in 1 : vector<16x128xf32>, vector<16x128xf32> -> vector<16x256xf32>
    %148 = arith.truncf %147 : vector<16x256xf32> to vector<16x256xbf16>
    %c0_56 = arith.constant 0 : index
    %c0_57 = arith.constant 0 : index
    %c0_58 = arith.constant 0 : index
    %149 = vector.load %arg10[%c0_56, %c0_57, %c0_58] : memref<1x256x512xbf16, #tpu.memory_space<vmem>>, vector<1x256x512xbf16>
    %150 = vector.shape_cast %149 : vector<1x256x512xbf16> to vector<256x512xbf16>
    %cst_59 = arith.constant dense<0.000000e+00> : vector<16x512xf32>
    %151 = tpu.matmul %148, %150, %cst_59 {dimension_numbers = #tpu.dot_dimension_numbers<[1], [0], [0], [1], [0, 0, 1, 1], [], []>} : vector<16x256xbf16>, vector<256x512xbf16>, vector<16x512xf32> -> vector<16x512xf32>
    %152 = vector.broadcast %18 : vector<1x512xf32> to vector<16x512xf32>
    %153 = arith.addf %151, %152 : vector<16x512xf32>
    %154 = vector.extract_strided_slice %153 {offsets = [0, 0], sizes = [16, 128], strides = [1, 1]} : vector<16x512xf32> to vector<16x128xf32>
    %155 = arith.negf %154 : vector<16x128xf32>
    %156 = math.exp %155 : vector<16x128xf32>
    %cst_60 = arith.constant 1.000000e+00 : f32
    %157 = vector.broadcast %cst_60 : f32 to vector<16x128xf32>
    %158 = arith.addf %157, %156 : vector<16x128xf32>
    %159 = arith.divf %157, %158 : vector<16x128xf32>
    %160 = vector.extract_strided_slice %153 {offsets = [0, 128], sizes = [16, 128], strides = [1, 1]} : vector<16x512xf32> to vector<16x128xf32>
    %161 = arith.negf %160 : vector<16x128xf32>
    %162 = math.exp %161 : vector<16x128xf32>
    %cst_61 = arith.constant 1.000000e+00 : f32
    %163 = vector.broadcast %cst_61 : f32 to vector<16x128xf32>
    %164 = arith.addf %163, %162 : vector<16x128xf32>
    %165 = arith.divf %163, %164 : vector<16x128xf32>
    %166 = vector.extract_strided_slice %153 {offsets = [0, 256], sizes = [16, 128], strides = [1, 1]} : vector<16x512xf32> to vector<16x128xf32>
    %167 = math.tanh %166 : vector<16x128xf32>
    %168 = vector.extract_strided_slice %153 {offsets = [0, 384], sizes = [16, 128], strides = [1, 1]} : vector<16x512xf32> to vector<16x128xf32>
    %169 = arith.negf %168 : vector<16x128xf32>
    %170 = math.exp %169 : vector<16x128xf32>
    %cst_62 = arith.constant 1.000000e+00 : f32
    %171 = vector.broadcast %cst_62 : f32 to vector<16x128xf32>
    %172 = arith.addf %171, %170 : vector<16x128xf32>
    %173 = arith.divf %171, %172 : vector<16x128xf32>
    %174 = arith.mulf %165, %114 : vector<16x128xf32>
    %175 = arith.mulf %159, %167 : vector<16x128xf32>
    %176 = arith.addf %174, %175 : vector<16x128xf32>
    %177 = math.tanh %176 : vector<16x128xf32>
    %178 = arith.mulf %173, %177 : vector<16x128xf32>
    %c48 = arith.constant 48 : index
    %c0_63 = arith.constant 0 : index
    %179 = vector.load %arg9[%c48, %c0_63] : memref<128x512xf32, #tpu.memory_space<vmem>>, vector<16x512xf32>
    %180 = arith.truncf %146 : vector<16x128xf32> to vector<16x128xbf16>
    %c0_64 = arith.constant 0 : index
    %c0_65 = arith.constant 0 : index
    %181 = vector.load %arg2[%c0_64, %c0_65] : memref<128x512xbf16, #tpu.memory_space<vmem>>, vector<128x512xbf16>
    %cst_66 = arith.constant dense<0.000000e+00> : vector<16x512xf32>
    %182 = tpu.matmul %180, %181, %cst_66 {dimension_numbers = #tpu.dot_dimension_numbers<[1], [0], [0], [1], [0, 0, 1, 1], [], []>} : vector<16x128xbf16>, vector<128x512xbf16>, vector<16x512xf32> -> vector<16x512xf32>
    %183 = arith.addf %179, %182 : vector<16x512xf32>
    %184 = vector.extract_strided_slice %183 {offsets = [0, 0], sizes = [16, 128], strides = [1, 1]} : vector<16x512xf32> to vector<16x128xf32>
    %185 = arith.negf %184 : vector<16x128xf32>
    %186 = math.exp %185 : vector<16x128xf32>
    %cst_67 = arith.constant 1.000000e+00 : f32
    %187 = vector.broadcast %cst_67 : f32 to vector<16x128xf32>
    %188 = arith.addf %187, %186 : vector<16x128xf32>
    %189 = arith.divf %187, %188 : vector<16x128xf32>
    %190 = vector.extract_strided_slice %183 {offsets = [0, 128], sizes = [16, 128], strides = [1, 1]} : vector<16x512xf32> to vector<16x128xf32>
    %191 = arith.negf %190 : vector<16x128xf32>
    %192 = math.exp %191 : vector<16x128xf32>
    %cst_68 = arith.constant 1.000000e+00 : f32
    %193 = vector.broadcast %cst_68 : f32 to vector<16x128xf32>
    %194 = arith.addf %193, %192 : vector<16x128xf32>
    %195 = arith.divf %193, %194 : vector<16x128xf32>
    %196 = vector.extract_strided_slice %183 {offsets = [0, 256], sizes = [16, 128], strides = [1, 1]} : vector<16x512xf32> to vector<16x128xf32>
    %197 = math.tanh %196 : vector<16x128xf32>
    %198 = vector.extract_strided_slice %183 {offsets = [0, 384], sizes = [16, 128], strides = [1, 1]} : vector<16x512xf32> to vector<16x128xf32>
    %199 = arith.negf %198 : vector<16x128xf32>
    %200 = math.exp %199 : vector<16x128xf32>
    %cst_69 = arith.constant 1.000000e+00 : f32
    %201 = vector.broadcast %cst_69 : f32 to vector<16x128xf32>
    %202 = arith.addf %201, %200 : vector<16x128xf32>
    %203 = arith.divf %201, %202 : vector<16x128xf32>
    %204 = arith.mulf %195, %144 : vector<16x128xf32>
    %205 = arith.mulf %189, %197 : vector<16x128xf32>
    %206 = arith.addf %204, %205 : vector<16x128xf32>
    %207 = math.tanh %206 : vector<16x128xf32>
    %208 = arith.mulf %203, %207 : vector<16x128xf32>
    %209 = tpu.concatenate %146, %178 in 1 : vector<16x128xf32>, vector<16x128xf32> -> vector<16x256xf32>
    %210 = arith.truncf %209 : vector<16x256xf32> to vector<16x256xbf16>
    %c0_70 = arith.constant 0 : index
    %c0_71 = arith.constant 0 : index
    %c0_72 = arith.constant 0 : index
    %211 = vector.load %arg10[%c0_70, %c0_71, %c0_72] : memref<1x256x512xbf16, #tpu.memory_space<vmem>>, vector<1x256x512xbf16>
    %212 = vector.shape_cast %211 : vector<1x256x512xbf16> to vector<256x512xbf16>
    %cst_73 = arith.constant dense<0.000000e+00> : vector<16x512xf32>
    %213 = tpu.matmul %210, %212, %cst_73 {dimension_numbers = #tpu.dot_dimension_numbers<[1], [0], [0], [1], [0, 0, 1, 1], [], []>} : vector<16x256xbf16>, vector<256x512xbf16>, vector<16x512xf32> -> vector<16x512xf32>
    %214 = vector.broadcast %18 : vector<1x512xf32> to vector<16x512xf32>
    %215 = arith.addf %213, %214 : vector<16x512xf32>
    %216 = vector.extract_strided_slice %215 {offsets = [0, 0], sizes = [16, 128], strides = [1, 1]} : vector<16x512xf32> to vector<16x128xf32>
    %217 = arith.negf %216 : vector<16x128xf32>
    %218 = math.exp %217 : vector<16x128xf32>
    %cst_74 = arith.constant 1.000000e+00 : f32
    %219 = vector.broadcast %cst_74 : f32 to vector<16x128xf32>
    %220 = arith.addf %219, %218 : vector<16x128xf32>
    %221 = arith.divf %219, %220 : vector<16x128xf32>
    %222 = vector.extract_strided_slice %215 {offsets = [0, 128], sizes = [16, 128], strides = [1, 1]} : vector<16x512xf32> to vector<16x128xf32>
    %223 = arith.negf %222 : vector<16x128xf32>
    %224 = math.exp %223 : vector<16x128xf32>
    %cst_75 = arith.constant 1.000000e+00 : f32
    %225 = vector.broadcast %cst_75 : f32 to vector<16x128xf32>
    %226 = arith.addf %225, %224 : vector<16x128xf32>
    %227 = arith.divf %225, %226 : vector<16x128xf32>
    %228 = vector.extract_strided_slice %215 {offsets = [0, 256], sizes = [16, 128], strides = [1, 1]} : vector<16x512xf32> to vector<16x128xf32>
    %229 = math.tanh %228 : vector<16x128xf32>
    %230 = vector.extract_strided_slice %215 {offsets = [0, 384], sizes = [16, 128], strides = [1, 1]} : vector<16x512xf32> to vector<16x128xf32>
    %231 = arith.negf %230 : vector<16x128xf32>
    %232 = math.exp %231 : vector<16x128xf32>
    %cst_76 = arith.constant 1.000000e+00 : f32
    %233 = vector.broadcast %cst_76 : f32 to vector<16x128xf32>
    %234 = arith.addf %233, %232 : vector<16x128xf32>
    %235 = arith.divf %233, %234 : vector<16x128xf32>
    %236 = arith.mulf %227, %176 : vector<16x128xf32>
    %237 = arith.mulf %221, %229 : vector<16x128xf32>
    %238 = arith.addf %236, %237 : vector<16x128xf32>
    %239 = math.tanh %238 : vector<16x128xf32>
    %240 = arith.mulf %235, %239 : vector<16x128xf32>
    %c64 = arith.constant 64 : index
    %c0_77 = arith.constant 0 : index
    %241 = vector.load %arg9[%c64, %c0_77] : memref<128x512xf32, #tpu.memory_space<vmem>>, vector<16x512xf32>
    %242 = arith.truncf %208 : vector<16x128xf32> to vector<16x128xbf16>
    %c0_78 = arith.constant 0 : index
    %c0_79 = arith.constant 0 : index
    %243 = vector.load %arg2[%c0_78, %c0_79] : memref<128x512xbf16, #tpu.memory_space<vmem>>, vector<128x512xbf16>
    %cst_80 = arith.constant dense<0.000000e+00> : vector<16x512xf32>
    %244 = tpu.matmul %242, %243, %cst_80 {dimension_numbers = #tpu.dot_dimension_numbers<[1], [0], [0], [1], [0, 0, 1, 1], [], []>} : vector<16x128xbf16>, vector<128x512xbf16>, vector<16x512xf32> -> vector<16x512xf32>
    %245 = arith.addf %241, %244 : vector<16x512xf32>
    %246 = vector.extract_strided_slice %245 {offsets = [0, 0], sizes = [16, 128], strides = [1, 1]} : vector<16x512xf32> to vector<16x128xf32>
    %247 = arith.negf %246 : vector<16x128xf32>
    %248 = math.exp %247 : vector<16x128xf32>
    %cst_81 = arith.constant 1.000000e+00 : f32
    %249 = vector.broadcast %cst_81 : f32 to vector<16x128xf32>
    %250 = arith.addf %249, %248 : vector<16x128xf32>
    %251 = arith.divf %249, %250 : vector<16x128xf32>
    %252 = vector.extract_strided_slice %245 {offsets = [0, 128], sizes = [16, 128], strides = [1, 1]} : vector<16x512xf32> to vector<16x128xf32>
    %253 = arith.negf %252 : vector<16x128xf32>
    %254 = math.exp %253 : vector<16x128xf32>
    %cst_82 = arith.constant 1.000000e+00 : f32
    %255 = vector.broadcast %cst_82 : f32 to vector<16x128xf32>
    %256 = arith.addf %255, %254 : vector<16x128xf32>
    %257 = arith.divf %255, %256 : vector<16x128xf32>
    %258 = vector.extract_strided_slice %245 {offsets = [0, 256], sizes = [16, 128], strides = [1, 1]} : vector<16x512xf32> to vector<16x128xf32>
    %259 = math.tanh %258 : vector<16x128xf32>
    %260 = vector.extract_strided_slice %245 {offsets = [0, 384], sizes = [16, 128], strides = [1, 1]} : vector<16x512xf32> to vector<16x128xf32>
    %261 = arith.negf %260 : vector<16x128xf32>
    %262 = math.exp %261 : vector<16x128xf32>
    %cst_83 = arith.constant 1.000000e+00 : f32
    %263 = vector.broadcast %cst_83 : f32 to vector<16x128xf32>
    %264 = arith.addf %263, %262 : vector<16x128xf32>
    %265 = arith.divf %263, %264 : vector<16x128xf32>
    %266 = arith.mulf %257, %206 : vector<16x128xf32>
    %267 = arith.mulf %251, %259 : vector<16x128xf32>
    %268 = arith.addf %266, %267 : vector<16x128xf32>
    %269 = math.tanh %268 : vector<16x128xf32>
    %270 = arith.mulf %265, %269 : vector<16x128xf32>
    %271 = tpu.concatenate %208, %240 in 1 : vector<16x128xf32>, vector<16x128xf32> -> vector<16x256xf32>
    %272 = arith.truncf %271 : vector<16x256xf32> to vector<16x256xbf16>
    %c0_84 = arith.constant 0 : index
    %c0_85 = arith.constant 0 : index
    %c0_86 = arith.constant 0 : index
    %273 = vector.load %arg10[%c0_84, %c0_85, %c0_86] : memref<1x256x512xbf16, #tpu.memory_space<vmem>>, vector<1x256x512xbf16>
    %274 = vector.shape_cast %273 : vector<1x256x512xbf16> to vector<256x512xbf16>
    %cst_87 = arith.constant dense<0.000000e+00> : vector<16x512xf32>
    %275 = tpu.matmul %272, %274, %cst_87 {dimension_numbers = #tpu.dot_dimension_numbers<[1], [0], [0], [1], [0, 0, 1, 1], [], []>} : vector<16x256xbf16>, vector<256x512xbf16>, vector<16x512xf32> -> vector<16x512xf32>
    %276 = vector.broadcast %18 : vector<1x512xf32> to vector<16x512xf32>
    %277 = arith.addf %275, %276 : vector<16x512xf32>
    %278 = vector.extract_strided_slice %277 {offsets = [0, 0], sizes = [16, 128], strides = [1, 1]} : vector<16x512xf32> to vector<16x128xf32>
    %279 = arith.negf %278 : vector<16x128xf32>
    %280 = math.exp %279 : vector<16x128xf32>
    %cst_88 = arith.constant 1.000000e+00 : f32
    %281 = vector.broadcast %cst_88 : f32 to vector<16x128xf32>
    %282 = arith.addf %281, %280 : vector<16x128xf32>
    %283 = arith.divf %281, %282 : vector<16x128xf32>
    %284 = vector.extract_strided_slice %277 {offsets = [0, 128], sizes = [16, 128], strides = [1, 1]} : vector<16x512xf32> to vector<16x128xf32>
    %285 = arith.negf %284 : vector<16x128xf32>
    %286 = math.exp %285 : vector<16x128xf32>
    %cst_89 = arith.constant 1.000000e+00 : f32
    %287 = vector.broadcast %cst_89 : f32 to vector<16x128xf32>
    %288 = arith.addf %287, %286 : vector<16x128xf32>
    %289 = arith.divf %287, %288 : vector<16x128xf32>
    %290 = vector.extract_strided_slice %277 {offsets = [0, 256], sizes = [16, 128], strides = [1, 1]} : vector<16x512xf32> to vector<16x128xf32>
    %291 = math.tanh %290 : vector<16x128xf32>
    %292 = vector.extract_strided_slice %277 {offsets = [0, 384], sizes = [16, 128], strides = [1, 1]} : vector<16x512xf32> to vector<16x128xf32>
    %293 = arith.negf %292 : vector<16x128xf32>
    %294 = math.exp %293 : vector<16x128xf32>
    %cst_90 = arith.constant 1.000000e+00 : f32
    %295 = vector.broadcast %cst_90 : f32 to vector<16x128xf32>
    %296 = arith.addf %295, %294 : vector<16x128xf32>
    %297 = arith.divf %295, %296 : vector<16x128xf32>
    %298 = arith.mulf %289, %238 : vector<16x128xf32>
    %299 = arith.mulf %283, %291 : vector<16x128xf32>
    %300 = arith.addf %298, %299 : vector<16x128xf32>
    %301 = math.tanh %300 : vector<16x128xf32>
    %302 = arith.mulf %297, %301 : vector<16x128xf32>
    %c80 = arith.constant 80 : index
    %c0_91 = arith.constant 0 : index
    %303 = vector.load %arg9[%c80, %c0_91] : memref<128x512xf32, #tpu.memory_space<vmem>>, vector<16x512xf32>
    %304 = arith.truncf %270 : vector<16x128xf32> to vector<16x128xbf16>
    %c0_92 = arith.constant 0 : index
    %c0_93 = arith.constant 0 : index
    %305 = vector.load %arg2[%c0_92, %c0_93] : memref<128x512xbf16, #tpu.memory_space<vmem>>, vector<128x512xbf16>
    %cst_94 = arith.constant dense<0.000000e+00> : vector<16x512xf32>
    %306 = tpu.matmul %304, %305, %cst_94 {dimension_numbers = #tpu.dot_dimension_numbers<[1], [0], [0], [1], [0, 0, 1, 1], [], []>} : vector<16x128xbf16>, vector<128x512xbf16>, vector<16x512xf32> -> vector<16x512xf32>
    %307 = arith.addf %303, %306 : vector<16x512xf32>
    %308 = vector.extract_strided_slice %307 {offsets = [0, 0], sizes = [16, 128], strides = [1, 1]} : vector<16x512xf32> to vector<16x128xf32>
    %309 = arith.negf %308 : vector<16x128xf32>
    %310 = math.exp %309 : vector<16x128xf32>
    %cst_95 = arith.constant 1.000000e+00 : f32
    %311 = vector.broadcast %cst_95 : f32 to vector<16x128xf32>
    %312 = arith.addf %311, %310 : vector<16x128xf32>
    %313 = arith.divf %311, %312 : vector<16x128xf32>
    %314 = vector.extract_strided_slice %307 {offsets = [0, 128], sizes = [16, 128], strides = [1, 1]} : vector<16x512xf32> to vector<16x128xf32>
    %315 = arith.negf %314 : vector<16x128xf32>
    %316 = math.exp %315 : vector<16x128xf32>
    %cst_96 = arith.constant 1.000000e+00 : f32
    %317 = vector.broadcast %cst_96 : f32 to vector<16x128xf32>
    %318 = arith.addf %317, %316 : vector<16x128xf32>
    %319 = arith.divf %317, %318 : vector<16x128xf32>
    %320 = vector.extract_strided_slice %307 {offsets = [0, 256], sizes = [16, 128], strides = [1, 1]} : vector<16x512xf32> to vector<16x128xf32>
    %321 = math.tanh %320 : vector<16x128xf32>
    %322 = vector.extract_strided_slice %307 {offsets = [0, 384], sizes = [16, 128], strides = [1, 1]} : vector<16x512xf32> to vector<16x128xf32>
    %323 = arith.negf %322 : vector<16x128xf32>
    %324 = math.exp %323 : vector<16x128xf32>
    %cst_97 = arith.constant 1.000000e+00 : f32
    %325 = vector.broadcast %cst_97 : f32 to vector<16x128xf32>
    %326 = arith.addf %325, %324 : vector<16x128xf32>
    %327 = arith.divf %325, %326 : vector<16x128xf32>
    %328 = arith.mulf %319, %268 : vector<16x128xf32>
    %329 = arith.mulf %313, %321 : vector<16x128xf32>
    %330 = arith.addf %328, %329 : vector<16x128xf32>
    %331 = math.tanh %330 : vector<16x128xf32>
    %332 = arith.mulf %327, %331 : vector<16x128xf32>
    %333 = tpu.concatenate %270, %302 in 1 : vector<16x128xf32>, vector<16x128xf32> -> vector<16x256xf32>
    %334 = arith.truncf %333 : vector<16x256xf32> to vector<16x256xbf16>
    %c0_98 = arith.constant 0 : index
    %c0_99 = arith.constant 0 : index
    %c0_100 = arith.constant 0 : index
    %335 = vector.load %arg10[%c0_98, %c0_99, %c0_100] : memref<1x256x512xbf16, #tpu.memory_space<vmem>>, vector<1x256x512xbf16>
    %336 = vector.shape_cast %335 : vector<1x256x512xbf16> to vector<256x512xbf16>
    %cst_101 = arith.constant dense<0.000000e+00> : vector<16x512xf32>
    %337 = tpu.matmul %334, %336, %cst_101 {dimension_numbers = #tpu.dot_dimension_numbers<[1], [0], [0], [1], [0, 0, 1, 1], [], []>} : vector<16x256xbf16>, vector<256x512xbf16>, vector<16x512xf32> -> vector<16x512xf32>
    %338 = vector.broadcast %18 : vector<1x512xf32> to vector<16x512xf32>
    %339 = arith.addf %337, %338 : vector<16x512xf32>
    %340 = vector.extract_strided_slice %339 {offsets = [0, 0], sizes = [16, 128], strides = [1, 1]} : vector<16x512xf32> to vector<16x128xf32>
    %341 = arith.negf %340 : vector<16x128xf32>
    %342 = math.exp %341 : vector<16x128xf32>
    %cst_102 = arith.constant 1.000000e+00 : f32
    %343 = vector.broadcast %cst_102 : f32 to vector<16x128xf32>
    %344 = arith.addf %343, %342 : vector<16x128xf32>
    %345 = arith.divf %343, %344 : vector<16x128xf32>
    %346 = vector.extract_strided_slice %339 {offsets = [0, 128], sizes = [16, 128], strides = [1, 1]} : vector<16x512xf32> to vector<16x128xf32>
    %347 = arith.negf %346 : vector<16x128xf32>
    %348 = math.exp %347 : vector<16x128xf32>
    %cst_103 = arith.constant 1.000000e+00 : f32
    %349 = vector.broadcast %cst_103 : f32 to vector<16x128xf32>
    %350 = arith.addf %349, %348 : vector<16x128xf32>
    %351 = arith.divf %349, %350 : vector<16x128xf32>
    %352 = vector.extract_strided_slice %339 {offsets = [0, 256], sizes = [16, 128], strides = [1, 1]} : vector<16x512xf32> to vector<16x128xf32>
    %353 = math.tanh %352 : vector<16x128xf32>
    %354 = vector.extract_strided_slice %339 {offsets = [0, 384], sizes = [16, 128], strides = [1, 1]} : vector<16x512xf32> to vector<16x128xf32>
    %355 = arith.negf %354 : vector<16x128xf32>
    %356 = math.exp %355 : vector<16x128xf32>
    %cst_104 = arith.constant 1.000000e+00 : f32
    %357 = vector.broadcast %cst_104 : f32 to vector<16x128xf32>
    %358 = arith.addf %357, %356 : vector<16x128xf32>
    %359 = arith.divf %357, %358 : vector<16x128xf32>
    %360 = arith.mulf %351, %300 : vector<16x128xf32>
    %361 = arith.mulf %345, %353 : vector<16x128xf32>
    %362 = arith.addf %360, %361 : vector<16x128xf32>
    %363 = math.tanh %362 : vector<16x128xf32>
    %364 = arith.mulf %359, %363 : vector<16x128xf32>
    %c96 = arith.constant 96 : index
    %c0_105 = arith.constant 0 : index
    %365 = vector.load %arg9[%c96, %c0_105] : memref<128x512xf32, #tpu.memory_space<vmem>>, vector<16x512xf32>
    %366 = arith.truncf %332 : vector<16x128xf32> to vector<16x128xbf16>
    %c0_106 = arith.constant 0 : index
    %c0_107 = arith.constant 0 : index
    %367 = vector.load %arg2[%c0_106, %c0_107] : memref<128x512xbf16, #tpu.memory_space<vmem>>, vector<128x512xbf16>
    %cst_108 = arith.constant dense<0.000000e+00> : vector<16x512xf32>
    %368 = tpu.matmul %366, %367, %cst_108 {dimension_numbers = #tpu.dot_dimension_numbers<[1], [0], [0], [1], [0, 0, 1, 1], [], []>} : vector<16x128xbf16>, vector<128x512xbf16>, vector<16x512xf32> -> vector<16x512xf32>
    %369 = arith.addf %365, %368 : vector<16x512xf32>
    %370 = vector.extract_strided_slice %369 {offsets = [0, 0], sizes = [16, 128], strides = [1, 1]} : vector<16x512xf32> to vector<16x128xf32>
    %371 = arith.negf %370 : vector<16x128xf32>
    %372 = math.exp %371 : vector<16x128xf32>
    %cst_109 = arith.constant 1.000000e+00 : f32
    %373 = vector.broadcast %cst_109 : f32 to vector<16x128xf32>
    %374 = arith.addf %373, %372 : vector<16x128xf32>
    %375 = arith.divf %373, %374 : vector<16x128xf32>
    %376 = vector.extract_strided_slice %369 {offsets = [0, 128], sizes = [16, 128], strides = [1, 1]} : vector<16x512xf32> to vector<16x128xf32>
    %377 = arith.negf %376 : vector<16x128xf32>
    %378 = math.exp %377 : vector<16x128xf32>
    %cst_110 = arith.constant 1.000000e+00 : f32
    %379 = vector.broadcast %cst_110 : f32 to vector<16x128xf32>
    %380 = arith.addf %379, %378 : vector<16x128xf32>
    %381 = arith.divf %379, %380 : vector<16x128xf32>
    %382 = vector.extract_strided_slice %369 {offsets = [0, 256], sizes = [16, 128], strides = [1, 1]} : vector<16x512xf32> to vector<16x128xf32>
    %383 = math.tanh %382 : vector<16x128xf32>
    %384 = vector.extract_strided_slice %369 {offsets = [0, 384], sizes = [16, 128], strides = [1, 1]} : vector<16x512xf32> to vector<16x128xf32>
    %385 = arith.negf %384 : vector<16x128xf32>
    %386 = math.exp %385 : vector<16x128xf32>
    %cst_111 = arith.constant 1.000000e+00 : f32
    %387 = vector.broadcast %cst_111 : f32 to vector<16x128xf32>
    %388 = arith.addf %387, %386 : vector<16x128xf32>
    %389 = arith.divf %387, %388 : vector<16x128xf32>
    %390 = arith.mulf %381, %330 : vector<16x128xf32>
    %391 = arith.mulf %375, %383 : vector<16x128xf32>
    %392 = arith.addf %390, %391 : vector<16x128xf32>
    %393 = math.tanh %392 : vector<16x128xf32>
    %394 = arith.mulf %389, %393 : vector<16x128xf32>
    %395 = tpu.concatenate %332, %364 in 1 : vector<16x128xf32>, vector<16x128xf32> -> vector<16x256xf32>
    %396 = arith.truncf %395 : vector<16x256xf32> to vector<16x256xbf16>
    %c0_112 = arith.constant 0 : index
    %c0_113 = arith.constant 0 : index
    %c0_114 = arith.constant 0 : index
    %397 = vector.load %arg10[%c0_112, %c0_113, %c0_114] : memref<1x256x512xbf16, #tpu.memory_space<vmem>>, vector<1x256x512xbf16>
    %398 = vector.shape_cast %397 : vector<1x256x512xbf16> to vector<256x512xbf16>
    %cst_115 = arith.constant dense<0.000000e+00> : vector<16x512xf32>
    %399 = tpu.matmul %396, %398, %cst_115 {dimension_numbers = #tpu.dot_dimension_numbers<[1], [0], [0], [1], [0, 0, 1, 1], [], []>} : vector<16x256xbf16>, vector<256x512xbf16>, vector<16x512xf32> -> vector<16x512xf32>
    %400 = vector.broadcast %18 : vector<1x512xf32> to vector<16x512xf32>
    %401 = arith.addf %399, %400 : vector<16x512xf32>
    %402 = vector.extract_strided_slice %401 {offsets = [0, 0], sizes = [16, 128], strides = [1, 1]} : vector<16x512xf32> to vector<16x128xf32>
    %403 = arith.negf %402 : vector<16x128xf32>
    %404 = math.exp %403 : vector<16x128xf32>
    %cst_116 = arith.constant 1.000000e+00 : f32
    %405 = vector.broadcast %cst_116 : f32 to vector<16x128xf32>
    %406 = arith.addf %405, %404 : vector<16x128xf32>
    %407 = arith.divf %405, %406 : vector<16x128xf32>
    %408 = vector.extract_strided_slice %401 {offsets = [0, 128], sizes = [16, 128], strides = [1, 1]} : vector<16x512xf32> to vector<16x128xf32>
    %409 = arith.negf %408 : vector<16x128xf32>
    %410 = math.exp %409 : vector<16x128xf32>
    %cst_117 = arith.constant 1.000000e+00 : f32
    %411 = vector.broadcast %cst_117 : f32 to vector<16x128xf32>
    %412 = arith.addf %411, %410 : vector<16x128xf32>
    %413 = arith.divf %411, %412 : vector<16x128xf32>
    %414 = vector.extract_strided_slice %401 {offsets = [0, 256], sizes = [16, 128], strides = [1, 1]} : vector<16x512xf32> to vector<16x128xf32>
    %415 = math.tanh %414 : vector<16x128xf32>
    %416 = vector.extract_strided_slice %401 {offsets = [0, 384], sizes = [16, 128], strides = [1, 1]} : vector<16x512xf32> to vector<16x128xf32>
    %417 = arith.negf %416 : vector<16x128xf32>
    %418 = math.exp %417 : vector<16x128xf32>
    %cst_118 = arith.constant 1.000000e+00 : f32
    %419 = vector.broadcast %cst_118 : f32 to vector<16x128xf32>
    %420 = arith.addf %419, %418 : vector<16x128xf32>
    %421 = arith.divf %419, %420 : vector<16x128xf32>
    %422 = arith.mulf %413, %362 : vector<16x128xf32>
    %423 = arith.mulf %407, %415 : vector<16x128xf32>
    %424 = arith.addf %422, %423 : vector<16x128xf32>
    %425 = math.tanh %424 : vector<16x128xf32>
    %426 = arith.mulf %421, %425 : vector<16x128xf32>
    %c112 = arith.constant 112 : index
    %c0_119 = arith.constant 0 : index
    %427 = vector.load %arg9[%c112, %c0_119] : memref<128x512xf32, #tpu.memory_space<vmem>>, vector<16x512xf32>
    %428 = arith.truncf %394 : vector<16x128xf32> to vector<16x128xbf16>
    %c0_120 = arith.constant 0 : index
    %c0_121 = arith.constant 0 : index
    %429 = vector.load %arg2[%c0_120, %c0_121] : memref<128x512xbf16, #tpu.memory_space<vmem>>, vector<128x512xbf16>
    %cst_122 = arith.constant dense<0.000000e+00> : vector<16x512xf32>
    %430 = tpu.matmul %428, %429, %cst_122 {dimension_numbers = #tpu.dot_dimension_numbers<[1], [0], [0], [1], [0, 0, 1, 1], [], []>} : vector<16x128xbf16>, vector<128x512xbf16>, vector<16x512xf32> -> vector<16x512xf32>
    %431 = arith.addf %427, %430 : vector<16x512xf32>
    %432 = vector.extract_strided_slice %431 {offsets = [0, 0], sizes = [16, 128], strides = [1, 1]} : vector<16x512xf32> to vector<16x128xf32>
    %433 = arith.negf %432 : vector<16x128xf32>
    %434 = math.exp %433 : vector<16x128xf32>
    %cst_123 = arith.constant 1.000000e+00 : f32
    %435 = vector.broadcast %cst_123 : f32 to vector<16x128xf32>
    %436 = arith.addf %435, %434 : vector<16x128xf32>
    %437 = arith.divf %435, %436 : vector<16x128xf32>
    %438 = vector.extract_strided_slice %431 {offsets = [0, 128], sizes = [16, 128], strides = [1, 1]} : vector<16x512xf32> to vector<16x128xf32>
    %439 = arith.negf %438 : vector<16x128xf32>
    %440 = math.exp %439 : vector<16x128xf32>
    %cst_124 = arith.constant 1.000000e+00 : f32
    %441 = vector.broadcast %cst_124 : f32 to vector<16x128xf32>
    %442 = arith.addf %441, %440 : vector<16x128xf32>
    %443 = arith.divf %441, %442 : vector<16x128xf32>
    %444 = vector.extract_strided_slice %431 {offsets = [0, 256], sizes = [16, 128], strides = [1, 1]} : vector<16x512xf32> to vector<16x128xf32>
    %445 = math.tanh %444 : vector<16x128xf32>
    %446 = vector.extract_strided_slice %431 {offsets = [0, 384], sizes = [16, 128], strides = [1, 1]} : vector<16x512xf32> to vector<16x128xf32>
    %447 = arith.negf %446 : vector<16x128xf32>
    %448 = math.exp %447 : vector<16x128xf32>
    %cst_125 = arith.constant 1.000000e+00 : f32
    %449 = vector.broadcast %cst_125 : f32 to vector<16x128xf32>
    %450 = arith.addf %449, %448 : vector<16x128xf32>
    %451 = arith.divf %449, %450 : vector<16x128xf32>
    %452 = arith.mulf %443, %392 : vector<16x128xf32>
    %453 = arith.mulf %437, %445 : vector<16x128xf32>
    %454 = arith.addf %452, %453 : vector<16x128xf32>
    %455 = math.tanh %454 : vector<16x128xf32>
    %456 = arith.mulf %451, %455 : vector<16x128xf32>
    %457 = tpu.concatenate %394, %426 in 1 : vector<16x128xf32>, vector<16x128xf32> -> vector<16x256xf32>
    %458 = arith.truncf %457 : vector<16x256xf32> to vector<16x256xbf16>
    %c0_126 = arith.constant 0 : index
    %c0_127 = arith.constant 0 : index
    %c0_128 = arith.constant 0 : index
    %459 = vector.load %arg10[%c0_126, %c0_127, %c0_128] : memref<1x256x512xbf16, #tpu.memory_space<vmem>>, vector<1x256x512xbf16>
    %460 = vector.shape_cast %459 : vector<1x256x512xbf16> to vector<256x512xbf16>
    %cst_129 = arith.constant dense<0.000000e+00> : vector<16x512xf32>
    %461 = tpu.matmul %458, %460, %cst_129 {dimension_numbers = #tpu.dot_dimension_numbers<[1], [0], [0], [1], [0, 0, 1, 1], [], []>} : vector<16x256xbf16>, vector<256x512xbf16>, vector<16x512xf32> -> vector<16x512xf32>
    %462 = vector.broadcast %18 : vector<1x512xf32> to vector<16x512xf32>
    %463 = arith.addf %461, %462 : vector<16x512xf32>
    %464 = vector.extract_strided_slice %463 {offsets = [0, 0], sizes = [16, 128], strides = [1, 1]} : vector<16x512xf32> to vector<16x128xf32>
    %465 = arith.negf %464 : vector<16x128xf32>
    %466 = math.exp %465 : vector<16x128xf32>
    %cst_130 = arith.constant 1.000000e+00 : f32
    %467 = vector.broadcast %cst_130 : f32 to vector<16x128xf32>
    %468 = arith.addf %467, %466 : vector<16x128xf32>
    %469 = arith.divf %467, %468 : vector<16x128xf32>
    %470 = vector.extract_strided_slice %463 {offsets = [0, 128], sizes = [16, 128], strides = [1, 1]} : vector<16x512xf32> to vector<16x128xf32>
    %471 = arith.negf %470 : vector<16x128xf32>
    %472 = math.exp %471 : vector<16x128xf32>
    %cst_131 = arith.constant 1.000000e+00 : f32
    %473 = vector.broadcast %cst_131 : f32 to vector<16x128xf32>
    %474 = arith.addf %473, %472 : vector<16x128xf32>
    %475 = arith.divf %473, %474 : vector<16x128xf32>
    %476 = vector.extract_strided_slice %463 {offsets = [0, 256], sizes = [16, 128], strides = [1, 1]} : vector<16x512xf32> to vector<16x128xf32>
    %477 = math.tanh %476 : vector<16x128xf32>
    %478 = vector.extract_strided_slice %463 {offsets = [0, 384], sizes = [16, 128], strides = [1, 1]} : vector<16x512xf32> to vector<16x128xf32>
    %479 = arith.negf %478 : vector<16x128xf32>
    %480 = math.exp %479 : vector<16x128xf32>
    %cst_132 = arith.constant 1.000000e+00 : f32
    %481 = vector.broadcast %cst_132 : f32 to vector<16x128xf32>
    %482 = arith.addf %481, %480 : vector<16x128xf32>
    %483 = arith.divf %481, %482 : vector<16x128xf32>
    %484 = arith.mulf %475, %424 : vector<16x128xf32>
    %485 = arith.mulf %469, %477 : vector<16x128xf32>
    %486 = arith.addf %484, %485 : vector<16x128xf32>
    %487 = math.tanh %486 : vector<16x128xf32>
    %488 = arith.mulf %483, %487 : vector<16x128xf32>
    %489 = tpu.concatenate %456, %488 in 1 : vector<16x128xf32>, vector<16x128xf32> -> vector<16x256xf32>
    %490 = arith.truncf %489 : vector<16x256xf32> to vector<16x256xbf16>
    %c0_133 = arith.constant 0 : index
    %c0_134 = arith.constant 0 : index
    %c0_135 = arith.constant 0 : index
    %491 = vector.load %arg10[%c0_133, %c0_134, %c0_135] : memref<1x256x512xbf16, #tpu.memory_space<vmem>>, vector<1x256x512xbf16>
    %492 = vector.shape_cast %491 : vector<1x256x512xbf16> to vector<256x512xbf16>
    %cst_136 = arith.constant dense<0.000000e+00> : vector<16x512xf32>
    %493 = tpu.matmul %490, %492, %cst_136 {dimension_numbers = #tpu.dot_dimension_numbers<[1], [0], [0], [1], [0, 0, 1, 1], [], []>} : vector<16x256xbf16>, vector<256x512xbf16>, vector<16x512xf32> -> vector<16x512xf32>
    %494 = vector.broadcast %18 : vector<1x512xf32> to vector<16x512xf32>
    %495 = arith.addf %493, %494 : vector<16x512xf32>
    %496 = vector.extract_strided_slice %495 {offsets = [0, 0], sizes = [16, 128], strides = [1, 1]} : vector<16x512xf32> to vector<16x128xf32>
    %497 = arith.negf %496 : vector<16x128xf32>
    %498 = math.exp %497 : vector<16x128xf32>
    %cst_137 = arith.constant 1.000000e+00 : f32
    %499 = vector.broadcast %cst_137 : f32 to vector<16x128xf32>
    %500 = arith.addf %499, %498 : vector<16x128xf32>
    %501 = arith.divf %499, %500 : vector<16x128xf32>
    %502 = vector.extract_strided_slice %495 {offsets = [0, 128], sizes = [16, 128], strides = [1, 1]} : vector<16x512xf32> to vector<16x128xf32>
    %503 = arith.negf %502 : vector<16x128xf32>
    %504 = math.exp %503 : vector<16x128xf32>
    %cst_138 = arith.constant 1.000000e+00 : f32
    %505 = vector.broadcast %cst_138 : f32 to vector<16x128xf32>
    %506 = arith.addf %505, %504 : vector<16x128xf32>
    %507 = arith.divf %505, %506 : vector<16x128xf32>
    %508 = vector.extract_strided_slice %495 {offsets = [0, 256], sizes = [16, 128], strides = [1, 1]} : vector<16x512xf32> to vector<16x128xf32>
    %509 = math.tanh %508 : vector<16x128xf32>
    %510 = vector.extract_strided_slice %495 {offsets = [0, 384], sizes = [16, 128], strides = [1, 1]} : vector<16x512xf32> to vector<16x128xf32>
    %511 = arith.negf %510 : vector<16x128xf32>
    %512 = math.exp %511 : vector<16x128xf32>
    %cst_139 = arith.constant 1.000000e+00 : f32
    %513 = vector.broadcast %cst_139 : f32 to vector<16x128xf32>
    %514 = arith.addf %513, %512 : vector<16x128xf32>
    %515 = arith.divf %513, %514 : vector<16x128xf32>
    %516 = arith.mulf %507, %486 : vector<16x128xf32>
    %517 = arith.mulf %501, %509 : vector<16x128xf32>
    %518 = arith.addf %516, %517 : vector<16x128xf32>
    %519 = math.tanh %518 : vector<16x128xf32>
    %520 = arith.mulf %515, %519 : vector<16x128xf32>
    %c0_140 = arith.constant 0 : index
    %c0_141 = arith.constant 0 : index
    %521 = vector.load %arg6[%c0_140, %c0_141] : memref<128x2xf32, #tpu.memory_space<vmem>>, vector<128x2xf32>
    %cst_142 = arith.constant dense<0.000000e+00> : vector<16x2xf32>
    %522 = tpu.matmul %520, %521, %cst_142 {dimension_numbers = #tpu.dot_dimension_numbers<[1], [0], [0], [1], [0, 0, 1, 1], [], []>} : vector<16x128xf32>, vector<128x2xf32>, vector<16x2xf32> -> vector<16x2xf32>
    %c0_143 = arith.constant 0 : index
    %c0_144 = arith.constant 0 : index
    %523 = vector.load %arg7[%c0_143, %c0_144] : memref<1x2xf32, #tpu.memory_space<vmem>>, vector<1x2xf32>
    %524 = vector.broadcast %523 : vector<1x2xf32> to vector<16x2xf32>
    %525 = arith.addf %522, %524 : vector<16x2xf32>
    %c0_145 = arith.constant 0 : index
    %c0_146 = arith.constant 0 : index
    %526 = vector.load %arg8[%c0_145, %c0_146] : memref<16x2xf32, #tpu.memory_space<vmem>>, vector<16x2xf32>
    tpu.vector_store %arg8[%c0_145, %c0_146], %525 {strides = array<i32>} : memref<16x2xf32, #tpu.memory_space<vmem>>, vector<16x2xf32>,
    return
  }
}

</mosaic_0001>

<bundles_post_ra>
// kernel: ozon_lstm_forward.1
= control target key start
LH: loop header
LB: loop body
LE: loop exit
PB: predicated region body
PF: predicated region fallthrough
CT: control target
= control target key end

     0   :  { %s10261_s0 = inlined_call_operand.vmem [shape: bf16[128,16], index: 0, kind: input, shape index: {}]   ;;  %s10262_s1 = inlined_call_operand.vmem [shape: bf16[16,512], index: 1, kind: input, shape index: {}]   ;;  %s10263_s2 = inlined_call_operand.vmem [shape: bf16[128,512], index: 2, kind: input, shape index: {}]   ;;  %s10264_s3 = inlined_call_operand.vmem [shape: f32[1,512], index: 3, kind: input, shape index: {}]   ;;  %s10265_s4 = inlined_call_operand.vmem [shape: bf16[1,256,512], index: 4, kind: input, shape index: {}]   ;;  %s10266_s5 = inlined_call_operand.vmem [shape: f32[1,1,512], index: 5, kind: input, shape index: {}]   ;;  %s10267_s6 = inlined_call_operand.vmem [shape: f32[128,2], index: 6, kind: input, shape index: {}]   ;;  %s10268_s7 = inlined_call_operand.vmem [shape: f32[1,2], index: 7, kind: input, shape index: {}]   ;;  %s10269_s8 = inlined_call_operand.vmem [shape: f32[16,2], index: 8, kind: output, shape index: {}]  }
   0x1   :  { %v38_v0 = vld [vmem:[%s10265_s4] sm:$0xff]  ;;  %v40_v1 = vld [vmem:[%s10265_s4 + $0x8] sm:$0xff]  ;;  %v42_v2 = vld [vmem:[%s10265_s4 + $0x10] sm:$0xff] }
   0x2   :  { %39 = vst [vmem:[#allocation3] sm:$0xff] %v38_v0  ;;  %v44_v3 = vld [vmem:[%s10265_s4 + $0x18] sm:$0xff]  ;;  %v46_v4 = vld [vmem:[%s10265_s4 + $0x20] sm:$0xff]  ;;  %v48_v5 = vld [vmem:[%s10265_s4 + $0x28] sm:$0xff] }
   0x3   :  { %41 = vst [vmem:[#allocation3 + $0x8] sm:$0xff] %v40_v1  ;;  %v50_v6 = vld [vmem:[%s10265_s4 + $0x30] sm:$0xff]  ;;  %v52_v7 = vld [vmem:[%s10265_s4 + $0x38] sm:$0xff]  ;;  %v54_v8 = vld [vmem:[%s10265_s4 + $0x40] sm:$0xff] }
   0x4   :  { %43 = vst [vmem:[#allocation3 + $0x10] sm:$0xff] %v42_v2  ;;  %v56_v9 = vld [vmem:[%s10265_s4 + $0x48] sm:$0xff]  ;;  %v58_v10 = vld [vmem:[%s10265_s4 + $0x50] sm:$0xff]  ;;  %v60_v11 = vld [vmem:[%s10265_s4 + $0x58] sm:$0xff] }
   0x5   :  { %45 = vst [vmem:[#allocation3 + $0x18] sm:$0xff] %v44_v3  ;;  %v62_v12 = vld [vmem:[%s10265_s4 + $0x60] sm:$0xff]  ;;  %v64_v13 = vld [vmem:[%s10265_s4 + $0x68] sm:$0xff]  ;;  %v66_v14 = vld [vmem:[%s10265_s4 + $0x70] sm:$0xff] }
   0x6   :  { %47 = vst [vmem:[#allocation3 + $0x20] sm:$0xff] %v46_v4  ;;  %v68_v15 = vld [vmem:[%s10265_s4 + $0x78] sm:$0xff]  ;;  %v70_v16 = vld [vmem:[%s10265_s4 + $0x80] sm:$0xff]  ;;  %v72_v17 = vld [vmem:[%s10265_s4 + $0x88] sm:$0xff] }
   0x7   :  { %49 = vst [vmem:[#allocation3 + $0x28] sm:$0xff] %v48_v5  ;;  %v74_v18 = vld [vmem:[%s10265_s4 + $0x90] sm:$0xff]  ;;  %v76_v19 = vld [vmem:[%s10265_s4 + $0x98] sm:$0xff]  ;;  %v78_v20 = vld [vmem:[%s10265_s4 + $0xa0] sm:$0xff] }
   0x8   :  { %51 = vst [vmem:[#allocation3 + $0x30] sm:$0xff] %v50_v6  ;;  %v80_v21 = vld [vmem:[%s10265_s4 + $0xa8] sm:$0xff]  ;;  %v82_v22 = vld [vmem:[%s10265_s4 + $0xb0] sm:$0xff]  ;;  %v84_v23 = vld [vmem:[%s10265_s4 + $0xb8] sm:$0xff] }
   0x9   :  { %53 = vst [vmem:[#allocation3 + $0x38] sm:$0xff] %v52_v7  ;;  %v86_v24 = vld [vmem:[%s10265_s4 + $0xc0] sm:$0xff]  ;;  %v88_v25 = vld [vmem:[%s10265_s4 + $0xc8] sm:$0xff]  ;;  %v90_v26 = vld [vmem:[%s10265_s4 + $0xd0] sm:$0xff] }
   0xa   :  { %55 = vst [vmem:[#allocation3 + $0x40] sm:$0xff] %v54_v8  ;;  %v92_v27 = vld [vmem:[%s10265_s4 + $0xd8] sm:$0xff]  ;;  %v94_v28 = vld [vmem:[%s10265_s4 + $0xe0] sm:$0xff]  ;;  %v96_v29 = vld [vmem:[%s10265_s4 + $0xe8] sm:$0xff] }
   0xb   :  { %57 = vst [vmem:[#allocation3 + $0x48] sm:$0xff] %v56_v9  ;;  %v98_v30 = vld [vmem:[%s10265_s4 + $0xf0] sm:$0xff]  ;;  %v100_v31 = vld [vmem:[%s10265_s4 + $0xf8] sm:$0xff]  ;;  %v102_v32 = vld [vmem:[%s10265_s4 + $0x100] sm:$0xff] }
   0xc   :  { %59 = vst [vmem:[#allocation3 + $0x50] sm:$0xff] %v58_v10  ;;  %v104_v33 = vld [vmem:[%s10265_s4 + $0x108] sm:$0xff]  ;;  %v106_v34 = vld [vmem:[%s10265_s4 + $0x110] sm:$0xff]  ;;  %v108_v35 = vld [vmem:[%s10265_s4 + $0x118] sm:$0xff] }
   0xd   :  { %61 = vst [vmem:[#allocation3 + $0x58] sm:$0xff] %v60_v11  ;;  %v110_v36 = vld [vmem:[%s10265_s4 + $0x120] sm:$0xff]  ;;  %v112_v37 = vld [vmem:[%s10265_s4 + $0x128] sm:$0xff]  ;;  %v114_v38 = vld [vmem:[%s10265_s4 + $0x130] sm:$0xff] }
   0xe   :  { %63 = vst [vmem:[#allocation3 + $0x60] sm:$0xff] %v62_v12  ;;  %v116_v39 = vld [vmem:[%s10265_s4 + $0x138] sm:$0xff]  ;;  %v118_v40 = vld [vmem:[%s10265_s4 + $0x140] sm:$0xff]  ;;  %v120_v41 = vld [vmem:[%s10265_s4 + $0x148] sm:$0xff] }
   0xf   :  { %65 = vst [vmem:[#allocation3 + $0x68] sm:$0xff] %v64_v13  ;;  %v122_v42 = vld [vmem:[%s10265_s4 + $0x150] sm:$0xff]  ;;  %v124_v43 = vld [vmem:[%s10265_s4 + $0x158] sm:$0xff]  ;;  %v126_v44 = vld [vmem:[%s10265_s4 + $0x160] sm:$0xff] }
  0x10   :  { %67 = vst [vmem:[#allocation3 + $0x70] sm:$0xff] %v66_v14  ;;  %v128_v45 = vld [vmem:[%s10265_s4 + $0x168] sm:$0xff]  ;;  %v130_v46 = vld [vmem:[%s10265_s4 + $0x170] sm:$0xff]  ;;  %v132_v47 = vld [vmem:[%s10265_s4 + $0x178] sm:$0xff] }
  0x11   :  { %69 = vst [vmem:[#allocation3 + $0x78] sm:$0xff] %v68_v15  ;;  %v134_v48 = vld [vmem:[%s10265_s4 + $0x180] sm:$0xff]  ;;  %v136_v49 = vld [vmem:[%s10265_s4 + $0x188] sm:$0xff]  ;;  %v138_v50 = vld [vmem:[%s10265_s4 + $0x190] sm:$0xff] }
  0x12   :  { %71 = vst [vmem:[#allocation3 + $0x80] sm:$0xff] %v70_v16  ;;  %v140_v51 = vld [vmem:[%s10265_s4 + $0x198] sm:$0xff]  ;;  %v142_v52 = vld [vmem:[%s10265_s4 + $0x1a0] sm:$0xff]  ;;  %v144_v53 = vld [vmem:[%s10265_s4 + $0x1a8] sm:$0xff] }
  0x13   :  { %73 = vst [vmem:[#allocation3 + $0x88] sm:$0xff] %v72_v17  ;;  %v146_v54 = vld [vmem:[%s10265_s4 + $0x1b0] sm:$0xff]  ;;  %v148_v55 = vld [vmem:[%s10265_s4 + $0x1b8] sm:$0xff]  ;;  %v150_v56 = vld [vmem:[%s10265_s4 + $0x1c0] sm:$0xff] }
  0x14   :  { %75 = vst [vmem:[#allocation3 + $0x90] sm:$0xff] %v74_v18  ;;  %v152_v57 = vld [vmem:[%s10265_s4 + $0x1c8] sm:$0xff]  ;;  %v154_v58 = vld [vmem:[%s10265_s4 + $0x1d0] sm:$0xff]  ;;  %v156_v59 = vld [vmem:[%s10265_s4 + $0x1d8] sm:$0xff] }
  0x15   :  { %77 = vst [vmem:[#allocation3 + $0x98] sm:$0xff] %v76_v19  ;;  %v158_v60 = vld [vmem:[%s10265_s4 + $0x1e0] sm:$0xff]  ;;  %v160_v61 = vld [vmem:[%s10265_s4 + $0x1e8] sm:$0xff]  ;;  %v162_v62 = vld [vmem:[%s10265_s4 + $0x1f0] sm:$0xff] }
  0x16   :  { %79 = vst [vmem:[#allocation3 + $0xa0] sm:$0xff] %v78_v20  ;;  %v164_v63 = vld [vmem:[%s10265_s4 + $0x1f8] sm:$0xff] }
  0x17   :  { %81 = vst [vmem:[#allocation3 + $0xa8] sm:$0xff] %v80_v21 }
  0x18   :  { %83 = vst [vmem:[#allocation3 + $0xb0] sm:$0xff] %v82_v22 }
  0x19   :  { %85 = vst [vmem:[#allocation3 + $0xb8] sm:$0xff] %v84_v23 }
  0x1a   :  { %87 = vst [vmem:[#allocation3 + $0xc0] sm:$0xff] %v86_v24 }
  0x1b   :  { %89 = vst [vmem:[#allocation3 + $0xc8] sm:$0xff] %v88_v25 }
  0x1c   :  { %91 = vst [vmem:[#allocation3 + $0xd0] sm:$0xff] %v90_v26 }
  0x1d   :  { %93 = vst [vmem:[#allocation3 + $0xd8] sm:$0xff] %v92_v27 }
  0x1e   :  { %95 = vst [vmem:[#allocation3 + $0xe0] sm:$0xff] %v94_v28 }
  0x1f   :  { %97 = vst [vmem:[#allocation3 + $0xe8] sm:$0xff] %v96_v29 }
  0x20   :  { %99 = vst [vmem:[#allocation3 + $0xf0] sm:$0xff] %v98_v30 }
  0x21   :  { %101 = vst [vmem:[#allocation3 + $0xf8] sm:$0xff] %v100_v31 }
  0x22   :  { %103 = vst [vmem:[#allocation3 + $0x100] sm:$0xff] %v102_v32 }
  0x23   :  { %105 = vst [vmem:[#allocation3 + $0x108] sm:$0xff] %v104_v33 }
  0x24   :  { %107 = vst [vmem:[#allocation3 + $0x110] sm:$0xff] %v106_v34 }
  0x25   :  { %109 = vst [vmem:[#allocation3 + $0x118] sm:$0xff] %v108_v35 }
  0x26   :  { %111 = vst [vmem:[#allocation3 + $0x120] sm:$0xff] %v110_v36 }
  0x27   :  { %113 = vst [vmem:[#allocation3 + $0x128] sm:$0xff] %v112_v37 }
  0x28   :  { %115 = vst [vmem:[#allocation3 + $0x130] sm:$0xff] %v114_v38 }
  0x29   :  { %117 = vst [vmem:[#allocation3 + $0x138] sm:$0xff] %v116_v39 }
  0x2a   :  { %119 = vst [vmem:[#allocation3 + $0x140] sm:$0xff] %v118_v40 }
  0x2b   :  { %121 = vst [vmem:[#allocation3 + $0x148] sm:$0xff] %v120_v41 }
  0x2c   :  { %123 = vst [vmem:[#allocation3 + $0x150] sm:$0xff] %v122_v42 }
  0x2d   :  { %125 = vst [vmem:[#allocation3 + $0x158] sm:$0xff] %v124_v43 }
  0x2e   :  { %127 = vst [vmem:[#allocation3 + $0x160] sm:$0xff] %v126_v44 }
  0x2f   :  { %129 = vst [vmem:[#allocation3 + $0x168] sm:$0xff] %v128_v45 }
  0x30   :  { %131 = vst [vmem:[#allocation3 + $0x170] sm:$0xff] %v130_v46 }
  0x31   :  { %133 = vst [vmem:[#allocation3 + $0x178] sm:$0xff] %v132_v47 }
  0x32   :  { %135 = vst [vmem:[#allocation3 + $0x180] sm:$0xff] %v134_v48 }
  0x33   :  { %137 = vst [vmem:[#allocation3 + $0x188] sm:$0xff] %v136_v49 }
  0x34   :  { %139 = vst [vmem:[#allocation3 + $0x190] sm:$0xff] %v138_v50 }
  0x35   :  { %141 = vst [vmem:[#allocation3 + $0x198] sm:$0xff] %v140_v51 }
  0x36   :  { %143 = vst [vmem:[#allocation3 + $0x1a0] sm:$0xff] %v142_v52 }
  0x37   :  { %145 = vst [vmem:[#allocation3 + $0x1a8] sm:$0xff] %v144_v53 }
  0x38   :  { %147 = vst [vmem:[#allocation3 + $0x1b0] sm:$0xff] %v146_v54 }
  0x39   :  { %149 = vst [vmem:[#allocation3 + $0x1b8] sm:$0xff] %v148_v55 }
  0x3a   :  { %151 = vst [vmem:[#allocation3 + $0x1c0] sm:$0xff] %v150_v56 }
  0x3b   :  { %153 = vst [vmem:[#allocation3 + $0x1c8] sm:$0xff] %v152_v57 }
  0x3c   :  { %155 = vst [vmem:[#allocation3 + $0x1d0] sm:$0xff] %v154_v58 }
  0x3d   :  { %157 = vst [vmem:[#allocation3 + $0x1d8] sm:$0xff] %v156_v59 }
  0x3e   :  { %159 = vst [vmem:[#allocation3 + $0x1e0] sm:$0xff] %v158_v60 }
  0x3f   :  { %161 = vst [vmem:[#allocation3 + $0x1e8] sm:$0xff] %v160_v61 }
  0x40   :  { %163 = vst [vmem:[#allocation3 + $0x1f0] sm:$0xff] %v162_v62 }
  0x41   :  { %165 = vst [vmem:[#allocation3 + $0x1f8] sm:$0xff] %v164_v63 }
  0x42   :  { %171 = vsyncadd [#allocation4], 8192  ;;  %v4927_v0 = vld [vmem:[%s10262_s1] sm:$0xf]  ;;  %v5592_v1 = vld [vmem:[%s10262_s1 + $0xc] sm:$0xf0] }
  0x43   :  { %v4928_v2 = vor.u32 %v5592_v1, %v4927_v0  ;;  %v4935_v3 = vld [vmem:[%s10262_s1 + $0x8] sm:$0xf]  ;;  %v5593_v4 = vld [vmem:[%s10262_s1 + $0x14] sm:$0xf0]  ;;  %v5591_v5 = vld [vmem:[%s10262_s1 + $0xc] sm:$0xf] }
  0x44   :  { %v4936_v6 = vor.u32 %v5593_v4, %v4935_v3  ;;  %v4937_v7 = vld [vmem:[%s10262_s1 + $0x18] sm:$0xf0]  ;;  %v5582_v8 = vld [vmem:[%s10261_s0] sm:$0xff]  ;;  %vm262_vm0 = vcmask 130048   ;;  %v4929_v12 = vld [vmem:[%s10262_s1 + $0x10] sm:$0xf0] }
  0x45   :  { %v6503_v9 = vld [vmem:[%s10261_s0 + $0x38] sm:$0xff]  ;;  %294 = vmatpush.bf16.msra.mxu0 %v4928_v2  ;;  %5722 = vmatpush.bf16.msra.mxu1 %v4928_v2  ;;  %v4940_v10 = vor.u32 %v5591_v5, %v4937_v7  ;;  %v5590_v11 = vld [vmem:[%s10262_s1 + $0x4] sm:$0xf]  ;;  %v5089_v15 = vld [vmem:[%s10263_s2 + $0xf0] sm:$0xf0] }
  0x46   :  { %392 = vmatpush.bf16.msra.mxu2 %v4936_v6  ;;  %v4932_v13 = vor.u32 %v5590_v11, %v4929_v12  ;;  %v5622_v14 = vld [vmem:[%s10263_s2 + $0xe4] sm:$0xf]  ;;  %v5623_v16 = vld [vmem:[%s10263_s2 + $0xec] sm:$0xf]  ;;  %v5097_v18 = vld [vmem:[%s10263_s2 + $0xf8] sm:$0xf0] }
  0x47   :  { %441 = vmatpush.bf16.msra.mxu3 %v4940_v10  ;;  %v6520_v17 = vor.u32 %v5622_v14, %v5089_v15  ;;  %v5095_v19 = vld [vmem:[%s10263_s2 + $0xe8] sm:$0xf]  ;;  %v5625_v20 = vld [vmem:[%s10263_s2 + $0xf4] sm:$0xf0]  ;;  %v6534_v21 = vor.u32 %v5623_v16, %v5097_v18  ;;  %v6544_v23 = vld [vmem:[%s10266_s5] sm:$0xf] }
  0x48   :  { %4941 = vmatmul.msk.bf16.vlgmr.msra.gmra.mxu0 %vm262_vm0, %v5582_v8  ;;  %4948 = vmatmul.msk.bf16.vlgmr.msra.gmra.mxu1 %vm262_vm0, %v6503_v9  ;;  %v6536_v22 = vor.u32 %v5625_v20, %v5095_v19  ;;  %10494 = vst [vmem:[#allocation7_spill] sm:$0xff] %v6544_v23  ;;  %v5087_v24 = vld [vmem:[%s10263_s2 + $0xe0] sm:$0xf]  ;;  %v5624_v25 = vld [vmem:[%s10263_s2 + $0xec] sm:$0xf0]  ;;  %v5583_v39 = vld [vmem:[%s10261_s0 + $0x8] sm:$0xff] }
  0x49   :  { %343 = vmatpush.bf16.msrb.mxu1 %v4932_v13  ;;  %4957 = vmatmul.msk.bf16.vlgmr.msra.gmra.mxu2 %vm262_vm0, %v5582_v8  ;;  %v6554_v26 = vor.u32 %v5624_v25, %v5087_v24  ;;  %v5618_v27 = vld [vmem:[%s10263_s2 + $0xc4] sm:$0xf]  ;;  %v5073_v28 = vld [vmem:[%s10263_s2 + $0xd0] sm:$0xf0]  ;;  %v5619_v29 = vld [vmem:[%s10263_s2 + $0xcc] sm:$0xf] }
  0x4a   :  { %4965 = vmatmul.msk.bf16.vlgmr.msra.gmra.mxu3 %vm262_vm0, %v5582_v8  ;;  %776 = vmatpush.bf16.msrb.mxu2 %v6536_v22  ;;  %v6565_v30 = vor.u32 %v5618_v27, %v5073_v28  ;;  %v5081_v31 = vld [vmem:[%s10263_s2 + $0xd8] sm:$0xf0]  ;;  %v5071_v32 = vld [vmem:[%s10263_s2 + $0xc0] sm:$0xf]  ;;  %v5620_v33 = vld [vmem:[%s10263_s2 + $0xcc] sm:$0xf0] }
  0x4b   :  { %790 = vmatpush.bf16.msrb.mxu3 %v6534_v21  ;;  %748 = vmatpush.bf16.msrb.mxu0 %v6554_v26  ;;  %v6577_v34 = vor.u32 %v5619_v29, %v5081_v31  ;;  %v6579_v35 = vor.u32 %v5620_v33, %v5071_v32  ;;  %v5079_v36 = vld [vmem:[%s10263_s2 + $0xc8] sm:$0xf]  ;;  %v5621_v37 = vld [vmem:[%s10263_s2 + $0xd4] sm:$0xf0]  ;;  %v5614_v40 = vld [vmem:[%s10263_s2 + $0xa4] sm:$0xf] }
  0x4c   :  { %v6588_v38 = vor.u32 %v5621_v37, %v5079_v36  ;;  %v5057_v41 = vld [vmem:[%s10263_s2 + $0xb0] sm:$0xf0]  ;;  %v5615_v42 = vld [vmem:[%s10263_s2 + $0xac] sm:$0xf]  ;;  %v5065_v44 = vld [vmem:[%s10263_s2 + $0xb8] sm:$0xf0] }
  0x4d   :  { %762 = vmatpush.bf16.msra.mxu1 %v6520_v17  ;;  %v6609_v43 = vor.u32 %v5614_v40, %v5057_v41  ;;  %v5055_v45 = vld [vmem:[%s10263_s2 + $0xa0] sm:$0xf]  ;;  %v5616_v46 = vld [vmem:[%s10263_s2 + $0xac] sm:$0xf0]  ;;  %v6620_v47 = vor.u32 %v5615_v42, %v5065_v44  ;;  %v5063_v49 = vld [vmem:[%s10263_s2 + $0xa8] sm:$0xf] }
  0x4e   :  { %777 = vmatpush.bf16.msrb.mxu2 %v6588_v38  ;;  %v6622_v48 = vor.u32 %v5616_v46, %v5055_v45  ;;  %v5617_v50 = vld [vmem:[%s10263_s2 + $0xb4] sm:$0xf0]  ;;  %v5584_v52 = vld [vmem:[%s10261_s0 + $0x10] sm:$0xff]  ;;  %v5610_v53 = vld [vmem:[%s10263_s2 + $0x84] sm:$0xf] }
  0x4f   :  { %791 = vmatpush.bf16.msrb.mxu3 %v6577_v34  ;;  %749 = vmatpush.bf16.msrb.mxu0 %v6579_v35  ;;  %v6631_v51 = vor.u32 %v5617_v50, %v5063_v49  ;;  %v5041_v54 = vld [vmem:[%s10263_s2 + $0x90] sm:$0xf0]  ;;  %v5611_v55 = vld [vmem:[%s10263_s2 + $0x8c] sm:$0xf]  ;;  %v5049_v57 = vld [vmem:[%s10263_s2 + $0x98] sm:$0xf0] }
  0x50   :  { %v6652_v56 = vor.u32 %v5610_v53, %v5041_v54  ;;  %v5039_v58 = vld [vmem:[%s10263_s2 + $0x80] sm:$0xf]  ;;  %v5612_v59 = vld [vmem:[%s10263_s2 + $0x8c] sm:$0xf0]  ;;  %v6663_v60 = vor.u32 %v5611_v55, %v5049_v57  ;;  %v5047_v62 = vld [vmem:[%s10263_s2 + $0x88] sm:$0xf] }
  0x51   :  { %763 = vmatpush.bf16.msra.mxu1 %v6565_v30  ;;  %v6665_v61 = vor.u32 %v5612_v59, %v5039_v58  ;;  %v5613_v63 = vld [vmem:[%s10263_s2 + $0x94] sm:$0xf0]  ;;  %v5606_v2 = vld [vmem:[%s10263_s2 + $0x64] sm:$0xf]  ;;  %v5025_v3 = vld [vmem:[%s10263_s2 + $0x70] sm:$0xf0] }
  0x52   :  { %778 = vmatpush.bf16.msrb.mxu2 %v6631_v51  ;;  %v6674_v0 = vor.u32 %v5613_v63, %v5047_v62  ;;  %v5585_v1 = vld [vmem:[%s10261_s0 + $0x18] sm:$0xff]  ;;  %v5607_v4 = vld [vmem:[%s10263_s2 + $0x6c] sm:$0xf]  ;;  %v6695_v5 = vor.u32 %v5606_v2, %v5025_v3  ;;  %v5023_v7 = vld [vmem:[%s10263_s2 + $0x60] sm:$0xf] }
  0x53   :  { %792 = vmatpush.bf16.msrb.mxu3 %v6620_v47  ;;  %750 = vmatpush.bf16.msrb.mxu0 %v6622_v48  ;;  %v5033_v6 = vld [vmem:[%s10263_s2 + $0x78] sm:$0xf0]  ;;  %v5031_v12 = vld [vmem:[%s10263_s2 + $0x68] sm:$0xf]  ;;  %v5609_v13 = vld [vmem:[%s10263_s2 + $0x74] sm:$0xf0] }
  0x54   :  { %v6706_v10 = vor.u32 %v5607_v4, %v5033_v6  ;;  %v6717_v14 = vor.u32 %v5609_v13, %v5031_v12  ;;  %v5586_v15 = vld [vmem:[%s10261_s0 + $0x20] sm:$0xff]  ;;  %v5009_v18 = vld [vmem:[%s10263_s2 + $0x50] sm:$0xf0]  ;;  %v5604_v24 = vld [vmem:[%s10263_s2 + $0x4c] sm:$0xf0] }
  0x55   :  { %764 = vmatpush.bf16.msra.mxu1 %v6609_v43  ;;  %v5602_v16 = vld [vmem:[%s10263_s2 + $0x44] sm:$0xf]  ;;  %v5007_v19 = vld [vmem:[%s10263_s2 + $0x40] sm:$0xf]  ;;  %v5603_v25 = vld [vmem:[%s10263_s2 + $0x4c] sm:$0xf] }
  0x56   :  { %779 = vmatpush.bf16.msrb.mxu2 %v6674_v0  ;;  %v6738_v20 = vor.u32 %v5602_v16, %v5009_v18  ;;  %v5017_v27 = vld [vmem:[%s10263_s2 + $0x58] sm:$0xf0]  ;;  %v5008_v28 = vor.u32 %v5604_v24, %v5007_v19  ;;  %v4991_v31 = vld [vmem:[%s10263_s2 + $0x20] sm:$0xf]  ;;  %v5600_v32 = vld [vmem:[%s10263_s2 + $0x2c] sm:$0xf0] }
  0x57   :  { %793 = vmatpush.bf16.msrb.mxu3 %v6663_v60  ;;  %751 = vmatpush.bf16.msrb.mxu0 %v6665_v61  ;;  %v6749_v29 = vor.u32 %v5603_v25, %v5017_v27  ;;  %v5015_v33 = vld [vmem:[%s10263_s2 + $0x48] sm:$0xf]  ;;  %v5605_v36 = vld [vmem:[%s10263_s2 + $0x54] sm:$0xf0]  ;;  %v4992_v37 = vor.u32 %v5600_v32, %v4991_v31  ;;  %v4975_v40 = vld [vmem:[%s10263_s2] sm:$0xf] }
  0x58   :  { %4942 = vmatmul.msk.bf16.gmra.mxu0 %vm262_vm0, %v5583_v39  ;;  %4949 = vmatmul.msk.bf16.vlgmr.msrb.gmra.mxu1 %vm262_vm0, %v5582_v8  ;;  %v5608_v8 = vld [vmem:[%s10263_s2 + $0x6c] sm:$0xf0]  ;;  %v5587_v44 = vld [vmem:[%s10261_s0 + $0x28] sm:$0xff]  ;;  %v5598_v45 = vld [vmem:[%s10263_s2 + $0x24] sm:$0xf] }
  0x59   :  { %4958 = vmatmul.msk.bf16.gmra.mxu2 %vm262_vm0, %v5583_v39  ;;  %765 = vmatpush.bf16.msra.mxu1 %v6652_v56  ;;  %v6708_v11 = vor.u32 %v5608_v8, %v5023_v7  ;;  %v5596_v41 = vld [vmem:[%s10263_s2 + $0xc] sm:$0xf0]  ;;  %v4993_v46 = vld [vmem:[%s10263_s2 + $0x30] sm:$0xf0]  ;;  %v5001_v50 = vld [vmem:[%s10263_s2 + $0x38] sm:$0xf0] }
  0x5a   :  { %4966 = vmatmul.msk.bf16.gmra.mxu3 %vm262_vm0, %v5583_v39  ;;  %780 = vmatpush.bf16.msrb.mxu2 %v6717_v14  ;;  %v4976_v42 = vor.u32 %v5596_v41, %v4975_v40  ;;  %v4996_v49 = vor.u32 %v5598_v45, %v4993_v46  ;;  %v5601_v53 = vld [vmem:[%s10263_s2 + $0x34] sm:$0xf0]  ;;  %v5588_v57 = vld [vmem:[%s10261_s0 + $0x30] sm:$0xff]  ;;  %v4983_v58 = vld [vmem:[%s10263_s2 + $0x8] sm:$0xf] }
  0x5b   :  { %794 = vmatpush.bf16.msrb.mxu3 %v6706_v10  ;;  %752 = vmatpush.bf16.msrb.mxu0 %v6708_v11  ;;  %v5595_v59 = vld [vmem:[%s10263_s2 + $0xc] sm:$0xf] }
  0x5d   :  { %766 = vmatpush.bf16.msra.mxu1 %v6695_v5 }
  0x5f   :  { %753 = vmatpush.bf16.msrb.mxu0 %v5008_v28  ;;  %795 = vmatpush.bf16.msrb.mxu3 %v6749_v29 }
  0x61   :  { %767 = vmatpush.bf16.msra.mxu1 %v6738_v20 }
  0x63   :  { %754 = vmatpush.bf16.msrb.mxu0 %v4992_v37 }
  0x65   :  { %768 = vmatpush.bf16.msra.mxu1 %v4996_v49 }
  0x67   :  { %755 = vmatpush.bf16.msrb.mxu0 %v4976_v42 }
  0x68   :  { %4943 = vmatmul.msk.bf16.gmra.mxu0 %vm262_vm0, %v5584_v52  ;;  %4950 = vmatmul.msk.bf16.gmra.mxu1 %vm262_vm0, %v5583_v39  ;;  %v6765_v39 = vor.u32 %v5605_v36, %v5015_v33 }
  0x69   :  { %4959 = vmatmul.msk.bf16.gmra.mxu2 %vm262_vm0, %v5584_v52 }
  0x6a   :  { %4967 = vmatmul.msk.bf16.gmra.mxu3 %vm262_vm0, %v5584_v52  ;;  %781 = vmatpush.bf16.msrb.mxu2 %v6765_v39 }
  0x6b   :  { %947 = vmatpush.bf16.msra.mxu0 %v6554_v26  ;;  %v5599_v26 = vld [vmem:[%s10263_s2 + $0x2c] sm:$0xf] }
  0x6c   :  { %v5004_v54 = vor.u32 %v5599_v26, %v5001_v50 }
  0x6e   :  { %796 = vmatpush.bf16.msrb.mxu3 %v5004_v54 }
  0x6f   :  { %948 = vmatpush.bf16.msra.mxu0 %v6579_v35  ;;  %v5597_v35 = vld [vmem:[%s10263_s2 + $0x14] sm:$0xf0] }
  0x70   :  { %v4984_v62 = vor.u32 %v5597_v35, %v4983_v58 }
  0x73   :  { %949 = vmatpush.bf16.msra.mxu0 %v6622_v48  ;;  %v4985_v48 = vld [vmem:[%s10263_s2 + $0x18] sm:$0xf0] }
  0x74   :  { %v4988_v63 = vor.u32 %v5595_v59, %v4985_v48 }
  0x76   :  { %797 = vmatpush.bf16.msrb.mxu3 %v4988_v63 }
  0x77   :  { %950 = vmatpush.bf16.msra.mxu0 %v6665_v61  ;;  %v5594_v61 = vld [vmem:[%s10263_s2 + $0x4] sm:$0xf] }
  0x78   :  { %4944 = vmatmul.msk.bf16.gmra.mxu0 %vm262_vm0, %v5585_v1  ;;  %4951 = vmatmul.msk.bf16.gmra.mxu1 %vm262_vm0, %v5584_v52  ;;  %v4999_v52 = vld [vmem:[%s10263_s2 + $0x28] sm:$0xf] }
  0x79   :  { %4960 = vmatmul.msk.bf16.gmra.mxu2 %vm262_vm0, %v5585_v1  ;;  %v5000_v55 = vor.u32 %v5601_v53, %v4999_v52 }
  0x7a   :  { %4968 = vmatmul.msk.bf16.gmra.mxu3 %vm262_vm0, %v5585_v1 }
  0x7b   :  { %782 = vmatpush.bf16.msrb.mxu2 %v5000_v55  ;;  %951 = vmatpush.bf16.msra.mxu0 %v6708_v11 }
  0x7c   :  { %989 = vmatpush.bf16.msra.mxu3 %v6534_v21  ;;  %v192_v21 = vld [vmem:[%s10264_s3] sm:$0xf] }
  0x7d   :  { %v6900_v16 = vperm.slane %v192_v21, 3  ;;  %v6913_v31 = vperm.slane %v192_v21, 1 }
  0x7f   :  { %783 = vmatpush.bf16.msrb.mxu2 %v4984_v62  ;;  %952 = vmatpush.bf16.msra.mxu0 %v5008_v28 }
  0x80   :  { %990 = vmatpush.bf16.msra.mxu3 %v6577_v34 }
  0x83   :  { %975 = vmatpush.bf16.msra.mxu2 %v6536_v22  ;;  %953 = vmatpush.bf16.msra.mxu0 %v4992_v37  ;;  %v6855_v22 = vperm.slane %v192_v21, 0 }
  0x84   :  { %991 = vmatpush.bf16.msra.mxu3 %v6620_v47 }
  0x87   :  { %976 = vmatpush.bf16.msra.mxu2 %v6588_v38  ;;  %954 = vmatpush.bf16.msra.mxu0 %v4976_v42 }
  0x88   :  { %4945 = vmatmul.msk.bf16.gmra.mxu0 %vm262_vm0, %v5586_v15  ;;  %4952 = vmatmul.msk.bf16.gmra.mxu1 %vm262_vm0, %v5585_v1  ;;  %v4977_v1 = vld [vmem:[%s10263_s2 + $0x10] sm:$0xf0] }
  0x89   :  { %4961 = vmatmul.msk.bf16.gmra.mxu2 %vm262_vm0, %v5586_v15  ;;  %v4980_v2 = vor.u32 %v5594_v61, %v4977_v1  ;;  %992 = vmatpush.bf16.msra.mxu3 %v6663_v60 }
  0x8a   :  { %4969 = vmatmul.msk.bf16.gmra.mxu3 %vm262_vm0, %v5586_v15 }
  0x8b   :  { %769 = vmatpush.bf16.msra.mxu1 %v4980_v2  ;;  %977 = vmatpush.bf16.msra.mxu2 %v6631_v51 }
  0x8d   :  { %993 = vmatpush.bf16.msra.mxu3 %v6706_v10 }
  0x8f   :  { %961 = vmatpush.bf16.msrb.mxu1 %v6520_v17  ;;  %978 = vmatpush.bf16.msra.mxu2 %v6674_v0  ;;  %v6240_v17 = vmov 0  }
  0x91   :  { %994 = vmatpush.bf16.msra.mxu3 %v6749_v29 }
  0x93   :  { %962 = vmatpush.bf16.msrb.mxu1 %v6565_v30  ;;  %979 = vmatpush.bf16.msra.mxu2 %v6717_v14 }
  0x95   :  { %995 = vmatpush.bf16.msra.mxu3 %v5004_v54 }
  0x97   :  { %963 = vmatpush.bf16.msrb.mxu1 %v6609_v43  ;;  %980 = vmatpush.bf16.msra.mxu2 %v6765_v39 }
  0x98   :  { %4946 = vmatmul.msk.bf16.gmra.mxu0 %vm262_vm0, %v5587_v44  ;;  %4953 = vmatmul.msk.bf16.gmra.mxu1 %vm262_vm0, %v5586_v15  ;;  %v6898_v15 = vperm.slane %v192_v21, 2 }
  0x99   :  { %4962 = vmatmul.msk.bf16.gmra.mxu2 %vm262_vm0, %v5587_v44  ;;  %996 = vmatpush.bf16.msra.mxu3 %v4988_v63 }
  0x9a   :  { %4970 = vmatmul.msk.bf16.gmra.mxu3 %vm262_vm0, %v5587_v44 }
  0x9b   :  { %964 = vmatpush.bf16.msrb.mxu1 %v6652_v56  ;;  %981 = vmatpush.bf16.msra.mxu2 %v5000_v55 }
  0x9f   :  { %965 = vmatpush.bf16.msrb.mxu1 %v6695_v5  ;;  %982 = vmatpush.bf16.msra.mxu2 %v4984_v62 }
  0xa3   :  { %966 = vmatpush.bf16.msrb.mxu1 %v6738_v20 }
  0xa7   :  { %967 = vmatpush.bf16.msrb.mxu1 %v4996_v49 }
  0xa8   :  { %4947 = vmatmul.msk.bf16.gmra.mxu0 %vm262_vm0, %v5588_v57  ;;  %4954 = vmatmul.msk.bf16.gmra.mxu1 %vm262_vm0, %v5587_v44 }
  0xa9   :  { %4963 = vmatmul.msk.bf16.gmra.mxu2 %vm262_vm0, %v5588_v57 }
  0xaa   :  { %4971 = vmatmul.msk.bf16.gmra.mxu3 %vm262_vm0, %v5588_v57 }
  0xab   :  { %968 = vmatpush.bf16.msrb.mxu1 %v4980_v2 }
  0xb8   :  { %4955 = vmatmul.msk.bf16.gmra.mxu1 %vm262_vm0, %v5588_v57  ;;  %756 = vmatmul.bf16.vlgmr.msrb.gmra.mxu0 %v6240_v17 }
  0xb9   :  { %4964 = vmatmul.msk.bf16.gmra.mxu2 %vm262_vm0, %v6503_v9 }
  0xba   :  { %4972 = vmatmul.msk.bf16.gmra.mxu3 %vm262_vm0, %v6503_v9 }
  0xc5   :  { %v6857_v30 = vpop.f32.mrf.mxu0  ;;  %v331_v34 = vpop.f32.mrf.mxu1 }
  0xc6   :  { %v6860_v38 = vadd.f32 %v331_v34, %v6855_v22 }
  0xc8   :  { %10495 = vst [vmem:[#allocation8_spill] sm:$0xff] %v6860_v38  ;;  %4956 = vmatmul.msk.bf16.gmra.mxu1 %vm262_vm0, %v6503_v9 }
  0xc9   :  { %784 = vmatmul.bf16.vlgmr.msrb.gmra.mxu2 %v6240_v17 }
  0xca   :  { %798 = vmatmul.bf16.vlgmr.msrb.gmra.mxu3 %v6240_v17 }
  0xcc   :  { %v6864_v43 = vpop.f32.mrf.mxu2 }
  0xcd   :  { %v6866_v47 = vpop.f32.mrf.mxu3  ;;  %v6868_v51 = vpop.f32.mrf.mxu0 }
  0xce   :  { %v333_v56 = vpop.f32.mrf.mxu1 }
  0xcf   :  { %v6871_v60 = vadd.f32 %v333_v56, %v6855_v22 }
  0xd1   :  { %10496 = vst [vmem:[#allocation9_spill] sm:$0xff] %v6871_v60 }
  0xd4   :  { %v6873_v0 = vpop.f32.mrf.mxu2 }
  0xd5   :  { %v6875_v3 = vpop.f32.mrf.mxu3  ;;  %v6877_v4 = vpop.f32.mrf.mxu0 }
  0xd6   :  { %v6879_v9 = vpop.f32.mrf.mxu1 }
  0xd8   :  { %770 = vmatmul.bf16.vlgmr.msra.gmra.mxu1 %v6240_v17 }
  0xdc   :  { %v6881_v5 = vpop.f32.mrf.mxu2 }
  0xdd   :  { %v6883_v6 = vpop.f32.mrf.mxu3  ;;  %v6885_v7 = vpop.f32.mrf.mxu0 }
  0xde   :  { %v6887_v8 = vpop.f32.mrf.mxu1 }
  0xe4   :  { %v6889_v10 = vpop.f32.mrf.mxu2 }
  0xe5   :  { %v6891_v11 = vpop.f32.mrf.mxu3  ;;  %v306_v12 = vpop.f32.mrf.mxu0 }
  0xe6   :  { %v6894_v13 = vadd.f32 %v306_v12, %v6855_v22  ;;  %v6896_v14 = vpop.f32.mrf.mxu1 }
  0xe8   :  { %10497 = vst [vmem:[#allocation10_spill] sm:$0xff] %v6894_v13 }
  0xec   :  { %v404_v18 = vpop.f32.mrf.mxu2 }
  0xed   :  { %v6903_v19 = vadd.f32 %v404_v18, %v6898_v15  ;;  %v453_v20 = vpop.f32.mrf.mxu3  ;;  %v308_v24 = vpop.f32.mrf.mxu0 }
  0xee   :  { %v6906_v25 = vadd.f32 %v453_v20, %v6900_v16  ;;  %v6909_v27 = vadd.f32 %v308_v24, %v6855_v22  ;;  %v6911_v28 = vpop.f32.mrf.mxu1 }
  0xef   :  { %10498 = vst [vmem:[#allocation11_spill] sm:$0xff] %v6903_v19 }
  0xf0   :  { %10499 = vst [vmem:[#allocation12_spill] sm:$0xff] %v6906_v25 }
  0xf1   :  { %10500 = vst [vmem:[#allocation13_spill] sm:$0xff] %v6909_v27 }
  0xf4   :  { %v406_v29 = vpop.f32.mrf.mxu2 }
  0xf5   :  { %v6916_v32 = vadd.f32 %v406_v29, %v6898_v15  ;;  %v455_v33 = vpop.f32.mrf.mxu3  ;;  %v311_v36 = vpop.f32.mrf.mxu0 }
  0xf6   :  { %v6919_v37 = vadd.f32 %v455_v33, %v6900_v16  ;;  %v6922_v39 = vadd.f32 %v311_v36, %v6855_v22  ;;  %v355_v40 = vpop.f32.mrf.mxu1 }
  0xf7   :  { %10501 = vst [vmem:[#allocation14_spill] sm:$0xff] %v6916_v32  ;;  %v6925_v41 = vadd.f32 %v355_v40, %v6913_v31 }
  0xf8   :  { %10502 = vst [vmem:[#allocation15_spill] sm:$0xff] %v6919_v37 }
  0xf9   :  { %10503 = vst [vmem:[#allocation16_spill] sm:$0xff] %v6922_v39 }
  0xfa   :  { %10504 = vst [vmem:[#allocation17_spill] sm:$0xff] %v6925_v41 }
  0xfc   :  { %v409_v42 = vpop.f32.mrf.mxu2 }
  0xfd   :  { %v6928_v44 = vadd.f32 %v409_v42, %v6898_v15  ;;  %v458_v45 = vpop.f32.mrf.mxu3  ;;  %v313_v46 = vpop.f32.mrf.mxu0 }
  0xfe   :  { %v6931_v26 = vadd.f32 %v458_v45, %v6900_v16  ;;  %v6934_v49 = vadd.f32 %v313_v46, %v6855_v22  ;;  %v357_v50 = vpop.f32.mrf.mxu1 }
  0xff   :  { %10505 = vst [vmem:[#allocation18_spill] sm:$0xff] %v6928_v44  ;;  %v6937_v52 = vadd.f32 %v357_v50, %v6913_v31 }
 0x100   :  { %10506 = vst [vmem:[#allocation19_spill] sm:$0xff] %v6931_v26 }
 0x101   :  { %10507 = vst [vmem:[#allocation20_spill] sm:$0xff] %v6934_v49 }
 0x102   :  { %10508 = vst [vmem:[#allocation21_spill] sm:$0xff] %v6937_v52 }
 0x104   :  { %v411_v53 = vpop.f32.mrf.mxu2 }
 0x105   :  { %v6940_v54 = vadd.f32 %v411_v53, %v6898_v15  ;;  %v460_v55 = vpop.f32.mrf.mxu3  ;;  %v316_v57 = vpop.f32.mrf.mxu0 }
 0x106   :  { %v6943_v58 = vadd.f32 %v460_v55, %v6900_v16  ;;  %v6946_v35 = vadd.f32 %v316_v57, %v6855_v22  ;;  %v360_v59 = vpop.f32.mrf.mxu1 }
 0x107   :  { %10509 = vst [vmem:[#allocation22_spill] sm:$0xff] %v6940_v54  ;;  %v6949_v62 = vadd.f32 %v360_v59, %v6913_v31 }
 0x108   :  { %10510 = vst [vmem:[#allocation23_spill] sm:$0xff] %v6943_v58 }
 0x109   :  { %10511 = vst [vmem:[#allocation24_spill] sm:$0xff] %v6946_v35 }
 0x10a   :  { %10512 = vst [vmem:[#allocation25_spill] sm:$0xff] %v6949_v62 }
 0x10c   :  { %v414_v48 = vpop.f32.mrf.mxu2 }
 0x10d   :  { %v6952_v63 = vadd.f32 %v414_v48, %v6898_v15  ;;  %v463_v61 = vpop.f32.mrf.mxu3  ;;  %v318_v1 = vpop.f32.mrf.mxu0 }
 0x10e   :  { %v6955_v2 = vadd.f32 %v463_v61, %v6900_v16  ;;  %v6958_v17 = vadd.f32 %v318_v1, %v6855_v22  ;;  %v362_v21 = vpop.f32.mrf.mxu1 }
 0x10f   :  { %10513 = vst [vmem:[#allocation26_spill] sm:$0xff] %v6952_v63  ;;  %v6961_v34 = vadd.f32 %v362_v21, %v6913_v31 }
 0x110   :  { %10514 = vst [vmem:[#allocation27_spill] sm:$0xff] %v6955_v2 }
 0x111   :  { %10515 = vst [vmem:[#allocation28_spill] sm:$0xff] %v6958_v17 }
 0x112   :  { %10516 = vst [vmem:[#allocation29_spill] sm:$0xff] %v6961_v34 }
 0x114   :  { %v416_v56 = vpop.f32.mrf.mxu2 }
 0x115   :  { %v6964_v12 = vadd.f32 %v416_v56, %v6898_v15  ;;  %v465_v18 = vpop.f32.mrf.mxu3  ;;  %v321_v20 = vpop.f32.mrf.mxu0 }
 0x116   :  { %v6967_v24 = vadd.f32 %v465_v18, %v6900_v16  ;;  %v6970_v29 = vadd.f32 %v321_v20, %v6855_v22  ;;  %v365_v33 = vpop.f32.mrf.mxu1 }
 0x117   :  { %10517 = vst [vmem:[#allocation30_spill] sm:$0xff] %v6964_v12  ;;  %v6973_v36 = vadd.f32 %v365_v33, %v6913_v31 }
 0x118   :  { %10518 = vst [vmem:[#allocation31_spill] sm:$0xff] %v6967_v24 }
 0x119   :  { %10519 = vst [vmem:[#allocation32_spill] sm:$0xff] %v6970_v29 }
 0x11a   :  { %10520 = vst [vmem:[#allocation33_spill] sm:$0xff] %v6973_v36 }
 0x11c   :  { %v419_v40 = vpop.f32.mrf.mxu2 }
 0x11d   :  { %v6976_v42 = vadd.f32 %v419_v40, %v6898_v15  ;;  %v468_v45 = vpop.f32.mrf.mxu3  ;;  %v323_v46 = vpop.f32.mrf.mxu0 }
 0x11e   :  { %v6979_v50 = vadd.f32 %v468_v45, %v6900_v16  ;;  %v6982_v53 = vadd.f32 %v323_v46, %v6855_v22  ;;  %v367_v55 = vpop.f32.mrf.mxu1 }
 0x11f   :  { %10521 = vst [vmem:[#allocation34_spill] sm:$0xff] %v6976_v42  ;;  %v6985_v57 = vadd.f32 %v367_v55, %v6913_v31 }
 0x120   :  { %10522 = vst [vmem:[#allocation35_spill] sm:$0xff] %v6979_v50 }
 0x121   :  { %10523 = vst [vmem:[#allocation36_spill] sm:$0xff] %v6982_v53 }
 0x122   :  { %10524 = vst [vmem:[#allocation37_spill] sm:$0xff] %v6985_v57 }
 0x124   :  { %v421_v59 = vpop.f32.mrf.mxu2 }
 0x125   :  { %v6988_v48 = vadd.f32 %v421_v59, %v6898_v15  ;;  %v470_v61 = vpop.f32.mrf.mxu3  ;;  %v326_v1 = vpop.f32.mrf.mxu0 }
 0x126   :  { %v6991_v21 = vadd.f32 %v470_v61, %v6900_v16  ;;  %v6994_v56 = vadd.f32 %v326_v1, %v6855_v22  ;;  %v370_v18 = vpop.f32.mrf.mxu1 }
 0x127   :  { %10525 = vst [vmem:[#allocation38_spill] sm:$0xff] %v6988_v48  ;;  %v6997_v20 = vadd.f32 %v370_v18, %v6913_v31  ;;  %v297_v18 = vadd.f32 %v6857_v30, %v6855_v22 }
 0x128   :  { %10526 = vst [vmem:[#allocation39_spill] sm:$0xff] %v6991_v21 }
 0x129   :  { %10527 = vst [vmem:[#allocation40_spill] sm:$0xff] %v6994_v56 }
 0x12a   :  { %10528 = vst [vmem:[#allocation41_spill] sm:$0xff] %v6997_v20 }
 0x12c   :  { %v424_v33 = vpop.f32.mrf.mxu2 }
 0x12d   :  { %v7000_v40 = vadd.f32 %v424_v33, %v6898_v15  ;;  %v473_v45 = vpop.f32.mrf.mxu3  ;;  %v328_v46 = vpop.f32.mrf.mxu0 }
 0x12e   :  { %v7003_v55 = vadd.f32 %v473_v45, %v6900_v16  ;;  %v7006_v59 = vadd.f32 %v328_v46, %v6855_v22  ;;  %v372_v61 = vpop.f32.mrf.mxu1 }
 0x12f   :  { %10529 = vst [vmem:[#allocation42_spill] sm:$0xff] %v7000_v40  ;;  %v7009_v1 = vadd.f32 %v372_v61, %v6913_v31  ;;  %v299_v61 = vadd.f32 %v6868_v51, %v6855_v22 }
 0x130   :  { %10530 = vst [vmem:[#allocation43_spill] sm:$0xff] %v7003_v55 }
 0x131   :  { %10531 = vst [vmem:[#allocation44_spill] sm:$0xff] %v7006_v59 }
 0x132   :  { %10532 = vst [vmem:[#allocation45_spill] sm:$0xff] %v7009_v1 }
 0x134   :  { %v426_v60 = vpop.f32.mrf.mxu2 }
 0x135   :  { %v7014_v38 = vadd.f32 %v426_v60, %v6898_v15  ;;  %v475_v33 = vpop.f32.mrf.mxu3  ;;  %v757_v40 = vpop.f32.mrf.mxu0 }
 0x136   :  { %v7017_v56 = vadd.f32 %v475_v33, %v6900_v16  ;;  %v375_v45 = vpop.f32.mrf.mxu1  ;;  %v804_v55 = vadd.f32 %v757_v40, %v297_v18 }
 0x137   :  { %10533 = vst [vmem:[#allocation46_spill] sm:$0xff] %v7014_v38  ;;  %v7020_v46 = vadd.f32 %v375_v45, %v6913_v31 }
 0x138   :  { %10534 = vst [vmem:[#allocation47_spill] sm:$0xff] %v7017_v56  ;;  %v5101_v59 = vmul.f32 -1.442695, %v804_v55 }
 0x139   :  { %10535 = vst [vmem:[#allocation48_spill] sm:$0xff] %v7020_v46 }
 0x13a   :  { %5725 = vpow2.f32 %v5101_v59 }
 0x13c   :  { %v429_v30 = vpop.f32.mrf.mxu2 }
 0x13d   :  { %v7025_v48 = vadd.f32 %v429_v30, %v6898_v15  ;;  %v478_v60 = vpop.f32.mrf.mxu3  ;;  %v759_v38 = vpop.f32.mrf.mxu0 }
 0x13e   :  { %v7028_v21 = vadd.f32 %v478_v60, %v6900_v16  ;;  %v377_v33 = vpop.f32.mrf.mxu1  ;;  %v808_v56 = vadd.f32 %v759_v38, %v299_v61 }
 0x13f   :  { %10536 = vst [vmem:[#allocation49_spill] sm:$0xff] %v7025_v48  ;;  %v7031_v40 = vadd.f32 %v377_v33, %v6913_v31 }
 0x140   :  { %10537 = vst [vmem:[#allocation50_spill] sm:$0xff] %v7028_v21  ;;  %v5726_v18 = vpop.eup %5725  ;;  %v5102_v55 = vmul.f32 -1.442695, %v808_v56  ;;  %v395_v56 = vadd.f32 %v6864_v43, %v6898_v15 }
 0x141   :  { %10538 = vst [vmem:[#allocation51_spill] sm:$0xff] %v7031_v40  ;;  %v818_v59 = vadd.f32 1.0, %v5726_v18 }
 0x142   :  { %5727 = vpow2.f32 %v5102_v55 }
 0x143   :  { %5729 = vrcp.f32 %v818_v59  ;;  %vm825_vm2 = vweird.f32 %v818_v59 }
 0x144   :  { %v431_v51 = vpop.f32.mrf.mxu2 }
 0x145   :  { %v7034_v45 = vadd.f32 %v431_v51, %v6898_v15  ;;  %v480_v30 = vpop.f32.mrf.mxu3 }
 0x146   :  { %v7037_v48 = vadd.f32 %v480_v30, %v6900_v16  ;;  %v380_v60 = vpop.f32.mrf.mxu1  ;;  %v829_v30 = vand.u32 2147483647, %v818_v59 }
 0x147   :  { %10539 = vst [vmem:[#allocation52_spill] sm:$0xff] %v7034_v45  ;;  %v7040_v21 = vadd.f32 %v380_v60, %v6913_v31  ;;  %v831_v45 = vand.u32 2147483648, %v818_v59 }
 0x148   :  { %10540 = vst [vmem:[#allocation53_spill] sm:$0xff] %v7037_v48  ;;  %v5728_v38 = vpop.eup %5727  ;;  %vm830_vm4 = vcmp.eq.f32.partialorder %v829_v30, 8.507059e+37 }
 0x149   :  { %10541 = vst [vmem:[#allocation54_spill] sm:$0xff] %v7040_v21  ;;  %v5730_v61 = vpop.eup %5729  ;;  %v819_v33 = vadd.f32 1.0, %v5728_v38  ;;  %v832_v1 = vor.u32 1.1754944e-38, %v831_v45 }
 0x14a   :  { %v821_v40 = vmul.f32 %v5730_v61, %v818_v59  ;;  %vm826_vm1 = vweird.f32 %v5730_v61  ;;  %v346_v59 = vadd.f32 %v6879_v9, %v6913_v31 }
 0x14b   :  { %5731 = vrcp.f32 %v819_v33  ;;  %vm827_vm3 = vmor %vm825_vm2, %vm826_vm1  ;;  %vm840_vm6 = vweird.f32 %v819_v33 }
 0x14c   :  { %v822_v18 = vsub.f32 1.0, %v821_v40  ;;  %v785_v55 = vpop.f32.mrf.mxu2  ;;  %v397_v40 = vadd.f32 %v6873_v0, %v6898_v15 }
 0x14d   :  { %v806_v51 = vadd.f32 %v785_v55, %v395_v56  ;;  %v799_v46 = vpop.f32.mrf.mxu3  ;;  %v446_v55 = vadd.f32 %v6875_v3, %v6900_v16 }
 0x14e   :  { %v823_v42 = vmul.f32 %v5730_v61, %v822_v18  ;;  %v382_v48 = vpop.f32.mrf.mxu1  ;;  %v444_v18 = vadd.f32 %v6866_v47, %v6900_v16 }
 0x14f   :  { %5733 = vtanh.f32 %v806_v51  ;;  %v7045_v60 = vadd.f32 %v382_v48, %v6913_v31 }
 0x150   :  { %v824_v21 = vadd.f32 %v5730_v61, %v823_v42  ;;  %v807_v0 = vadd.f32 %v799_v46, %v444_v18  ;;  %v348_v46 = vadd.f32 %v6887_v8, %v6913_v31 }
 0x151   :  { %10542 = vst [vmem:[#allocation55_spill] sm:$0xff] %v7045_v60  ;;  %v5732_v38 = vpop.eup %5731  ;;  %v844_v60 = vand.u32 2147483647, %v819_v33 }
 0x152   :  { %v836_v43 = vmul.f32 %v5732_v38, %v819_v33  ;;  %v828_v50 = vsel %vm827_vm3, %v5730_v61, %v824_v21  ;;  %v846_v21 = vand.u32 2147483648, %v819_v33  ;;  %vm841_vm5 = vweird.f32 %v5732_v38 }
 0x153   :  { %v833_v56 = vsel %vm830_vm4, %v832_v1, %v828_v50  ;;  %vm842_vm7 = vmor %vm840_vm6, %vm841_vm5  ;;  %v5105_v29 = vmul.f32 -1.442695, %v807_v0  ;;  %vm845_vm8 = vcmp.eq.f32.partialorder %v844_v60, 8.507059e+37 }
 0x154   :  { %v837_v48 = vsub.f32 1.0, %v836_v43  ;;  %v787_v51 = vpop.f32.mrf.mxu2  ;;  %v847_v43 = vor.u32 1.1754944e-38, %v846_v21 }
 0x155   :  { %v5734_v42 = vpop.eup %5733  ;;  %v810_v45 = vadd.f32 %v787_v51, %v397_v40  ;;  %v801_v61 = vpop.f32.mrf.mxu3 }
 0x156   :  { %v7055_v30 = vmul.f32 %v5734_v42, %v833_v56  ;;  %v838_v50 = vmul.f32 %v5732_v38, %v837_v48  ;;  %v771_v1 = vpop.f32.mrf.mxu1  ;;  %v811_v47 = vadd.f32 %v801_v61, %v446_v55 }
 0x157   :  { %5735 = vtanh.f32 %v810_v45  ;;  %v805_v20 = vadd.f32 %v771_v1, %v346_v59 }
 0x158   :  { %v839_v3 = vadd.f32 %v5732_v38, %v838_v50  ;;  %v5106_v51 = vmul.f32 -1.442695, %v811_v47 }
 0x159   :  { %v5103_v53 = vmul.f32 -1.442695, %v805_v20 }
 0x15a   :  { %v843_v9 = vsel %vm842_vm7, %v5732_v38, %v839_v3 }
 0x15b   :  { %v848_v40 = vsel %vm845_vm8, %v847_v43, %v843_v9  ;;  %5737 = vpow2.f32 %v5103_v53 }
 0x15c   :  { %5739 = vpow2.f32 %v5105_v29 }
 0x15d   :  { %v5736_v56 = vpop.eup %5735  ;;  %5741 = vpow2.f32 %v5106_v51 }
 0x15e   :  { %v931_v18 = vmul.f32 %v5736_v56, %v848_v40  ;;  %v773_v48 = vpop.f32.mrf.mxu1 }
 0x15f   :  { %v809_v55 = vadd.f32 %v773_v48, %v348_v46 }
 0x161   :  { %v5104_v42 = vmul.f32 -1.442695, %v809_v55  ;;  %v5738_v33 = vpop.eup %5737 }
 0x162   :  { %v856_v59 = vadd.f32 1.0, %v5738_v33  ;;  %v5740_v45 = vpop.eup %5739 }
 0x163   :  { %5743 = vpow2.f32 %v5104_v42  ;;  %v5742_v20 = vpop.eup %5741  ;;  %v7059_v60 = vadd.f32 1.0, %v5740_v45 }
 0x164   :  { %5745 = vrcp.f32 %v856_v59  ;;  %v7061_v38 = vadd.f32 1.0, %v5742_v20  ;;  %v869_v0 = vand.u32 2147483648, %v856_v59  ;;  %v867_v1 = vand.u32 2147483647, %v856_v59 }
 0x165   :  { %5747 = vrcp.f32 %v7059_v60  ;;  %vm863_vm10 = vweird.f32 %v856_v59  ;;  %vm903_vm3 = vweird.f32 %v7059_v60 }
 0x166   :  { %5749 = vrcp.f32 %v7061_v38  ;;  %v870_v40 = vor.u32 1.1754944e-38, %v869_v0  ;;  %vm868_vm12 = vcmp.eq.f32.partialorder %v867_v1, 8.507059e+37  ;;  %vm918_vm4 = vweird.f32 %v7061_v38 }
 0x169   :  { %v5744_v53 = vpop.eup %5743 }
 0x16a   :  { %v5746_v21 = vpop.eup %5745  ;;  %v857_v8 = vadd.f32 1.0, %v5744_v53 }
 0x16b   :  { %v859_v29 = vmul.f32 %v5746_v21, %v856_v59  ;;  %vm864_vm9 = vweird.f32 %v5746_v21  ;;  %v5748_v47 = vpop.eup %5747 }
 0x16c   :  { %5751 = vrcp.f32 %v857_v8  ;;  %v5750_v3 = vpop.eup %5749  ;;  %vm865_vm11 = vmor %vm863_vm10, %vm864_vm9  ;;  %v899_v46 = vmul.f32 %v5748_v47, %v7059_v60  ;;  %v884_v45 = vand.u32 2147483648, %v857_v8  ;;  %v882_v53 = vand.u32 2147483647, %v857_v8 }
 0x16d   :  { %v860_v61 = vsub.f32 1.0, %v859_v29  ;;  %v914_v48 = vmul.f32 %v5750_v3, %v7061_v38  ;;  %vm878_vm14 = vweird.f32 %v857_v8  ;;  %vm904_vm1 = vweird.f32 %v5748_v47 }
 0x16e   :  { %v900_v59 = vsub.f32 1.0, %v899_v46  ;;  %vm883_vm0 = vcmp.eq.f32.partialorder %v882_v53, 8.507059e+37  ;;  %vm919_vm2 = vweird.f32 %v5750_v3  ;;  %v924_v46 = vand.u32 2147483648, %v7061_v38  ;;  %vm905_vm5 = vmor %vm903_vm3, %vm904_vm1 }
 0x16f   :  { %v861_v50 = vmul.f32 %v5746_v21, %v860_v61  ;;  %v915_v61 = vsub.f32 1.0, %v914_v48  ;;  %vm920_vm6 = vmor %vm918_vm4, %vm919_vm2 }
 0x170   :  { %v901_v1 = vmul.f32 %v5748_v47, %v900_v59 }
 0x171   :  { %v862_v43 = vadd.f32 %v5746_v21, %v861_v50 }
 0x172   :  { %v5752_v9 = vpop.eup %5751 }
 0x173   :  { %v866_v51 = vsel %vm865_vm11, %v5746_v21, %v862_v43  ;;  %v874_v56 = vmul.f32 %v5752_v9, %v857_v8  ;;  %vm879_vm13 = vweird.f32 %v5752_v9  ;;  %v885_v21 = vor.u32 1.1754944e-38, %v884_v45 }
 0x174   :  { %v871_v55 = vsel %vm868_vm12, %v870_v40, %v866_v51  ;;  %vm880_vm15 = vmor %vm878_vm14, %vm879_vm13  ;;  %v916_v43 = vmul.f32 %v5750_v3, %v915_v61  ;;  %v909_v8 = vand.u32 2147483648, %v7059_v60 }
 0x175   :  { %v928_v42 = vmul.f32 0.0, %v871_v55  ;;  %v875_v33 = vsub.f32 1.0, %v874_v56  ;;  %v902_v55 = vadd.f32 %v5748_v47, %v901_v1 }
 0x176   :  { %v910_v45 = vor.u32 1.1754944e-38, %v909_v8 }
 0x177   :  { %v876_v20 = vmul.f32 %v5752_v9, %v875_v33  ;;  %v7068_v29 = vadd.f32 %v7055_v30, %v928_v42  ;;  %v917_v30 = vadd.f32 %v5750_v3, %v916_v43  ;;  %v906_v48 = vsel %vm905_vm5, %v5748_v47, %v902_v55 }
 0x178   :  { %v449_v55 = vadd.f32 %v6883_v6, %v6900_v16 }
 0x179   :  { %v877_v0 = vadd.f32 %v5752_v9, %v876_v20  ;;  %5753 = vtanh.f32 %v7068_v29  ;;  %v921_v42 = vsel %vm920_vm6, %v5750_v3, %v917_v30  ;;  %v925_v20 = vor.u32 1.1754944e-38, %v924_v46 }
 0x17a   :  { %v304_v30 = vadd.f32 %v6885_v7, %v6855_v22  ;;  %v400_v7 = vadd.f32 %v6881_v5, %v6898_v15  ;;  %v402_v5 = vadd.f32 %v6889_v10, %v6898_v15 }
 0x17b   :  { %v881_v50 = vsel %vm880_vm15, %v5752_v9, %v877_v0  ;;  %v907_v9 = vand.u32 2147483647, %v7059_v60  ;;  %v302_v60 = vadd.f32 %v6877_v4, %v6855_v22  ;;  %v353_v4 = vadd.f32 %v6911_v28, %v6913_v31 }
 0x17c   :  { %v886_v40 = vsel %vm883_vm0, %v885_v21, %v881_v50 }
 0x17d   :  { %v929_v51 = vmul.f32 0.0, %v886_v40  ;;  %vm908_vm7 = vcmp.eq.f32.partialorder %v907_v9, 8.507059e+37 }
 0x17e   :  { %v911_v59 = vsel %vm908_vm7, %v910_v45, %v906_v48 }
 0x17f   :  { %v7070_v56 = vadd.f32 %v931_v18, %v929_v51  ;;  %v922_v18 = vand.u32 2147483647, %v7061_v38  ;;  %v5754_v33 = vpop.eup %5753  ;;  %v351_v38 = vadd.f32 %v6896_v14, %v6913_v31  ;;  %v451_v31 = vadd.f32 %v6891_v11, %v6900_v16 }
 0x180   :  { %v936_v0 = vmul.f32 %v5754_v33, %v911_v59 }
 0x181   :  { %5755 = vtanh.f32 %v7070_v56  ;;  %vm923_vm8 = vcmp.eq.f32.partialorder %v922_v18, 8.507059e+37 }
 0x182   :  { %v926_v61 = vsel %vm923_vm8, %v925_v20, %v921_v42 }
 0x187   :  { %v5756_v53 = vpop.eup %5755 }
 0x188   :  { %v937_v21 = vmul.f32 %v5756_v53, %v926_v61 }
 0x18a   :  { %v7080_v50 = vpack.c.bf16 %v937_v21, %v936_v0 }
 0x18c   :  { %955 = vmatmul.bf16.vlgmr.msra.gmra.mxu0 %v7080_v50  ;;  %969 = vmatmul.bf16.vlgmr.msrb.gmra.mxu1 %v7080_v50 }
 0x18d   :  { %983 = vmatmul.bf16.vlgmr.msra.gmra.mxu2 %v7080_v50  ;;  %997 = vmatmul.bf16.vlgmr.msra.gmra.mxu3 %v7080_v50 }
 0x209   :  { %v956_v47 = vpop.f32.mrf.mxu0  ;;  %v970_v3 = vpop.f32.mrf.mxu1 }
 0x20a   :  { %v1003_v1 = vadd.f32 %v956_v47, %v302_v60  ;;  %v1004_v43 = vadd.f32 %v970_v3, %v351_v38 }
 0x20c   :  { %v5107_v40 = vmul.f32 -1.442695, %v1003_v1  ;;  %v5109_v51 = vmul.f32 -1.442695, %v1004_v43 }
 0x20e   :  { %5757 = vpow2.f32 %v5107_v40 }
 0x20f   :  { %5759 = vpow2.f32 %v5109_v51 }
 0x210   :  { %v998_v8 = vpop.f32.mrf.mxu3  ;;  %v984_v22 = vpop.f32.mrf.mxu2 }
 0x211   :  { %v1006_v46 = vadd.f32 %v998_v8, %v449_v55  ;;  %v958_v14 = vpop.f32.mrf.mxu0  ;;  %v972_v9 = vpop.f32.mrf.mxu1  ;;  %v1005_v0 = vadd.f32 %v984_v22, %v400_v7 }
 0x212   :  { %v1007_v18 = vadd.f32 %v958_v14, %v304_v30  ;;  %v1008_v48 = vadd.f32 %v972_v9, %v353_v4 }
 0x213   :  { %v5111_v42 = vmul.f32 -1.442695, %v1006_v46 }
 0x214   :  { %v5758_v33 = vpop.eup %5757  ;;  %v5108_v45 = vmul.f32 -1.442695, %v1007_v18  ;;  %v5110_v6 = vmul.f32 -1.442695, %v1008_v48 }
 0x215   :  { %v5760_v20 = vpop.eup %5759  ;;  %v1017_v53 = vadd.f32 1.0, %v5758_v33  ;;  %5761 = vpow2.f32 %v5111_v42 }
 0x216   :  { %v1055_v59 = vadd.f32 1.0, %v5760_v20  ;;  %5763 = vpow2.f32 %v5108_v45 }
 0x217   :  { %5765 = vrcp.f32 %v1017_v53  ;;  %v1028_v8 = vand.u32 2147483647, %v1017_v53  ;;  %v1030_v46 = vand.u32 2147483648, %v1017_v53  ;;  %vm1024_vm11 = vweird.f32 %v1017_v53 }
 0x218   :  { %5767 = vrcp.f32 %v1055_v59  ;;  %v1000_v28 = vpop.f32.mrf.mxu3  ;;  %v1068_v4 = vand.u32 2147483648, %v1055_v59  ;;  %v986_v14 = vpop.f32.mrf.mxu2  ;;  %v1066_v18 = vand.u32 2147483647, %v1055_v59  ;;  %vm1062_vm12 = vweird.f32 %v1055_v59 }
 0x219   :  { %5769 = vpow2.f32 %v5110_v6  ;;  %v1010_v38 = vadd.f32 %v1000_v28, %v451_v31  ;;  %v1009_v42 = vadd.f32 %v986_v14, %v402_v5  ;;  %v1031_v45 = vor.u32 1.1754944e-38, %v1030_v46 }
 0x21a   :  { %v1069_v7 = vor.u32 1.1754944e-38, %v1068_v4  ;;  %vm1029_vm15 = vcmp.eq.f32.partialorder %v1028_v8, 8.507059e+37  ;;  %vm1067_vm0 = vcmp.eq.f32.partialorder %v1066_v18, 8.507059e+37 }
 0x21b   :  { %v5762_v61 = vpop.eup %5761  ;;  %v5112_v55 = vmul.f32 -1.442695, %v1010_v38 }
 0x21c   :  { %v5764_v21 = vpop.eup %5763  ;;  %v7100_v60 = vadd.f32 1.0, %v5762_v61 }
 0x21d   :  { %v5766_v47 = vpop.eup %5765  ;;  %v7102_v3 = vadd.f32 1.0, %v5764_v21 }
 0x21e   :  { %v5768_v1 = vpop.eup %5767  ;;  %v1020_v43 = vmul.f32 %v5766_v47, %v1017_v53  ;;  %5771 = vrcp.f32 %v7100_v60  ;;  %vm1025_vm9 = vweird.f32 %v5766_v47  ;;  %vm1102_vm5 = vweird.f32 %v7100_v60 }
 0x21f   :  { %v5770_v40 = vpop.eup %5769  ;;  %v1058_v51 = vmul.f32 %v5768_v1, %v1055_v59  ;;  %5773 = vtanh.f32 %v1005_v0  ;;  %vm1063_vm10 = vweird.f32 %v5768_v1  ;;  %vm1026_vm13 = vmor %vm1024_vm11, %vm1025_vm9  ;;  %vm1039_vm1 = vweird.f32 %v7102_v3 }
 0x220   :  { %v1021_v11 = vsub.f32 1.0, %v1020_v43  ;;  %5775 = vrcp.f32 %v7102_v3  ;;  %v7108_v16 = vadd.f32 1.0, %v5770_v40  ;;  %vm1064_vm14 = vmor %vm1062_vm12, %vm1063_vm10  ;;  %v1108_v43 = vand.u32 2147483648, %v7100_v60 }
 0x221   :  { %v1059_v30 = vsub.f32 1.0, %v1058_v51 }
 0x222   :  { %v1022_v9 = vmul.f32 %v5766_v47, %v1021_v11  ;;  %5777 = vrcp.f32 %v7108_v16  ;;  %v1081_v14 = vand.u32 2147483647, %v7108_v16  ;;  %vm1077_vm8 = vweird.f32 %v7108_v16 }
 0x223   :  { %v1060_v48 = vmul.f32 %v5768_v1, %v1059_v30  ;;  %5779 = vpow2.f32 %v5112_v55  ;;  %v1083_v55 = vand.u32 2147483648, %v7108_v16  ;;  %v1045_v30 = vand.u32 2147483648, %v7102_v3 }
 0x224   :  { %v7111_v10 = vpop.eup %5771  ;;  %v1023_v15 = vadd.f32 %v5766_v47, %v1022_v9  ;;  %5781 = vtanh.f32 %v1009_v42  ;;  %v1106_v42 = vand.u32 2147483647, %v7100_v60  ;;  %vm1082_vm11 = vcmp.eq.f32.partialorder %v1081_v14, 8.507059e+37 }
 0x225   :  { %v5774_v33 = vpop.eup %5773  ;;  %v1061_v20 = vadd.f32 %v5768_v1, %v1060_v48  ;;  %v1098_v6 = vmul.f32 %v7111_v10, %v7100_v60  ;;  %vm1103_vm3 = vweird.f32 %v7111_v10  ;;  %v1084_v60 = vor.u32 1.1754944e-38, %v1083_v55 }
 0x226   :  { %v5776_v22 = vpop.eup %5775  ;;  %v1027_v28 = vsel %vm1026_vm13, %v5766_v47, %v1023_v15  ;;  %vm7134_vm7 = vmor %vm1102_vm5, %vm1103_vm3  ;;  %vm1107_vm12 = vcmp.eq.f32.partialorder %v1106_v42, 8.507059e+37 }
 0x227   :  { %v1032_v31 = vsel %vm1029_vm15, %v1031_v45, %v1027_v28  ;;  %v1065_v61 = vsel %vm1064_vm14, %v5768_v1, %v1061_v20  ;;  %v1099_v0 = vsub.f32 1.0, %v1098_v6  ;;  %v1035_v53 = vmul.f32 %v5776_v22, %v7102_v3 }
 0x228   :  { %v5778_v21 = vpop.eup %5777  ;;  %v1070_v38 = vsel %vm1067_vm0, %v1069_v7, %v1065_v61  ;;  %v1129_v59 = vmul.f32 %v5774_v33, %v1032_v31  ;;  %v1043_v1 = vand.u32 2147483647, %v7102_v3  ;;  %vm1040_vm2 = vweird.f32 %v5776_v22 }
 0x229   :  { %v1127_v40 = vmul.f32 %v1070_v38, %v7068_v29  ;;  %v1100_v5 = vmul.f32 %v7111_v10, %v1099_v0  ;;  %v1036_v51 = vsub.f32 1.0, %v1035_v53  ;;  %v1073_v47 = vmul.f32 %v5778_v21, %v7108_v16  ;;  %v5780_v11 = vpop.eup %5779  ;;  %vm1041_vm6 = vmor %vm1039_vm1, %vm1040_vm2 }
 0x22a   :  { %v1096_v9 = vadd.f32 1.0, %v5780_v11  ;;  %vm1078_vm4 = vweird.f32 %v5778_v21  ;;  %v5782_v15 = vpop.eup %5781  ;;  %v1046_v33 = vor.u32 1.1754944e-38, %v1045_v30  ;;  %vm1044_vm9 = vcmp.eq.f32.partialorder %v1043_v1, 8.507059e+37 }
 0x22b   :  { %v7124_v4 = vadd.f32 %v1129_v59, %v1127_v40  ;;  %v1074_v8 = vsub.f32 1.0, %v1073_v47  ;;  %v1037_v46 = vmul.f32 %v5776_v22, %v1036_v51  ;;  %v1101_v29 = vadd.f32 %v7111_v10, %v1100_v5  ;;  %vm1079_vm10 = vmor %vm1077_vm8, %vm1078_vm4 }
 0x22c   :  { %v1109_v3 = vor.u32 1.1754944e-38, %v1108_v43  ;;  %v1123_v51 = vand.u32 2147483648, %v1096_v9  ;;  %vm1117_vm14 = vweird.f32 %v1096_v9 }
 0x22d   :  { %10543 = vst [vmem:[#allocation56_spill] sm:$0xff] %v7124_v4  ;;  %5783 = vtanh.f32 %v7124_v4  ;;  %v1075_v18 = vmul.f32 %v5778_v21, %v1074_v8  ;;  %v1038_v48 = vadd.f32 %v5776_v22, %v1037_v46  ;;  %v1105_v7 = vsel %vm7134_vm7, %v7111_v10, %v1101_v29 }
 0x22e   :  { %5785 = vrcp.f32 %v1096_v9  ;;  %v1110_v38 = vsel %vm1107_vm12, %v1109_v3, %v1105_v7  ;;  %v1124_v11 = vor.u32 1.1754944e-38, %v1123_v51 }
 0x22f   :  { %v1042_v20 = vsel %vm1041_vm6, %v5776_v22, %v1038_v48  ;;  %v1076_v6 = vadd.f32 %v5778_v21, %v1075_v18 }
 0x230   :  { %v1047_v28 = vsel %vm1044_vm9, %v1046_v33, %v1042_v20 }
 0x231   :  { %v1080_v31 = vsel %vm1079_vm10, %v5778_v21, %v1076_v6  ;;  %v1130_v61 = vmul.f32 %v5782_v15, %v1047_v28  ;;  %v1121_v21 = vand.u32 2147483647, %v1096_v9 }
 0x232   :  { %v1085_v0 = vsel %vm1082_vm11, %v1084_v60, %v1080_v31 }
 0x233   :  { %v5784_v53 = vpop.eup %5783  ;;  %v1128_v16 = vmul.f32 %v1085_v0, %v7070_v56  ;;  %vm1122_vm0 = vcmp.eq.f32.partialorder %v1121_v21, 8.507059e+37 }
 0x234   :  { %v5786_v22 = vpop.eup %5785  ;;  %v7143_v59 = vmul.f32 %v5784_v53, %v1110_v38 }
 0x235   :  { %v7145_v40 = vadd.f32 %v1130_v61, %v1128_v16  ;;  %v1113_v5 = vmul.f32 %v5786_v22, %v1096_v9  ;;  %vm1118_vm13 = vweird.f32 %v5786_v22 }
 0x236   :  { %vm1119_vm15 = vmor %vm1117_vm14, %vm1118_vm13 }
 0x237   :  { %10546 = vst [vmem:[#allocation57_spill] sm:$0xff] %v7145_v40  ;;  %5787 = vtanh.f32 %v7145_v40  ;;  %v1114_v10 = vsub.f32 1.0, %v1113_v5 }
 0x239   :  { %v1115_v43 = vmul.f32 %v5786_v22, %v1114_v10 }
 0x23b   :  { %v1116_v47 = vadd.f32 %v5786_v22, %v1115_v43 }
 0x23d   :  { %v5788_v55 = vpop.eup %5787  ;;  %v1120_v1 = vsel %vm1119_vm15, %v5786_v22, %v1116_v47 }
 0x23e   :  { %v1125_v56 = vsel %vm1122_vm0, %v1124_v11, %v1120_v1 }
 0x23f   :  { %v7148_v30 = vmul.f32 %v5788_v55, %v1125_v56 }
 0x240   :  { %6238 = dma.done.wait [#allocation4], 8192 }
 0x241   :  { %6239 = vsyncadd [#allocation4], 4294959104  ;;  %v5227_v8 = vld [vmem:[#allocation3 + $0xe0] sm:$0xf]  ;;  %v5656_v46 = vld [vmem:[#allocation3 + $0xec] sm:$0xf0] }
 0x242   :  { %v5355_v29 = vld [vmem:[#allocation3 + $0x1e0] sm:$0xf]  ;;  %v7150_v14 = vor.u32 %v5656_v46, %v5227_v8  ;;  %v5688_v18 = vld [vmem:[#allocation3 + $0x1ec] sm:$0xf0]  ;;  %v5654_v48 = vld [vmem:[#allocation3 + $0xe4] sm:$0xf] }
 0x243   :  { %v5229_v15 = vld [vmem:[#allocation3 + $0xf0] sm:$0xf0]  ;;  %v7152_v42 = vor.u32 %v5688_v18, %v5355_v29  ;;  %v5686_v33 = vld [vmem:[#allocation3 + $0x1e4] sm:$0xf]  ;;  %v5211_v20 = vld [vmem:[#allocation3 + $0xc0] sm:$0xf] }
 0x244   :  { %10547 = vst [vmem:[#allocation58_spill] sm:$0xff] %v7150_v14  ;;  %v7154_v9 = vor.u32 %v5654_v48, %v5229_v15  ;;  %v5357_v45 = vld [vmem:[#allocation3 + $0x1f0] sm:$0xf0]  ;;  %1535 = vmatpush.bf16.msrb.mxu0 %v7150_v14  ;;  %v5652_v7 = vld [vmem:[#allocation3 + $0xcc] sm:$0xf0]  ;;  %v10272_v32 = vmov 0.0|0.0  }
 0x245   :  { %10548 = vst [vmem:[#allocation59_spill] sm:$0xff] %v7152_v42  ;;  %v7157_v6 = vor.u32 %v5686_v33, %v5357_v45  ;;  %v5339_v60 = vld [vmem:[#allocation3 + $0x1c0] sm:$0xf]  ;;  %v5684_v28 = vld [vmem:[#allocation3 + $0x1cc] sm:$0xf0]  ;;  %1549 = vmatpush.bf16.msra.mxu1 %v7152_v42  ;;  %v7161_v3 = vor.u32 %v5652_v7, %v5211_v20 }
 0x246   :  { %10549 = vst [vmem:[#allocation60_spill] sm:$0xff] %v7154_v9  ;;  %1563 = vmatpush.bf16.msrb.mxu2 %v7154_v9  ;;  %v7163_v31 = vor.u32 %v5684_v28, %v5339_v60  ;;  %v5650_v61 = vld [vmem:[#allocation3 + $0xc4] sm:$0xf]  ;;  %v5213_v0 = vld [vmem:[#allocation3 + $0xd0] sm:$0xf0] }
 0x247   :  { %10550 = vst [vmem:[#allocation61_spill] sm:$0xff] %v7157_v6  ;;  %v5682_v53 = vld [vmem:[#allocation3 + $0x1c4] sm:$0xf]  ;;  %1577 = vmatpush.bf16.msrb.mxu3 %v7157_v6  ;;  %v7166_v38 = vor.u32 %v5650_v61, %v5213_v0  ;;  %v5341_v16 = vld [vmem:[#allocation3 + $0x1d0] sm:$0xf0] }
 0x248   :  { %10551 = vst [vmem:[#allocation62_spill] sm:$0xff] %v7161_v3  ;;  %v5195_v22 = vld [vmem:[#allocation3 + $0xa0] sm:$0xf]  ;;  %v5648_v5 = vld [vmem:[#allocation3 + $0xac] sm:$0xf0]  ;;  %v7168_v10 = vor.u32 %v5682_v53, %v5341_v16  ;;  %1536 = vmatpush.bf16.msrb.mxu0 %v7161_v3 }
 0x249   :  { %10552 = vst [vmem:[#allocation63_spill] sm:$0xff] %v7163_v31  ;;  %v5323_v51 = vld [vmem:[#allocation3 + $0x1a0] sm:$0xf]  ;;  %v5680_v43 = vld [vmem:[#allocation3 + $0x1ac] sm:$0xf0]  ;;  %v7171_v47 = vor.u32 %v5648_v5, %v5195_v22  ;;  %1550 = vmatpush.bf16.msra.mxu1 %v7163_v31 }
 0x24a   :  { %10553 = vst [vmem:[#allocation64_spill] sm:$0xff] %v7166_v38  ;;  %v5646_v21 = vld [vmem:[#allocation3 + $0xa4] sm:$0xf]  ;;  %v5197_v11 = vld [vmem:[#allocation3 + $0xb0] sm:$0xf0]  ;;  %1564 = vmatpush.bf16.msrb.mxu2 %v7166_v38  ;;  %v7175_v56 = vor.u32 %v5680_v43, %v5323_v51 }
 0x24b   :  { %10554 = vst [vmem:[#allocation65_spill] sm:$0xff] %v7168_v10  ;;  %v5678_v55 = vld [vmem:[#allocation3 + $0x1a4] sm:$0xf]  ;;  %v5325_v1 = vld [vmem:[#allocation3 + $0x1b0] sm:$0xf0]  ;;  %v7177_v8 = vor.u32 %v5646_v21, %v5197_v11  ;;  %1578 = vmatpush.bf16.msrb.mxu3 %v7168_v10 }
 0x24c   :  { %10555 = vst [vmem:[#allocation66_spill] sm:$0xff] %v7171_v47  ;;  %v5179_v46 = vld [vmem:[#allocation3 + $0x80] sm:$0xf]  ;;  %v5644_v29 = vld [vmem:[#allocation3 + $0x8c] sm:$0xf0]  ;;  %v7180_v48 = vor.u32 %v5678_v55, %v5325_v1  ;;  %1537 = vmatpush.bf16.msrb.mxu0 %v7171_v47 }
 0x24d   :  { %10556 = vst [vmem:[#allocation67_spill] sm:$0xff] %v7175_v56  ;;  %v5307_v18 = vld [vmem:[#allocation3 + $0x180] sm:$0xf]  ;;  %v5676_v15 = vld [vmem:[#allocation3 + $0x18c] sm:$0xf0]  ;;  %v7183_v60 = vor.u32 %v5644_v29, %v5179_v46  ;;  %1551 = vmatpush.bf16.msra.mxu1 %v7175_v56 }
 0x24e   :  { %10557 = vst [vmem:[#allocation68_spill] sm:$0xff] %v7177_v8  ;;  %v5642_v33 = vld [vmem:[#allocation3 + $0x84] sm:$0xf]  ;;  %v5181_v45 = vld [vmem:[#allocation3 + $0x90] sm:$0xf0]  ;;  %1565 = vmatpush.bf16.msrb.mxu2 %v7177_v8  ;;  %v7187_v28 = vor.u32 %v5676_v15, %v5307_v18 }
 0x24f   :  { %10558 = vst [vmem:[#allocation69_spill] sm:$0xff] %v7180_v48  ;;  %v5674_v20 = vld [vmem:[#allocation3 + $0x184] sm:$0xf]  ;;  %v5309_v7 = vld [vmem:[#allocation3 + $0x190] sm:$0xf0]  ;;  %v7189_v61 = vor.u32 %v5642_v33, %v5181_v45  ;;  %1579 = vmatpush.bf16.msrb.mxu3 %v7180_v48 }
 0x250   :  { %10559 = vst [vmem:[#allocation70_spill] sm:$0xff] %v7183_v60  ;;  %v5163_v0 = vld [vmem:[#allocation3 + $0x60] sm:$0xf]  ;;  %v5640_v53 = vld [vmem:[#allocation3 + $0x6c] sm:$0xf0]  ;;  %v7192_v22 = vor.u32 %v5674_v20, %v5309_v7  ;;  %1538 = vmatpush.bf16.msrb.mxu0 %v7183_v60 }
 0x251   :  { %10560 = vst [vmem:[#allocation71_spill] sm:$0xff] %v7187_v28  ;;  %v5291_v16 = vld [vmem:[#allocation3 + $0x160] sm:$0xf]  ;;  %v5672_v5 = vld [vmem:[#allocation3 + $0x16c] sm:$0xf0]  ;;  %v7195_v55 = vor.u32 %v5640_v53, %v5163_v0  ;;  %1552 = vmatpush.bf16.msra.mxu1 %v7187_v28 }
 0x252   :  { %10561 = vst [vmem:[#allocation72_spill] sm:$0xff] %v7189_v61  ;;  %v5638_v51 = vld [vmem:[#allocation3 + $0x64] sm:$0xf]  ;;  %v5165_v43 = vld [vmem:[#allocation3 + $0x70] sm:$0xf0]  ;;  %1566 = vmatpush.bf16.msrb.mxu2 %v7189_v61  ;;  %v7199_v1 = vor.u32 %v5672_v5, %v5291_v16 }
 0x253   :  { %10562 = vst [vmem:[#allocation73_spill] sm:$0xff] %v7192_v22  ;;  %v5670_v21 = vld [vmem:[#allocation3 + $0x164] sm:$0xf]  ;;  %v5293_v11 = vld [vmem:[#allocation3 + $0x170] sm:$0xf0]  ;;  %v7201_v46 = vor.u32 %v5638_v51, %v5165_v43  ;;  %1580 = vmatpush.bf16.msrb.mxu3 %v7192_v22 }
 0x254   :  { %10563 = vst [vmem:[#allocation74_spill] sm:$0xff] %v7195_v55  ;;  %v5147_v29 = vld [vmem:[#allocation3 + $0x40] sm:$0xf]  ;;  %v5636_v18 = vld [vmem:[#allocation3 + $0x4c] sm:$0xf0]  ;;  %v7204_v33 = vor.u32 %v5670_v21, %v5293_v11  ;;  %1539 = vmatpush.bf16.msrb.mxu0 %v7195_v55 }
 0x255   :  { %10564 = vst [vmem:[#allocation75_spill] sm:$0xff] %v7199_v1  ;;  %v5275_v15 = vld [vmem:[#allocation3 + $0x140] sm:$0xf]  ;;  %v5668_v45 = vld [vmem:[#allocation3 + $0x14c] sm:$0xf0]  ;;  %v7207_v12 = vor.u32 %v5636_v18, %v5147_v29  ;;  %1553 = vmatpush.bf16.msra.mxu1 %v7199_v1 }
 0x256   :  { %10565 = vst [vmem:[#allocation76_spill] sm:$0xff] %v7201_v46  ;;  %v5634_v20 = vld [vmem:[#allocation3 + $0x44] sm:$0xf]  ;;  %v5149_v7 = vld [vmem:[#allocation3 + $0x50] sm:$0xf0]  ;;  %1567 = vmatpush.bf16.msrb.mxu2 %v7201_v46  ;;  %v7211_v16 = vor.u32 %v5668_v45, %v5275_v15 }
 0x257   :  { %10566 = vst [vmem:[#allocation77_spill] sm:$0xff] %v7204_v33  ;;  %v5666_v0 = vld [vmem:[#allocation3 + $0x144] sm:$0xf]  ;;  %v5277_v53 = vld [vmem:[#allocation3 + $0x150] sm:$0xf0]  ;;  %v7213_v5 = vor.u32 %v5634_v20, %v5149_v7  ;;  %1581 = vmatpush.bf16.msrb.mxu3 %v7204_v33 }
 0x258   :  { %10567 = vst [vmem:[#allocation78_spill] sm:$0xff] %v7207_v12  ;;  %v5131_v51 = vld [vmem:[#allocation3 + $0x20] sm:$0xf]  ;;  %v5632_v43 = vld [vmem:[#allocation3 + $0x2c] sm:$0xf0]  ;;  %v7216_v11 = vor.u32 %v5666_v0, %v5277_v53  ;;  %1540 = vmatpush.bf16.msrb.mxu0 %v7207_v12 }
 0x259   :  { %10568 = vst [vmem:[#allocation79_spill] sm:$0xff] %v7211_v16  ;;  %v5259_v21 = vld [vmem:[#allocation3 + $0x120] sm:$0xf]  ;;  %v5664_v24 = vld [vmem:[#allocation3 + $0x12c] sm:$0xf0]  ;;  %v7219_v63 = vor.u32 %v5632_v43, %v5131_v51  ;;  %1554 = vmatpush.bf16.msra.mxu1 %v7211_v16 }
 0x25a   :  { %10569 = vst [vmem:[#allocation80_spill] sm:$0xff] %v7213_v5  ;;  %v5630_v57 = vld [vmem:[#allocation3 + $0x24] sm:$0xf]  ;;  %v5133_v2 = vld [vmem:[#allocation3 + $0x30] sm:$0xf0]  ;;  %1568 = vmatpush.bf16.msrb.mxu2 %v7213_v5  ;;  %v7223_v20 = vor.u32 %v5664_v24, %v5259_v21 }
 0x25b   :  { %10570 = vst [vmem:[#allocation81_spill] sm:$0xff] %v7216_v11  ;;  %v5662_v29 = vld [vmem:[#allocation3 + $0x124] sm:$0xf]  ;;  %v5261_v18 = vld [vmem:[#allocation3 + $0x130] sm:$0xf0]  ;;  %v7225_v7 = vor.u32 %v5630_v57, %v5133_v2  ;;  %1582 = vmatpush.bf16.msrb.mxu3 %v7216_v11 }
 0x25c   :  { %10571 = vst [vmem:[#allocation82_spill] sm:$0xff] %v7219_v63  ;;  %v5115_v15 = vld [vmem:[#allocation3] sm:$0xf]  ;;  %v5628_v45 = vld [vmem:[#allocation3 + $0xc] sm:$0xf0]  ;;  %v7228_v17 = vor.u32 %v5662_v29, %v5261_v18  ;;  %1541 = vmatpush.bf16.msrb.mxu0 %v7219_v63 }
 0x25d   :  { %10572 = vst [vmem:[#allocation83_spill] sm:$0xff] %v7223_v20  ;;  %v5243_v0 = vld [vmem:[#allocation3 + $0x100] sm:$0xf]  ;;  %v5660_v53 = vld [vmem:[#allocation3 + $0x10c] sm:$0xf0]  ;;  %v7231_v34 = vor.u32 %v5628_v45, %v5115_v15  ;;  %1555 = vmatpush.bf16.msra.mxu1 %v7223_v20 }
 0x25e   :  { %10573 = vst [vmem:[#allocation84_spill] sm:$0xff] %v7225_v7  ;;  %v5626_v36 = vld [vmem:[#allocation3 + $0x4] sm:$0xf]  ;;  %v5117_v35 = vld [vmem:[#allocation3 + $0x10] sm:$0xf0]  ;;  %1569 = vmatpush.bf16.msrb.mxu2 %v7225_v7  ;;  %v7235_v21 = vor.u32 %v5660_v53, %v5243_v0 }
 0x25f   :  { %10574 = vst [vmem:[#allocation85_spill] sm:$0xff] %v7228_v17  ;;  %v5658_v51 = vld [vmem:[#allocation3 + $0x104] sm:$0xf]  ;;  %v5245_v43 = vld [vmem:[#allocation3 + $0x110] sm:$0xf0]  ;;  %v7237_v29 = vor.u32 %v5626_v36, %v5117_v35  ;;  %1583 = vmatpush.bf16.msrb.mxu3 %v7228_v17 }
 0x260   :  { %v5235_v54 = vld [vmem:[#allocation3 + $0xe8] sm:$0xf]  ;;  %v5657_v58 = vld [vmem:[#allocation3 + $0xf4] sm:$0xf0]  ;;  %10575 = vst [vmem:[#allocation86_spill] sm:$0xff] %v7231_v34  ;;  %v7240_v26 = vor.u32 %v5658_v51, %v5245_v43  ;;  %1542 = vmatpush.bf16.msrb.mxu0 %v7231_v34 }
 0x261   :  { %v5363_v44 = vld [vmem:[#allocation3 + $0x1e8] sm:$0xf]  ;;  %v5689_v24 = vld [vmem:[#allocation3 + $0x1f4] sm:$0xf0]  ;;  %v5655_v2 = vld [vmem:[#allocation3 + $0xec] sm:$0xf]  ;;  %v7242_v62 = vor.u32 %v5657_v58, %v5235_v54  ;;  %1556 = vmatpush.bf16.msra.mxu1 %v7235_v21 }
 0x262   :  { %v5237_v57 = vld [vmem:[#allocation3 + $0xf8] sm:$0xf0]  ;;  %10576 = vst [vmem:[#allocation87_spill] sm:$0xff] %v7235_v21  ;;  %v5687_v18 = vld [vmem:[#allocation3 + $0x1ec] sm:$0xf]  ;;  %v7244_v15 = vor.u32 %v5689_v24, %v5363_v44  ;;  %1570 = vmatpush.bf16.msrb.mxu2 %v7237_v29 }
 0x263   :  { %10577 = vst [vmem:[#allocation88_spill] sm:$0xff] %v7237_v29  ;;  %v5365_v49 = vld [vmem:[#allocation3 + $0x1f8] sm:$0xf0]  ;;  %v7246_v45 = vor.u32 %v5655_v2, %v5237_v57  ;;  %v5219_v39 = vld [vmem:[#allocation3 + $0xc8] sm:$0xf]  ;;  %1584 = vmatpush.bf16.msrb.mxu3 %v7240_v26  ;;  %1543 = vmatmul.bf16.vlgmr.msrb.gmra.mxu0 %v7080_v50 }
 0x264   :  { %10578 = vst [vmem:[#allocation89_spill] sm:$0xff] %v7240_v26  ;;  %v5653_v40 = vld [vmem:[#allocation3 + $0xd4] sm:$0xf0]  ;;  %v5347_v4 = vld [vmem:[#allocation3 + $0x1c8] sm:$0xf]  ;;  %v7249_v0 = vor.u32 %v5687_v18, %v5365_v49  ;;  %1591 = vmatpush.bf16.msra.mxu0 %v7242_v62  ;;  %1557 = vmatmul.bf16.vlgmr.msra.gmra.mxu1 %v10272_v32 }
 0x265   :  { %10579 = vst [vmem:[#allocation90_spill] sm:$0xff] %v7244_v15  ;;  %v5685_v35 = vld [vmem:[#allocation3 + $0x1d4] sm:$0xf0]  ;;  %v5651_v36 = vld [vmem:[#allocation3 + $0xcc] sm:$0xf]  ;;  %v7255_v44 = vor.u32 %v5653_v40, %v5219_v39  ;;  %1605 = vmatpush.bf16.msrb.mxu1 %v7244_v15  ;;  %1571 = vmatmul.bf16.vlgmr.msrb.gmra.mxu2 %v7080_v50 }
 0x266   :  { %10580 = vst [vmem:[#allocation91_spill] sm:$0xff] %v7249_v0  ;;  %v5221_v53 = vld [vmem:[#allocation3 + $0xd8] sm:$0xf0]  ;;  %v5683_v54 = vld [vmem:[#allocation3 + $0x1cc] sm:$0xf]  ;;  %1619 = vmatpush.bf16.msra.mxu2 %v7246_v45  ;;  %v7259_v49 = vor.u32 %v5685_v35, %v5347_v4  ;;  %1585 = vmatmul.bf16.vlgmr.msrb.gmra.mxu3 %v10272_v32 }
 0x267   :  { %v5349_v58 = vld [vmem:[#allocation3 + $0x1d8] sm:$0xf0]  ;;  %v7261_v51 = vor.u32 %v5651_v36, %v5221_v53  ;;  %v5203_v43 = vld [vmem:[#allocation3 + $0xa8] sm:$0xf]  ;;  %v5649_v24 = vld [vmem:[#allocation3 + $0xb4] sm:$0xf0]  ;;  %1633 = vmatpush.bf16.msra.mxu3 %v7249_v0 }
 0x268   :  { %10581 = vst [vmem:[#allocation92_spill] sm:$0xff] %v7259_v49  ;;  %v5331_v2 = vld [vmem:[#allocation3 + $0x1a8] sm:$0xf]  ;;  %v7265_v57 = vor.u32 %v5683_v54, %v5349_v58  ;;  %v5681_v18 = vld [vmem:[#allocation3 + $0x1b4] sm:$0xf0]  ;;  %1592 = vmatpush.bf16.msra.mxu0 %v7255_v44  ;;  %v7271_v36 = vor.u32 %v5649_v24, %v5203_v43 }
 0x269   :  { %v5647_v39 = vld [vmem:[#allocation3 + $0xac] sm:$0xf]  ;;  %v5205_v40 = vld [vmem:[#allocation3 + $0xb8] sm:$0xf0]  ;;  %1606 = vmatpush.bf16.msrb.mxu1 %v7259_v49  ;;  %v7275_v53 = vor.u32 %v5681_v18, %v5331_v2  ;;  %v5187_v58 = vld [vmem:[#allocation3 + $0x88] sm:$0xf] }
 0x26a   :  { %10582 = vst [vmem:[#allocation93_spill] sm:$0xff] %v7265_v57  ;;  %v5679_v4 = vld [vmem:[#allocation3 + $0x1ac] sm:$0xf]  ;;  %v5333_v35 = vld [vmem:[#allocation3 + $0x1b8] sm:$0xf0]  ;;  %1620 = vmatpush.bf16.msra.mxu2 %v7261_v51  ;;  %v7277_v54 = vor.u32 %v5647_v39, %v5205_v40 }
 0x26b   :  { %10583 = vst [vmem:[#allocation94_spill] sm:$0xff] %v7275_v53  ;;  %v5645_v37 = vld [vmem:[#allocation3 + $0x94] sm:$0xf0]  ;;  %v5315_v19 = vld [vmem:[#allocation3 + $0x188] sm:$0xf]  ;;  %1634 = vmatpush.bf16.msra.mxu3 %v7265_v57  ;;  %v7280_v25 = vor.u32 %v5679_v4, %v5333_v35 }
 0x26c   :  { %10584 = vst [vmem:[#allocation95_spill] sm:$0xff] %v7277_v54  ;;  %v5677_v52 = vld [vmem:[#allocation3 + $0x194] sm:$0xf0]  ;;  %v5643_v27 = vld [vmem:[#allocation3 + $0x8c] sm:$0xf]  ;;  %1593 = vmatpush.bf16.msra.mxu0 %v7271_v36  ;;  %v7283_v41 = vor.u32 %v5645_v37, %v5187_v58 }
 0x26d   :  { %10585 = vst [vmem:[#allocation96_spill] sm:$0xff] %v7280_v25  ;;  %v5189_v32 = vld [vmem:[#allocation3 + $0x98] sm:$0xf0]  ;;  %v5675_v43 = vld [vmem:[#allocation3 + $0x18c] sm:$0xf]  ;;  %1607 = vmatpush.bf16.msrb.mxu1 %v7275_v53  ;;  %v7287_v2 = vor.u32 %v5677_v52, %v5315_v19 }
 0x26e   :  { %v5317_v24 = vld [vmem:[#allocation3 + $0x198] sm:$0xf0]  ;;  %10586 = vst [vmem:[#allocation97_spill] sm:$0xff] %v7283_v41  ;;  %1621 = vmatpush.bf16.msra.mxu2 %v7277_v54  ;;  %v7289_v18 = vor.u32 %v5643_v27, %v5189_v32  ;;  %v5171_v39 = vld [vmem:[#allocation3 + $0x68] sm:$0xf] }
 0x26f   :  { %10587 = vst [vmem:[#allocation98_spill] sm:$0xff] %v7287_v2  ;;  %v5641_v40 = vld [vmem:[#allocation3 + $0x74] sm:$0xf0]  ;;  %v5299_v4 = vld [vmem:[#allocation3 + $0x168] sm:$0xf]  ;;  %1635 = vmatpush.bf16.msra.mxu3 %v7280_v25  ;;  %v7292_v35 = vor.u32 %v5675_v43, %v5317_v24 }
 0x270   :  { %10588 = vst [vmem:[#allocation99_spill] sm:$0xff] %v7289_v18  ;;  %v5673_v13 = vld [vmem:[#allocation3 + $0x174] sm:$0xf0]  ;;  %v5639_v23 = vld [vmem:[#allocation3 + $0x6c] sm:$0xf]  ;;  %1594 = vmatpush.bf16.msra.mxu0 %v7283_v41  ;;  %v7295_v53 = vor.u32 %v5641_v40, %v5171_v39 }
 0x271   :  { %10589 = vst [vmem:[#allocation100_spill] sm:$0xff] %v7292_v35  ;;  %v5173_v57 = vld [vmem:[#allocation3 + $0x78] sm:$0xf0]  ;;  %v5671_v37 = vld [vmem:[#allocation3 + $0x16c] sm:$0xf]  ;;  %1608 = vmatpush.bf16.msrb.mxu1 %v7287_v2  ;;  %v7299_v19 = vor.u32 %v5673_v13, %v5299_v4 }
 0x272   :  { %v5301_v58 = vld [vmem:[#allocation3 + $0x178] sm:$0xf0]  ;;  %10590 = vst [vmem:[#allocation101_spill] sm:$0xff] %v7295_v53  ;;  %1622 = vmatpush.bf16.msra.mxu2 %v7289_v18  ;;  %v7301_v27 = vor.u32 %v5639_v23, %v5173_v57  ;;  %v5155_v32 = vld [vmem:[#allocation3 + $0x48] sm:$0xf] }
 0x273   :  { %10591 = vst [vmem:[#allocation102_spill] sm:$0xff] %v7299_v19  ;;  %v5637_v52 = vld [vmem:[#allocation3 + $0x54] sm:$0xf0]  ;;  %v5283_v43 = vld [vmem:[#allocation3 + $0x148] sm:$0xf]  ;;  %1636 = vmatpush.bf16.msra.mxu3 %v7292_v35  ;;  %v7304_v24 = vor.u32 %v5671_v37, %v5301_v58 }
 0x274   :  { %10592 = vst [vmem:[#allocation103_spill] sm:$0xff] %v7301_v27  ;;  %v5669_v25 = vld [vmem:[#allocation3 + $0x154] sm:$0xf0]  ;;  %v5635_v54 = vld [vmem:[#allocation3 + $0x4c] sm:$0xf]  ;;  %1595 = vmatpush.bf16.msra.mxu0 %v7295_v53  ;;  %v7307_v2 = vor.u32 %v5637_v52, %v5155_v32 }
 0x275   :  { %10593 = vst [vmem:[#allocation104_spill] sm:$0xff] %v7304_v24  ;;  %v5157_v41 = vld [vmem:[#allocation3 + $0x58] sm:$0xf0]  ;;  %v5667_v39 = vld [vmem:[#allocation3 + $0x14c] sm:$0xf]  ;;  %1609 = vmatpush.bf16.msrb.mxu1 %v7299_v19  ;;  %v7311_v23 = vor.u32 %v5669_v25, %v5283_v43 }
 0x276   :  { %v5285_v40 = vld [vmem:[#allocation3 + $0x158] sm:$0xf0]  ;;  %10594 = vst [vmem:[#allocation105_spill] sm:$0xff] %v7307_v2  ;;  %1623 = vmatpush.bf16.msra.mxu2 %v7301_v27  ;;  %v7313_v13 = vor.u32 %v5635_v54, %v5157_v41  ;;  %v5139_v57 = vld [vmem:[#allocation3 + $0x28] sm:$0xf] }
 0x277   :  { %10595 = vst [vmem:[#allocation106_spill] sm:$0xff] %v7311_v23  ;;  %v5633_v4 = vld [vmem:[#allocation3 + $0x34] sm:$0xf0]  ;;  %v5267_v37 = vld [vmem:[#allocation3 + $0x128] sm:$0xf]  ;;  %1637 = vmatpush.bf16.msra.mxu3 %v7304_v24  ;;  %v7316_v58 = vor.u32 %v5667_v39, %v5285_v40 }
 0x278   :  { %10596 = vst [vmem:[#allocation107_spill] sm:$0xff] %v7313_v13  ;;  %v5665_v35 = vld [vmem:[#allocation3 + $0x134] sm:$0xf0]  ;;  %v5631_v18 = vld [vmem:[#allocation3 + $0x2c] sm:$0xf]  ;;  %1596 = vmatpush.bf16.msra.mxu0 %v7307_v2  ;;  %v7319_v19 = vor.u32 %v5633_v4, %v5139_v57 }
 0x279   :  { %10597 = vst [vmem:[#allocation108_spill] sm:$0xff] %v7316_v58  ;;  %v5141_v53 = vld [vmem:[#allocation3 + $0x38] sm:$0xf0]  ;;  %v5663_v32 = vld [vmem:[#allocation3 + $0x12c] sm:$0xf]  ;;  %1610 = vmatpush.bf16.msrb.mxu1 %v7311_v23  ;;  %v7323_v41 = vor.u32 %v5665_v35, %v5267_v37 }
 0x27a   :  { %v5269_v52 = vld [vmem:[#allocation3 + $0x138] sm:$0xf0]  ;;  %10598 = vst [vmem:[#allocation109_spill] sm:$0xff] %v7319_v19  ;;  %v5123_v25 = vld [vmem:[#allocation3 + $0x8] sm:$0xf]  ;;  %1624 = vmatpush.bf16.msra.mxu2 %v7313_v13  ;;  %v7325_v54 = vor.u32 %v5631_v18, %v5141_v53 }
 0x27b   :  { %10599 = vst [vmem:[#allocation110_spill] sm:$0xff] %v7323_v41  ;;  %v5629_v43 = vld [vmem:[#allocation3 + $0x14] sm:$0xf0]  ;;  %v5251_v39 = vld [vmem:[#allocation3 + $0x108] sm:$0xf]  ;;  %1638 = vmatpush.bf16.msra.mxu3 %v7316_v58  ;;  %v7328_v24 = vor.u32 %v5663_v32, %v5269_v52 }
 0x27c   :  { %10600 = vst [vmem:[#allocation111_spill] sm:$0xff] %v7325_v54  ;;  %v5661_v40 = vld [vmem:[#allocation3 + $0x114] sm:$0xf0]  ;;  %v5627_v27 = vld [vmem:[#allocation3 + $0xc] sm:$0xf]  ;;  %1597 = vmatpush.bf16.msra.mxu0 %v7319_v19  ;;  %v7337_v18 = vor.u32 %v5629_v43, %v5123_v25 }
 0x27d   :  { %10601 = vst [vmem:[#allocation112_spill] sm:$0xff] %v7328_v24  ;;  %v5125_v2 = vld [vmem:[#allocation3 + $0x18] sm:$0xf0]  ;;  %v5659_v57 = vld [vmem:[#allocation3 + $0x10c] sm:$0xf]  ;;  %1611 = vmatpush.bf16.msrb.mxu1 %v7323_v41  ;;  %v7347_v32 = vor.u32 %v5661_v40, %v5251_v39 }
 0x27e   :  { %v5253_v4 = vld [vmem:[#allocation3 + $0x118] sm:$0xf0]  ;;  %v5489_v23 = vld [vmem:[%s10263_s2 + $0xe0] sm:$0xf]  ;;  %v5720_v53 = vld [vmem:[%s10263_s2 + $0xec] sm:$0xf0]  ;;  %1625 = vmatpush.bf16.msra.mxu2 %v7325_v54  ;;  %v7349_v52 = vor.u32 %v5627_v27, %v5125_v2 }
 0x27f   :  { %10602 = vst [vmem:[#allocation113_spill] sm:$0xff] %v7337_v18  ;;  %v5718_v35 = vld [vmem:[%s10263_s2 + $0xe4] sm:$0xf]  ;;  %v5491_v37 = vld [vmem:[%s10263_s2 + $0xf0] sm:$0xf0]  ;;  %1639 = vmatpush.bf16.msra.mxu3 %v7328_v24  ;;  %v7352_v25 = vor.u32 %v5659_v57, %v5253_v4  ;;  %v7354_v43 = vor.u32 %v5720_v53, %v5489_v23 }
 0x280   :  { %10603 = vst [vmem:[#allocation114_spill] sm:$0xff] %v7347_v32  ;;  %v5473_v58 = vld [vmem:[%s10263_s2 + $0xc0] sm:$0xf]  ;;  %v5497_v41 = vld [vmem:[%s10263_s2 + $0xe8] sm:$0xf]  ;;  %v7365_v2 = vor.u32 %v5718_v35, %v5491_v37  ;;  %1598 = vmatpush.bf16.msra.mxu0 %v7337_v18 }
 0x281   :  { %10604 = vst [vmem:[#allocation115_spill] sm:$0xff] %v7349_v52  ;;  %v5721_v39 = vld [vmem:[%s10263_s2 + $0xf4] sm:$0xf0]  ;;  %v5716_v27 = vld [vmem:[%s10263_s2 + $0xcc] sm:$0xf0]  ;;  %1612 = vmatpush.bf16.msrb.mxu1 %v7347_v32 }
 0x282   :  { %10605 = vst [vmem:[#allocation116_spill] sm:$0xff] %v7352_v25  ;;  %v5719_v23 = vld [vmem:[%s10263_s2 + $0xec] sm:$0xf]  ;;  %v5499_v40 = vld [vmem:[%s10263_s2 + $0xf8] sm:$0xf0]  ;;  %1626 = vmatpush.bf16.msra.mxu2 %v7349_v52  ;;  %v7385_v53 = vor.u32 %v5721_v39, %v5497_v41  ;;  %v7389_v35 = vor.u32 %v5716_v27, %v5473_v58 }
 0x283   :  { %10606 = vst [vmem:[#allocation117_spill] sm:$0xff] %v7354_v43  ;;  %v5714_v57 = vld [vmem:[%s10263_s2 + $0xc4] sm:$0xf]  ;;  %v5475_v4 = vld [vmem:[%s10263_s2 + $0xd0] sm:$0xf0]  ;;  %1640 = vmatpush.bf16.msra.mxu3 %v7352_v25  ;;  %v7391_v37 = vor.u32 %v5719_v23, %v5499_v40  ;;  %1599 = vmatmul.bf16.vlgmr.msra.gmra.mxu0 %v7080_v50  ;;  %v10612_v40 = vmov 0.0|0.0  }
 0x284   :  { %10607 = vst [vmem:[#allocation118_spill] sm:$0xff] %v7365_v2  ;;  %1974 = vmatpush.bf16.msrb.mxu0 %v7354_v43  ;;  %v5457_v24 = vld [vmem:[%s10263_s2 + $0xa0] sm:$0xf]  ;;  %v5481_v32 = vld [vmem:[%s10263_s2 + $0xc8] sm:$0xf]  ;;  %v7404_v58 = vor.u32 %v5714_v57, %v5475_v4  ;;  %1613 = vmatmul.bf16.vlgmr.msrb.gmra.mxu1 %v10612_v40 }
 0x285   :  { %10608 = vst [vmem:[#allocation119_spill] sm:$0xff] %v7385_v53  ;;  %v5717_v41 = vld [vmem:[%s10263_s2 + $0xd4] sm:$0xf0]  ;;  %1988 = vmatpush.bf16.msra.mxu1 %v7365_v2  ;;  %v5712_v39 = vld [vmem:[%s10263_s2 + $0xac] sm:$0xf0]  ;;  %1627 = vmatmul.bf16.vlgmr.msra.gmra.mxu2 %v7080_v50 }
 0x286   :  { %10609 = vst [vmem:[#allocation120_spill] sm:$0xff] %v7389_v35  ;;  %v5715_v27 = vld [vmem:[%s10263_s2 + $0xcc] sm:$0xf]  ;;  %v5483_v23 = vld [vmem:[%s10263_s2 + $0xd8] sm:$0xf0]  ;;  %1641 = vmatmul.bf16.vlgmr.msra.gmra.mxu3 %v10612_v40  ;;  %2002 = vmatpush.bf16.msrb.mxu2 %v7385_v53  ;;  %v7425_v2 = vor.u32 %v5717_v41, %v5481_v32  ;;  %v7429_v50 = vor.u32 %v5712_v39, %v5457_v24 }
 0x287   :  { %10610 = vst [vmem:[#allocation121_spill] sm:$0xff] %v7391_v37  ;;  %v5710_v57 = vld [vmem:[%s10263_s2 + $0xa4] sm:$0xf]  ;;  %v5459_v4 = vld [vmem:[%s10263_s2 + $0xb0] sm:$0xf0]  ;;  %2016 = vmatpush.bf16.msrb.mxu3 %v7391_v37  ;;  %v7431_v25 = vor.u32 %v5715_v27, %v5483_v23 }
 0x288   :  { %10611 = vst [vmem:[#allocation122_spill] sm:$0xff] %v7404_v58  ;;  %1975 = vmatpush.bf16.msrb.mxu0 %v7389_v35  ;;  %v5441_v52 = vld [vmem:[%s10263_s2 + $0x80] sm:$0xf]  ;;  %v5465_v40 = vld [vmem:[%s10263_s2 + $0xa8] sm:$0xf]  ;;  %v7443_v41 = vor.u32 %v5710_v57, %v5459_v4 }
 0x289   :  { %10613 = vst [vmem:[#allocation123_spill] sm:$0xff] %v7425_v2  ;;  %v5713_v32 = vld [vmem:[%s10263_s2 + $0xb4] sm:$0xf0]  ;;  %1989 = vmatpush.bf16.msra.mxu1 %v7404_v58  ;;  %v5708_v24 = vld [vmem:[%s10263_s2 + $0x8c] sm:$0xf0] }
 0x28a   :  { %10614 = vst [vmem:[#allocation124_spill] sm:$0xff] %v7429_v50  ;;  %v5711_v39 = vld [vmem:[%s10263_s2 + $0xac] sm:$0xf]  ;;  %v5467_v27 = vld [vmem:[%s10263_s2 + $0xb8] sm:$0xf0]  ;;  %2003 = vmatpush.bf16.msrb.mxu2 %v7425_v2  ;;  %v7461_v4 = vor.u32 %v5713_v32, %v5465_v40  ;;  %v7465_v58 = vor.u32 %v5708_v24, %v5441_v52 }
 0x28b   :  { %10615 = vst [vmem:[#allocation125_spill] sm:$0xff] %v7431_v25  ;;  %v5706_v23 = vld [vmem:[%s10263_s2 + $0x84] sm:$0xf]  ;;  %v5443_v57 = vld [vmem:[%s10263_s2 + $0x90] sm:$0xf0]  ;;  %2017 = vmatpush.bf16.msrb.mxu3 %v7431_v25  ;;  %v7467_v37 = vor.u32 %v5711_v39, %v5467_v27 }
 0x28c   :  { %10616 = vst [vmem:[#allocation126_spill] sm:$0xff] %v7443_v41  ;;  %1976 = vmatpush.bf16.msrb.mxu0 %v7429_v50  ;;  %v5425_v53 = vld [vmem:[%s10263_s2 + $0x60] sm:$0xf]  ;;  %v5449_v35 = vld [vmem:[%s10263_s2 + $0x88] sm:$0xf]  ;;  %v7479_v32 = vor.u32 %v5706_v23, %v5443_v57 }
 0x28d   :  { %10617 = vst [vmem:[#allocation127_spill] sm:$0xff] %v7461_v4  ;;  %v5709_v40 = vld [vmem:[%s10263_s2 + $0x94] sm:$0xf0]  ;;  %1990 = vmatpush.bf16.msra.mxu1 %v7443_v41  ;;  %v5704_v52 = vld [vmem:[%s10263_s2 + $0x6c] sm:$0xf0] }
 0x28e   :  { %10618 = vst [vmem:[#allocation128_spill] sm:$0xff] %v7465_v58  ;;  %v5707_v24 = vld [vmem:[%s10263_s2 + $0x8c] sm:$0xf]  ;;  %v5451_v39 = vld [vmem:[%s10263_s2 + $0x98] sm:$0xf0]  ;;  %2004 = vmatpush.bf16.msrb.mxu2 %v7461_v4  ;;  %v7497_v57 = vor.u32 %v5709_v40, %v5449_v35  ;;  %v7501_v41 = vor.u32 %v5704_v52, %v5425_v53 }
 0x28f   :  { %10619 = vst [vmem:[#allocation129_spill] sm:$0xff] %v7467_v37  ;;  %v5702_v27 = vld [vmem:[%s10263_s2 + $0x64] sm:$0xf]  ;;  %v5427_v23 = vld [vmem:[%s10263_s2 + $0x70] sm:$0xf0]  ;;  %2018 = vmatpush.bf16.msrb.mxu3 %v7467_v37  ;;  %v7503_v25 = vor.u32 %v5707_v24, %v5451_v39 }
 0x290   :  { %10620 = vst [vmem:[#allocation130_spill] sm:$0xff] %v7479_v32  ;;  %1977 = vmatpush.bf16.msrb.mxu0 %v7465_v58  ;;  %v5409_v2 = vld [vmem:[%s10263_s2 + $0x40] sm:$0xf]  ;;  %v5433_v50 = vld [vmem:[%s10263_s2 + $0x68] sm:$0xf]  ;;  %v7515_v40 = vor.u32 %v5702_v27, %v5427_v23 }
 0x291   :  { %10621 = vst [vmem:[#allocation131_spill] sm:$0xff] %v7497_v57  ;;  %v5705_v35 = vld [vmem:[%s10263_s2 + $0x74] sm:$0xf0]  ;;  %1991 = vmatpush.bf16.msra.mxu1 %v7479_v32  ;;  %v5700_v53 = vld [vmem:[%s10263_s2 + $0x4c] sm:$0xf0] }
 0x292   :  { %10622 = vst [vmem:[#allocation132_spill] sm:$0xff] %v7501_v41  ;;  %v5703_v52 = vld [vmem:[%s10263_s2 + $0x6c] sm:$0xf]  ;;  %v5435_v24 = vld [vmem:[%s10263_s2 + $0x78] sm:$0xf0]  ;;  %2005 = vmatpush.bf16.msrb.mxu2 %v7497_v57  ;;  %v7533_v23 = vor.u32 %v5705_v35, %v5433_v50  ;;  %v7537_v32 = vor.u32 %v5700_v53, %v5409_v2 }
 0x293   :  { %10623 = vst [vmem:[#allocation133_spill] sm:$0xff] %v7503_v25  ;;  %v5698_v39 = vld [vmem:[%s10263_s2 + $0x44] sm:$0xf]  ;;  %v5411_v27 = vld [vmem:[%s10263_s2 + $0x50] sm:$0xf0]  ;;  %2019 = vmatpush.bf16.msrb.mxu3 %v7503_v25  ;;  %v7539_v37 = vor.u32 %v5703_v52, %v5435_v24 }
 0x294   :  { %10624 = vst [vmem:[#allocation134_spill] sm:$0xff] %v7515_v40  ;;  %1978 = vmatpush.bf16.msrb.mxu0 %v7501_v41  ;;  %v5393_v4 = vld [vmem:[%s10263_s2 + $0x20] sm:$0xf]  ;;  %v5417_v58 = vld [vmem:[%s10263_s2 + $0x48] sm:$0xf]  ;;  %v7551_v35 = vor.u32 %v5698_v39, %v5411_v27 }
 0x295   :  { %10625 = vst [vmem:[#allocation135_spill] sm:$0xff] %v7533_v23  ;;  %v5701_v50 = vld [vmem:[%s10263_s2 + $0x54] sm:$0xf0]  ;;  %1992 = vmatpush.bf16.msra.mxu1 %v7515_v40  ;;  %v5696_v2 = vld [vmem:[%s10263_s2 + $0x2c] sm:$0xf0] }
 0x296   :  { %10626 = vst [vmem:[#allocation136_spill] sm:$0xff] %v7537_v32  ;;  %v5699_v53 = vld [vmem:[%s10263_s2 + $0x4c] sm:$0xf]  ;;  %v5419_v52 = vld [vmem:[%s10263_s2 + $0x58] sm:$0xf0]  ;;  %2006 = vmatpush.bf16.msrb.mxu2 %v7533_v23  ;;  %v7569_v27 = vor.u32 %v5701_v50, %v5417_v58  ;;  %v7573_v40 = vor.u32 %v5696_v2, %v5393_v4 }
 0x297   :  { %10627 = vst [vmem:[#allocation137_spill] sm:$0xff] %v7539_v37  ;;  %v5694_v24 = vld [vmem:[%s10263_s2 + $0x24] sm:$0xf]  ;;  %v5395_v39 = vld [vmem:[%s10263_s2 + $0x30] sm:$0xf0]  ;;  %2020 = vmatpush.bf16.msrb.mxu3 %v7539_v37  ;;  %v7575_v25 = vor.u32 %v5699_v53, %v5419_v52 }
 0x298   :  { %10628 = vst [vmem:[#allocation138_spill] sm:$0xff] %v7551_v35  ;;  %1979 = vmatpush.bf16.msrb.mxu0 %v7537_v32  ;;  %v5377_v57 = vld [vmem:[%s10263_s2] sm:$0xf]  ;;  %v5401_v41 = vld [vmem:[%s10263_s2 + $0x28] sm:$0xf]  ;;  %v7587_v50 = vor.u32 %v5694_v24, %v5395_v39 }
 0x299   :  { %10629 = vst [vmem:[#allocation139_spill] sm:$0xff] %v7569_v27  ;;  %v5697_v58 = vld [vmem:[%s10263_s2 + $0x34] sm:$0xf0]  ;;  %1993 = vmatpush.bf16.msra.mxu1 %v7551_v35  ;;  %v5692_v4 = vld [vmem:[%s10263_s2 + $0xc] sm:$0xf0] }
 0x29a   :  { %10630 = vst [vmem:[#allocation140_spill] sm:$0xff] %v7573_v40  ;;  %v5695_v2 = vld [vmem:[%s10263_s2 + $0x2c] sm:$0xf]  ;;  %v5403_v53 = vld [vmem:[%s10263_s2 + $0x38] sm:$0xf0]  ;;  %2007 = vmatpush.bf16.msrb.mxu2 %v7569_v27  ;;  %v7605_v39 = vor.u32 %v5697_v58, %v5401_v41  ;;  %v7609_v35 = vor.u32 %v5692_v4, %v5377_v57  ;;  %v7630_v4 = vpack.c.bf16 %v7148_v30, %v7143_v59  ;;  %v10635_v30 = vld [vmem:[#allocation93_spill] sm:$0xff] }
 0x29b   :  { %v5690_v52 = vld [vmem:[%s10263_s2 + $0x4] sm:$0xf]  ;;  %v5379_v24 = vld [vmem:[%s10263_s2 + $0x10] sm:$0xf0]  ;;  %2021 = vmatpush.bf16.msrb.mxu3 %v7575_v25  ;;  %v7611_v37 = vor.u32 %v5695_v2, %v5403_v53  ;;  %v5385_v23 = vld [vmem:[%s10263_s2 + $0x8] sm:$0xf] }
 0x29c   :  { %10631 = vst [vmem:[#allocation141_spill] sm:$0xff] %v7605_v39  ;;  %1980 = vmatpush.bf16.msrb.mxu0 %v7573_v40  ;;  %v5693_v32 = vld [vmem:[%s10263_s2 + $0x14] sm:$0xf0]  ;;  %v7620_v41 = vor.u32 %v5690_v52, %v5379_v24  ;;  %v5691_v58 = vld [vmem:[%s10263_s2 + $0xc] sm:$0xf] }
 0x29d   :  { %10632 = vst [vmem:[#allocation142_spill] sm:$0xff] %v7609_v35  ;;  %1994 = vmatpush.bf16.msra.mxu1 %v7587_v50  ;;  %v5387_v57 = vld [vmem:[%s10263_s2 + $0x18] sm:$0xf0]  ;;  %v7633_v2 = vor.u32 %v5693_v32, %v5385_v23  ;;  %v10636_v32 = vld [vmem:[#allocation95_spill] sm:$0xff]  ;;  %v10637_v23 = vld [vmem:[#allocation97_spill] sm:$0xff] }
 0x29e   :  { %2008 = vmatpush.bf16.msrb.mxu2 %v7605_v39  ;;  %v7637_v53 = vor.u32 %v5691_v58, %v5387_v57  ;;  %v10634_v59 = vld [vmem:[#allocation94_spill] sm:$0xff]  ;;  %v10639_v24 = vld [vmem:[#allocation96_spill] sm:$0xff]  ;;  %v10640_v58 = vld [vmem:[#allocation99_spill] sm:$0xff] }
 0x29f   :  { %10633 = vst [vmem:[#allocation143_spill] sm:$0xff] %v7633_v2  ;;  %2022 = vmatpush.bf16.msrb.mxu3 %v7611_v37  ;;  %v10638_v52 = vld [vmem:[#allocation98_spill] sm:$0xff]  ;;  %v10641_v57 = vld [vmem:[#allocation101_spill] sm:$0xff] }
 0x2a0   :  { %1981 = vmatpush.bf16.msrb.mxu0 %v7609_v35 }
 0x2a1   :  { %1995 = vmatpush.bf16.msra.mxu1 %v7620_v41 }
 0x2a2   :  { %2009 = vmatpush.bf16.msrb.mxu2 %v7633_v2 }
 0x2a3   :  { %1982 = vmatmul.bf16.vlgmr.msrb.gmra.mxu0 %v7630_v4  ;;  %2023 = vmatpush.bf16.msrb.mxu3 %v7637_v53 }
 0x2a4   :  { %2165 = vmatpush.bf16.msra.mxu0 %v7150_v14  ;;  %1996 = vmatmul.bf16.vlgmr.msra.gmra.mxu1 %v7630_v4 }
 0x2a5   :  { %2179 = vmatpush.bf16.msrb.mxu1 %v7152_v42  ;;  %2010 = vmatmul.bf16.vlgmr.msrb.gmra.mxu2 %v7630_v4 }
 0x2a6   :  { %2193 = vmatpush.bf16.msra.mxu2 %v7154_v9  ;;  %2024 = vmatmul.bf16.vlgmr.msrb.gmra.mxu3 %v7630_v4 }
 0x2a7   :  { %2207 = vmatpush.bf16.msra.mxu3 %v7157_v6 }
 0x2a8   :  { %2166 = vmatpush.bf16.msra.mxu0 %v7161_v3 }
 0x2a9   :  { %2180 = vmatpush.bf16.msrb.mxu1 %v7163_v31 }
 0x2aa   :  { %2194 = vmatpush.bf16.msra.mxu2 %v7166_v38 }
 0x2ab   :  { %2208 = vmatpush.bf16.msra.mxu3 %v7168_v10 }
 0x2ac   :  { %2167 = vmatpush.bf16.msra.mxu0 %v7171_v47 }
 0x2ad   :  { %2181 = vmatpush.bf16.msrb.mxu1 %v7175_v56 }
 0x2ae   :  { %2195 = vmatpush.bf16.msra.mxu2 %v7177_v8 }
 0x2af   :  { %2209 = vmatpush.bf16.msra.mxu3 %v7180_v48 }
 0x2b0   :  { %2168 = vmatpush.bf16.msra.mxu0 %v7183_v60 }
 0x2b1   :  { %2182 = vmatpush.bf16.msrb.mxu1 %v7187_v28 }
 0x2b2   :  { %2196 = vmatpush.bf16.msra.mxu2 %v7189_v61 }
 0x2b3   :  { %2210 = vmatpush.bf16.msra.mxu3 %v7192_v22 }
 0x2b4   :  { %2169 = vmatpush.bf16.msra.mxu0 %v7195_v55 }
 0x2b5   :  { %2183 = vmatpush.bf16.msrb.mxu1 %v7199_v1 }
 0x2b6   :  { %2197 = vmatpush.bf16.msra.mxu2 %v7201_v46 }
 0x2b7   :  { %2211 = vmatpush.bf16.msra.mxu3 %v7204_v33 }
 0x2b8   :  { %2170 = vmatpush.bf16.msra.mxu0 %v7207_v12 }
 0x2b9   :  { %2184 = vmatpush.bf16.msrb.mxu1 %v7211_v16 }
 0x2ba   :  { %2198 = vmatpush.bf16.msra.mxu2 %v7213_v5 }
 0x2bb   :  { %2212 = vmatpush.bf16.msra.mxu3 %v7216_v11 }
 0x2bc   :  { %2171 = vmatpush.bf16.msra.mxu0 %v7219_v63 }
 0x2bd   :  { %2185 = vmatpush.bf16.msrb.mxu1 %v7223_v20 }
 0x2be   :  { %2199 = vmatpush.bf16.msra.mxu2 %v7225_v7 }
 0x2bf   :  { %2213 = vmatpush.bf16.msra.mxu3 %v7228_v17 }
 0x2c0   :  { %2172 = vmatpush.bf16.msra.mxu0 %v7231_v34 }
 0x2c1   :  { %2186 = vmatpush.bf16.msrb.mxu1 %v7235_v21  ;;  %v10654_v21 = vld [vmem:[#allocation119_spill] sm:$0xff] }
 0x2c2   :  { %2200 = vmatpush.bf16.msra.mxu2 %v7237_v29 }
 0x2c3   :  { %2173 = vmatmul.bf16.vlgmr.msra.gmra.mxu0 %v7630_v4  ;;  %2214 = vmatpush.bf16.msra.mxu3 %v7240_v26  ;;  %v10647_v26 = vld [vmem:[#allocation104_spill] sm:$0xff] }
 0x2c4   :  { %2221 = vmatpush.bf16.msrb.mxu0 %v7242_v62 }
 0x2c5   :  { %2235 = vmatpush.bf16.msra.mxu1 %v7244_v15  ;;  %2201 = vmatmul.bf16.vlgmr.msra.gmra.mxu2 %v7630_v4  ;;  %v10644_v15 = vld [vmem:[#allocation103_spill] sm:$0xff] }
 0x2c6   :  { %2249 = vmatpush.bf16.msrb.mxu2 %v7246_v45 }
 0x2c7   :  { %2263 = vmatpush.bf16.msrb.mxu3 %v7249_v0  ;;  %v10643_v0 = vld [vmem:[#allocation100_spill] sm:$0xff] }
 0x2c8   :  { %2222 = vmatpush.bf16.msrb.mxu0 %v7255_v44 }
 0x2c9   :  { %2236 = vmatpush.bf16.msra.mxu1 %v7259_v49  ;;  %v10642_v49 = vld [vmem:[#allocation102_spill] sm:$0xff] }
 0x2ca   :  { %2250 = vmatpush.bf16.msrb.mxu2 %v7261_v51 }
 0x2cb   :  { %2264 = vmatpush.bf16.msrb.mxu3 %v10635_v30  ;;  %v10646_v30 = vld [vmem:[#allocation106_spill] sm:$0xff] }
 0x2cc   :  { %2223 = vmatpush.bf16.msrb.mxu0 %v7271_v36 }
 0x2cd   :  { %2237 = vmatpush.bf16.msra.mxu1 %v10634_v59  ;;  %v10645_v59 = vld [vmem:[#allocation105_spill] sm:$0xff] }
 0x2ce   :  { %2251 = vmatpush.bf16.msrb.mxu2 %v10636_v32 }
 0x2cf   :  { %2265 = vmatpush.bf16.msrb.mxu3 %v10639_v24  ;;  %v10649_v24 = vld [vmem:[#allocation108_spill] sm:$0xff] }
 0x2d0   :  { %2224 = vmatpush.bf16.msrb.mxu0 %v10637_v23 }
 0x2d1   :  { %2238 = vmatpush.bf16.msra.mxu1 %v10638_v52  ;;  %v10648_v52 = vld [vmem:[#allocation110_spill] sm:$0xff] }
 0x2d2   :  { %2252 = vmatpush.bf16.msrb.mxu2 %v10640_v58 }
 0x2d3   :  { %2266 = vmatpush.bf16.msrb.mxu3 %v10643_v0  ;;  %v10651_v0 = vld [vmem:[#allocation112_spill] sm:$0xff] }
 0x2d4   :  { %2225 = vmatpush.bf16.msrb.mxu0 %v10641_v57 }
 0x2d5   :  { %2239 = vmatpush.bf16.msra.mxu1 %v10642_v49  ;;  %v10650_v49 = vld [vmem:[#allocation114_spill] sm:$0xff] }
 0x2d6   :  { %2253 = vmatpush.bf16.msrb.mxu2 %v10644_v15 }
 0x2d7   :  { %2267 = vmatpush.bf16.msrb.mxu3 %v10647_v26  ;;  %v10653_v26 = vld [vmem:[#allocation120_spill] sm:$0xff] }
 0x2d8   :  { %2226 = vmatpush.bf16.msrb.mxu0 %v10645_v59 }
 0x2d9   :  { %2240 = vmatpush.bf16.msra.mxu1 %v10646_v30  ;;  %v10652_v30 = vld [vmem:[#allocation115_spill] sm:$0xff] }
 0x2da   :  { %2254 = vmatpush.bf16.msrb.mxu2 %v7313_v13 }
 0x2db   :  { %2268 = vmatpush.bf16.msrb.mxu3 %v10649_v24  ;;  %v10656_v24 = vld [vmem:[#allocation124_spill] sm:$0xff] }
 0x2dc   :  { %2227 = vmatpush.bf16.msrb.mxu0 %v7319_v19  ;;  %v10660_v19 = vld [vmem:[#allocation128_spill] sm:$0xff] }
 0x2dd   :  { %2241 = vmatpush.bf16.msra.mxu1 %v10648_v52  ;;  %v10655_v52 = vld [vmem:[#allocation116_spill] sm:$0xff] }
 0x2de   :  { %2255 = vmatpush.bf16.msrb.mxu2 %v7325_v54 }
 0x2df   :  { %2269 = vmatpush.bf16.msrb.mxu3 %v10651_v0 }
 0x2e0   :  { %2228 = vmatpush.bf16.msrb.mxu0 %v7337_v18  ;;  %v10657_v18 = vld [vmem:[#allocation123_spill] sm:$0xff]  ;;  %v1544_v0 = vpop.f32.mrf.mxu0 }
 0x2e1   :  { %2242 = vmatpush.bf16.msra.mxu1 %v10650_v49  ;;  %v10658_v49 = vld [vmem:[#allocation7_spill] sm:$0xff]  ;;  %v1558_v54 = vpop.f32.mrf.mxu1 }
 0x2e2   :  { %2256 = vmatpush.bf16.msrb.mxu2 %v10652_v30  ;;  %v10661_v30 = vld [vmem:[#allocation127_spill] sm:$0xff] }
 0x2e3   :  { %2229 = vmatmul.bf16.vlgmr.msrb.gmra.mxu0 %v7630_v4  ;;  %2270 = vmatpush.bf16.msrb.mxu3 %v10655_v52 }
 0x2e4   :  { %2412 = vmatpush.bf16.msra.mxu0 %v7354_v43  ;;  %v7720_v43 = vperm.slane %v10658_v49, 0 }
 0x2e5   :  { %2257 = vmatmul.bf16.vlgmr.msrb.gmra.mxu2 %v7630_v4  ;;  %v10663_v4 = vld [vmem:[#allocation132_spill] sm:$0xff] }
 0x2e6   :  { %2440 = vmatpush.bf16.msra.mxu2 %v10654_v21  ;;  %10659 = vst [vmem:[#allocation95_spill] sm:$0xff] %v7720_v43  ;;  %v7726_v21 = vperm.slane %v10658_v49, 1 }
 0x2e8   :  { %2413 = vmatpush.bf16.msra.mxu0 %v10653_v26  ;;  %v1545_v26 = vadd.f32 %v1544_v0, %v7720_v43  ;;  %10662 = vst [vmem:[#allocation7_spill] sm:$0xff] %v7726_v21  ;;  %v1572_v52 = vpop.f32.mrf.mxu2  ;;  %v1546_v13 = vpop.f32.mrf.mxu0  ;;  %v10666_v0 = vld [vmem:[#allocation135_spill] sm:$0xff] }
 0x2e9   :  { %v1573_v17 = vadd.f32 %v1572_v52, %v7726_v21  ;;  %v1586_v20 = vpop.f32.mrf.mxu3  ;;  %v1560_v11 = vpop.f32.mrf.mxu1 }
 0x2ea   :  { %2441 = vmatpush.bf16.msra.mxu2 %v10657_v18  ;;  %v1559_v18 = vadd.f32 %v1558_v54, %v1545_v26 }
 0x2eb   :  { %v1587_v59 = vadd.f32 %v1586_v20, %v1573_v17 }
 0x2ec   :  { %2414 = vmatpush.bf16.msra.mxu0 %v10656_v24  ;;  %v10664_v24 = vld [vmem:[#allocation131_spill] sm:$0xff]  ;;  %v5369_v16 = vmul.f32 -1.442695, %v1559_v18 }
 0x2ed   :  { %v5371_v57 = vmul.f32 -1.442695, %v1587_v59 }
 0x2ee   :  { %2442 = vmatpush.bf16.msra.mxu2 %v10661_v30  ;;  %v10665_v30 = vld [vmem:[#allocation136_spill] sm:$0xff]  ;;  %5790 = vpow2.f32 %v5369_v16 }
 0x2ef   :  { %5792 = vpow2.f32 %v5371_v57 }
 0x2f0   :  { %2415 = vmatpush.bf16.msra.mxu0 %v10660_v19  ;;  %v1547_v19 = vadd.f32 %v1546_v13, %v7720_v43  ;;  %v1574_v33 = vpop.f32.mrf.mxu2 }
 0x2f1   :  { %v1575_v54 = vadd.f32 %v1574_v33, %v7726_v21  ;;  %v1588_v17 = vpop.f32.mrf.mxu3  ;;  %v7774_v21 = vperm.slane %v10658_v49, 2 }
 0x2f2   :  { %2443 = vmatpush.bf16.msra.mxu2 %v10664_v24  ;;  %v1561_v15 = vadd.f32 %v1560_v11, %v1547_v19 }
 0x2f3   :  { %v1589_v20 = vadd.f32 %v1588_v17, %v1575_v54  ;;  %10668 = vst [vmem:[#allocation145_spill] sm:$0xff] %v7774_v21 }
 0x2f4   :  { %2416 = vmatpush.bf16.msra.mxu0 %v10663_v4  ;;  %v5370_v26 = vmul.f32 -1.442695, %v1561_v15  ;;  %v5791_v11 = vpop.eup %5790 }
 0x2f5   :  { %v5372_v13 = vmul.f32 -1.442695, %v1589_v20  ;;  %v5793_v33 = vpop.eup %5792  ;;  %v7743_v16 = vadd.f32 1.0, %v5791_v11 }
 0x2f6   :  { %2444 = vmatpush.bf16.msra.mxu2 %v10666_v0  ;;  %5794 = vpow2.f32 %v5370_v26  ;;  %v7745_v18 = vadd.f32 1.0, %v5793_v33  ;;  %v7760_v26 = vperm.slane %v10658_v49, 3 }
 0x2f7   :  { %5796 = vpow2.f32 %v5372_v13  ;;  %vm1660_vm1 = vweird.f32 %v7743_v16 }
 0x2f8   :  { %2417 = vmatpush.bf16.msra.mxu0 %v10665_v30  ;;  %5798 = vrcp.f32 %v7743_v16  ;;  %10667 = vst [vmem:[#allocation144_spill] sm:$0xff] %v7760_v26  ;;  %vm1698_vm2 = vweird.f32 %v7745_v18 }
 0x2f9   :  { %5800 = vrcp.f32 %v7745_v18 }
 0x2fa   :  { %2445 = vmatpush.bf16.msra.mxu2 %v7569_v27 }
 0x2fc   :  { %2418 = vmatpush.bf16.msra.mxu0 %v7573_v40  ;;  %v5795_v15 = vpop.eup %5794 }
 0x2fd   :  { %v5797_v19 = vpop.eup %5796  ;;  %v7750_v59 = vadd.f32 1.0, %v5795_v15 }
 0x2fe   :  { %2446 = vmatpush.bf16.msra.mxu2 %v7605_v39  ;;  %v7752_v52 = vadd.f32 1.0, %v5797_v19  ;;  %v7762_v54 = vpop.eup %5798 }
 0x2ff   :  { %5802 = vrcp.f32 %v7750_v59  ;;  %v7766_v13 = vpop.eup %5800  ;;  %v1656_v11 = vmul.f32 %v7762_v54, %v7743_v16  ;;  %vm1661_vm3 = vweird.f32 %v7762_v54  ;;  %vm1675_vm7 = vweird.f32 %v7750_v59 }
 0x300   :  { %2419 = vmatpush.bf16.msra.mxu0 %v7609_v35  ;;  %v1600_v57 = vpop.f32.mrf.mxu0  ;;  %5804 = vrcp.f32 %v7752_v52  ;;  %vm1699_vm4 = vweird.f32 %v7766_v13  ;;  %vm7809_vm5 = vmor %vm1660_vm1, %vm1661_vm3  ;;  %vm1713_vm12 = vweird.f32 %v7752_v52 }
 0x301   :  { %v1614_v17 = vpop.f32.mrf.mxu1  ;;  %v1601_v49 = vadd.f32 %v1600_v57, %v7774_v21  ;;  %vm7827_vm9 = vmor %vm1698_vm2, %vm1699_vm4 }
 0x302   :  { %2447 = vmatpush.bf16.msra.mxu2 %v7633_v2 }
 0x304   :  { %2603 = vmatpush.bf16.msrb.mxu0 %v7150_v14 }
 0x305   :  { %v7771_v19 = vpop.eup %5802 }
 0x306   :  { %2631 = vmatpush.bf16.msrb.mxu2 %v7154_v9  ;;  %v7776_v43 = vpop.eup %5804  ;;  %v1615_v9 = vadd.f32 %v1614_v17, %v1601_v49  ;;  %vm1676_vm8 = vweird.f32 %v7771_v19 }
 0x307   :  { %vm1714_vm10 = vweird.f32 %v7776_v43  ;;  %vm7840_vm11 = vmor %vm1675_vm7, %vm1676_vm8 }
 0x308   :  { %2604 = vmatpush.bf16.msrb.mxu0 %v7161_v3  ;;  %v1628_v20 = vpop.f32.mrf.mxu2  ;;  %vm7851_vm14 = vmor %vm1713_vm12, %vm1714_vm10 }
 0x309   :  { %v1629_v33 = vadd.f32 %v1628_v20, %v7760_v26  ;;  %v1642_v15 = vpop.f32.mrf.mxu3  ;;  %v1671_v20 = vmul.f32 %v7771_v19, %v7750_v59  ;;  %v1616_v14 = vpop.f32.mrf.mxu1 }
 0x30a   :  { %2632 = vmatpush.bf16.msrb.mxu2 %v7166_v38  ;;  %v1602_v38 = vpop.f32.mrf.mxu0 }
 0x30c   :  { %2605 = vmatpush.bf16.msrb.mxu0 %v7171_v47  ;;  %v1709_v47 = vmul.f32 %v7776_v43, %v7752_v52 }
 0x30e   :  { %2633 = vmatpush.bf16.msrb.mxu2 %v7177_v8  ;;  %v1710_v3 = vsub.f32 1.0, %v1709_v47 }
 0x310   :  { %2606 = vmatpush.bf16.msrb.mxu0 %v7183_v60  ;;  %v1657_v60 = vsub.f32 1.0, %v1656_v11 }
 0x311   :  { %v1644_v2 = vpop.f32.mrf.mxu3 }
 0x312   :  { %2634 = vmatpush.bf16.msrb.mxu2 %v7189_v61  ;;  %v1643_v61 = vadd.f32 %v1642_v15, %v1629_v33  ;;  %v1630_v15 = vpop.f32.mrf.mxu2 }
 0x313   :  { %v1631_v11 = vadd.f32 %v1630_v15, %v7760_v26  ;;  %v1704_v15 = vand.u32 2147483648, %v7745_v18 }
 0x314   :  { %2607 = vmatpush.bf16.msrb.mxu0 %v7195_v55  ;;  %v1694_v55 = vmul.f32 %v7766_v13, %v7745_v18  ;;  %v5373_v8 = vmul.f32 -1.442695, %v1643_v61  ;;  %v1603_v61 = vadd.f32 %v1602_v38, %v7774_v21  ;;  %v1666_v38 = vand.u32 2147483648, %v7743_v16 }
 0x315   :  { %v1645_v57 = vadd.f32 %v1644_v2, %v1631_v11  ;;  %v1711_v2 = vmul.f32 %v7776_v43, %v1710_v3 }
 0x316   :  { %2635 = vmatpush.bf16.msrb.mxu2 %v7201_v46  ;;  %5806 = vpow2.f32 %v5373_v8  ;;  %v1695_v33 = vsub.f32 1.0, %v1694_v55  ;;  %v1672_v46 = vsub.f32 1.0, %v1671_v20  ;;  %v1664_v8 = vand.u32 2147483647, %v7743_v16 }
 0x317   :  { %v1617_v17 = vadd.f32 %v1616_v14, %v1603_v61  ;;  %v5374_v20 = vmul.f32 -1.442695, %v1645_v57  ;;  %5808 = vtanh.f32 %v1615_v9  ;;  %v1702_v14 = vand.u32 2147483647, %v7745_v18 }
 0x318   :  { %2608 = vmatpush.bf16.msrb.mxu0 %v7207_v12  ;;  %v1658_v12 = vmul.f32 %v7762_v54, %v1657_v60  ;;  %v1696_v60 = vmul.f32 %v7766_v13, %v1695_v33  ;;  %v1673_v33 = vmul.f32 %v7771_v19, %v1672_v46  ;;  %vm7813_vm6 = vcmp.eq.f32.partialorder %v1664_v8, 8.507059e+37 }
 0x319   :  { %5810 = vpow2.f32 %v5374_v20  ;;  %v1667_v3 = vor.u32 1.1754944e-38, %v1666_v38  ;;  %v1679_v16 = vand.u32 2147483647, %v7750_v59  ;;  %v1681_v61 = vand.u32 2147483648, %v7750_v59 }
 0x31a   :  { %2636 = vmatpush.bf16.msrb.mxu2 %v7213_v5  ;;  %v1659_v55 = vadd.f32 %v7762_v54, %v1658_v12  ;;  %v1697_v9 = vadd.f32 %v7766_v13, %v1696_v60  ;;  %v1674_v57 = vadd.f32 %v7771_v19, %v1673_v33  ;;  %v1712_v60 = vadd.f32 %v7776_v43, %v1711_v2 }
 0x31b   :  { %v1705_v18 = vor.u32 1.1754944e-38, %v1704_v15  ;;  %v1719_v38 = vand.u32 2147483648, %v7752_v52  ;;  %vm1703_vm13 = vcmp.eq.f32.partialorder %v1702_v14, 8.507059e+37  ;;  %v1682_v2 = vor.u32 1.1754944e-38, %v1681_v61 }
 0x31c   :  { %2609 = vmatpush.bf16.msrb.mxu0 %v7219_v63  ;;  %v5807_v47 = vpop.eup %5806  ;;  %v1663_v8 = vsel %vm7809_vm5, %v7762_v54, %v1659_v55  ;;  %v1701_v59 = vsel %vm7827_vm9, %v7766_v13, %v1697_v9  ;;  %v1717_v54 = vand.u32 2147483647, %v7752_v52  ;;  %v1678_v11 = vsel %vm7840_vm11, %v7771_v19, %v1674_v57 }
 0x31d   :  { %v7803_v49 = vadd.f32 1.0, %v5807_v47  ;;  %v5809_v20 = vpop.eup %5808  ;;  %vm1680_vm15 = vcmp.eq.f32.partialorder %v1679_v16, 8.507059e+37  ;;  %v1716_v52 = vsel %vm7851_vm14, %v7776_v43, %v1712_v60  ;;  %v1720_v14 = vor.u32 1.1754944e-38, %v1719_v38  ;;  %v10680_v43 = vld [vmem:[#allocation17_spill] sm:$0xff] }
 0x31e   :  { %2637 = vmatpush.bf16.msrb.mxu2 %v7225_v7  ;;  %v1706_v9 = vsel %vm1703_vm13, %v1705_v18, %v1701_v59  ;;  %vm1718_vm0 = vcmp.eq.f32.partialorder %v1717_v54, 8.507059e+37  ;;  %v1683_v47 = vsel %vm1680_vm15, %v1682_v2, %v1678_v11  ;;  %v10683_v11 = vld [vmem:[#allocation13_spill] sm:$0xff] }
 0x31f   :  { %5812 = vrcp.f32 %v7803_v49  ;;  %v5811_v55 = vpop.eup %5810  ;;  %v1721_v33 = vsel %vm1718_vm0, %v1720_v14, %v1716_v52  ;;  %vm1738_vm2 = vweird.f32 %v7803_v49 }
 0x320   :  { %2610 = vmatpush.bf16.msrb.mxu0 %v7231_v34  ;;  %5814 = vtanh.f32 %v1617_v17  ;;  %v1668_v17 = vsel %vm7813_vm6, %v1667_v3, %v1663_v8  ;;  %v7863_v13 = vadd.f32 1.0, %v5811_v55  ;;  %v1983_v46 = vpop.f32.mrf.mxu0  ;;  %v10679_v8 = vld [vmem:[#allocation10_spill] sm:$0xff]  ;;  %v1763_v55 = vmul.f32 0.0, %v1706_v9 }
 0x321   :  { %v1765_v61 = vmul.f32 %v5809_v20, %v1668_v17  ;;  %v2030_v19 = vadd.f32 %v1983_v46, %v10679_v8  ;;  %v1997_v16 = vpop.f32.mrf.mxu1  ;;  %v1764_v20 = vmul.f32 0.0, %v1721_v33  ;;  %v10684_v46 = vld [vmem:[#allocation21_spill] sm:$0xff]  ;;  %v1742_v33 = vand.u32 2147483647, %v7803_v49 }
 0x322   :  { %2638 = vmatpush.bf16.msrb.mxu2 %v7237_v29  ;;  %5816 = vrcp.f32 %v7863_v13  ;;  %v2031_v60 = vadd.f32 %v1997_v16, %v10680_v43  ;;  %vm1753_vm6 = vweird.f32 %v7863_v13 }
 0x323   :  { %v5503_v38 = vmul.f32 -1.442695, %v2030_v19  ;;  %v7870_v59 = vadd.f32 %v1765_v61, %v1763_v55  ;;  %vm1743_vm5 = vcmp.eq.f32.partialorder %v1742_v33, 8.507059e+37 }
 0x324   :  { %v5505_v18 = vmul.f32 -1.442695, %v2031_v60 }
 0x325   :  { %v7855_v15 = vpop.eup %5812  ;;  %10681 = vst [vmem:[#allocation10_spill] sm:$0xff] %v7870_v59  ;;  %5818 = vpow2.f32 %v5503_v38 }
 0x326   :  { %v5815_v12 = vpop.eup %5814  ;;  %v1734_v3 = vmul.f32 %v7855_v15, %v7803_v49  ;;  %5820 = vpow2.f32 %v5505_v18  ;;  %vm1739_vm1 = vweird.f32 %v7855_v15 }
 0x327   :  { %v1766_v21 = vmul.f32 %v5815_v12, %v1683_v47  ;;  %5822 = vtanh.f32 %v7870_v59  ;;  %vm7890_vm3 = vmor %vm1738_vm2, %vm1739_vm1 }
 0x328   :  { %v1735_v57 = vsub.f32 1.0, %v1734_v3  ;;  %v5817_v54 = vpop.eup %5816  ;;  %v1985_v2 = vpop.f32.mrf.mxu0 }
 0x329   :  { %v7873_v17 = vadd.f32 %v1766_v21, %v1764_v20  ;;  %v1749_v3 = vmul.f32 %v5817_v54, %v7863_v13  ;;  %v2034_v52 = vadd.f32 %v1985_v2, %v10683_v11  ;;  %v1999_v12 = vpop.f32.mrf.mxu1  ;;  %v2025_v8 = vpop.f32.mrf.mxu3  ;;  %v1744_v21 = vand.u32 2147483648, %v7803_v49 }
 0x32a   :  { %v1736_v26 = vmul.f32 %v7855_v15, %v1735_v57  ;;  %v2035_v61 = vadd.f32 %v1999_v12, %v10684_v46  ;;  %v10685_v57 = vld [vmem:[#allocation12_spill] sm:$0xff]  ;;  %v2011_v55 = vpop.f32.mrf.mxu2  ;;  %v1759_v20 = vand.u32 2147483648, %v7863_v13  ;;  %vm1754_vm4 = vweird.f32 %v5817_v54 }
 0x32b   :  { %10682 = vst [vmem:[#allocation17_spill] sm:$0xff] %v7873_v17  ;;  %v1750_v9 = vsub.f32 1.0, %v1749_v3  ;;  %v5819_v19 = vpop.eup %5818  ;;  %5824 = vtanh.f32 %v7873_v17  ;;  %v5504_v16 = vmul.f32 -1.442695, %v2034_v52  ;;  %v2033_v47 = vadd.f32 %v2025_v8, %v10685_v57  ;;  %vm1755_vm7 = vmor %vm1753_vm6, %vm1754_vm4  ;;  %v10689_v57 = vld [vmem:[#allocation15_spill] sm:$0xff] }
 0x32c   :  { %v1737_v14 = vadd.f32 %v7855_v15, %v1736_v26  ;;  %v5821_v43 = vpop.eup %5820  ;;  %v7886_v26 = vadd.f32 1.0, %v5819_v19  ;;  %v5506_v60 = vmul.f32 -1.442695, %v2035_v61  ;;  %v1745_v11 = vor.u32 1.1754944e-38, %v1744_v21 }
 0x32d   :  { %v1751_v18 = vmul.f32 %v5817_v54, %v1750_v9  ;;  %v7895_v3 = vadd.f32 1.0, %v5821_v43  ;;  %5826 = vpow2.f32 %v5504_v16  ;;  %v5507_v2 = vmul.f32 -1.442695, %v2033_v47  ;;  %v5823_v12 = vpop.eup %5822  ;;  %v10688_v9 = vld [vmem:[#allocation11_spill] sm:$0xff] }
 0x32e   :  { %v1741_v49 = vsel %vm7890_vm3, %v7855_v15, %v1737_v14  ;;  %5828 = vrcp.f32 %v7886_v26  ;;  %v1757_v52 = vand.u32 2147483647, %v7863_v13  ;;  %v2032_v46 = vadd.f32 %v2011_v55, %v10688_v9 }
 0x32f   :  { %5830 = vrcp.f32 %v7895_v3  ;;  %v1746_v61 = vsel %vm1743_vm5, %v1745_v11, %v1741_v49  ;;  %v1752_v8 = vadd.f32 %v5817_v54, %v1751_v18  ;;  %v1760_v15 = vor.u32 1.1754944e-38, %v1759_v20 }
 0x330   :  { %5832 = vpow2.f32 %v5506_v60  ;;  %vm1758_vm8 = vcmp.eq.f32.partialorder %v1757_v52, 8.507059e+37  ;;  %v1771_v38 = vmul.f32 %v5823_v12, %v1746_v61  ;;  %vm2051_vm9 = vweird.f32 %v7886_v26 }
 0x331   :  { %v5825_v19 = vpop.eup %5824  ;;  %5834 = vpow2.f32 %v5507_v2  ;;  %v2027_v14 = vpop.f32.mrf.mxu3  ;;  %v1756_v21 = vsel %vm1755_vm7, %v5817_v54, %v1752_v8  ;;  %v2055_v13 = vand.u32 2147483647, %v7886_v26  ;;  %vm2089_vm10 = vweird.f32 %v7895_v3 }
 0x332   :  { %v2037_v47 = vadd.f32 %v2027_v14, %v10689_v57  ;;  %5836 = vtanh.f32 %v2032_v46  ;;  %v1761_v43 = vsel %vm1758_vm8, %v1760_v15, %v1756_v21  ;;  %v2057_v2 = vand.u32 2147483648, %v7886_v26  ;;  %v2013_v9 = vpop.f32.mrf.mxu2  ;;  %v10690_v57 = vld [vmem:[#allocation118_spill] sm:$0xff] }
 0x333   :  { %v5827_v16 = vpop.eup %5826  ;;  %v1772_v60 = vmul.f32 %v5825_v19, %v1761_v43  ;;  %v2095_v52 = vand.u32 2147483648, %v7895_v3  ;;  %v2093_v14 = vand.u32 2147483647, %v7895_v3  ;;  %v10692_v43 = vld [vmem:[#allocation14_spill] sm:$0xff]  ;;  %vm2056_vm14 = vcmp.eq.f32.partialorder %v2055_v13, 8.507059e+37  ;;  %v10698_v13 = vld [vmem:[#allocation125_spill] sm:$0xff] }
 0x334   :  { %v5829_v55 = vpop.eup %5828  ;;  %v7906_v33 = vadd.f32 1.0, %v5827_v16  ;;  %v5508_v54 = vmul.f32 -1.442695, %v2037_v47  ;;  %v10691_v47 = vld [vmem:[#allocation121_spill] sm:$0xff] }
 0x335   :  { %v5831_v18 = vpop.eup %5830  ;;  %v2047_v20 = vmul.f32 %v5829_v55, %v7886_v26  ;;  %v7916_v12 = vpack.c.bf16 %v1772_v60, %v1771_v38  ;;  %vm2052_vm11 = vweird.f32 %v5829_v55  ;;  %v2036_v38 = vadd.f32 %v2013_v9, %v10692_v43 }
 0x336   :  { %v5833_v49 = vpop.eup %5832  ;;  %v2085_v11 = vmul.f32 %v5831_v18, %v7895_v3  ;;  %5838 = vrcp.f32 %v7906_v33  ;;  %vm2090_vm12 = vweird.f32 %v5831_v18  ;;  %vm7933_vm13 = vmor %vm2051_vm9, %vm2052_vm11  ;;  %vm2094_vm0 = vcmp.eq.f32.partialorder %v2093_v14, 8.507059e+37 }
 0x337   :  { %v5835_v46 = vpop.eup %5834  ;;  %v2048_v61 = vsub.f32 1.0, %v2047_v20  ;;  %v7918_v8 = vadd.f32 1.0, %v5833_v49  ;;  %5840 = vpow2.f32 %v5508_v54  ;;  %2187 = vmatmul.bf16.vlgmr.msrb.gmra.mxu1 %v7916_v12  ;;  %2215 = vmatmul.bf16.vlgmr.msra.gmra.mxu3 %v7916_v12  ;;  %v2058_v54 = vor.u32 1.1754944e-38, %v2057_v2  ;;  %vm7940_vm15 = vmor %vm2089_vm10, %vm2090_vm12  ;;  %v10697_v2 = vld [vmem:[#allocation122_spill] sm:$0xff] }
 0x338   :  { %v2086_v19 = vsub.f32 1.0, %v2085_v11  ;;  %v7920_v15 = vadd.f32 1.0, %v5835_v46  ;;  %v5837_v21 = vpop.eup %5836  ;;  %2426 = vmatpush.bf16.msrb.mxu1 %v10690_v57  ;;  %2454 = vmatpush.bf16.msra.mxu3 %v10691_v47  ;;  %v2096_v49 = vor.u32 1.1754944e-38, %v2095_v52  ;;  %vm2066_vm1 = vweird.f32 %v7906_v33  ;;  %v10699_v46 = vld [vmem:[#allocation126_spill] sm:$0xff] }
 0x339   :  { %5842 = vrcp.f32 %v7918_v8  ;;  %v2049_v16 = vmul.f32 %v5829_v55, %v2048_v61  ;;  %v2070_v57 = vand.u32 2147483647, %v7906_v33  ;;  %vm2104_vm2 = vweird.f32 %v7918_v8 }
 0x33a   :  { %v2087_v60 = vmul.f32 %v5831_v18, %v2086_v19  ;;  %5844 = vrcp.f32 %v7920_v15  ;;  %vm2129_vm7 = vweird.f32 %v7920_v15 }
 0x33b   :  { %v2050_v11 = vadd.f32 %v5829_v55, %v2049_v16  ;;  %5846 = vtanh.f32 %v2036_v38  ;;  %vm2071_vm6 = vcmp.eq.f32.partialorder %v2070_v57, 8.507059e+37 }
 0x33c   :  { %v5839_v9 = vpop.eup %5838  ;;  %v2088_v61 = vadd.f32 %v5831_v18, %v2087_v60  ;;  %2427 = vmatpush.bf16.msrb.mxu1 %v10697_v2  ;;  %2455 = vmatpush.bf16.msra.mxu3 %v10698_v13 }
 0x33d   :  { %v5841_v19 = vpop.eup %5840  ;;  %v2062_v26 = vmul.f32 %v5839_v9, %v7906_v33  ;;  %v2054_v43 = vsel %vm7933_vm13, %v5829_v55, %v2050_v11  ;;  %v2072_v55 = vand.u32 2147483648, %v7906_v33  ;;  %vm2067_vm3 = vweird.f32 %v5839_v9  ;;  %v10706_v33 = vld [vmem:[#allocation130_spill] sm:$0xff] }
 0x33e   :  { %v7949_v52 = vadd.f32 1.0, %v5841_v19  ;;  %v2059_v3 = vsel %vm2056_vm14, %v2058_v54, %v2054_v43  ;;  %v2092_v16 = vsel %vm7940_vm15, %v5831_v18, %v2088_v61  ;;  %v2110_v18 = vand.u32 2147483648, %v7918_v8  ;;  %v10700_v61 = vld [vmem:[#allocation129_spill] sm:$0xff]  ;;  %vm7970_vm5 = vmor %vm2066_vm1, %vm2067_vm3 }
 0x33f   :  { %v5843_v14 = vpop.eup %5842  ;;  %v2063_v60 = vsub.f32 1.0, %v2062_v26  ;;  %v2097_v47 = vsel %vm2094_vm0, %v2096_v49, %v2092_v16  ;;  %v2156_v11 = vmul.f32 %v5837_v21, %v2059_v3  ;;  %v2108_v49 = vand.u32 2147483647, %v7918_v8  ;;  %v10701_v26 = vld [vmem:[#allocation56_spill] sm:$0xff] }
 0x340   :  { %v7956_v20 = vpop.eup %5844  ;;  %v2100_v38 = vmul.f32 %v5843_v14, %v7918_v8  ;;  %5848 = vrcp.f32 %v7949_v52  ;;  %2428 = vmatpush.bf16.msrb.mxu1 %v10699_v46  ;;  %2456 = vmatpush.bf16.msra.mxu3 %v10700_v61  ;;  %v2154_v43 = vmul.f32 %v2097_v47, %v10701_v26  ;;  %vm2105_vm4 = vweird.f32 %v5843_v14 }
 0x341   :  { %v2125_v54 = vmul.f32 %v7956_v20, %v7920_v15  ;;  %v2064_v16 = vmul.f32 %v5839_v9, %v2063_v60  ;;  %v5847_v13 = vpop.eup %5846  ;;  %v2073_v21 = vor.u32 1.1754944e-38, %v2072_v55  ;;  %v2111_v46 = vor.u32 1.1754944e-38, %v2110_v18  ;;  %vm7978_vm8 = vmor %vm2104_vm2, %vm2105_vm4  ;;  %v10707_v60 = vld [vmem:[#allocation133_spill] sm:$0xff] }
 0x342   :  { %v2101_v19 = vsub.f32 1.0, %v2100_v38  ;;  %v7984_v55 = vadd.f32 %v2156_v11, %v2154_v43  ;;  %vm2109_vm9 = vcmp.eq.f32.partialorder %v2108_v49, 8.507059e+37  ;;  %vm2130_vm10 = vweird.f32 %v7956_v20  ;;  %v10708_v49 = vld [vmem:[#allocation134_spill] sm:$0xff]  ;;  %v10709_v43 = vld [vmem:[#allocation137_spill] sm:$0xff] }
 0x343   :  { %v2126_v2 = vsub.f32 1.0, %v2125_v54  ;;  %v2065_v59 = vadd.f32 %v5839_v9, %v2064_v16  ;;  %v2133_v8 = vand.u32 2147483647, %v7920_v15  ;;  %vm2144_vm11 = vweird.f32 %v7949_v52  ;;  %vm8004_vm13 = vmor %vm2129_vm7, %vm2130_vm10 }
 0x344   :  { %v2102_v3 = vmul.f32 %v5843_v14, %v2101_v19  ;;  %2429 = vmatpush.bf16.msrb.mxu1 %v10706_v33  ;;  %2457 = vmatpush.bf16.msra.mxu3 %v10707_v60  ;;  %v2135_v19 = vand.u32 2147483648, %v7920_v15  ;;  %5850 = vtanh.f32 %v7984_v55 }
 0x345   :  { %v2127_v61 = vmul.f32 %v7956_v20, %v2126_v2  ;;  %v2069_v57 = vsel %vm7970_vm5, %v5839_v9, %v2065_v59  ;;  %vm2134_vm15 = vcmp.eq.f32.partialorder %v2133_v8, 8.507059e+37 }
 0x346   :  { %v5849_v38 = vpop.eup %5848  ;;  %v2103_v18 = vadd.f32 %v5843_v14, %v2102_v3  ;;  %v2074_v54 = vsel %vm2071_vm6, %v2073_v21, %v2069_v57  ;;  %v2136_v21 = vor.u32 1.1754944e-38, %v2135_v19  ;;  %v10726_v3 = vld [vmem:[#allocation111_spill] sm:$0xff] }
 0x347   :  { %v2140_v2 = vmul.f32 %v5849_v38, %v7949_v52  ;;  %v2157_v26 = vmul.f32 %v5847_v13, %v2074_v54  ;;  %2243 = vmatmul.bf16.vlgmr.msra.gmra.mxu1 %v7916_v12  ;;  %2271 = vmatmul.bf16.vlgmr.msrb.gmra.mxu3 %v7916_v12  ;;  %v2128_v59 = vadd.f32 %v7956_v20, %v2127_v61  ;;  %vm2145_vm12 = vweird.f32 %v5849_v38  ;;  %v10712_v12 = vld [vmem:[#allocation57_spill] sm:$0xff] }
 0x348   :  { %v2107_v11 = vsel %vm7978_vm8, %v5843_v14, %v2103_v18  ;;  %2430 = vmatpush.bf16.msrb.mxu1 %v10708_v49  ;;  %2458 = vmatpush.bf16.msra.mxu3 %v10709_v43  ;;  %v2150_v13 = vand.u32 2147483648, %v7949_v52  ;;  %vm8014_vm14 = vmor %vm2144_vm11, %vm2145_vm12  ;;  %v10715_v18 = vld [vmem:[#allocation138_spill] sm:$0xff]  ;;  %v10719_v14 = vld [vmem:[#allocation79_spill] sm:$0xff] }
 0x349   :  { %v2141_v17 = vsub.f32 1.0, %v2140_v2  ;;  %v2112_v9 = vsel %vm2109_vm9, %v2111_v46, %v2107_v11  ;;  %v2148_v46 = vand.u32 2147483647, %v7949_v52  ;;  %v2132_v47 = vsel %vm8004_vm13, %v7956_v20, %v2128_v59  ;;  %v10716_v59 = vld [vmem:[#allocation77_spill] sm:$0xff] }
 0x34a   :  { %v2155_v61 = vmul.f32 %v2112_v9, %v10712_v12  ;;  %v2151_v2 = vor.u32 1.1754944e-38, %v2150_v13  ;;  %v5851_v54 = vpop.eup %5850  ;;  %v2137_v19 = vsel %vm2134_vm15, %v2136_v21, %v2132_v47  ;;  %v10718_v9 = vld [vmem:[#allocation103_spill] sm:$0xff]  ;;  %v10720_v13 = vld [vmem:[#allocation81_spill] sm:$0xff] }
 0x34b   :  { %v2142_v16 = vmul.f32 %v5849_v38, %v2141_v17  ;;  %vm2149_vm0 = vcmp.eq.f32.partialorder %v2148_v46, 8.507059e+37  ;;  %v2162_v8 = vmul.f32 %v5851_v54, %v2137_v19  ;;  %v10717_v17 = vld [vmem:[#allocation101_spill] sm:$0xff]  ;;  %v10727_v47 = vld [vmem:[#allocation87_spill] sm:$0xff] }
 0x34c   :  { %v8018_v15 = vadd.f32 %v2157_v26, %v2155_v61  ;;  %2431 = vmatpush.bf16.msrb.mxu1 %v10715_v18  ;;  %2459 = vmatpush.bf16.msra.mxu3 %v7575_v25  ;;  %v10721_v12 = vld [vmem:[#allocation105_spill] sm:$0xff]  ;;  %v10722_v61 = vld [vmem:[#allocation107_spill] sm:$0xff] }
 0x34d   :  { %v2143_v57 = vadd.f32 %v5849_v38, %v2142_v16  ;;  %v10723_v16 = vld [vmem:[#allocation83_spill] sm:$0xff]  ;;  %v10724_v46 = vld [vmem:[#allocation85_spill] sm:$0xff] }
 0x34e   :  { %5852 = vtanh.f32 %v8018_v15  ;;  %v10725_v21 = vld [vmem:[#allocation109_spill] sm:$0xff]  ;;  %v10732_v19 = vld [vmem:[#allocation115_spill] sm:$0xff] }
 0x34f   :  { %v2147_v52 = vsel %vm8014_vm14, %v5849_v38, %v2143_v57  ;;  %v10728_v57 = vld [vmem:[#allocation89_spill] sm:$0xff] }
 0x350   :  { %2432 = vmatpush.bf16.msrb.mxu1 %v7587_v50  ;;  %2460 = vmatpush.bf16.msra.mxu3 %v7611_v37  ;;  %v2152_v20 = vsel %vm2149_vm0, %v2151_v2, %v2147_v52  ;;  %v10729_v2 = vld [vmem:[#allocation90_spill] sm:$0xff]  ;;  %v10730_v52 = vld [vmem:[#allocation91_spill] sm:$0xff]  ;;  %v10731_v54 = vld [vmem:[#allocation113_spill] sm:$0xff] }
 0x354   :  { %v5853_v11 = vpop.eup %5852  ;;  %2433 = vmatpush.bf16.msrb.mxu1 %v7620_v41  ;;  %2461 = vmatpush.bf16.msra.mxu3 %v7637_v53 }
 0x355   :  { %v2163_v26 = vmul.f32 %v5853_v11, %v2152_v20  ;;  %v10733_v20 = vld [vmem:[#allocation117_spill] sm:$0xff]  ;;  %v10735_v11 = vld [vmem:[#allocation92_spill] sm:$0xff] }
 0x357   :  { %v2411_v38 = vpack.c.bf16 %v2163_v26, %v2162_v8  ;;  %v10734_v8 = vld [vmem:[#allocation119_spill] sm:$0xff]  ;;  %v10736_v26 = vld [vmem:[#allocation93_spill] sm:$0xff] }
 0x358   :  { %2617 = vmatpush.bf16.msra.mxu1 %v7152_v42  ;;  %2645 = vmatpush.bf16.msrb.mxu3 %v7157_v6 }
 0x359   :  { %2420 = vmatmul.bf16.vlgmr.msra.gmra.mxu0 %v2411_v38  ;;  %2434 = vmatmul.bf16.vlgmr.msrb.gmra.mxu1 %v2411_v38 }
 0x35a   :  { %2462 = vmatmul.bf16.vlgmr.msra.gmra.mxu3 %v2411_v38  ;;  %2448 = vmatmul.bf16.vlgmr.msra.gmra.mxu2 %v2411_v38 }
 0x35b   :  { %2659 = vmatpush.bf16.msra.mxu0 %v7242_v62  ;;  %2687 = vmatpush.bf16.msra.mxu2 %v7246_v45 }
 0x35c   :  { %2618 = vmatpush.bf16.msra.mxu1 %v7163_v31  ;;  %2646 = vmatpush.bf16.msrb.mxu3 %v7168_v10 }
 0x35f   :  { %2660 = vmatpush.bf16.msra.mxu0 %v7255_v44  ;;  %2688 = vmatpush.bf16.msra.mxu2 %v7261_v51 }
 0x360   :  { %2619 = vmatpush.bf16.msra.mxu1 %v7175_v56  ;;  %2647 = vmatpush.bf16.msrb.mxu3 %v7180_v48 }
 0x363   :  { %2661 = vmatpush.bf16.msra.mxu0 %v7271_v36  ;;  %2689 = vmatpush.bf16.msra.mxu2 %v10636_v32 }
 0x364   :  { %2620 = vmatpush.bf16.msra.mxu1 %v7187_v28  ;;  %2648 = vmatpush.bf16.msrb.mxu3 %v7192_v22 }
 0x367   :  { %2662 = vmatpush.bf16.msra.mxu0 %v10637_v23  ;;  %2690 = vmatpush.bf16.msra.mxu2 %v10640_v58 }
 0x368   :  { %2621 = vmatpush.bf16.msra.mxu1 %v7199_v1  ;;  %2649 = vmatpush.bf16.msrb.mxu3 %v10716_v59 }
 0x369   :  { %2611 = vmatmul.bf16.vlgmr.msrb.gmra.mxu0 %v2411_v38 }
 0x36a   :  { %2639 = vmatmul.bf16.vlgmr.msrb.gmra.mxu2 %v2411_v38 }
 0x36b   :  { %2663 = vmatpush.bf16.msra.mxu0 %v10717_v17  ;;  %2691 = vmatpush.bf16.msra.mxu2 %v10718_v9 }
 0x36c   :  { %2622 = vmatpush.bf16.msra.mxu1 %v10719_v14  ;;  %2650 = vmatpush.bf16.msrb.mxu3 %v10720_v13  ;;  %v10743_v13 = vld [vmem:[#allocation98_spill] sm:$0xff]  ;;  %v10744_v14 = vld [vmem:[#allocation100_spill] sm:$0xff] }
 0x36f   :  { %2664 = vmatpush.bf16.msra.mxu0 %v10721_v12  ;;  %2692 = vmatpush.bf16.msra.mxu2 %v10722_v61 }
 0x370   :  { %2623 = vmatpush.bf16.msra.mxu1 %v10723_v16  ;;  %2651 = vmatpush.bf16.msrb.mxu3 %v10724_v46  ;;  %v10741_v46 = vld [vmem:[#allocation124_spill] sm:$0xff]  ;;  %v10742_v16 = vld [vmem:[#allocation127_spill] sm:$0xff] }
 0x373   :  { %2665 = vmatpush.bf16.msra.mxu0 %v10725_v21  ;;  %2693 = vmatpush.bf16.msra.mxu2 %v10726_v3 }
 0x374   :  { %2624 = vmatpush.bf16.msra.mxu1 %v10727_v47  ;;  %2652 = vmatpush.bf16.msrb.mxu3 %v10728_v57  ;;  %v10737_v47 = vld [vmem:[#allocation120_spill] sm:$0xff]  ;;  %v10738_v57 = vld [vmem:[#allocation123_spill] sm:$0xff] }
 0x377   :  { %2666 = vmatpush.bf16.msra.mxu0 %v10731_v54  ;;  %2694 = vmatpush.bf16.msra.mxu2 %v10732_v19 }
 0x378   :  { %2673 = vmatpush.bf16.msrb.mxu1 %v10729_v2  ;;  %2701 = vmatpush.bf16.msra.mxu3 %v10730_v52  ;;  %v10739_v2 = vld [vmem:[#allocation94_spill] sm:$0xff]  ;;  %v10740_v52 = vld [vmem:[#allocation96_spill] sm:$0xff] }
 0x37a   :  { %2667 = vmatmul.bf16.vlgmr.msra.gmra.mxu0 %v2411_v38  ;;  %2695 = vmatmul.bf16.vlgmr.msra.gmra.mxu2 %v2411_v38  ;;  %v10746_v38 = vld [vmem:[#allocation102_spill] sm:$0xff] }
 0x37b   :  { %2850 = vmatpush.bf16.msrb.mxu0 %v10733_v20  ;;  %2878 = vmatpush.bf16.msrb.mxu2 %v10734_v8 }
 0x37c   :  { %2674 = vmatpush.bf16.msrb.mxu1 %v10735_v11  ;;  %2702 = vmatpush.bf16.msra.mxu3 %v10736_v26  ;;  %v10745_v11 = vld [vmem:[#allocation128_spill] sm:$0xff] }
 0x37d   :  { %v10747_v26 = vld [vmem:[#allocation104_spill] sm:$0xff] }
 0x37f   :  { %2851 = vmatpush.bf16.msrb.mxu0 %v10737_v47  ;;  %2879 = vmatpush.bf16.msrb.mxu2 %v10738_v57 }
 0x380   :  { %2675 = vmatpush.bf16.msrb.mxu1 %v10739_v2  ;;  %2703 = vmatpush.bf16.msra.mxu3 %v10740_v52  ;;  %v10748_v52 = vld [vmem:[#allocation106_spill] sm:$0xff]  ;;  %v10749_v2 = vld [vmem:[#allocation108_spill] sm:$0xff] }
 0x383   :  { %2852 = vmatpush.bf16.msrb.mxu0 %v10741_v46  ;;  %2880 = vmatpush.bf16.msrb.mxu2 %v10742_v16 }
 0x384   :  { %2676 = vmatpush.bf16.msrb.mxu1 %v10743_v13  ;;  %2704 = vmatpush.bf16.msra.mxu3 %v10744_v14  ;;  %v10750_v14 = vld [vmem:[#allocation110_spill] sm:$0xff]  ;;  %v10751_v13 = vld [vmem:[#allocation112_spill] sm:$0xff] }
 0x387   :  { %2853 = vmatpush.bf16.msrb.mxu0 %v10745_v11  ;;  %2881 = vmatpush.bf16.msrb.mxu2 %v10664_v24 }
 0x388   :  { %2677 = vmatpush.bf16.msrb.mxu1 %v10746_v38  ;;  %2705 = vmatpush.bf16.msra.mxu3 %v10747_v26  ;;  %v10752_v26 = vld [vmem:[#allocation114_spill] sm:$0xff]  ;;  %v10753_v38 = vld [vmem:[#allocation116_spill] sm:$0xff] }
 0x38b   :  { %2854 = vmatpush.bf16.msrb.mxu0 %v10663_v4  ;;  %2882 = vmatpush.bf16.msrb.mxu2 %v10666_v0 }
 0x38c   :  { %2678 = vmatpush.bf16.msrb.mxu1 %v10748_v52  ;;  %2706 = vmatpush.bf16.msra.mxu3 %v10749_v2  ;;  %v10754_v52 = vld [vmem:[#allocation143_spill] sm:$0xff]  ;;  %v10755_v2 = vld [vmem:[#allocation58_spill] sm:$0xff] }
 0x38f   :  { %2855 = vmatpush.bf16.msrb.mxu0 %v10665_v30  ;;  %2883 = vmatpush.bf16.msrb.mxu2 %v7569_v27  ;;  %v10756_v30 = vld [vmem:[#allocation60_spill] sm:$0xff]  ;;  %v10757_v27 = vld [vmem:[#allocation62_spill] sm:$0xff] }
 0x390   :  { %2679 = vmatpush.bf16.msrb.mxu1 %v10750_v14  ;;  %2707 = vmatpush.bf16.msra.mxu3 %v10751_v13  ;;  %v10758_v14 = vld [vmem:[#allocation64_spill] sm:$0xff]  ;;  %v10759_v13 = vld [vmem:[#allocation66_spill] sm:$0xff] }
 0x393   :  { %2856 = vmatpush.bf16.msrb.mxu0 %v7573_v40  ;;  %2884 = vmatpush.bf16.msrb.mxu2 %v7605_v39  ;;  %v10760_v40 = vld [vmem:[#allocation68_spill] sm:$0xff]  ;;  %v10761_v39 = vld [vmem:[#allocation70_spill] sm:$0xff] }
 0x394   :  { %2680 = vmatpush.bf16.msrb.mxu1 %v10752_v26  ;;  %2708 = vmatpush.bf16.msra.mxu3 %v10753_v38  ;;  %v10762_v26 = vld [vmem:[#allocation72_spill] sm:$0xff]  ;;  %v10763_v38 = vld [vmem:[#allocation74_spill] sm:$0xff] }
 0x397   :  { %2857 = vmatpush.bf16.msrb.mxu0 %v7609_v35  ;;  %2885 = vmatpush.bf16.msrb.mxu2 %v10754_v52  ;;  %v10764_v35 = vld [vmem:[#allocation76_spill] sm:$0xff]  ;;  %v10765_v52 = vld [vmem:[#allocation78_spill] sm:$0xff] }
 0x39b   :  { %3041 = vmatpush.bf16.msra.mxu0 %v10755_v2  ;;  %3069 = vmatpush.bf16.msra.mxu2 %v10756_v30  ;;  %v2174_v30 = vpop.f32.mrf.mxu0 }
 0x39f   :  { %3042 = vmatpush.bf16.msra.mxu0 %v10757_v27  ;;  %3070 = vmatpush.bf16.msra.mxu2 %v10758_v14 }
 0x3a3   :  { %3043 = vmatpush.bf16.msra.mxu0 %v10759_v13  ;;  %3071 = vmatpush.bf16.msra.mxu2 %v10760_v40  ;;  %v2202_v13 = vpop.f32.mrf.mxu2  ;;  %v2176_v14 = vpop.f32.mrf.mxu0 }
 0x3a7   :  { %3044 = vmatpush.bf16.msra.mxu0 %v10761_v39  ;;  %3072 = vmatpush.bf16.msra.mxu2 %v10762_v26  ;;  %v10766_v39 = vld [vmem:[#allocation95_spill] sm:$0xff] }
 0x3a8   :  { %v2175_v26 = vadd.f32 %v2174_v30, %v10766_v39  ;;  %v2177_v2 = vadd.f32 %v2176_v14, %v10766_v39 }
 0x3ab   :  { %3045 = vmatpush.bf16.msra.mxu0 %v10763_v38  ;;  %3073 = vmatpush.bf16.msra.mxu2 %v10764_v35  ;;  %v10767_v35 = vld [vmem:[#allocation7_spill] sm:$0xff] }
 0x3ac   :  { %v2203_v27 = vadd.f32 %v2202_v13, %v10767_v35 }
 0x3af   :  { %3046 = vmatpush.bf16.msra.mxu0 %v10765_v52  ;;  %3074 = vmatpush.bf16.msra.mxu2 %v7213_v5  ;;  %v2204_v5 = vpop.f32.mrf.mxu2 }
 0x3b3   :  { %3047 = vmatpush.bf16.msra.mxu0 %v7219_v63  ;;  %3075 = vmatpush.bf16.msra.mxu2 %v7225_v7 }
 0x3b4   :  { %v2188_v40 = vpop.f32.mrf.mxu1 }
 0x3b5   :  { %v2189_v38 = vadd.f32 %v2188_v40, %v2175_v26  ;;  %v2205_v40 = vadd.f32 %v2204_v5, %v10767_v35  ;;  %v2230_v26 = vpop.f32.mrf.mxu0 }
 0x3b7   :  { %3048 = vmatpush.bf16.msra.mxu0 %v7231_v34  ;;  %3076 = vmatpush.bf16.msra.mxu2 %v7237_v29  ;;  %v5509_v52 = vmul.f32 -1.442695, %v2189_v38  ;;  %v2258_v13 = vpop.f32.mrf.mxu2 }
 0x3b9   :  { %5854 = vpow2.f32 %v5509_v52 }
 0x3ba   :  { %v2216_v63 = vpop.f32.mrf.mxu3 }
 0x3bb   :  { %v2217_v0 = vadd.f32 %v2216_v63, %v2203_v27 }
 0x3bc   :  { %v2190_v7 = vpop.f32.mrf.mxu1 }
 0x3bd   :  { %v5511_v4 = vmul.f32 -1.442695, %v2217_v0  ;;  %v2191_v24 = vadd.f32 %v2190_v7, %v2177_v2  ;;  %v10768_v0 = vld [vmem:[#allocation144_spill] sm:$0xff] }
 0x3bf   :  { %v5855_v34 = vpop.eup %5854  ;;  %5856 = vpow2.f32 %v5511_v4  ;;  %v5510_v29 = vmul.f32 -1.442695, %v2191_v24  ;;  %v2259_v4 = vadd.f32 %v2258_v13, %v10768_v0  ;;  %v2260_v13 = vpop.f32.mrf.mxu2 }
 0x3c0   :  { %v8115_v11 = vadd.f32 1.0, %v5855_v34 }
 0x3c1   :  { %5858 = vpow2.f32 %v5510_v29 }
 0x3c2   :  { %5860 = vrcp.f32 %v8115_v11  ;;  %v2218_v30 = vpop.f32.mrf.mxu3  ;;  %v2296_v57 = vand.u32 2147483648, %v8115_v11  ;;  %vm2290_vm1 = vweird.f32 %v8115_v11 }
 0x3c3   :  { %v2219_v52 = vadd.f32 %v2218_v30, %v2205_v40 }
 0x3c4   :  { %v2244_v14 = vpop.f32.mrf.mxu1 }
 0x3c5   :  { %v5857_v38 = vpop.eup %5856  ;;  %v5512_v63 = vmul.f32 -1.442695, %v2219_v52 }
 0x3c6   :  { %v8119_v27 = vadd.f32 1.0, %v5857_v38  ;;  %v10769_v38 = vld [vmem:[#allocation145_spill] sm:$0xff] }
 0x3c7   :  { %v5859_v7 = vpop.eup %5858  ;;  %5862 = vpow2.f32 %v5512_v63  ;;  %v2231_v35 = vadd.f32 %v2230_v26, %v10769_v38  ;;  %v2232_v63 = vpop.f32.mrf.mxu0  ;;  %v2261_v26 = vadd.f32 %v2260_v13, %v10768_v0 }
 0x3c8   :  { %v8122_v34 = vpop.eup %5860  ;;  %5864 = vrcp.f32 %v8119_v27  ;;  %v8125_v5 = vadd.f32 1.0, %v5859_v7  ;;  %v2294_v7 = vand.u32 2147483647, %v8115_v11  ;;  %v2233_v8 = vadd.f32 %v2232_v63, %v10769_v38 }
 0x3c9   :  { %v2286_v29 = vmul.f32 %v8122_v34, %v8115_v11  ;;  %vm2328_vm4 = vweird.f32 %v8119_v27  ;;  %vm2291_vm5 = vweird.f32 %v8122_v34 }
 0x3ca   :  { %5866 = vrcp.f32 %v8125_v5  ;;  %v2272_v24 = vpop.f32.mrf.mxu3  ;;  %vm8145_vm2 = vcmp.eq.f32.partialorder %v2294_v7, 8.507059e+37  ;;  %vm2305_vm7 = vweird.f32 %v8125_v5  ;;  %vm8169_vm8 = vmor %vm2290_vm1, %vm2291_vm5 }
 0x3cb   :  { %v2273_v2 = vadd.f32 %v2272_v24, %v2259_v4  ;;  %v2287_v40 = vsub.f32 1.0, %v2286_v29  ;;  %v2334_v24 = vand.u32 2147483648, %v8119_v27 }
 0x3cc   :  { %v2246_v30 = vpop.f32.mrf.mxu1 }
 0x3cd   :  { %v5863_v52 = vpop.eup %5862  ;;  %v5513_v39 = vmul.f32 -1.442695, %v2273_v2  ;;  %v2288_v4 = vmul.f32 %v8122_v34, %v2287_v40  ;;  %v2335_v7 = vor.u32 1.1754944e-38, %v2334_v24 }
 0x3ce   :  { %v5865_v16 = vpop.eup %5864  ;;  %v8131_v46 = vadd.f32 1.0, %v5863_v52  ;;  %v2245_v52 = vadd.f32 %v2244_v14, %v2231_v35  ;;  %v2332_v35 = vand.u32 2147483647, %v8119_v27 }
 0x3cf   :  { %v2324_v47 = vmul.f32 %v5865_v16, %v8119_v27  ;;  %5868 = vpow2.f32 %v5513_v39  ;;  %v2297_v39 = vor.u32 1.1754944e-38, %v2296_v57  ;;  %vm2329_vm3 = vweird.f32 %v5865_v16  ;;  %v10775_v27 = vld [vmem:[#allocation25_spill] sm:$0xff] }
 0x3d0   :  { %v8136_v59 = vpop.eup %5866  ;;  %5870 = vrcp.f32 %v8131_v46  ;;  %v2289_v0 = vadd.f32 %v8122_v34, %v2288_v4  ;;  %vm8155_vm6 = vmor %vm2328_vm4, %vm2329_vm3  ;;  %v10774_v4 = vld [vmem:[#allocation16_spill] sm:$0xff]  ;;  %vm2333_vm9 = vcmp.eq.f32.partialorder %v2332_v35, 8.507059e+37  ;;  %vm2343_vm13 = vweird.f32 %v8131_v46  ;;  %v10791_v35 = vld [vmem:[#allocation23_spill] sm:$0xff] }
 0x3d1   :  { %v2325_v29 = vsub.f32 1.0, %v2324_v47  ;;  %v2301_v2 = vmul.f32 %v8136_v59, %v8125_v5  ;;  %5872 = vtanh.f32 %v2245_v52  ;;  %vm2306_vm10 = vweird.f32 %v8136_v59 }
 0x3d2   :  { %v2274_v20 = vpop.f32.mrf.mxu3  ;;  %vm8198_vm14 = vmor %vm2305_vm7, %vm2306_vm10 }
 0x3d3   :  { %v2326_v40 = vmul.f32 %v5865_v16, %v2325_v29  ;;  %v2302_v13 = vsub.f32 1.0, %v2301_v2  ;;  %v2275_v47 = vadd.f32 %v2274_v20, %v2261_v26 }
 0x3d5   :  { %v5869_v14 = vpop.eup %5868  ;;  %v2327_v19 = vadd.f32 %v5865_v16, %v2326_v40  ;;  %v5514_v57 = vmul.f32 -1.442695, %v2275_v47  ;;  %v2303_v47 = vmul.f32 %v8136_v59, %v2302_v13 }
 0x3d6   :  { %v2421_v54 = vpop.f32.mrf.mxu0  ;;  %v2435_v63 = vpop.f32.mrf.mxu1  ;;  %v8159_v20 = vadd.f32 1.0, %v5869_v14  ;;  %v2309_v14 = vand.u32 2147483647, %v8125_v5 }
 0x3d7   :  { %v5871_v38 = vpop.eup %5870  ;;  %v2468_v26 = vadd.f32 %v2421_v54, %v10774_v4  ;;  %v2469_v2 = vadd.f32 %v2435_v63, %v10775_v27  ;;  %v2331_v40 = vsel %vm8155_vm6, %v5865_v16, %v2327_v19  ;;  %v2293_v54 = vsel %vm8169_vm8, %v8122_v34, %v2289_v0 }
 0x3d8   :  { %v2339_v24 = vmul.f32 %v5871_v38, %v8131_v46  ;;  %5874 = vrcp.f32 %v8159_v20  ;;  %v2349_v4 = vand.u32 2147483648, %v8131_v46  ;;  %v2247_v27 = vadd.f32 %v2246_v30, %v2233_v8  ;;  %v5873_v19 = vpop.eup %5872 }
 0x3d9   :  { %v5515_v63 = vmul.f32 -1.442695, %v2468_v26  ;;  %5876 = vpow2.f32 %v5514_v57  ;;  %v2336_v22 = vsel %vm2333_vm9, %v2335_v7, %v2331_v40  ;;  %v5517_v16 = vmul.f32 -1.442695, %v2469_v2  ;;  %v10780_v57 = vld [vmem:[#allocation10_spill] sm:$0xff] }
 0x3da   :  { %v2340_v11 = vsub.f32 1.0, %v2339_v24  ;;  %vm2344_vm11 = vweird.f32 %v5871_v38  ;;  %v2298_v0 = vsel %vm8145_vm2, %v2297_v39, %v2293_v54  ;;  %v2304_v34 = vadd.f32 %v8136_v59, %v2303_v47  ;;  %v10783_v24 = vld [vmem:[#allocation19_spill] sm:$0xff] }
 0x3db   :  { %5878 = vpow2.f32 %v5515_v63  ;;  %vm8186_vm12 = vcmp.eq.f32.partialorder %v2309_v14, 8.507059e+37  ;;  %v2311_v8 = vand.u32 2147483648, %v8125_v5  ;;  %v2347_v30 = vand.u32 2147483647, %v8131_v46  ;;  %vm8206_vm15 = vmor %vm2343_vm13, %vm2344_vm11  ;;  %v10786_v5 = vld [vmem:[#allocation20_spill] sm:$0xff] }
 0x3dc   :  { %v2341_v13 = vmul.f32 %v5871_v38, %v2340_v11  ;;  %5880 = vpow2.f32 %v5517_v16  ;;  %v2393_v29 = vmul.f32 %v2336_v22, %v10780_v57  ;;  %v2350_v22 = vor.u32 1.1754944e-38, %v2349_v4  ;;  %v10787_v16 = vld [vmem:[#allocation29_spill] sm:$0xff] }
 0x3dd   :  { %v2463_v7 = vpop.f32.mrf.mxu3  ;;  %v2395_v47 = vmul.f32 %v5873_v19, %v2298_v0  ;;  %5882 = vtanh.f32 %v2247_v27  ;;  %v2308_v63 = vsel %vm8198_vm14, %v8136_v59, %v2304_v34  ;;  %vm2348_vm0 = vcmp.eq.f32.partialorder %v2347_v30, 8.507059e+37  ;;  %v2449_v1 = vpop.f32.mrf.mxu2 }
 0x3de   :  { %v2342_v39 = vadd.f32 %v5871_v38, %v2341_v13  ;;  %v2423_v26 = vpop.f32.mrf.mxu0  ;;  %v2437_v2 = vpop.f32.mrf.mxu1  ;;  %v2471_v52 = vadd.f32 %v2463_v7, %v10783_v24  ;;  %v2312_v24 = vor.u32 1.1754944e-38, %v2311_v8  ;;  %vm2368_vm1 = vweird.f32 %v8159_v20 }
 0x3df   :  { %v8203_v40 = vpop.eup %5874  ;;  %v2472_v14 = vadd.f32 %v2423_v26, %v10786_v5  ;;  %v2473_v13 = vadd.f32 %v2437_v2, %v10787_v16  ;;  %v8219_v27 = vadd.f32 %v2395_v47, %v2393_v29  ;;  %v2374_v5 = vand.u32 2147483648, %v8159_v20 }
 0x3e0   :  { %v5877_v54 = vpop.eup %5876  ;;  %v2346_v11 = vsel %vm8206_vm15, %v5871_v38, %v2342_v39  ;;  %v5519_v7 = vmul.f32 -1.442695, %v2471_v52  ;;  %v2313_v38 = vsel %vm8186_vm12, %v2312_v24, %v2308_v63  ;;  %v2364_v34 = vmul.f32 %v8203_v40, %v8159_v20  ;;  %v10789_v39 = vld [vmem:[#allocation17_spill] sm:$0xff]  ;;  %v10790_v52 = vld [vmem:[#allocation18_spill] sm:$0xff] }
 0x3e1   :  { %v5879_v57 = vpop.eup %5878  ;;  %v8217_v28 = vadd.f32 1.0, %v5877_v54  ;;  %v5516_v4 = vmul.f32 -1.442695, %v2472_v14  ;;  %10788 = vst [vmem:[#allocation13_spill] sm:$0xff] %v8219_v27  ;;  %v2351_v19 = vsel %vm2348_vm0, %v2350_v22, %v2346_v11  ;;  %v5518_v30 = vmul.f32 -1.442695, %v2473_v13 }
 0x3e2   :  { %v8221_v0 = vadd.f32 1.0, %v5879_v57  ;;  %5884 = vpow2.f32 %v5519_v7  ;;  %v5881_v59 = vpop.eup %5880  ;;  %v2394_v26 = vmul.f32 %v2351_v19, %v10789_v39  ;;  %v2470_v46 = vadd.f32 %v2449_v1, %v10790_v52 }
 0x3e3   :  { %5886 = vrcp.f32 %v8217_v28  ;;  %v8229_v8 = vadd.f32 1.0, %v5881_v59  ;;  %v5883_v29 = vpop.eup %5882  ;;  %v2365_v54 = vsub.f32 1.0, %v2364_v34  ;;  %v2372_v57 = vand.u32 2147483647, %v8159_v20 }
 0x3e4   :  { %5888 = vrcp.f32 %v8221_v0  ;;  %v2396_v47 = vmul.f32 %v5883_v29, %v2313_v38  ;;  %vm2369_vm2 = vweird.f32 %v8203_v40  ;;  %v8251_v19 = vor.u32 1.1754944e-38, %v2374_v5 }
 0x3e5   :  { %5890 = vpow2.f32 %v5516_v4  ;;  %v2465_v2 = vpop.f32.mrf.mxu3  ;;  %v2366_v59 = vmul.f32 %v8203_v40, %v2365_v54  ;;  %vm2489_vm3 = vweird.f32 %v8221_v0  ;;  %v2387_v34 = vand.u32 2147483647, %v8217_v28  ;;  %vm8293_vm8 = vmor %vm2368_vm1, %vm2369_vm2 }
 0x3e6   :  { %5892 = vtanh.f32 %v8219_v27  ;;  %v2475_v22 = vadd.f32 %v2465_v2, %v10791_v35  ;;  %v8239_v16 = vadd.f32 %v2396_v47, %v2394_v26  ;;  %v2493_v26 = vand.u32 2147483647, %v8221_v0 }
 0x3e7   :  { %5894 = vrcp.f32 %v8229_v8  ;;  %v2495_v35 = vand.u32 2147483648, %v8221_v0  ;;  %vm8271_vm4 = vcmp.eq.f32.partialorder %v2372_v57, 8.507059e+37  ;;  %vm2527_vm6 = vweird.f32 %v8229_v8 }
 0x3e8   :  { %v5885_v14 = vpop.eup %5884  ;;  %5896 = vpow2.f32 %v5518_v30  ;;  %v5520_v63 = vmul.f32 -1.442695, %v2475_v22  ;;  %10792 = vst [vmem:[#allocation21_spill] sm:$0xff] %v8239_v16  ;;  %v2451_v22 = vpop.f32.mrf.mxu2  ;;  %v2367_v57 = vadd.f32 %v8203_v40, %v2366_v59  ;;  %vm8307_vm10 = vcmp.eq.f32.partialorder %v2493_v26, 8.507059e+37 }
 0x3e9   :  { %v8237_v11 = vpop.eup %5886  ;;  %v8241_v13 = vadd.f32 1.0, %v5885_v14  ;;  %5898 = vtanh.f32 %v2470_v46  ;;  %v2533_v46 = vand.u32 2147483648, %v8229_v8  ;;  %v2496_v20 = vor.u32 1.1754944e-38, %v2495_v35 }
 0x3ea   :  { %v8243_v7 = vpop.eup %5888  ;;  %5900 = vpow2.f32 %v5520_v63  ;;  %v2379_v29 = vmul.f32 %v8237_v11, %v8217_v28  ;;  %v2531_v63 = vand.u32 2147483647, %v8229_v8  ;;  %vm2383_vm11 = vweird.f32 %v8217_v28 }
 0x3eb   :  { %v5891_v24 = vpop.eup %5890  ;;  %v2485_v4 = vmul.f32 %v8243_v7, %v8221_v0  ;;  %5902 = vrcp.f32 %v8241_v13  ;;  %vm2490_vm5 = vweird.f32 %v8243_v7  ;;  %v2534_v0 = vor.u32 1.1754944e-38, %v2533_v46 }
 0x3ec   :  { %v8253_v1 = vpop.eup %5892  ;;  %v8256_v38 = vadd.f32 1.0, %v5891_v24  ;;  %5904 = vtanh.f32 %v8239_v16  ;;  %v2380_v27 = vsub.f32 1.0, %v2379_v29  ;;  %vm8303_vm9 = vmor %vm2489_vm3, %vm2490_vm5  ;;  %vm8321_vm13 = vcmp.eq.f32.partialorder %v2531_v63, 8.507059e+37 }
 0x3ed   :  { %v8260_v30 = vpop.eup %5894  ;;  %v2486_v39 = vsub.f32 1.0, %v2485_v4  ;;  %vm2384_vm14 = vweird.f32 %v8237_v11  ;;  %vm8332_vm15 = vcmp.eq.f32.partialorder %v2387_v34, 8.507059e+37  ;;  %v2389_v63 = vand.u32 2147483648, %v8217_v28 }
 0x3ee   :  { %v5897_v2 = vpop.eup %5896  ;;  %v2523_v52 = vmul.f32 %v8260_v30, %v8229_v8  ;;  %5906 = vrcp.f32 %v8256_v38  ;;  %vm2528_vm7 = vweird.f32 %v8260_v30  ;;  %v2371_v8 = vsel %vm8293_vm8, %v8203_v40, %v2367_v57 }
 0x3ef   :  { %v5899_v5 = vpop.eup %5898  ;;  %v8275_v14 = vadd.f32 1.0, %v5897_v2  ;;  %v2487_v54 = vmul.f32 %v8243_v7, %v2486_v39  ;;  %v10795_v39 = vld [vmem:[#allocation22_spill] sm:$0xff]  ;;  %vm8316_vm12 = vmor %vm2527_vm6, %vm2528_vm7  ;;  %v2381_v61 = vmul.f32 %v8237_v11, %v2380_v27  ;;  %vm2504_vm0 = vweird.f32 %v8256_v38 }
 0x3f0   :  { %v5901_v24 = vpop.eup %5900  ;;  %v2524_v4 = vsub.f32 1.0, %v2523_v52  ;;  %v2474_v3 = vadd.f32 %v2451_v22, %v10795_v39  ;;  %v2508_v40 = vand.u32 2147483647, %v8256_v38  ;;  %v2510_v34 = vand.u32 2147483648, %v8256_v38  ;;  %vm2385_vm6 = vmor %vm2383_vm11, %vm2384_vm14 }
 0x3f1   :  { %v8283_v16 = vpop.eup %5902  ;;  %5908 = vrcp.f32 %v8275_v14  ;;  %v8286_v2 = vadd.f32 1.0, %v5901_v24  ;;  %v2488_v59 = vadd.f32 %v8243_v7, %v2487_v54  ;;  %vm2542_vm1 = vweird.f32 %v8275_v14 }
 0x3f2   :  { %v2525_v21 = vmul.f32 %v8260_v30, %v2524_v4  ;;  %v5905_v24 = vpop.eup %5904  ;;  %v2563_v4 = vmul.f32 %v8283_v16, %v8241_v13  ;;  %v2382_v12 = vadd.f32 %v8237_v11, %v2381_v61  ;;  %vm2509_vm5 = vcmp.eq.f32.partialorder %v2508_v40, 8.507059e+37 }
 0x3f3   :  { %5910 = vrcp.f32 %v8286_v2  ;;  %v2492_v56 = vsel %vm8303_vm9, %v8243_v7, %v2488_v59  ;;  %v2548_v7 = vand.u32 2147483648, %v8275_v14  ;;  %v2390_v61 = vor.u32 1.1754944e-38, %v2389_v63 }
 0x3f4   :  { %v5907_v35 = vpop.eup %5906  ;;  %v2526_v39 = vadd.f32 %v8260_v30, %v2525_v21  ;;  %5912 = vtanh.f32 %v2474_v3  ;;  %v2376_v3 = vsel %vm8271_vm4, %v8251_v19, %v2371_v8  ;;  %v2497_v59 = vsel %vm8307_vm10, %v2496_v20, %v2492_v56 }
 0x3f5   :  { %v2500_v48 = vmul.f32 %v5907_v35, %v8256_v38  ;;  %vm2505_vm2 = vweird.f32 %v5907_v35  ;;  %v2511_v56 = vor.u32 1.1754944e-38, %v2510_v34  ;;  %v2594_v26 = vmul.f32 %v5899_v5, %v2497_v59 }
 0x3f6   :  { %v2530_v21 = vsel %vm8316_vm12, %v8260_v30, %v2526_v39  ;;  %v2564_v30 = vsub.f32 1.0, %v2563_v4  ;;  %v2546_v39 = vand.u32 2147483647, %v8275_v14  ;;  %vm8366_vm4 = vmor %vm2504_vm0, %vm2505_vm2  ;;  %v2386_v38 = vsel %vm2385_vm6, %v8237_v11, %v2382_v12 }
 0x3f7   :  { %v5909_v57 = vpop.eup %5908  ;;  %v2501_v52 = vsub.f32 1.0, %v2500_v48  ;;  %v2535_v48 = vsel %vm8321_vm13, %v2534_v0, %v2530_v21  ;;  %v2549_v5 = vor.u32 1.1754944e-38, %v2548_v7  ;;  %v2391_v63 = vsel %vm8332_vm15, %v2390_v61, %v2386_v38  ;;  %v10821_v38 = vld [vmem:[#allocation129_spill] sm:$0xff] }
 0x3f8   :  { %v2538_v27 = vmul.f32 %v5909_v57, %v8275_v14  ;;  %vm2543_vm3 = vweird.f32 %v5909_v57  ;;  %v2592_v21 = vmul.f32 %v2535_v48, %v7984_v55  ;;  %vm8384_vm8 = vcmp.eq.f32.partialorder %v2546_v39, 8.507059e+37 }
 0x3f9   :  { %v8356_v29 = vpop.eup %5910  ;;  %v2502_v54 = vmul.f32 %v5907_v35, %v2501_v52  ;;  %vm8378_vm7 = vmor %vm2542_vm1, %vm2543_vm3  ;;  %v2401_v12 = vmul.f32 %v8253_v1, %v2376_v3  ;;  %v2402_v11 = vmul.f32 %v5905_v24, %v2391_v63  ;;  %v2565_v14 = vmul.f32 %v8283_v16, %v2564_v30  ;;  %v10824_v63 = vld [vmem:[#allocation67_spill] sm:$0xff] }
 0x3fa   :  { %v2539_v47 = vsub.f32 1.0, %v2538_v27  ;;  %v2578_v19 = vmul.f32 %v8356_v29, %v8286_v2  ;;  %v5913_v20 = vpop.eup %5912  ;;  %vm2567_vm9 = vweird.f32 %v8241_v13  ;;  %vm2568_vm10 = vweird.f32 %v8283_v16 }
 0x3fb   :  { %v2503_v0 = vadd.f32 %v5907_v35, %v2502_v54  ;;  %v8395_v27 = vadd.f32 %v2594_v26, %v2592_v21  ;;  %v2602_v59 = vpack.c.bf16 %v2402_v11, %v2401_v12  ;;  %vm2582_vm11 = vweird.f32 %v8286_v2  ;;  %vm8411_vm13 = vmor %vm2567_vm9, %vm2568_vm10  ;;  %v10820_v21 = vld [vmem:[#allocation126_spill] sm:$0xff]  ;;  %v10827_v12 = vld [vmem:[#allocation111_spill] sm:$0xff] }
 0x3fc   :  { %v2540_v4 = vmul.f32 %v5909_v57, %v2539_v47  ;;  %v2579_v8 = vsub.f32 1.0, %v2578_v19  ;;  %vm2583_vm12 = vweird.f32 %v8356_v29  ;;  %v2573_v24 = vand.u32 2147483648, %v8241_v13  ;;  %v10816_v19 = vld [vmem:[#allocation118_spill] sm:$0xff]  ;;  %v10828_v11 = vld [vmem:[#allocation71_spill] sm:$0xff] }
 0x3fd   :  { %v2507_v40 = vsel %vm8366_vm4, %v5907_v35, %v2503_v0  ;;  %v2588_v3 = vand.u32 2147483648, %v8286_v2  ;;  %2625 = vmatmul.bf16.vlgmr.msra.gmra.mxu1 %v2602_v59  ;;  %2653 = vmatmul.bf16.vlgmr.msrb.gmra.mxu3 %v2602_v59  ;;  %v2566_v48 = vadd.f32 %v8283_v16, %v2565_v14  ;;  %v2571_v54 = vand.u32 2147483647, %v8241_v13  ;;  %vm2584_vm14 = vmor %vm2582_vm11, %vm2583_vm12  ;;  %v10818_v0 = vld [vmem:[#allocation122_spill] sm:$0xff]  ;;  %v10829_v14 = vld [vmem:[#allocation73_spill] sm:$0xff] }
 0x3fe   :  { %v2512_v55 = vsel %vm2509_vm5, %v2511_v56, %v2507_v40  ;;  %v2541_v52 = vadd.f32 %v5909_v57, %v2540_v4  ;;  %v2580_v35 = vmul.f32 %v8356_v29, %v2579_v8  ;;  %v2586_v47 = vand.u32 2147483647, %v8286_v2  ;;  %2864 = vmatpush.bf16.msra.mxu1 %v10816_v19  ;;  %v10819_v2 = vld [vmem:[#allocation125_spill] sm:$0xff] }
 0x3ff   :  { %v2595_v46 = vmul.f32 %v5913_v20, %v2512_v55  ;;  %5914 = vtanh.f32 %v8395_v27  ;;  %v2574_v56 = vor.u32 1.1754944e-38, %v2573_v24  ;;  %v2589_v20 = vor.u32 1.1754944e-38, %v2588_v3  ;;  %v10825_v55 = vld [vmem:[#allocation69_spill] sm:$0xff]  ;;  %v10836_v3 = vld [vmem:[#allocation120_spill] sm:$0xff] }
 0x400   :  { %v2545_v7 = vsel %vm8378_vm7, %v5909_v57, %v2541_v52  ;;  %v2581_v39 = vadd.f32 %v8356_v29, %v2580_v35  ;;  %v2570_v13 = vsel %vm8411_vm13, %v8283_v16, %v2566_v48  ;;  %vm2572_vm15 = vcmp.eq.f32.partialorder %v2571_v54, 8.507059e+37  ;;  %v10822_v16 = vld [vmem:[#allocation105_spill] sm:$0xff]  ;;  %v10838_v48 = vld [vmem:[#allocation79_spill] sm:$0xff]  ;;  %v10840_v54 = vld [vmem:[#allocation124_spill] sm:$0xff] }
 0x401   :  { %v2550_v1 = vsel %vm8384_vm8, %v2549_v5, %v2545_v7  ;;  %vm2587_vm0 = vcmp.eq.f32.partialorder %v2586_v47, 8.507059e+37  ;;  %v2575_v4 = vsel %vm2572_vm15, %v2574_v56, %v2570_v13  ;;  %v10826_v52 = vld [vmem:[#allocation109_spill] sm:$0xff]  ;;  %v10831_v7 = vld [vmem:[#allocation115_spill] sm:$0xff] }
 0x402   :  { %v2593_v30 = vmul.f32 %v2550_v1, %v8018_v15  ;;  %v10817_v15 = vld [vmem:[#allocation121_spill] sm:$0xff]  ;;  %v2585_v26 = vsel %vm2584_vm14, %v8356_v29, %v2581_v39  ;;  %2865 = vmatpush.bf16.msra.mxu1 %v10818_v0  ;;  %v10823_v29 = vld [vmem:[#allocation107_spill] sm:$0xff] }
 0x403   :  { %2892 = vmatpush.bf16.msrb.mxu3 %v10817_v15  ;;  %v2590_v8 = vsel %vm2587_vm0, %v2589_v20, %v2585_v26  ;;  %v10830_v35 = vld [vmem:[#allocation113_spill] sm:$0xff]  ;;  %v10834_v1 = vld [vmem:[#allocation75_spill] sm:$0xff]  ;;  %v10844_v20 = vld [vmem:[#allocation128_spill] sm:$0xff] }
 0x404   :  { %v8423_v22 = vadd.f32 %v2595_v46, %v2593_v30  ;;  %v10832_v46 = vld [vmem:[#allocation117_spill] sm:$0xff]  ;;  %v10837_v30 = vld [vmem:[#allocation123_spill] sm:$0xff] }
 0x405   :  { %v5915_v61 = vpop.eup %5914  ;;  %v10835_v24 = vld [vmem:[#allocation77_spill] sm:$0xff]  ;;  %v10841_v39 = vld [vmem:[#allocation127_spill] sm:$0xff] }
 0x406   :  { %5916 = vtanh.f32 %v8423_v22  ;;  %2866 = vmatpush.bf16.msra.mxu1 %v10820_v21  ;;  %v2600_v5 = vmul.f32 %v5915_v61, %v2575_v4  ;;  %v10839_v57 = vld [vmem:[#allocation81_spill] sm:$0xff]  ;;  %v10842_v47 = vld [vmem:[#allocation83_spill] sm:$0xff]  ;;  %v10848_v4 = vld [vmem:[#allocation90_spill] sm:$0xff] }
 0x407   :  { %2893 = vmatpush.bf16.msrb.mxu3 %v10819_v2  ;;  %v10843_v56 = vld [vmem:[#allocation85_spill] sm:$0xff]  ;;  %v10845_v13 = vld [vmem:[#allocation131_spill] sm:$0xff] }
 0x408   :  { %v10846_v26 = vld [vmem:[#allocation87_spill] sm:$0xff]  ;;  %v10847_v61 = vld [vmem:[#allocation89_spill] sm:$0xff] }
 0x40a   :  { %2867 = vmatpush.bf16.msra.mxu1 %v10706_v33 }
 0x40b   :  { %2894 = vmatpush.bf16.msrb.mxu3 %v10821_v38 }
 0x40c   :  { %v5917_v34 = vpop.eup %5916 }
 0x40d   :  { %v2601_v40 = vmul.f32 %v5917_v34, %v2590_v8  ;;  %2681 = vmatmul.bf16.vlgmr.msrb.gmra.mxu1 %v2602_v59  ;;  %2709 = vmatmul.bf16.vlgmr.msra.gmra.mxu3 %v2602_v59  ;;  %v10833_v59 = vld [vmem:[#allocation119_spill] sm:$0xff]  ;;  %v10850_v34 = vld [vmem:[#allocation132_spill] sm:$0xff] }
 0x40e   :  { %2868 = vmatpush.bf16.msra.mxu1 %v10708_v49  ;;  %v10849_v8 = vld [vmem:[#allocation91_spill] sm:$0xff] }
 0x40f   :  { %v2849_v28 = vpack.c.bf16 %v2601_v40, %v2600_v5  ;;  %2895 = vmatpush.bf16.msrb.mxu3 %v10707_v60  ;;  %v10851_v5 = vld [vmem:[#allocation135_spill] sm:$0xff]  ;;  %v10852_v40 = vld [vmem:[#allocation92_spill] sm:$0xff] }
 0x411   :  { %2858 = vmatmul.bf16.vlgmr.msrb.gmra.mxu0 %v2849_v28  ;;  %2886 = vmatmul.bf16.vlgmr.msrb.gmra.mxu2 %v2849_v28 }
 0x412   :  { %3097 = vmatpush.bf16.msrb.mxu0 %v7242_v62  ;;  %3125 = vmatpush.bf16.msrb.mxu2 %v7246_v45 }
 0x413   :  { %2896 = vmatpush.bf16.msrb.mxu3 %v10709_v43  ;;  %2869 = vmatpush.bf16.msra.mxu1 %v10715_v18 }
 0x416   :  { %3098 = vmatpush.bf16.msrb.mxu0 %v7255_v44  ;;  %3126 = vmatpush.bf16.msrb.mxu2 %v7261_v51 }
 0x417   :  { %2897 = vmatpush.bf16.msrb.mxu3 %v7575_v25  ;;  %2870 = vmatpush.bf16.msra.mxu1 %v7587_v50 }
 0x41a   :  { %3099 = vmatpush.bf16.msrb.mxu0 %v7271_v36  ;;  %3127 = vmatpush.bf16.msrb.mxu2 %v10636_v32 }
 0x41b   :  { %2898 = vmatpush.bf16.msrb.mxu3 %v7611_v37  ;;  %2871 = vmatpush.bf16.msra.mxu1 %v7620_v41 }
 0x41e   :  { %3100 = vmatpush.bf16.msrb.mxu0 %v10637_v23  ;;  %3128 = vmatpush.bf16.msrb.mxu2 %v10640_v58 }
 0x41f   :  { %2899 = vmatpush.bf16.msrb.mxu3 %v7637_v53  ;;  %2872 = vmatmul.bf16.vlgmr.msra.gmra.mxu1 %v2849_v28 }
 0x420   :  { %3055 = vmatpush.bf16.msrb.mxu1 %v7152_v42 }
 0x421   :  { %3049 = vmatmul.bf16.vlgmr.msra.gmra.mxu0 %v2849_v28  ;;  %3077 = vmatmul.bf16.vlgmr.msra.gmra.mxu2 %v2849_v28 }
 0x422   :  { %2900 = vmatmul.bf16.vlgmr.msrb.gmra.mxu3 %v2849_v28  ;;  %3101 = vmatpush.bf16.msrb.mxu0 %v10717_v17 }
 0x423   :  { %3083 = vmatpush.bf16.msra.mxu3 %v7157_v6  ;;  %3129 = vmatpush.bf16.msrb.mxu2 %v10718_v9 }
 0x424   :  { %3056 = vmatpush.bf16.msrb.mxu1 %v7163_v31 }
 0x426   :  { %3102 = vmatpush.bf16.msrb.mxu0 %v10822_v16 }
 0x427   :  { %3084 = vmatpush.bf16.msra.mxu3 %v7168_v10  ;;  %3130 = vmatpush.bf16.msrb.mxu2 %v10823_v29 }
 0x428   :  { %3057 = vmatpush.bf16.msrb.mxu1 %v10824_v63 }
 0x42a   :  { %3103 = vmatpush.bf16.msrb.mxu0 %v10826_v52 }
 0x42b   :  { %3085 = vmatpush.bf16.msra.mxu3 %v10825_v55  ;;  %3131 = vmatpush.bf16.msrb.mxu2 %v10827_v12 }
 0x42c   :  { %3058 = vmatpush.bf16.msrb.mxu1 %v10828_v11  ;;  %v10890_v11 = vld [vmem:[#allocation24_spill] sm:$0xff] }
 0x42e   :  { %3104 = vmatpush.bf16.msrb.mxu0 %v10830_v35 }
 0x42f   :  { %3086 = vmatpush.bf16.msra.mxu3 %v10829_v14  ;;  %3132 = vmatpush.bf16.msrb.mxu2 %v10831_v7 }
 0x430   :  { %3059 = vmatpush.bf16.msrb.mxu1 %v10834_v1 }
 0x431   :  { %3105 = vmatmul.bf16.vlgmr.msrb.gmra.mxu0 %v2849_v28 }
 0x432   :  { %3288 = vmatpush.bf16.msra.mxu0 %v10832_v46  ;;  %3133 = vmatmul.bf16.vlgmr.msrb.gmra.mxu2 %v2849_v28  ;;  %v10853_v28 = vld [vmem:[#allocation93_spill] sm:$0xff] }
 0x433   :  { %3316 = vmatpush.bf16.msra.mxu2 %v10833_v59  ;;  %3087 = vmatpush.bf16.msra.mxu3 %v10835_v24 }
 0x434   :  { %3060 = vmatpush.bf16.msrb.mxu1 %v10838_v48 }
 0x436   :  { %3289 = vmatpush.bf16.msra.mxu0 %v10836_v3 }
 0x437   :  { %3317 = vmatpush.bf16.msra.mxu2 %v10837_v30  ;;  %3088 = vmatpush.bf16.msra.mxu3 %v10839_v57  ;;  %v10888_v57 = vld [vmem:[#allocation95_spill] sm:$0xff] }
 0x438   :  { %3061 = vmatpush.bf16.msrb.mxu1 %v10842_v47  ;;  %v10855_v47 = vld [vmem:[#allocation139_spill] sm:$0xff] }
 0x43a   :  { %3290 = vmatpush.bf16.msra.mxu0 %v10840_v54 }
 0x43b   :  { %3318 = vmatpush.bf16.msra.mxu2 %v10841_v39  ;;  %3089 = vmatpush.bf16.msra.mxu3 %v10843_v56  ;;  %v10854_v56 = vld [vmem:[#allocation136_spill] sm:$0xff] }
 0x43c   :  { %3062 = vmatpush.bf16.msrb.mxu1 %v10846_v26  ;;  %v10857_v26 = vld [vmem:[#allocation96_spill] sm:$0xff] }
 0x43e   :  { %3291 = vmatpush.bf16.msra.mxu0 %v10844_v20 }
 0x43f   :  { %3319 = vmatpush.bf16.msra.mxu2 %v10845_v13  ;;  %3090 = vmatpush.bf16.msra.mxu3 %v10847_v61  ;;  %v10856_v13 = vld [vmem:[#allocation94_spill] sm:$0xff]  ;;  %v10858_v61 = vld [vmem:[#allocation140_spill] sm:$0xff] }
 0x440   :  { %3111 = vmatpush.bf16.msra.mxu1 %v10848_v4  ;;  %v10859_v4 = vld [vmem:[#allocation141_spill] sm:$0xff] }
 0x442   :  { %3292 = vmatpush.bf16.msra.mxu0 %v10850_v34  ;;  %v10861_v34 = vld [vmem:[#allocation100_spill] sm:$0xff] }
 0x443   :  { %3139 = vmatpush.bf16.msrb.mxu3 %v10849_v8  ;;  %3320 = vmatpush.bf16.msra.mxu2 %v10851_v5  ;;  %v10860_v8 = vld [vmem:[#allocation98_spill] sm:$0xff] }
 0x444   :  { %3112 = vmatpush.bf16.msra.mxu1 %v10852_v40  ;;  %v10862_v5 = vld [vmem:[#allocation142_spill] sm:$0xff]  ;;  %v10863_v40 = vld [vmem:[#allocation143_spill] sm:$0xff] }
 0x446   :  { %3293 = vmatpush.bf16.msra.mxu0 %v10854_v56  ;;  %v10865_v56 = vld [vmem:[#allocation60_spill] sm:$0xff] }
 0x447   :  { %3140 = vmatpush.bf16.msrb.mxu3 %v10853_v28  ;;  %3321 = vmatpush.bf16.msra.mxu2 %v10855_v47  ;;  %v10864_v28 = vld [vmem:[#allocation58_spill] sm:$0xff] }
 0x448   :  { %3113 = vmatpush.bf16.msra.mxu1 %v10856_v13  ;;  %v10866_v47 = vld [vmem:[#allocation102_spill] sm:$0xff]  ;;  %v10867_v13 = vld [vmem:[#allocation104_spill] sm:$0xff] }
 0x44a   :  { %3294 = vmatpush.bf16.msra.mxu0 %v10858_v61  ;;  %v10869_v61 = vld [vmem:[#allocation64_spill] sm:$0xff] }
 0x44b   :  { %3141 = vmatpush.bf16.msrb.mxu3 %v10857_v26  ;;  %3322 = vmatpush.bf16.msra.mxu2 %v10859_v4  ;;  %v10868_v26 = vld [vmem:[#allocation62_spill] sm:$0xff] }
 0x44c   :  { %3114 = vmatpush.bf16.msra.mxu1 %v10860_v8  ;;  %v10870_v4 = vld [vmem:[#allocation106_spill] sm:$0xff]  ;;  %v10871_v8 = vld [vmem:[#allocation108_spill] sm:$0xff] }
 0x44e   :  { %3295 = vmatpush.bf16.msra.mxu0 %v10862_v5  ;;  %v10873_v5 = vld [vmem:[#allocation68_spill] sm:$0xff] }
 0x44f   :  { %3142 = vmatpush.bf16.msrb.mxu3 %v10861_v34  ;;  %3323 = vmatpush.bf16.msra.mxu2 %v10863_v40  ;;  %v10872_v34 = vld [vmem:[#allocation66_spill] sm:$0xff] }
 0x450   :  { %3115 = vmatpush.bf16.msra.mxu1 %v10866_v47  ;;  %v10874_v40 = vld [vmem:[#allocation110_spill] sm:$0xff]  ;;  %v10877_v47 = vld [vmem:[#allocation72_spill] sm:$0xff] }
 0x452   :  { %3479 = vmatpush.bf16.msrb.mxu0 %v10864_v28  ;;  %v10875_v28 = vld [vmem:[#allocation112_spill] sm:$0xff] }
 0x453   :  { %3507 = vmatpush.bf16.msrb.mxu2 %v10865_v56  ;;  %3143 = vmatpush.bf16.msrb.mxu3 %v10867_v13  ;;  %v10876_v56 = vld [vmem:[#allocation70_spill] sm:$0xff] }
 0x454   :  { %3116 = vmatpush.bf16.msra.mxu1 %v10870_v4  ;;  %v10878_v13 = vld [vmem:[#allocation114_spill] sm:$0xff]  ;;  %v10881_v4 = vld [vmem:[#allocation76_spill] sm:$0xff] }
 0x456   :  { %3480 = vmatpush.bf16.msrb.mxu0 %v10868_v26  ;;  %v10879_v26 = vld [vmem:[#allocation116_spill] sm:$0xff] }
 0x457   :  { %3508 = vmatpush.bf16.msrb.mxu2 %v10869_v61  ;;  %3144 = vmatpush.bf16.msrb.mxu3 %v10871_v8  ;;  %v10880_v61 = vld [vmem:[#allocation74_spill] sm:$0xff] }
 0x458   :  { %3117 = vmatpush.bf16.msra.mxu1 %v10874_v40  ;;  %v10882_v8 = vld [vmem:[#allocation78_spill] sm:$0xff]  ;;  %v10885_v40 = vld [vmem:[#allocation84_spill] sm:$0xff] }
 0x45a   :  { %3481 = vmatpush.bf16.msrb.mxu0 %v10872_v34  ;;  %v10883_v34 = vld [vmem:[#allocation80_spill] sm:$0xff] }
 0x45b   :  { %3509 = vmatpush.bf16.msrb.mxu2 %v10873_v5  ;;  %3145 = vmatpush.bf16.msrb.mxu3 %v10875_v28  ;;  %v10884_v5 = vld [vmem:[#allocation82_spill] sm:$0xff]  ;;  %v2612_v28 = vpop.f32.mrf.mxu0 }
 0x45c   :  { %3118 = vmatpush.bf16.msra.mxu1 %v10878_v13 }
 0x45e   :  { %3482 = vmatpush.bf16.msrb.mxu0 %v10876_v56  ;;  %v10886_v56 = vld [vmem:[#allocation86_spill] sm:$0xff] }
 0x45f   :  { %3510 = vmatpush.bf16.msrb.mxu2 %v10877_v47  ;;  %3146 = vmatpush.bf16.msrb.mxu3 %v10879_v26  ;;  %v10887_v47 = vld [vmem:[#allocation88_spill] sm:$0xff]  ;;  %v2640_v26 = vpop.f32.mrf.mxu2 }
 0x462   :  { %3483 = vmatpush.bf16.msrb.mxu0 %v10880_v61  ;;  %v2613_v61 = vadd.f32 %v2612_v28, %v10888_v57 }
 0x463   :  { %3511 = vmatpush.bf16.msrb.mxu2 %v10881_v4  ;;  %v2614_v13 = vpop.f32.mrf.mxu0 }
 0x466   :  { %3484 = vmatpush.bf16.msrb.mxu0 %v10882_v8  ;;  %v10889_v8 = vld [vmem:[#allocation7_spill] sm:$0xff] }
 0x467   :  { %3512 = vmatpush.bf16.msrb.mxu2 %v10883_v34  ;;  %v2641_v54 = vadd.f32 %v2640_v26, %v10889_v8  ;;  %v2642_v1 = vpop.f32.mrf.mxu2 }
 0x468   :  { %v2643_v28 = vadd.f32 %v2642_v1, %v10889_v8 }
 0x46a   :  { %3485 = vmatpush.bf16.msrb.mxu0 %v10884_v5  ;;  %v2615_v5 = vadd.f32 %v2614_v13, %v10888_v57 }
 0x46b   :  { %3513 = vmatpush.bf16.msrb.mxu2 %v10885_v40  ;;  %v2668_v20 = vpop.f32.mrf.mxu0 }
 0x46e   :  { %3486 = vmatpush.bf16.msrb.mxu0 %v10886_v56 }
 0x46f   :  { %3514 = vmatpush.bf16.msrb.mxu2 %v10887_v47 }
 0x473   :  { %v2670_v40 = vpop.f32.mrf.mxu0 }
 0x47a   :  { %v2626_v48 = vpop.f32.mrf.mxu1 }
 0x47b   :  { %v2627_v4 = vadd.f32 %v2626_v48, %v2613_v61 }
 0x47d   :  { %v5521_v39 = vmul.f32 -1.442695, %v2627_v4 }
 0x47f   :  { %5918 = vpow2.f32 %v5521_v39 }
 0x480   :  { %v2654_v34 = vpop.f32.mrf.mxu3 }
 0x481   :  { %v2655_v24 = vadd.f32 %v2654_v34, %v2641_v54  ;;  %v2696_v34 = vpop.f32.mrf.mxu2 }
 0x482   :  { %v2628_v56 = vpop.f32.mrf.mxu1 }
 0x483   :  { %v5523_v30 = vmul.f32 -1.442695, %v2655_v24  ;;  %v2629_v47 = vadd.f32 %v2628_v56, %v2615_v5 }
 0x485   :  { %v5919_v3 = vpop.eup %5918  ;;  %5920 = vpow2.f32 %v5523_v30  ;;  %v5522_v14 = vmul.f32 -1.442695, %v2629_v47 }
 0x486   :  { %v8528_v48 = vadd.f32 1.0, %v5919_v3 }
 0x487   :  { %5922 = vpow2.f32 %v5522_v14  ;;  %v10891_v14 = vld [vmem:[#allocation144_spill] sm:$0xff] }
 0x488   :  { %v2656_v61 = vpop.f32.mrf.mxu3  ;;  %5924 = vrcp.f32 %v8528_v48  ;;  %v2697_v1 = vadd.f32 %v2696_v34, %v10891_v14  ;;  %vm2728_vm1 = vweird.f32 %v8528_v48 }
 0x489   :  { %v2657_v26 = vadd.f32 %v2656_v61, %v2643_v28 }
 0x48a   :  { %v2682_v4 = vpop.f32.mrf.mxu1 }
 0x48b   :  { %v5921_v57 = vpop.eup %5920  ;;  %v5524_v54 = vmul.f32 -1.442695, %v2657_v26 }
 0x48c   :  { %v8532_v24 = vadd.f32 1.0, %v5921_v57 }
 0x48d   :  { %v5923_v30 = vpop.eup %5922  ;;  %5926 = vpow2.f32 %v5524_v54 }
 0x48e   :  { %v2859_v39 = vpop.f32.mrf.mxu0  ;;  %5928 = vrcp.f32 %v8532_v24  ;;  %v8536_v3 = vadd.f32 1.0, %v5923_v30  ;;  %v8538_v28 = vpop.eup %5924  ;;  %vm2766_vm2 = vweird.f32 %v8532_v24 }
 0x48f   :  { %v2906_v13 = vadd.f32 %v2859_v39, %v10890_v11  ;;  %v10892_v39 = vld [vmem:[#allocation28_spill] sm:$0xff]  ;;  %v2724_v34 = vmul.f32 %v8538_v28, %v8528_v48  ;;  %vm2729_vm5 = vweird.f32 %v8538_v28 }
 0x490   :  { %v2710_v56 = vpop.f32.mrf.mxu3  ;;  %vm2743_vm7 = vweird.f32 %v8536_v3  ;;  %vm8613_vm9 = vmor %vm2728_vm1, %vm2729_vm5 }
 0x491   :  { %v5527_v47 = vmul.f32 -1.442695, %v2906_v13  ;;  %v2711_v5 = vadd.f32 %v2710_v56, %v2697_v1  ;;  %v2725_v55 = vsub.f32 1.0, %v2724_v34 }
 0x492   :  { %v8540_v61 = vpop.f32.mrf.mxu1 }
 0x493   :  { %5930 = vpow2.f32 %v5527_v47  ;;  %v5927_v26 = vpop.eup %5926  ;;  %v5525_v57 = vmul.f32 -1.442695, %v2711_v5  ;;  %v2698_v47 = vpop.f32.mrf.mxu2  ;;  %v10893_v5 = vld [vmem:[#allocation145_spill] sm:$0xff] }
 0x494   :  { %5932 = vrcp.f32 %v8536_v3  ;;  %v8544_v54 = vpop.eup %5928  ;;  %v8546_v8 = vadd.f32 1.0, %v5927_v26  ;;  %v2669_v46 = vadd.f32 %v2668_v20, %v10893_v5  ;;  %v2699_v35 = vadd.f32 %v2698_v47, %v10891_v14 }
 0x495   :  { %v2762_v30 = vmul.f32 %v8544_v54, %v8532_v24  ;;  %5934 = vpow2.f32 %v5525_v57  ;;  %v2671_v57 = vadd.f32 %v2670_v40, %v10893_v5  ;;  %v2732_v20 = vand.u32 2147483647, %v8528_v48  ;;  %v10894_v40 = vld [vmem:[#allocation33_spill] sm:$0xff] }
 0x496   :  { %v2861_v11 = vpop.f32.mrf.mxu0  ;;  %5936 = vrcp.f32 %v8546_v8  ;;  %v2683_v63 = vadd.f32 %v2682_v4, %v2669_v46  ;;  %v2772_v4 = vand.u32 2147483648, %v8532_v24  ;;  %vm2767_vm3 = vweird.f32 %v8544_v54 }
 0x497   :  { %v2910_v13 = vadd.f32 %v2861_v11, %v10892_v39  ;;  %v2763_v56 = vsub.f32 1.0, %v2762_v30  ;;  %v2734_v11 = vand.u32 2147483648, %v8528_v48  ;;  %vm8579_vm4 = vcmp.eq.f32.partialorder %v2732_v20, 8.507059e+37  ;;  %v10897_v20 = vld [vmem:[#allocation26_spill] sm:$0xff]  ;;  %vm8595_vm6 = vmor %vm2766_vm2, %vm2767_vm3 }
 0x498   :  { %v2712_v26 = vpop.f32.mrf.mxu3  ;;  %v2773_v29 = vor.u32 1.1754944e-38, %v2772_v4  ;;  %v10900_v4 = vld [vmem:[#allocation27_spill] sm:$0xff]  ;;  %vm2781_vm10 = vweird.f32 %v8546_v8 }
 0x499   :  { %v5931_v1 = vpop.eup %5930  ;;  %v5528_v59 = vmul.f32 -1.442695, %v2910_v13  ;;  %v2764_v30 = vmul.f32 %v8544_v54, %v2763_v56  ;;  %v2713_v13 = vadd.f32 %v2712_v26, %v2699_v35  ;;  %v2735_v47 = vor.u32 1.1754944e-38, %v2734_v11 }
 0x49a   :  { %v8555_v39 = vadd.f32 1.0, %v5931_v1  ;;  %v8557_v7 = vpop.eup %5932  ;;  %v2726_v56 = vmul.f32 %v8538_v28, %v2725_v55  ;;  %v2770_v35 = vand.u32 2147483647, %v8532_v24 }
 0x49b   :  { %v5935_v52 = vpop.eup %5934  ;;  %5938 = vpow2.f32 %v5528_v59  ;;  %v2739_v10 = vmul.f32 %v8557_v7, %v8536_v3  ;;  %v2887_v59 = vpop.f32.mrf.mxu2  ;;  %v5526_v11 = vmul.f32 -1.442695, %v2713_v13  ;;  %vm2744_vm13 = vweird.f32 %v8557_v7 }
 0x49c   :  { %v2873_v12 = vpop.f32.mrf.mxu1  ;;  %v8564_v1 = vpop.eup %5936  ;;  %5940 = vrcp.f32 %v8555_v39  ;;  %v8574_v5 = vadd.f32 1.0, %v5935_v52  ;;  %v2749_v52 = vand.u32 2147483648, %v8536_v3  ;;  %v2727_v13 = vadd.f32 %v8538_v28, %v2726_v56  ;;  %vm8665_vm15 = vmor %vm2743_vm7, %vm2744_vm13 }
 0x49d   :  { %v2907_v46 = vadd.f32 %v2873_v12, %v10894_v40  ;;  %v2777_v34 = vmul.f32 %v8564_v1, %v8546_v8  ;;  %5942 = vtanh.f32 %v2683_v63  ;;  %v2765_v40 = vadd.f32 %v8544_v54, %v2764_v30 }
 0x49e   :  { %v2740_v55 = vsub.f32 1.0, %v2739_v10  ;;  %5944 = vpow2.f32 %v5526_v11  ;;  %v2747_v30 = vand.u32 2147483647, %v8536_v3  ;;  %vm2771_vm8 = vcmp.eq.f32.partialorder %v2770_v35, 8.507059e+37 }
 0x49f   :  { %v2778_v26 = vsub.f32 1.0, %v2777_v34  ;;  %v5529_v14 = vmul.f32 -1.442695, %v2907_v46  ;;  %5946 = vrcp.f32 %v8574_v5  ;;  %v2908_v34 = vadd.f32 %v2887_v59, %v10897_v20 }
 0x4a0   :  { %v2769_v24 = vsel %vm8595_vm6, %v8544_v54, %v2765_v40  ;;  %v2685_v20 = vadd.f32 %v8540_v61, %v2671_v57  ;;  %v2787_v54 = vand.u32 2147483648, %v8546_v8  ;;  %v2731_v61 = vsel %vm8613_vm9, %v8538_v28, %v2727_v13  ;;  %v10915_v40 = vld [vmem:[#allocation21_spill] sm:$0xff] }
 0x4a1   :  { %v5939_v63 = vpop.eup %5938  ;;  %5948 = vpow2.f32 %v5529_v14  ;;  %v2779_v11 = vmul.f32 %v8564_v1, %v2778_v26  ;;  %v2750_v14 = vor.u32 1.1754944e-38, %v2749_v52  ;;  %v10903_v26 = vld [vmem:[#allocation37_spill] sm:$0xff]  ;;  %v2774_v35 = vsel %vm2771_vm8, %v2773_v29, %v2769_v24 }
 0x4a2   :  { %v8589_v16 = vpop.eup %5940  ;;  %v8601_v46 = vadd.f32 1.0, %v5939_v63  ;;  %vm8627_vm11 = vcmp.eq.f32.partialorder %v2747_v30, 8.507059e+37  ;;  %vm2782_vm12 = vweird.f32 %v8564_v1  ;;  %v2736_v29 = vsel %vm8579_vm4, %v2735_v47, %v2731_v61  ;;  %v10906_v63 = vld [vmem:[#allocation13_spill] sm:$0xff] }
 0x4a3   :  { %v5943_v6 = vpop.eup %5942  ;;  %v2923_v48 = vmul.f32 %v8589_v16, %v8555_v39  ;;  %v2780_v28 = vadd.f32 %v8564_v1, %v2779_v11  ;;  %vm8650_vm14 = vmor %vm2781_vm10, %vm2782_vm12  ;;  %vm2927_vm1 = vweird.f32 %v8555_v39  ;;  %vm2806_vm3 = vweird.f32 %v8574_v5 }
 0x4a4   :  { %v2875_v59 = vpop.f32.mrf.mxu1  ;;  %5950 = vrcp.f32 %v8601_v46  ;;  %v5945_v57 = vpop.eup %5944  ;;  %v2833_v61 = vmul.f32 %v5943_v6, %v2736_v29  ;;  %vm2928_vm4 = vweird.f32 %v8589_v16  ;;  %vm2942_vm6 = vweird.f32 %v8601_v46 }
 0x4a5   :  { %v2901_v31 = vpop.f32.mrf.mxu3  ;;  %v2911_v10 = vadd.f32 %v2875_v59, %v10903_v26  ;;  %5952 = vtanh.f32 %v2908_v34  ;;  %v8637_v13 = vadd.f32 1.0, %v5945_v57  ;;  %v2831_v26 = vmul.f32 %v2774_v35, %v10906_v63  ;;  %v2889_v35 = vpop.f32.mrf.mxu2  ;;  %vm8710_vm5 = vmor %vm2927_vm1, %vm2928_vm4 }
 0x4a6   :  { %v2909_v56 = vadd.f32 %v2901_v31, %v10900_v4  ;;  %v2741_v31 = vmul.f32 %v8557_v7, %v2740_v55  ;;  %v2785_v55 = vand.u32 2147483647, %v8546_v8  ;;  %v8632_v4 = vpop.eup %5946  ;;  %v2924_v42 = vsub.f32 1.0, %v2923_v48 }
 0x4a7   :  { %v5949_v34 = vpop.eup %5948  ;;  %v5530_v59 = vmul.f32 -1.442695, %v2911_v10  ;;  %v2802_v47 = vmul.f32 %v8632_v4, %v8574_v5  ;;  %v2784_v48 = vsel %vm8650_vm14, %v8564_v1, %v2780_v28  ;;  %v2931_v57 = vand.u32 2147483647, %v8555_v39 }
 0x4a8   :  { %v5531_v52 = vmul.f32 -1.442695, %v2909_v56  ;;  %v2742_v30 = vadd.f32 %v8557_v7, %v2741_v31  ;;  %v2788_v56 = vor.u32 1.1754944e-38, %v2787_v54  ;;  %v8656_v11 = vadd.f32 1.0, %v5949_v34  ;;  %v10909_v31 = vld [vmem:[#allocation31_spill] sm:$0xff] }
 0x4a9   :  { %v8680_v34 = vadd.f32 %v2833_v61, %v2831_v26  ;;  %vm2786_vm0 = vcmp.eq.f32.partialorder %v2785_v55, 8.507059e+37  ;;  %v2925_v1 = vmul.f32 %v8589_v16, %v2924_v42  ;;  %v2803_v29 = vsub.f32 1.0, %v2802_v47 }
 0x4aa   :  { %5954 = vpow2.f32 %v5531_v52  ;;  %v8644_v9 = vpop.eup %5950  ;;  %v2746_v6 = vsel %vm8665_vm15, %v8557_v7, %v2742_v30  ;;  %v2933_v52 = vand.u32 2147483648, %v8555_v39  ;;  %vm8689_vm2 = vcmp.eq.f32.partialorder %v2931_v57, 8.507059e+37 }
 0x4ab   :  { %5956 = vrcp.f32 %v8637_v13  ;;  %v8659_v54 = vpop.eup %5952  ;;  %v2938_v3 = vmul.f32 %v8644_v9, %v8601_v46  ;;  %v2751_v63 = vsel %vm8627_vm11, %v2750_v14, %v2746_v6  ;;  %v2804_v8 = vmul.f32 %v8632_v4, %v2803_v29 }
 0x4ac   :  { %5958 = vpow2.f32 %v5530_v59  ;;  %v2789_v59 = vsel %vm2786_vm0, %v2788_v56, %v2784_v48  ;;  %v2934_v56 = vor.u32 1.1754944e-38, %v2933_v52  ;;  %v2948_v52 = vand.u32 2147483648, %v8601_v46 }
 0x4ad   :  { %v2903_v24 = vpop.f32.mrf.mxu3  ;;  %5960 = vtanh.f32 %v2685_v20  ;;  %v2939_v26 = vsub.f32 1.0, %v2938_v3  ;;  %v2832_v14 = vmul.f32 %v2789_v59, %v10915_v40  ;;  %vm2807_vm7 = vweird.f32 %v8632_v4 }
 0x4ae   :  { %v2913_v10 = vadd.f32 %v2903_v24, %v10909_v31  ;;  %5962 = vrcp.f32 %v8656_v11  ;;  %v10912_v24 = vld [vmem:[#allocation30_spill] sm:$0xff]  ;;  %vm2943_vm9 = vweird.f32 %v8644_v9  ;;  %vm2965_vm10 = vweird.f32 %v8656_v11  ;;  %vm8749_vm13 = vmor %vm2806_vm3, %vm2807_vm7 }
 0x4af   :  { %v2912_v7 = vadd.f32 %v2889_v35, %v10912_v24  ;;  %v2969_v24 = vand.u32 2147483647, %v8656_v11  ;;  %v2812_v3 = vand.u32 2147483648, %v8574_v5  ;;  %vm8763_vm15 = vmor %vm2942_vm6, %vm2943_vm9  ;;  %vm2821_vm1 = vweird.f32 %v8637_v13 }
 0x4b0   :  { %v5532_v20 = vmul.f32 -1.442695, %v2913_v10  ;;  %v5955_v28 = vpop.eup %5954  ;;  %v2926_v10 = vadd.f32 %v8589_v16, %v2925_v1  ;;  %v2940_v1 = vmul.f32 %v8644_v9, %v2939_v26 }
 0x4b1   :  { %v8685_v30 = vpop.eup %5956  ;;  %v8693_v55 = vadd.f32 1.0, %v5955_v28  ;;  %vm2970_vm11 = vcmp.eq.f32.partialorder %v2969_v24, 8.507059e+37  ;;  %v2825_v24 = vand.u32 2147483647, %v8637_v13 }
 0x4b2   :  { %5964 = vpow2.f32 %v5532_v20  ;;  %v5959_v42 = vpop.eup %5958  ;;  %v2817_v47 = vmul.f32 %v8685_v30, %v8637_v13  ;;  %v2946_v20 = vand.u32 2147483647, %v8601_v46  ;;  %v2930_v59 = vsel %vm8710_vm5, %v8589_v16, %v2926_v10 }
 0x4b3   :  { %v5961_v31 = vpop.eup %5960  ;;  %5966 = vtanh.f32 %v8680_v34  ;;  %v8703_v57 = vadd.f32 1.0, %v5959_v42  ;;  %v2805_v42 = vadd.f32 %v8632_v4, %v2804_v8  ;;  %v2935_v16 = vsel %vm8689_vm2, %v2934_v56, %v2930_v59 }
 0x4b4   :  { %v5963_v61 = vpop.eup %5962  ;;  %v2834_v48 = vmul.f32 %v5961_v31, %v2751_v63  ;;  %5968 = vtanh.f32 %v2912_v7  ;;  %v2818_v35 = vsub.f32 1.0, %v2817_v47  ;;  %v2971_v7 = vand.u32 2147483648, %v8656_v11 }
 0x4b5   :  { %v2961_v6 = vmul.f32 %v5963_v61, %v8656_v11  ;;  %5970 = vrcp.f32 %v8693_v55  ;;  %vm2966_vm8 = vweird.f32 %v5963_v61  ;;  %v2949_v31 = vor.u32 1.1754944e-38, %v2948_v52 }
 0x4b6   :  { %5972 = vrcp.f32 %v8703_v57  ;;  %v8718_v29 = vadd.f32 %v2834_v48, %v2832_v14  ;;  %v2819_v40 = vmul.f32 %v8685_v30, %v2818_v35  ;;  %v2941_v10 = vadd.f32 %v8644_v9, %v2940_v1  ;;  %vm2967_vm14 = vmor %vm2965_vm10, %vm2966_vm8 }
 0x4b7   :  { %v2962_v39 = vsub.f32 1.0, %v2961_v6  ;;  %vm8741_vm12 = vcmp.eq.f32.partialorder %v2946_v20, 8.507059e+37  ;;  %v2972_v6 = vor.u32 1.1754944e-38, %v2971_v7  ;;  %v2809_v11 = vsel %vm8749_vm13, %v8632_v4, %v2805_v42 }
 0x4b8   :  { %v5965_v28 = vpop.eup %5964  ;;  %10918 = vst [vmem:[#allocation12_spill] sm:$0xff] %v8718_v29  ;;  %v2810_v52 = vand.u32 2147483647, %v8574_v5  ;;  %v2820_v59 = vadd.f32 %v8685_v30, %v2819_v40  ;;  %vm2822_vm0 = vweird.f32 %v8685_v30  ;;  %v2945_v5 = vsel %vm8763_vm15, %v8644_v9, %v2941_v10 }
 0x4b9   :  { %v8725_v63 = vadd.f32 1.0, %v5965_v28  ;;  %v8729_v26 = vpop.eup %5966  ;;  %v2963_v47 = vmul.f32 %v5963_v61, %v2962_v39  ;;  %v2984_v39 = vand.u32 2147483647, %v8703_v57  ;;  %v2827_v7 = vand.u32 2147483648, %v8637_v13  ;;  %vm8782_vm4 = vmor %vm2821_vm1, %vm2822_vm0 }
 0x4ba   :  { %v5969_v14 = vpop.eup %5968  ;;  %vm2811_vm3 = vcmp.eq.f32.partialorder %v2810_v52, 8.507059e+37  ;;  %v2813_v40 = vor.u32 1.1754944e-38, %v2812_v3  ;;  %v2824_v13 = vsel %vm8782_vm4, %v8685_v30, %v2820_v59  ;;  %vm2980_vm5 = vweird.f32 %v8703_v57 }
 0x4bb   :  { %5974 = vrcp.f32 %v8725_v63  ;;  %v8737_v8 = vpop.eup %5970  ;;  %v2964_v48 = vadd.f32 %v5963_v61, %v2963_v47  ;;  %v2986_v47 = vand.u32 2147483648, %v8703_v57  ;;  %v2828_v3 = vor.u32 1.1754944e-38, %v2827_v7 }
 0x4bc   :  { %5976 = vtanh.f32 %v8718_v29  ;;  %v5973_v56 = vpop.eup %5972  ;;  %v2814_v52 = vsel %vm2811_vm3, %v2813_v40, %v2809_v11  ;;  %vm2826_vm6 = vcmp.eq.f32.partialorder %v2825_v24, 8.507059e+37  ;;  %vm2985_vm8 = vcmp.eq.f32.partialorder %v2984_v39, 8.507059e+37 }
 0x4bd   :  { %v2968_v1 = vsel %vm2967_vm14, %v5963_v61, %v2964_v48  ;;  %v2976_v28 = vmul.f32 %v5973_v56, %v8703_v57  ;;  %v3001_v61 = vmul.f32 %v8737_v8, %v8693_v55  ;;  %vm2981_vm2 = vweird.f32 %v5973_v56 }
 0x4be   :  { %v2973_v4 = vsel %vm2970_vm11, %v2972_v6, %v2968_v1  ;;  %v3032_v1 = vmul.f32 %v8659_v54, %v2935_v16  ;;  %vm2982_vm7 = vmor %vm2980_vm5, %vm2981_vm2  ;;  %v2839_v54 = vmul.f32 %v8729_v26, %v2814_v52  ;;  %vm3006_vm9 = vweird.f32 %v8737_v8  ;;  %v10932_v52 = vld [vmem:[#allocation105_spill] sm:$0xff] }
 0x4bf   :  { %v2977_v46 = vsub.f32 1.0, %v2976_v28  ;;  %v3030_v48 = vmul.f32 %v2973_v4, %v8395_v27  ;;  %v3002_v20 = vsub.f32 1.0, %v3001_v61  ;;  %v2950_v27 = vsel %vm8741_vm12, %v2949_v31, %v2945_v5 }
 0x4c0   :  { %v2987_v4 = vor.u32 1.1754944e-38, %v2986_v47  ;;  %v3033_v61 = vmul.f32 %v5969_v14, %v2950_v27  ;;  %vm3005_vm11 = vweird.f32 %v8693_v55  ;;  %v3009_v39 = vand.u32 2147483647, %v8693_v55  ;;  %v10935_v27 = vld [vmem:[#allocation65_spill] sm:$0xff]  ;;  %v10951_v14 = vld [vmem:[#allocation127_spill] sm:$0xff] }
 0x4c1   :  { %v8779_v42 = vpop.eup %5974  ;;  %v2978_v12 = vmul.f32 %v5973_v56, %v2977_v46  ;;  %v2829_v46 = vsel %vm2826_vm6, %v2828_v3, %v2824_v13  ;;  %v8797_v9 = vadd.f32 %v3032_v1, %v3030_v48  ;;  %v3003_v11 = vmul.f32 %v8737_v8, %v3002_v20  ;;  %vm8816_vm12 = vmor %vm3005_vm11, %vm3006_vm9  ;;  %v10930_v1 = vld [vmem:[#allocation59_spill] sm:$0xff]  ;;  %v10931_v20 = vld [vmem:[#allocation61_spill] sm:$0xff] }
 0x4c2   :  { %v5977_v10 = vpop.eup %5976  ;;  %v3016_v6 = vmul.f32 %v8779_v42, %v8725_v63  ;;  %vm3021_vm10 = vweird.f32 %v8779_v42  ;;  %vm3020_vm13 = vweird.f32 %v8725_v63  ;;  %v3024_v24 = vand.u32 2147483647, %v8725_v63  ;;  %v10933_v3 = vld [vmem:[#allocation107_spill] sm:$0xff] }
 0x4c3   :  { %v2979_v28 = vadd.f32 %v5973_v56, %v2978_v12  ;;  %v2840_v16 = vmul.f32 %v5977_v10, %v2829_v46  ;;  %5978 = vtanh.f32 %v8797_v9  ;;  %v3004_v26 = vadd.f32 %v8737_v8, %v3003_v11  ;;  %vm3022_vm14 = vmor %vm3020_vm13, %vm3021_vm10  ;;  %v10937_v46 = vld [vmem:[#allocation111_spill] sm:$0xff] }
 0x4c4   :  { %v3017_v29 = vsub.f32 1.0, %v3016_v6  ;;  %vm3010_vm15 = vcmp.eq.f32.partialorder %v3009_v39, 8.507059e+37  ;;  %vm3025_vm0 = vcmp.eq.f32.partialorder %v3024_v24, 8.507059e+37  ;;  %v10941_v11 = vld [vmem:[#allocation115_spill] sm:$0xff]  ;;  %v10953_v24 = vld [vmem:[#allocation81_spill] sm:$0xff] }
 0x4c5   :  { %v2983_v30 = vsel %vm2982_vm7, %v5973_v56, %v2979_v28  ;;  %v3040_v31 = vpack.c.bf16 %v2840_v16, %v2839_v54  ;;  %v3008_v7 = vsel %vm8816_vm12, %v8737_v8, %v3004_v26  ;;  %v10934_v28 = vld [vmem:[#allocation63_spill] sm:$0xff]  ;;  %v10939_v54 = vld [vmem:[#allocation69_spill] sm:$0xff] }
 0x4c6   :  { %v2988_v59 = vsel %vm2985_vm8, %v2987_v4, %v2983_v30  ;;  %v3018_v57 = vmul.f32 %v8779_v42, %v3017_v29  ;;  %v3026_v29 = vand.u32 2147483648, %v8725_v63  ;;  %v10936_v4 = vld [vmem:[#allocation109_spill] sm:$0xff]  ;;  %v10938_v30 = vld [vmem:[#allocation67_spill] sm:$0xff] }
 0x4c7   :  { %v3031_v35 = vmul.f32 %v2988_v59, %v8423_v22  ;;  %3063 = vmatmul.bf16.vlgmr.msrb.gmra.mxu1 %v3040_v31  ;;  %3091 = vmatmul.bf16.vlgmr.msra.gmra.mxu3 %v3040_v31  ;;  %v3011_v22 = vand.u32 2147483648, %v8693_v55  ;;  %v10940_v16 = vld [vmem:[#allocation113_spill] sm:$0xff]  ;;  %v10947_v26 = vld [vmem:[#allocation123_spill] sm:$0xff] }
 0x4c8   :  { %v3019_v56 = vadd.f32 %v8779_v42, %v3018_v57  ;;  %3302 = vmatpush.bf16.msrb.mxu1 %v10816_v19  ;;  %3330 = vmatpush.bf16.msra.mxu3 %v10817_v15  ;;  %v3027_v48 = vor.u32 1.1754944e-38, %v3026_v29  ;;  %v10942_v59 = vld [vmem:[#allocation117_spill] sm:$0xff]  ;;  %v10943_v57 = vld [vmem:[#allocation119_spill] sm:$0xff]  ;;  %v10950_v29 = vld [vmem:[#allocation124_spill] sm:$0xff] }
 0x4c9   :  { %v8805_v5 = vadd.f32 %v3033_v61, %v3031_v35  ;;  %v5979_v40 = vpop.eup %5978  ;;  %v3012_v10 = vor.u32 1.1754944e-38, %v3011_v22  ;;  %v10944_v61 = vld [vmem:[#allocation71_spill] sm:$0xff]  ;;  %v10945_v35 = vld [vmem:[#allocation73_spill] sm:$0xff] }
 0x4ca   :  { %v3023_v47 = vsel %vm3022_vm14, %v8779_v42, %v3019_v56  ;;  %v10929_v42 = vld [vmem:[#allocation103_spill] sm:$0xff]  ;;  %v10949_v22 = vld [vmem:[#allocation77_spill] sm:$0xff] }
 0x4cb   :  { %5980 = vtanh.f32 %v8805_v5  ;;  %v3013_v12 = vsel %vm3010_vm15, %v3012_v10, %v3008_v7  ;;  %v3028_v6 = vsel %vm3025_vm0, %v3027_v48, %v3023_v47  ;;  %v10948_v56 = vld [vmem:[#allocation75_spill] sm:$0xff]  ;;  %v10954_v7 = vld [vmem:[#allocation128_spill] sm:$0xff]  ;;  %v10957_v10 = vld [vmem:[#allocation85_spill] sm:$0xff] }
 0x4cc   :  { %3303 = vmatpush.bf16.msrb.mxu1 %v10818_v0  ;;  %3331 = vmatpush.bf16.msra.mxu3 %v10819_v2  ;;  %v3038_v63 = vmul.f32 %v5979_v40, %v3013_v12  ;;  %v10952_v39 = vld [vmem:[#allocation79_spill] sm:$0xff]  ;;  %v10958_v48 = vld [vmem:[#allocation132_spill] sm:$0xff] }
 0x4cd   :  { %v10955_v47 = vld [vmem:[#allocation131_spill] sm:$0xff] }
 0x4ce   :  { %v10956_v40 = vld [vmem:[#allocation83_spill] sm:$0xff] }
 0x4cf   :  { %v10960_v12 = vld [vmem:[#allocation87_spill] sm:$0xff] }
 0x4d0   :  { %3304 = vmatpush.bf16.msrb.mxu1 %v10820_v21  ;;  %3332 = vmatpush.bf16.msra.mxu3 %v10821_v38 }
 0x4d1   :  { %v5981_v55 = vpop.eup %5980 }
 0x4d2   :  { %v3039_v13 = vmul.f32 %v5981_v55, %v3028_v6  ;;  %v10959_v55 = vld [vmem:[#allocation135_spill] sm:$0xff]  ;;  %v10961_v6 = vld [vmem:[#allocation89_spill] sm:$0xff] }
 0x4d4   :  { %v3287_v8 = vpack.c.bf16 %v3039_v13, %v3038_v63  ;;  %3305 = vmatpush.bf16.msrb.mxu1 %v10706_v33  ;;  %3333 = vmatpush.bf16.msra.mxu3 %v10707_v60  ;;  %v10962_v63 = vld [vmem:[#allocation90_spill] sm:$0xff]  ;;  %v10963_v13 = vld [vmem:[#allocation91_spill] sm:$0xff] }
 0x4d6   :  { %3296 = vmatmul.bf16.vlgmr.msra.gmra.mxu0 %v3287_v8  ;;  %3324 = vmatmul.bf16.vlgmr.msra.gmra.mxu2 %v3287_v8 }
 0x4d7   :  { %3535 = vmatpush.bf16.msra.mxu0 %v7242_v62  ;;  %3563 = vmatpush.bf16.msra.mxu2 %v7246_v45 }
 0x4d8   :  { %3119 = vmatmul.bf16.vlgmr.msra.gmra.mxu1 %v3040_v31  ;;  %3147 = vmatmul.bf16.vlgmr.msrb.gmra.mxu3 %v3040_v31  ;;  %v10946_v31 = vld [vmem:[#allocation120_spill] sm:$0xff] }
 0x4d9   :  { %3306 = vmatpush.bf16.msrb.mxu1 %v10708_v49  ;;  %3334 = vmatpush.bf16.msra.mxu3 %v10709_v43 }
 0x4db   :  { %3536 = vmatpush.bf16.msra.mxu0 %v7255_v44  ;;  %3564 = vmatpush.bf16.msra.mxu2 %v7261_v51 }
 0x4dd   :  { %3307 = vmatpush.bf16.msrb.mxu1 %v10715_v18  ;;  %3335 = vmatpush.bf16.msra.mxu3 %v7575_v25 }
 0x4df   :  { %3537 = vmatpush.bf16.msra.mxu0 %v7271_v36  ;;  %3565 = vmatpush.bf16.msra.mxu2 %v10636_v32 }
 0x4e1   :  { %3308 = vmatpush.bf16.msrb.mxu1 %v7587_v50  ;;  %3336 = vmatpush.bf16.msra.mxu3 %v7611_v37 }
 0x4e3   :  { %3538 = vmatpush.bf16.msra.mxu0 %v10637_v23  ;;  %3566 = vmatpush.bf16.msra.mxu2 %v10640_v58 }
 0x4e5   :  { %3309 = vmatpush.bf16.msrb.mxu1 %v7620_v41  ;;  %3337 = vmatpush.bf16.msra.mxu3 %v7637_v53 }
 0x4e6   :  { %3487 = vmatmul.bf16.vlgmr.msrb.gmra.mxu0 %v3287_v8  ;;  %3515 = vmatmul.bf16.vlgmr.msrb.gmra.mxu2 %v3287_v8 }
 0x4e7   :  { %3539 = vmatpush.bf16.msra.mxu0 %v10717_v17  ;;  %3567 = vmatpush.bf16.msra.mxu2 %v10929_v42  ;;  %v11006_v17 = vld [vmem:[#allocation41_spill] sm:$0xff] }
 0x4e8   :  { %3310 = vmatmul.bf16.vlgmr.msrb.gmra.mxu1 %v3287_v8  ;;  %3338 = vmatmul.bf16.vlgmr.msra.gmra.mxu3 %v3287_v8 }
 0x4e9   :  { %3493 = vmatpush.bf16.msra.mxu1 %v10930_v1  ;;  %3521 = vmatpush.bf16.msrb.mxu3 %v10931_v20 }
 0x4eb   :  { %3540 = vmatpush.bf16.msra.mxu0 %v10932_v52  ;;  %3568 = vmatpush.bf16.msra.mxu2 %v10933_v3 }
 0x4ed   :  { %3494 = vmatpush.bf16.msra.mxu1 %v10934_v28  ;;  %3522 = vmatpush.bf16.msrb.mxu3 %v10935_v27 }
 0x4ef   :  { %3541 = vmatpush.bf16.msra.mxu0 %v10936_v4  ;;  %3569 = vmatpush.bf16.msra.mxu2 %v10937_v46  ;;  %v11005_v4 = vld [vmem:[#allocation145_spill] sm:$0xff] }
 0x4f1   :  { %3495 = vmatpush.bf16.msra.mxu1 %v10938_v30  ;;  %3523 = vmatpush.bf16.msrb.mxu3 %v10939_v54 }
 0x4f3   :  { %3542 = vmatpush.bf16.msra.mxu0 %v10940_v16  ;;  %3570 = vmatpush.bf16.msra.mxu2 %v10941_v11 }
 0x4f5   :  { %3496 = vmatpush.bf16.msra.mxu1 %v10944_v61  ;;  %3524 = vmatpush.bf16.msrb.mxu3 %v10945_v35 }
 0x4f6   :  { %3543 = vmatmul.bf16.vlgmr.msra.gmra.mxu0 %v3287_v8  ;;  %3571 = vmatmul.bf16.vlgmr.msra.gmra.mxu2 %v3287_v8  ;;  %v10964_v8 = vld [vmem:[#allocation136_spill] sm:$0xff] }
 0x4f7   :  { %3726 = vmatpush.bf16.msrb.mxu0 %v10942_v59  ;;  %3754 = vmatpush.bf16.msrb.mxu2 %v10943_v57 }
 0x4f9   :  { %3497 = vmatpush.bf16.msra.mxu1 %v10948_v56  ;;  %3525 = vmatpush.bf16.msrb.mxu3 %v10949_v22 }
 0x4fb   :  { %3727 = vmatpush.bf16.msrb.mxu0 %v10946_v31  ;;  %3755 = vmatpush.bf16.msrb.mxu2 %v10947_v26 }
 0x4fd   :  { %3498 = vmatpush.bf16.msra.mxu1 %v10952_v39  ;;  %3526 = vmatpush.bf16.msrb.mxu3 %v10953_v24 }
 0x4ff   :  { %3728 = vmatpush.bf16.msrb.mxu0 %v10950_v29  ;;  %3756 = vmatpush.bf16.msrb.mxu2 %v10951_v14  ;;  %v10967_v14 = vld [vmem:[#allocation93_spill] sm:$0xff]  ;;  %v10968_v29 = vld [vmem:[#allocation140_spill] sm:$0xff] }
 0x501   :  { %3499 = vmatpush.bf16.msra.mxu1 %v10956_v40  ;;  %3527 = vmatpush.bf16.msrb.mxu3 %v10957_v10  ;;  %v11001_v40 = vld [vmem:[#allocation7_spill] sm:$0xff] }
 0x503   :  { %3729 = vmatpush.bf16.msrb.mxu0 %v10954_v7  ;;  %3757 = vmatpush.bf16.msrb.mxu2 %v10955_v47  ;;  %v10965_v7 = vld [vmem:[#allocation139_spill] sm:$0xff]  ;;  %v10966_v47 = vld [vmem:[#allocation92_spill] sm:$0xff] }
 0x505   :  { %3500 = vmatpush.bf16.msra.mxu1 %v10960_v12  ;;  %3528 = vmatpush.bf16.msrb.mxu3 %v10961_v6  ;;  %v10971_v12 = vld [vmem:[#allocation96_spill] sm:$0xff]  ;;  %v10972_v6 = vld [vmem:[#allocation142_spill] sm:$0xff] }
 0x507   :  { %3730 = vmatpush.bf16.msrb.mxu0 %v10958_v48  ;;  %3758 = vmatpush.bf16.msrb.mxu2 %v10959_v55  ;;  %v10969_v48 = vld [vmem:[#allocation141_spill] sm:$0xff]  ;;  %v10970_v55 = vld [vmem:[#allocation94_spill] sm:$0xff] }
 0x509   :  { %3549 = vmatpush.bf16.msrb.mxu1 %v10962_v63  ;;  %3577 = vmatpush.bf16.msra.mxu3 %v10963_v13  ;;  %v10973_v63 = vld [vmem:[#allocation143_spill] sm:$0xff]  ;;  %v10974_v13 = vld [vmem:[#allocation58_spill] sm:$0xff] }
 0x50b   :  { %3731 = vmatpush.bf16.msrb.mxu0 %v10964_v8  ;;  %3759 = vmatpush.bf16.msrb.mxu2 %v10965_v7  ;;  %v10975_v8 = vld [vmem:[#allocation60_spill] sm:$0xff]  ;;  %v10976_v7 = vld [vmem:[#allocation98_spill] sm:$0xff] }
 0x50d   :  { %3550 = vmatpush.bf16.msrb.mxu1 %v10966_v47  ;;  %3578 = vmatpush.bf16.msra.mxu3 %v10967_v14  ;;  %v10977_v47 = vld [vmem:[#allocation100_spill] sm:$0xff]  ;;  %v10978_v14 = vld [vmem:[#allocation62_spill] sm:$0xff] }
 0x50f   :  { %3732 = vmatpush.bf16.msrb.mxu0 %v10968_v29  ;;  %3760 = vmatpush.bf16.msrb.mxu2 %v10969_v48  ;;  %v10979_v29 = vld [vmem:[#allocation64_spill] sm:$0xff]  ;;  %v10980_v48 = vld [vmem:[#allocation102_spill] sm:$0xff] }
 0x511   :  { %3551 = vmatpush.bf16.msrb.mxu1 %v10970_v55  ;;  %3579 = vmatpush.bf16.msra.mxu3 %v10971_v12  ;;  %v10981_v55 = vld [vmem:[#allocation104_spill] sm:$0xff]  ;;  %v10982_v12 = vld [vmem:[#allocation66_spill] sm:$0xff] }
 0x513   :  { %3733 = vmatpush.bf16.msrb.mxu0 %v10972_v6  ;;  %3761 = vmatpush.bf16.msrb.mxu2 %v10973_v63  ;;  %v10983_v6 = vld [vmem:[#allocation68_spill] sm:$0xff]  ;;  %v10984_v63 = vld [vmem:[#allocation106_spill] sm:$0xff] }
 0x515   :  { %3552 = vmatpush.bf16.msrb.mxu1 %v10976_v7  ;;  %3580 = vmatpush.bf16.msra.mxu3 %v10977_v47  ;;  %v10987_v7 = vld [vmem:[#allocation72_spill] sm:$0xff]  ;;  %v10988_v47 = vld [vmem:[#allocation110_spill] sm:$0xff] }
 0x517   :  { %3917 = vmatpush.bf16.msra.mxu0 %v10974_v13  ;;  %3945 = vmatpush.bf16.msra.mxu2 %v10975_v8  ;;  %v10985_v13 = vld [vmem:[#allocation108_spill] sm:$0xff]  ;;  %v10986_v8 = vld [vmem:[#allocation70_spill] sm:$0xff] }
 0x519   :  { %3553 = vmatpush.bf16.msrb.mxu1 %v10980_v48  ;;  %3581 = vmatpush.bf16.msra.mxu3 %v10981_v55  ;;  %v10991_v48 = vld [vmem:[#allocation76_spill] sm:$0xff]  ;;  %v10992_v55 = vld [vmem:[#allocation114_spill] sm:$0xff] }
 0x51b   :  { %3918 = vmatpush.bf16.msra.mxu0 %v10978_v14  ;;  %3946 = vmatpush.bf16.msra.mxu2 %v10979_v29  ;;  %v10989_v14 = vld [vmem:[#allocation112_spill] sm:$0xff]  ;;  %v10990_v29 = vld [vmem:[#allocation74_spill] sm:$0xff] }
 0x51d   :  { %3554 = vmatpush.bf16.msrb.mxu1 %v10984_v63  ;;  %3582 = vmatpush.bf16.msra.mxu3 %v10985_v13  ;;  %v10995_v63 = vld [vmem:[#allocation80_spill] sm:$0xff]  ;;  %v10996_v13 = vld [vmem:[#allocation82_spill] sm:$0xff] }
 0x51f   :  { %3919 = vmatpush.bf16.msra.mxu0 %v10982_v12  ;;  %3947 = vmatpush.bf16.msra.mxu2 %v10983_v6  ;;  %v10993_v12 = vld [vmem:[#allocation116_spill] sm:$0xff]  ;;  %v10994_v6 = vld [vmem:[#allocation78_spill] sm:$0xff] }
 0x521   :  { %3555 = vmatpush.bf16.msrb.mxu1 %v10988_v47  ;;  %3583 = vmatpush.bf16.msra.mxu3 %v10989_v14  ;;  %v10998_v47 = vld [vmem:[#allocation86_spill] sm:$0xff]  ;;  %v10999_v14 = vld [vmem:[#allocation88_spill] sm:$0xff] }
 0x523   :  { %3920 = vmatpush.bf16.msra.mxu0 %v10986_v8  ;;  %3948 = vmatpush.bf16.msra.mxu2 %v10987_v7  ;;  %v10997_v8 = vld [vmem:[#allocation84_spill] sm:$0xff]  ;;  %v3050_v7 = vpop.f32.mrf.mxu0 }
 0x525   :  { %3556 = vmatpush.bf16.msrb.mxu1 %v10992_v55  ;;  %3584 = vmatpush.bf16.msra.mxu3 %v10993_v12  ;;  %v11000_v55 = vld [vmem:[#allocation95_spill] sm:$0xff] }
 0x526   :  { %v3051_v31 = vadd.f32 %v3050_v7, %v11000_v55 }
 0x527   :  { %3921 = vmatpush.bf16.msra.mxu0 %v10990_v29  ;;  %3949 = vmatpush.bf16.msra.mxu2 %v10991_v48  ;;  %v3078_v48 = vpop.f32.mrf.mxu2 }
 0x52b   :  { %3922 = vmatpush.bf16.msra.mxu0 %v10994_v6  ;;  %3950 = vmatpush.bf16.msra.mxu2 %v10995_v63  ;;  %v3052_v29 = vpop.f32.mrf.mxu0  ;;  %v3079_v63 = vadd.f32 %v3078_v48, %v11001_v40 }
 0x52f   :  { %3923 = vmatpush.bf16.msra.mxu0 %v10996_v13  ;;  %3951 = vmatpush.bf16.msra.mxu2 %v10997_v8  ;;  %v3053_v8 = vadd.f32 %v3052_v29, %v11000_v55 }
 0x533   :  { %3924 = vmatpush.bf16.msra.mxu0 %v10998_v47  ;;  %3952 = vmatpush.bf16.msra.mxu2 %v10999_v14  ;;  %v8921_v26 = vpop.f32.mrf.mxu0  ;;  %v3080_v47 = vpop.f32.mrf.mxu2 }
 0x534   :  { %v3081_v7 = vadd.f32 %v3080_v47, %v11001_v40  ;;  %v3107_v35 = vadd.f32 %v8921_v26, %v11005_v4 }
 0x53b   :  { %v3108_v13 = vpop.f32.mrf.mxu0  ;;  %v3134_v29 = vpop.f32.mrf.mxu2 }
 0x544   :  { %v3064_v12 = vpop.f32.mrf.mxu1 }
 0x545   :  { %v3065_v10 = vadd.f32 %v3064_v12, %v3051_v31 }
 0x547   :  { %v5533_v6 = vmul.f32 -1.442695, %v3065_v10 }
 0x549   :  { %5982 = vpow2.f32 %v5533_v6 }
 0x54a   :  { %v3092_v57 = vpop.f32.mrf.mxu3 }
 0x54b   :  { %v3093_v59 = vadd.f32 %v3092_v57, %v3079_v63 }
 0x54c   :  { %v3066_v24 = vpop.f32.mrf.mxu1 }
 0x54d   :  { %v5535_v14 = vmul.f32 -1.442695, %v3093_v59  ;;  %v3067_v39 = vadd.f32 %v3066_v24, %v3053_v8 }
 0x54f   :  { %v5983_v11 = vpop.eup %5982  ;;  %5984 = vpow2.f32 %v5535_v14  ;;  %v5534_v16 = vmul.f32 -1.442695, %v3067_v39  ;;  %v11003_v39 = vld [vmem:[#allocation32_spill] sm:$0xff] }
 0x550   :  { %v8927_v31 = vadd.f32 1.0, %v5983_v11 }
 0x551   :  { %5986 = vpow2.f32 %v5534_v16  ;;  %v11002_v16 = vld [vmem:[#allocation144_spill] sm:$0xff] }
 0x552   :  { %v3094_v10 = vpop.f32.mrf.mxu3  ;;  %5988 = vrcp.f32 %v8927_v31  ;;  %v3135_v11 = vadd.f32 %v3134_v29, %v11002_v16  ;;  %vm3166_vm1 = vweird.f32 %v8927_v31  ;;  %v3170_v30 = vand.u32 2147483647, %v8927_v31 }
 0x553   :  { %v3297_v48 = vpop.f32.mrf.mxu0  ;;  %v3095_v12 = vadd.f32 %v3094_v10, %v3081_v7 }
 0x554   :  { %v3344_v24 = vadd.f32 %v3297_v48, %v11003_v39  ;;  %vm8984_vm5 = vcmp.eq.f32.partialorder %v3170_v30, 8.507059e+37 }
 0x555   :  { %v3120_v6 = vpop.f32.mrf.mxu1  ;;  %v5985_v22 = vpop.eup %5984  ;;  %v5536_v56 = vmul.f32 -1.442695, %v3095_v12 }
 0x556   :  { %v8930_v57 = vadd.f32 1.0, %v5985_v22  ;;  %v5539_v12 = vmul.f32 -1.442695, %v3344_v24  ;;  %v3121_v54 = vadd.f32 %v3120_v6, %v3107_v35 }
 0x557   :  { %v5987_v59 = vpop.eup %5986  ;;  %5990 = vpow2.f32 %v5536_v56 }
 0x558   :  { %5992 = vrcp.f32 %v8930_v57  ;;  %v8933_v14 = vadd.f32 1.0, %v5987_v59  ;;  %v8938_v7 = vpop.eup %5988  ;;  %v11004_v59 = vld [vmem:[#allocation36_spill] sm:$0xff]  ;;  %vm3204_vm2 = vweird.f32 %v8930_v57 }
 0x559   :  { %v3162_v39 = vmul.f32 %v8938_v7, %v8927_v31  ;;  %vm3167_vm3 = vweird.f32 %v8938_v7 }
 0x55a   :  { %5994 = vrcp.f32 %v8933_v14  ;;  %vm3181_vm6 = vweird.f32 %v8933_v14  ;;  %vm9012_vm10 = vmor %vm3166_vm1, %vm3167_vm3 }
 0x55b   :  { %v3148_v47 = vpop.f32.mrf.mxu3  ;;  %v3299_v8 = vpop.f32.mrf.mxu0  ;;  %v3163_v61 = vsub.f32 1.0, %v3162_v39 }
 0x55c   :  { %v3149_v63 = vadd.f32 %v3148_v47, %v3135_v11  ;;  %v3348_v46 = vadd.f32 %v3299_v8, %v11004_v59  ;;  %v3136_v11 = vpop.f32.mrf.mxu2  ;;  %v3172_v8 = vand.u32 2147483648, %v8927_v31  ;;  %v3187_v31 = vand.u32 2147483648, %v8933_v14 }
 0x55d   :  { %v3122_v10 = vpop.f32.mrf.mxu1  ;;  %v5991_v22 = vpop.eup %5990 }
 0x55e   :  { %v5537_v40 = vmul.f32 -1.442695, %v3149_v63  ;;  %v8940_v56 = vpop.eup %5992  ;;  %v8942_v55 = vadd.f32 1.0, %v5991_v22  ;;  %v5540_v24 = vmul.f32 -1.442695, %v3348_v46  ;;  %v3137_v63 = vadd.f32 %v3136_v11, %v11002_v16 }
 0x55f   :  { %v3200_v48 = vmul.f32 %v8940_v56, %v8930_v57  ;;  %v8968_v42 = vor.u32 1.1754944e-38, %v3172_v8  ;;  %vm3205_vm4 = vweird.f32 %v8940_v56 }
 0x560   :  { %5996 = vpow2.f32 %v5537_v40  ;;  %v8948_v29 = vpop.eup %5994  ;;  %vm8999_vm8 = vmor %vm3204_vm2, %vm3205_vm4  ;;  %vm3219_vm9 = vweird.f32 %v8942_v55 }
 0x561   :  { %5998 = vrcp.f32 %v8942_v55  ;;  %v3201_v22 = vsub.f32 1.0, %v3200_v48  ;;  %v3177_v40 = vmul.f32 %v8948_v29, %v8933_v14  ;;  %vm3182_vm11 = vweird.f32 %v8948_v29 }
 0x562   :  { %6000 = vpow2.f32 %v5539_v12  ;;  %v3109_v12 = vadd.f32 %v3108_v13, %v11005_v4  ;;  %vm9042_vm14 = vmor %vm3181_vm6, %vm3182_vm11 }
 0x563   :  { %v3150_v47 = vpop.f32.mrf.mxu3  ;;  %6002 = vpow2.f32 %v5540_v24  ;;  %v3202_v26 = vmul.f32 %v8940_v56, %v3201_v22  ;;  %v3178_v39 = vsub.f32 1.0, %v3177_v40 }
 0x564   :  { %v3151_v11 = vadd.f32 %v3150_v47, %v3137_v63  ;;  %v3164_v47 = vmul.f32 %v8938_v7, %v3163_v61  ;;  %v3123_v4 = vadd.f32 %v3122_v10, %v3109_v12  ;;  %v3225_v10 = vand.u32 2147483648, %v8942_v55 }
 0x565   :  { %v3311_v3 = vpop.f32.mrf.mxu1  ;;  %v3203_v61 = vadd.f32 %v8940_v56, %v3202_v26  ;;  %v3179_v22 = vmul.f32 %v8948_v29, %v3178_v39  ;;  %v3223_v12 = vand.u32 2147483647, %v8942_v55 }
 0x566   :  { %v5997_v59 = vpop.eup %5996  ;;  %v3345_v13 = vadd.f32 %v3311_v3, %v11006_v17  ;;  %v5538_v6 = vmul.f32 -1.442695, %v3151_v11  ;;  %v3208_v17 = vand.u32 2147483647, %v8930_v57  ;;  %v11021_v11 = vld [vmem:[#allocation39_spill] sm:$0xff] }
 0x567   :  { %v8958_v52 = vpop.eup %5998  ;;  %v8961_v46 = vadd.f32 1.0, %v5997_v59  ;;  %v3210_v59 = vand.u32 2147483648, %v8930_v57  ;;  %v3207_v57 = vsel %vm8999_vm8, %v8940_v56, %v3203_v61  ;;  %vm3224_vm15 = vcmp.eq.f32.partialorder %v3223_v12, 8.507059e+37 }
 0x568   :  { %v6001_v48 = vpop.eup %6000  ;;  %v3215_v16 = vmul.f32 %v8958_v52, %v8942_v55  ;;  %v5541_v40 = vmul.f32 -1.442695, %v3345_v13  ;;  %vm3220_vm7 = vweird.f32 %v8958_v52  ;;  %vm3209_vm12 = vcmp.eq.f32.partialorder %v3208_v17, 8.507059e+37 }
 0x569   :  { %6004 = vrcp.f32 %v8961_v46  ;;  %v8976_v35 = vadd.f32 1.0, %v6001_v48  ;;  %v3211_v8 = vor.u32 1.1754944e-38, %v3210_v59  ;;  %v3165_v48 = vadd.f32 %v8938_v7, %v3164_v47  ;;  %vm9027_vm13 = vmor %vm3219_vm9, %vm3220_vm7 }
 0x56a   :  { %v3216_v24 = vsub.f32 1.0, %v3215_v16  ;;  %6006 = vtanh.f32 %v3121_v54  ;;  %v6003_v16 = vpop.eup %6002  ;;  %v3185_v54 = vand.u32 2147483647, %v8933_v14  ;;  %v3180_v47 = vadd.f32 %v8948_v29, %v3179_v22  ;;  %v3325_v22 = vpop.f32.mrf.mxu2 }
 0x56b   :  { %v3339_v3 = vpop.f32.mrf.mxu3  ;;  %6008 = vpow2.f32 %v5538_v6  ;;  %v9006_v13 = vadd.f32 1.0, %v6003_v16  ;;  %v3169_v6 = vsel %vm9012_vm10, %v8938_v7, %v3165_v48  ;;  %v11015_v7 = vld [vmem:[#allocation35_spill] sm:$0xff]  ;;  %v3212_v30 = vsel %vm3209_vm12, %v3211_v8, %v3207_v57  ;;  %v11019_v57 = vld [vmem:[#allocation34_spill] sm:$0xff] }
 0x56c   :  { %v3217_v63 = vmul.f32 %v8958_v52, %v3216_v24  ;;  %6010 = vrcp.f32 %v8976_v35  ;;  %v3347_v17 = vadd.f32 %v3339_v3, %v11015_v7  ;;  %v3226_v24 = vor.u32 1.1754944e-38, %v3225_v10 }
 0x56d   :  { %v3313_v59 = vpop.f32.mrf.mxu1  ;;  %6012 = vpow2.f32 %v5541_v40  ;;  %v11016_v40 = vld [vmem:[#allocation45_spill] sm:$0xff]  ;;  %v3184_v3 = vsel %vm9042_vm14, %v8948_v29, %v3180_v47  ;;  %vm3186_vm0 = vcmp.eq.f32.partialorder %v3185_v54, 8.507059e+37  ;;  %v3188_v14 = vor.u32 1.1754944e-38, %v3187_v31  ;;  %v11020_v31 = vld [vmem:[#allocation12_spill] sm:$0xff] }
 0x56e   :  { %v3218_v26 = vadd.f32 %v8958_v52, %v3217_v63  ;;  %6014 = vtanh.f32 %v3123_v4  ;;  %v3349_v48 = vadd.f32 %v3313_v59, %v11016_v40  ;;  %v5543_v8 = vmul.f32 -1.442695, %v3347_v17 }
 0x56f   :  { %v8993_v39 = vpop.eup %6004  ;;  %6016 = vrcp.f32 %v9006_v13  ;;  %v3346_v63 = vadd.f32 %v3325_v22, %v11019_v57  ;;  %v3269_v40 = vmul.f32 %v3212_v30, %v8680_v34  ;;  %v3189_v54 = vsel %vm3186_vm0, %v3188_v14, %v3184_v3 }
 0x570   :  { %v6007_v55 = vpop.eup %6006  ;;  %v3240_v16 = vmul.f32 %v8993_v39, %v8961_v46  ;;  %v3222_v61 = vsel %vm9027_vm13, %v8958_v52, %v3218_v26  ;;  %v5542_v26 = vmul.f32 -1.442695, %v3349_v48  ;;  %v3371_v22 = vand.u32 2147483648, %v8976_v35 }
 0x571   :  { %v6009_v56 = vpop.eup %6008  ;;  %v3227_v59 = vsel %vm3224_vm15, %v3226_v24, %v3222_v61  ;;  %v3250_v17 = vand.u32 2147483648, %v8961_v46  ;;  %vm3244_vm1 = vweird.f32 %v8961_v46  ;;  %vm3245_vm3 = vweird.f32 %v8993_v39 }
 0x572   :  { %v9047_v58 = vadd.f32 1.0, %v6009_v56  ;;  %v9049_v52 = vpop.eup %6010  ;;  %v3174_v56 = vsel %vm8984_vm5, %v8968_v42, %v3169_v6  ;;  %v3241_v23 = vsub.f32 1.0, %v3240_v16  ;;  %v3270_v61 = vmul.f32 %v3227_v59, %v11020_v31  ;;  %vm9108_vm6 = vmor %vm3244_vm1, %vm3245_vm3 }
 0x573   :  { %v3341_v7 = vpop.f32.mrf.mxu3  ;;  %v6013_v10 = vpop.eup %6012  ;;  %v3361_v12 = vmul.f32 %v9049_v52, %v8976_v35  ;;  %v3271_v34 = vmul.f32 %v6007_v55, %v3174_v56  ;;  %v3248_v16 = vand.u32 2147483647, %v8961_v46  ;;  %v9080_v55 = vor.u32 1.1754944e-38, %v3371_v22 }
 0x574   :  { %6018 = vrcp.f32 %v9047_v58  ;;  %v6015_v29 = vpop.eup %6014  ;;  %v9062_v47 = vadd.f32 1.0, %v6013_v10  ;;  %v3351_v42 = vadd.f32 %v3341_v7, %v11021_v11  ;;  %v3242_v48 = vmul.f32 %v8993_v39, %v3241_v23  ;;  %v3327_v10 = vpop.f32.mrf.mxu2 }
 0x575   :  { %6020 = vpow2.f32 %v5543_v8  ;;  %v9067_v6 = vpop.eup %6016  ;;  %v3272_v30 = vmul.f32 %v6015_v29, %v3189_v54  ;;  %v9073_v24 = vadd.f32 %v3271_v34, %v3269_v40  ;;  %v3362_v3 = vsub.f32 1.0, %v3361_v12 }
 0x576   :  { %6022 = vpow2.f32 %v5542_v26  ;;  %v5544_v4 = vmul.f32 -1.442695, %v3351_v42  ;;  %v3376_v59 = vmul.f32 %v9067_v6, %v9006_v13  ;;  %vm9085_vm2 = vcmp.eq.f32.partialorder %v3248_v16, 8.507059e+37  ;;  %v11024_v42 = vld [vmem:[#allocation38_spill] sm:$0xff] }
 0x577   :  { %6024 = vrcp.f32 %v9062_v47  ;;  %v9078_v14 = vadd.f32 %v3272_v30, %v3270_v61  ;;  %v3251_v7 = vor.u32 1.1754944e-38, %v3250_v17  ;;  %v3243_v40 = vadd.f32 %v8993_v39, %v3242_v48 }
 0x578   :  { %6026 = vtanh.f32 %v3346_v63  ;;  %vm3366_vm4 = vweird.f32 %v9049_v52  ;;  %v3363_v54 = vmul.f32 %v9049_v52, %v3362_v3  ;;  %vm3365_vm5 = vweird.f32 %v8976_v35 }
 0x579   :  { %6028 = vpow2.f32 %v5544_v4  ;;  %v3377_v22 = vsub.f32 1.0, %v3376_v59  ;;  %v3350_v34 = vadd.f32 %v3327_v10, %v11024_v42  ;;  %v3265_v30 = vand.u32 2147483648, %v9047_v58  ;;  %vm9152_vm0 = vmor %vm3365_vm5, %vm3366_vm4 }
 0x57a   :  { %v9076_v26 = vpop.eup %6018  ;;  %6030 = vtanh.f32 %v9073_v24  ;;  %v3263_v3 = vand.u32 2147483647, %v9047_v58  ;;  %v3247_v46 = vsel %vm9108_vm6, %v8993_v39, %v3243_v40  ;;  %vm3259_vm8 = vweird.f32 %v9047_v58 }
 0x57b   :  { %v6021_v57 = vpop.eup %6020  ;;  %v3255_v63 = vmul.f32 %v9076_v26, %v9047_v58  ;;  %6032 = vtanh.f32 %v9078_v14  ;;  %vm3260_vm7 = vweird.f32 %v9076_v26  ;;  %v3409_v10 = vand.u32 2147483648, %v9062_v47 }
 0x57c   :  { %v6023_v56 = vpop.eup %6022  ;;  %v9094_v29 = vadd.f32 1.0, %v6021_v57  ;;  %v3364_v57 = vadd.f32 %v9049_v52, %v3363_v54  ;;  %vm9125_vm9 = vmor %vm3259_vm8, %vm3260_vm7  ;;  %v3266_v39 = vor.u32 1.1754944e-38, %v3265_v30  ;;  %v3407_v40 = vand.u32 2147483647, %v9062_v47 }
 0x57d   :  { %v6025_v12 = vpop.eup %6024  ;;  %v3256_v31 = vsub.f32 1.0, %v3255_v63  ;;  %v9099_v61 = vadd.f32 1.0, %v6023_v56  ;;  %v3252_v54 = vsel %vm9085_vm2, %v3251_v7, %v3247_v46  ;;  %vm3264_vm11 = vcmp.eq.f32.partialorder %v3263_v3, 8.507059e+37 }
 0x57e   :  { %v3399_v11 = vmul.f32 %v6025_v12, %v9062_v47  ;;  %v9104_v16 = vpop.eup %6026  ;;  %6034 = vrcp.f32 %v9094_v29  ;;  %vm3404_vm10 = vweird.f32 %v6025_v12  ;;  %vm3403_vm12 = vweird.f32 %v9062_v47 }
 0x57f   :  { %v3257_v48 = vmul.f32 %v9076_v26, %v3256_v31  ;;  %v6029_v4 = vpop.eup %6028  ;;  %6036 = vrcp.f32 %v9099_v61  ;;  %vm9142_vm13 = vmor %vm3403_vm12, %vm3404_vm10  ;;  %vm3380_vm14 = vweird.f32 %v9006_v13  ;;  %vm3381_vm15 = vweird.f32 %v9067_v6 }
 0x580   :  { %v3400_v59 = vsub.f32 1.0, %v3399_v11  ;;  %v3378_v11 = vmul.f32 %v9067_v6, %v3377_v22  ;;  %v9130_v42 = vadd.f32 1.0, %v6029_v4  ;;  %v6031_v17 = vpop.eup %6030  ;;  %v3410_v4 = vor.u32 1.1754944e-38, %v3409_v10  ;;  %vm9175_vm3 = vmor %vm3380_vm14, %vm3381_vm15 }
 0x581   :  { %v3258_v63 = vadd.f32 %v9076_v26, %v3257_v48  ;;  %v6033_v48 = vpop.eup %6032  ;;  %vm3408_vm1 = vcmp.eq.f32.partialorder %v3407_v40, 8.507059e+37  ;;  %v3384_v10 = vand.u32 2147483647, %v9006_v13  ;;  %vm3418_vm6 = vweird.f32 %v9099_v61 }
 0x582   :  { %v3401_v31 = vmul.f32 %v6025_v12, %v3400_v59  ;;  %6038 = vrcp.f32 %v9130_v42  ;;  %v3379_v3 = vadd.f32 %v9067_v6, %v3378_v11  ;;  %v3277_v59 = vmul.f32 %v6031_v17, %v3252_v54 }
 0x583   :  { %v3262_v58 = vsel %vm9125_vm9, %v9076_v26, %v3258_v63  ;;  %v3368_v63 = vsel %vm9152_vm0, %v9049_v52, %v3364_v57  ;;  %6040 = vtanh.f32 %v3350_v34  ;;  %v3424_v54 = vand.u32 2147483648, %v9099_v61 }
 0x584   :  { %v3402_v8 = vadd.f32 %v6025_v12, %v3401_v31  ;;  %v9140_v22 = vpop.eup %6034  ;;  %v3267_v23 = vsel %vm3264_vm11, %v3266_v39, %v3262_v58  ;;  %v3386_v39 = vand.u32 2147483648, %v9006_v13  ;;  %v3383_v40 = vsel %vm9175_vm3, %v9067_v6, %v3379_v3 }
 0x585   :  { %v6037_v26 = vpop.eup %6036  ;;  %v3278_v46 = vmul.f32 %v6033_v48, %v3267_v23  ;;  %v3439_v58 = vmul.f32 %v9140_v22, %v9094_v29  ;;  %vm3385_vm5 = vcmp.eq.f32.partialorder %v3384_v10, 8.507059e+37  ;;  %vm3444_vm9 = vweird.f32 %v9140_v22 }
 0x586   :  { %v3406_v7 = vsel %vm9142_vm13, %v6025_v12, %v3402_v8  ;;  %v3414_v56 = vmul.f32 %v6037_v26, %v9099_v61  ;;  %v11033_v12 = vand.u32 2147483647, %v8976_v35  ;;  %v3422_v35 = vand.u32 2147483647, %v9099_v61 }
 0x587   :  { %v3411_v31 = vsel %vm3408_vm1, %v3410_v4, %v3406_v7  ;;  %v9167_v8 = vpack.c.bf16 %v3278_v46, %v3277_v59  ;;  %vm3419_vm4 = vweird.f32 %v6037_v26  ;;  %v3387_v6 = vor.u32 1.1754944e-38, %v3386_v39 }
 0x588   :  { %vm3370_vm2 = vcmp.eq.f32.partialorder %v11033_v12, 8.507059e+37  ;;  %v3415_v57 = vsub.f32 1.0, %v3414_v56  ;;  %v9179_v11 = vpop.eup %6038  ;;  %v3468_v13 = vmul.f32 %v3411_v31, %v8797_v9  ;;  %vm3420_vm7 = vmor %vm3418_vm6, %vm3419_vm4  ;;  %v3425_v9 = vor.u32 1.1754944e-38, %v3424_v54 }
 0x589   :  { %v3373_v17 = vsel %vm3370_vm2, %v9080_v55, %v3368_v63  ;;  %3501 = vmatmul.bf16.vlgmr.msra.gmra.mxu1 %v9167_v8  ;;  %3529 = vmatmul.bf16.vlgmr.msrb.gmra.mxu3 %v9167_v8  ;;  %v3454_v48 = vmul.f32 %v9179_v11, %v9130_v42  ;;  %v3440_v55 = vsub.f32 1.0, %v3439_v58  ;;  %v3388_v47 = vsel %vm3385_vm5, %v3387_v6, %v3383_v40  ;;  %v6041_v7 = vpop.eup %6040  ;;  %v11040_v6 = vld [vmem:[#allocation101_spill] sm:$0xff]  ;;  %v11058_v58 = vld [vmem:[#allocation83_spill] sm:$0xff] }
 0x58a   :  { %v3416_v34 = vmul.f32 %v6037_v26, %v3415_v57  ;;  %3740 = vmatpush.bf16.msra.mxu1 %v10816_v19  ;;  %3768 = vmatpush.bf16.msrb.mxu3 %v10817_v15  ;;  %v3470_v30 = vmul.f32 %v9104_v16, %v3373_v17  ;;  %vm3423_vm8 = vcmp.eq.f32.partialorder %v3422_v35, 8.507059e+37  ;;  %v3471_v10 = vmul.f32 %v6041_v7, %v3388_v47  ;;  %v11045_v47 = vld [vmem:[#allocation107_spill] sm:$0xff]  ;;  %v11047_v7 = vld [vmem:[#allocation73_spill] sm:$0xff] }
 0x58b   :  { %v3455_v23 = vsub.f32 1.0, %v3454_v48  ;;  %v3441_v46 = vmul.f32 %v9140_v22, %v3440_v55  ;;  %vm3459_vm10 = vweird.f32 %v9179_v11  ;;  %vm3443_vm11 = vweird.f32 %v9094_v29  ;;  %v11041_v55 = vld [vmem:[#allocation103_spill] sm:$0xff] }
 0x58c   :  { %v3417_v4 = vadd.f32 %v6037_v26, %v3416_v34  ;;  %v9196_v3 = vadd.f32 %v3470_v30, %v3468_v13  ;;  %v3464_v39 = vand.u32 2147483648, %v9130_v42  ;;  %vm9216_vm12 = vmor %vm3443_vm11, %vm3444_vm9  ;;  %v3447_v12 = vand.u32 2147483647, %v9094_v29  ;;  %v11042_v30 = vld [vmem:[#allocation67_spill] sm:$0xff] }
 0x58d   :  { %v3456_v16 = vmul.f32 %v9179_v11, %v3455_v23  ;;  %vm3458_vm13 = vweird.f32 %v9130_v42  ;;  %v3462_v52 = vand.u32 2147483647, %v9130_v42  ;;  %v11044_v23 = vld [vmem:[#allocation105_spill] sm:$0xff] }
 0x58e   :  { %v3421_v59 = vsel %vm3420_vm7, %v6037_v26, %v3417_v4  ;;  %3741 = vmatpush.bf16.msra.mxu1 %v10818_v0  ;;  %3769 = vmatpush.bf16.msrb.mxu3 %v10819_v2  ;;  %6042 = vtanh.f32 %v9196_v3  ;;  %v3442_v26 = vadd.f32 %v9140_v22, %v3441_v46  ;;  %vm3460_vm14 = vmor %vm3458_vm13, %vm3459_vm10  ;;  %v3465_v54 = vor.u32 1.1754944e-38, %v3464_v39  ;;  %v11043_v4 = vld [vmem:[#allocation69_spill] sm:$0xff]  ;;  %v11049_v46 = vld [vmem:[#allocation111_spill] sm:$0xff] }
 0x58f   :  { %v3426_v63 = vsel %vm3423_vm8, %v3425_v9, %v3421_v59  ;;  %v3457_v31 = vadd.f32 %v9179_v11, %v3456_v16  ;;  %vm3448_vm15 = vcmp.eq.f32.partialorder %v3447_v12, 8.507059e+37  ;;  %vm3463_vm0 = vcmp.eq.f32.partialorder %v3462_v52, 8.507059e+37  ;;  %v11046_v9 = vld [vmem:[#allocation71_spill] sm:$0xff]  ;;  %v11048_v59 = vld [vmem:[#allocation109_spill] sm:$0xff]  ;;  %v11060_v52 = vld [vmem:[#allocation120_spill] sm:$0xff] }
 0x590   :  { %v3469_v61 = vmul.f32 %v3426_v63, %v8805_v5  ;;  %v3449_v5 = vand.u32 2147483648, %v9094_v29  ;;  %v3446_v57 = vsel %vm9216_vm12, %v9140_v22, %v3442_v26  ;;  %v11050_v63 = vld [vmem:[#allocation75_spill] sm:$0xff]  ;;  %v11051_v16 = vld [vmem:[#allocation77_spill] sm:$0xff] }
 0x591   :  { %v3461_v17 = vsel %vm3460_vm14, %v9179_v11, %v3457_v31  ;;  %v11039_v11 = vld [vmem:[#allocation99_spill] sm:$0xff]  ;;  %v11055_v31 = vld [vmem:[#allocation81_spill] sm:$0xff] }
 0x592   :  { %v9205_v56 = vadd.f32 %v3471_v10, %v3469_v61  ;;  %3742 = vmatpush.bf16.msra.mxu1 %v10820_v21  ;;  %3770 = vmatpush.bf16.msrb.mxu3 %v10821_v38  ;;  %v3450_v35 = vor.u32 1.1754944e-38, %v3449_v5  ;;  %v3466_v13 = vsel %vm3463_vm0, %v3465_v54, %v3461_v17  ;;  %v11052_v10 = vld [vmem:[#allocation113_spill] sm:$0xff]  ;;  %v11053_v61 = vld [vmem:[#allocation115_spill] sm:$0xff] }
 0x593   :  { %v11054_v26 = vld [vmem:[#allocation79_spill] sm:$0xff]  ;;  %v11056_v5 = vld [vmem:[#allocation117_spill] sm:$0xff] }
 0x594   :  { %6044 = vtanh.f32 %v9205_v56  ;;  %v6043_v40 = vpop.eup %6042  ;;  %v3451_v42 = vsel %vm3448_vm15, %v3450_v35, %v3446_v57  ;;  %v11057_v39 = vld [vmem:[#allocation119_spill] sm:$0xff]  ;;  %v11059_v12 = vld [vmem:[#allocation85_spill] sm:$0xff]  ;;  %v11064_v35 = vld [vmem:[#allocation90_spill] sm:$0xff] }
 0x595   :  { %v3476_v34 = vmul.f32 %v6043_v40, %v3451_v42  ;;  %v11061_v57 = vld [vmem:[#allocation123_spill] sm:$0xff]  ;;  %v11063_v40 = vld [vmem:[#allocation89_spill] sm:$0xff] }
 0x596   :  { %3743 = vmatpush.bf16.msra.mxu1 %v10706_v33  ;;  %3771 = vmatpush.bf16.msrb.mxu3 %v10707_v60  ;;  %v11062_v17 = vld [vmem:[#allocation87_spill] sm:$0xff] }
 0x597   :  { %v11065_v54 = vld [vmem:[#allocation91_spill] sm:$0xff] }
 0x598   :  { %v11067_v42 = vld [vmem:[#allocation127_spill] sm:$0xff] }
 0x599   :  { %3557 = vmatmul.bf16.vlgmr.msrb.gmra.mxu1 %v9167_v8  ;;  %3585 = vmatmul.bf16.vlgmr.msra.gmra.mxu3 %v9167_v8  ;;  %v11038_v8 = vld [vmem:[#allocation97_spill] sm:$0xff] }
 0x59a   :  { %v6045_v29 = vpop.eup %6044  ;;  %3744 = vmatpush.bf16.msra.mxu1 %v10708_v49  ;;  %3772 = vmatpush.bf16.msrb.mxu3 %v10709_v43 }
 0x59b   :  { %v3477_v22 = vmul.f32 %v6045_v29, %v3466_v13  ;;  %v11066_v29 = vld [vmem:[#allocation124_spill] sm:$0xff] }
 0x59c   :  { %v11068_v13 = vld [vmem:[#allocation92_spill] sm:$0xff] }
 0x59d   :  { %v3725_v48 = vpack.c.bf16 %v3477_v22, %v3476_v34  ;;  %v11069_v34 = vld [vmem:[#allocation93_spill] sm:$0xff]  ;;  %v11070_v22 = vld [vmem:[#allocation128_spill] sm:$0xff] }
 0x59e   :  { %3745 = vmatpush.bf16.msra.mxu1 %v10715_v18  ;;  %3773 = vmatpush.bf16.msrb.mxu3 %v7575_v25 }
 0x59f   :  { %3734 = vmatmul.bf16.vlgmr.msrb.gmra.mxu0 %v3725_v48  ;;  %3762 = vmatmul.bf16.vlgmr.msrb.gmra.mxu2 %v3725_v48 }
 0x5a0   :  { %3973 = vmatpush.bf16.msrb.mxu0 %v7242_v62  ;;  %4001 = vmatpush.bf16.msrb.mxu2 %v7246_v45 }
 0x5a2   :  { %3746 = vmatpush.bf16.msra.mxu1 %v7587_v50  ;;  %3774 = vmatpush.bf16.msrb.mxu3 %v7611_v37 }
 0x5a4   :  { %3974 = vmatpush.bf16.msrb.mxu0 %v7255_v44  ;;  %4002 = vmatpush.bf16.msrb.mxu2 %v7261_v51 }
 0x5a6   :  { %3747 = vmatpush.bf16.msra.mxu1 %v7620_v41  ;;  %3775 = vmatpush.bf16.msrb.mxu3 %v7637_v53 }
 0x5a8   :  { %3975 = vmatpush.bf16.msrb.mxu0 %v7271_v36  ;;  %4003 = vmatpush.bf16.msrb.mxu2 %v10636_v32 }
 0x5a9   :  { %3748 = vmatmul.bf16.vlgmr.msra.gmra.mxu1 %v3725_v48  ;;  %3776 = vmatmul.bf16.vlgmr.msrb.gmra.mxu3 %v3725_v48 }
 0x5aa   :  { %3931 = vmatpush.bf16.msrb.mxu1 %v10930_v1  ;;  %3959 = vmatpush.bf16.msra.mxu3 %v10931_v20 }
 0x5ac   :  { %3976 = vmatpush.bf16.msrb.mxu0 %v11038_v8  ;;  %4004 = vmatpush.bf16.msrb.mxu2 %v11039_v11 }
 0x5ae   :  { %3932 = vmatpush.bf16.msrb.mxu1 %v10934_v28  ;;  %3960 = vmatpush.bf16.msra.mxu3 %v10935_v27 }
 0x5af   :  { %3925 = vmatmul.bf16.vlgmr.msra.gmra.mxu0 %v3725_v48  ;;  %3953 = vmatmul.bf16.vlgmr.msra.gmra.mxu2 %v3725_v48 }
 0x5b0   :  { %3977 = vmatpush.bf16.msrb.mxu0 %v11040_v6  ;;  %4005 = vmatpush.bf16.msrb.mxu2 %v11041_v55 }
 0x5b2   :  { %3933 = vmatpush.bf16.msrb.mxu1 %v11042_v30  ;;  %3961 = vmatpush.bf16.msra.mxu3 %v11043_v4 }
 0x5b4   :  { %3978 = vmatpush.bf16.msrb.mxu0 %v11044_v23  ;;  %4006 = vmatpush.bf16.msrb.mxu2 %v11045_v47 }
 0x5b6   :  { %3934 = vmatpush.bf16.msrb.mxu1 %v11046_v9  ;;  %3962 = vmatpush.bf16.msra.mxu3 %v11047_v7 }
 0x5b8   :  { %3979 = vmatpush.bf16.msrb.mxu0 %v11048_v59  ;;  %4007 = vmatpush.bf16.msrb.mxu2 %v11049_v46 }
 0x5ba   :  { %3935 = vmatpush.bf16.msrb.mxu1 %v11050_v63  ;;  %3963 = vmatpush.bf16.msra.mxu3 %v11051_v16 }
 0x5bc   :  { %3980 = vmatpush.bf16.msrb.mxu0 %v11052_v10  ;;  %4008 = vmatpush.bf16.msrb.mxu2 %v11053_v61  ;;  %v11112_v10 = vld [vmem:[#allocation145_spill] sm:$0xff] }
 0x5be   :  { %3936 = vmatpush.bf16.msrb.mxu1 %v11054_v26  ;;  %3964 = vmatpush.bf16.msra.mxu3 %v11055_v31  ;;  %v11107_v31 = vld [vmem:[#allocation88_spill] sm:$0xff]  ;;  %v3516_v26 = vpop.f32.mrf.mxu2 }
 0x5bf   :  { %3981 = vmatmul.bf16.vlgmr.msrb.gmra.mxu0 %v3725_v48  ;;  %4009 = vmatmul.bf16.vlgmr.msrb.gmra.mxu2 %v3725_v48  ;;  %v11071_v48 = vld [vmem:[#allocation131_spill] sm:$0xff] }
 0x5c0   :  { %4164 = vmatpush.bf16.msra.mxu0 %v11056_v5  ;;  %4192 = vmatpush.bf16.msra.mxu2 %v11057_v39  ;;  %v11072_v5 = vld [vmem:[#allocation94_spill] sm:$0xff]  ;;  %v11073_v39 = vld [vmem:[#allocation96_spill] sm:$0xff] }
 0x5c2   :  { %3937 = vmatpush.bf16.msrb.mxu1 %v11058_v58  ;;  %3965 = vmatpush.bf16.msra.mxu3 %v11059_v12  ;;  %v11104_v12 = vld [vmem:[#allocation82_spill] sm:$0xff] }
 0x5c3   :  { %v11106_v58 = vld [vmem:[#allocation86_spill] sm:$0xff] }
 0x5c4   :  { %4165 = vmatpush.bf16.msra.mxu0 %v11060_v52  ;;  %4193 = vmatpush.bf16.msra.mxu2 %v11061_v57  ;;  %v11074_v52 = vld [vmem:[#allocation132_spill] sm:$0xff]  ;;  %v11075_v57 = vld [vmem:[#allocation135_spill] sm:$0xff] }
 0x5c6   :  { %3938 = vmatpush.bf16.msrb.mxu1 %v11062_v17  ;;  %3966 = vmatpush.bf16.msra.mxu3 %v11063_v40  ;;  %v11100_v40 = vld [vmem:[#allocation74_spill] sm:$0xff]  ;;  %v11103_v17 = vld [vmem:[#allocation80_spill] sm:$0xff] }
 0x5c8   :  { %4166 = vmatpush.bf16.msra.mxu0 %v11066_v29  ;;  %4194 = vmatpush.bf16.msra.mxu2 %v11067_v42  ;;  %v11077_v29 = vld [vmem:[#allocation100_spill] sm:$0xff] }
 0x5c9   :  { %v11078_v42 = vld [vmem:[#allocation136_spill] sm:$0xff] }
 0x5ca   :  { %3987 = vmatpush.bf16.msra.mxu1 %v11064_v35  ;;  %4015 = vmatpush.bf16.msrb.mxu3 %v11065_v54  ;;  %v11076_v54 = vld [vmem:[#allocation98_spill] sm:$0xff]  ;;  %v11099_v35 = vld [vmem:[#allocation72_spill] sm:$0xff] }
 0x5cc   :  { %4167 = vmatpush.bf16.msra.mxu0 %v11070_v22  ;;  %4195 = vmatpush.bf16.msra.mxu2 %v11071_v48  ;;  %v11081_v22 = vld [vmem:[#allocation104_spill] sm:$0xff] }
 0x5cd   :  { %v11082_v48 = vld [vmem:[#allocation140_spill] sm:$0xff] }
 0x5ce   :  { %3988 = vmatpush.bf16.msra.mxu1 %v11068_v13  ;;  %4016 = vmatpush.bf16.msrb.mxu3 %v11069_v34  ;;  %v11079_v13 = vld [vmem:[#allocation139_spill] sm:$0xff]  ;;  %v11080_v34 = vld [vmem:[#allocation102_spill] sm:$0xff] }
 0x5d0   :  { %4168 = vmatpush.bf16.msra.mxu0 %v11074_v52  ;;  %4196 = vmatpush.bf16.msra.mxu2 %v11075_v57  ;;  %v11085_v52 = vld [vmem:[#allocation108_spill] sm:$0xff]  ;;  %v11086_v57 = vld [vmem:[#allocation142_spill] sm:$0xff] }
 0x5d2   :  { %3989 = vmatpush.bf16.msra.mxu1 %v11072_v5  ;;  %4017 = vmatpush.bf16.msrb.mxu3 %v11073_v39  ;;  %v11083_v5 = vld [vmem:[#allocation141_spill] sm:$0xff]  ;;  %v11084_v39 = vld [vmem:[#allocation106_spill] sm:$0xff] }
 0x5d4   :  { %4169 = vmatpush.bf16.msra.mxu0 %v11078_v42  ;;  %4197 = vmatpush.bf16.msra.mxu2 %v11079_v13  ;;  %v11089_v42 = vld [vmem:[#allocation60_spill] sm:$0xff]  ;;  %v11090_v13 = vld [vmem:[#allocation110_spill] sm:$0xff] }
 0x5d6   :  { %3990 = vmatpush.bf16.msra.mxu1 %v11076_v54  ;;  %4018 = vmatpush.bf16.msrb.mxu3 %v11077_v29  ;;  %v11087_v54 = vld [vmem:[#allocation143_spill] sm:$0xff]  ;;  %v11088_v29 = vld [vmem:[#allocation58_spill] sm:$0xff] }
 0x5d8   :  { %4170 = vmatpush.bf16.msra.mxu0 %v11082_v48  ;;  %4198 = vmatpush.bf16.msra.mxu2 %v11083_v5  ;;  %v11093_v48 = vld [vmem:[#allocation64_spill] sm:$0xff]  ;;  %v11094_v5 = vld [vmem:[#allocation114_spill] sm:$0xff] }
 0x5da   :  { %3991 = vmatpush.bf16.msra.mxu1 %v11080_v34  ;;  %4019 = vmatpush.bf16.msrb.mxu3 %v11081_v22  ;;  %v11091_v34 = vld [vmem:[#allocation112_spill] sm:$0xff]  ;;  %v11092_v22 = vld [vmem:[#allocation62_spill] sm:$0xff] }
 0x5dc   :  { %4171 = vmatpush.bf16.msra.mxu0 %v11086_v57  ;;  %4199 = vmatpush.bf16.msra.mxu2 %v11087_v54  ;;  %v11097_v57 = vld [vmem:[#allocation68_spill] sm:$0xff]  ;;  %v11098_v54 = vld [vmem:[#allocation70_spill] sm:$0xff] }
 0x5de   :  { %3992 = vmatpush.bf16.msra.mxu1 %v11084_v39  ;;  %4020 = vmatpush.bf16.msrb.mxu3 %v11085_v52  ;;  %v11095_v39 = vld [vmem:[#allocation116_spill] sm:$0xff]  ;;  %v11096_v52 = vld [vmem:[#allocation66_spill] sm:$0xff] }
 0x5e0   :  { %4355 = vmatpush.bf16.msrb.mxu0 %v11088_v29  ;;  %4383 = vmatpush.bf16.msrb.mxu2 %v11089_v42 }
 0x5e2   :  { %3993 = vmatpush.bf16.msra.mxu1 %v11090_v13  ;;  %4021 = vmatpush.bf16.msrb.mxu3 %v11091_v34  ;;  %v11101_v13 = vld [vmem:[#allocation76_spill] sm:$0xff]  ;;  %v11102_v34 = vld [vmem:[#allocation78_spill] sm:$0xff] }
 0x5e4   :  { %4356 = vmatpush.bf16.msrb.mxu0 %v11092_v22  ;;  %4384 = vmatpush.bf16.msrb.mxu2 %v11093_v48  ;;  %v3518_v48 = vpop.f32.mrf.mxu2 }
 0x5e6   :  { %3994 = vmatpush.bf16.msra.mxu1 %v11094_v5  ;;  %4022 = vmatpush.bf16.msrb.mxu3 %v11095_v39  ;;  %v11105_v5 = vld [vmem:[#allocation84_spill] sm:$0xff]  ;;  %v3488_v39 = vpop.f32.mrf.mxu0 }
 0x5e8   :  { %4357 = vmatpush.bf16.msrb.mxu0 %v11096_v52  ;;  %4385 = vmatpush.bf16.msrb.mxu2 %v11097_v57 }
 0x5ec   :  { %4358 = vmatpush.bf16.msrb.mxu0 %v11098_v54  ;;  %4386 = vmatpush.bf16.msrb.mxu2 %v11099_v35  ;;  %v11108_v35 = vld [vmem:[#allocation95_spill] sm:$0xff] }
 0x5ed   :  { %v3489_v57 = vadd.f32 %v3488_v39, %v11108_v35 }
 0x5ee   :  { %v3490_v54 = vpop.f32.mrf.mxu0 }
 0x5f0   :  { %4359 = vmatpush.bf16.msrb.mxu0 %v11100_v40  ;;  %4387 = vmatpush.bf16.msrb.mxu2 %v11101_v13 }
 0x5f4   :  { %4360 = vmatpush.bf16.msrb.mxu0 %v11102_v34  ;;  %4388 = vmatpush.bf16.msrb.mxu2 %v11103_v17  ;;  %v11109_v34 = vld [vmem:[#allocation7_spill] sm:$0xff] }
 0x5f5   :  { %v3517_v63 = vadd.f32 %v3516_v26, %v11109_v34 }
 0x5f6   :  { %v3544_v16 = vpop.f32.mrf.mxu0 }
 0x5f7   :  { %v3545_v4 = vadd.f32 %v3544_v16, %v11112_v10 }
 0x5f8   :  { %4361 = vmatpush.bf16.msrb.mxu0 %v11104_v12  ;;  %4389 = vmatpush.bf16.msrb.mxu2 %v11105_v5  ;;  %v3491_v12 = vadd.f32 %v3490_v54, %v11108_v35 }
 0x5fc   :  { %4362 = vmatpush.bf16.msrb.mxu0 %v11106_v58  ;;  %4390 = vmatpush.bf16.msrb.mxu2 %v11107_v31 }
 0x5fe   :  { %v3546_v39 = vpop.f32.mrf.mxu0 }
 0x5ff   :  { %v3547_v30 = vadd.f32 %v3546_v39, %v11112_v10  ;;  %v11113_v39 = vld [vmem:[#allocation44_spill] sm:$0xff] }
 0x606   :  { %v3502_v40 = vpop.f32.mrf.mxu1 }
 0x607   :  { %v3503_v52 = vadd.f32 %v3502_v40, %v3489_v57  ;;  %v3519_v40 = vadd.f32 %v3518_v48, %v11109_v34 }
 0x609   :  { %v5545_v13 = vmul.f32 -1.442695, %v3503_v52 }
 0x60b   :  { %6046 = vpow2.f32 %v5545_v13 }
 0x60c   :  { %v3530_v17 = vpop.f32.mrf.mxu3 }
 0x60d   :  { %v3531_v5 = vadd.f32 %v3530_v17, %v3517_v63  ;;  %v3572_v17 = vpop.f32.mrf.mxu2 }
 0x60e   :  { %v3504_v22 = vpop.f32.mrf.mxu1 }
 0x60f   :  { %v5547_v58 = vmul.f32 -1.442695, %v3531_v5  ;;  %v3505_v7 = vadd.f32 %v3504_v22, %v3491_v12  ;;  %v11111_v5 = vld [vmem:[#allocation40_spill] sm:$0xff] }
 0x611   :  { %v6047_v31 = vpop.eup %6046  ;;  %6048 = vpow2.f32 %v5547_v58  ;;  %v5546_v9 = vmul.f32 -1.442695, %v3505_v7 }
 0x612   :  { %v9322_v42 = vadd.f32 1.0, %v6047_v31  ;;  %v11110_v31 = vld [vmem:[#allocation144_spill] sm:$0xff] }
 0x613   :  { %6050 = vpow2.f32 %v5546_v9  ;;  %v3573_v58 = vadd.f32 %v3572_v17, %v11110_v31 }
 0x614   :  { %v3532_v52 = vpop.f32.mrf.mxu3  ;;  %6052 = vrcp.f32 %v9322_v42  ;;  %vm3604_vm1 = vweird.f32 %v9322_v42 }
 0x615   :  { %v3533_v26 = vadd.f32 %v3532_v52, %v3519_v40 }
 0x616   :  { %v3558_v13 = vpop.f32.mrf.mxu1 }
 0x617   :  { %v6049_v57 = vpop.eup %6048  ;;  %v5548_v63 = vmul.f32 -1.442695, %v3533_v26  ;;  %v3559_v16 = vadd.f32 %v3558_v13, %v3545_v4 }
 0x618   :  { %v9326_v54 = vadd.f32 1.0, %v6049_v57 }
 0x619   :  { %v6051_v12 = vpop.eup %6050  ;;  %6054 = vpow2.f32 %v5548_v63 }
 0x61a   :  { %6056 = vrcp.f32 %v9326_v54  ;;  %v9329_v7 = vadd.f32 1.0, %v6051_v12  ;;  %v9332_v9 = vpop.eup %6052  ;;  %v3648_v47 = vand.u32 2147483648, %v9326_v54  ;;  %vm3642_vm5 = vweird.f32 %v9326_v54 }
 0x61b   :  { %v3600_v63 = vmul.f32 %v9332_v9, %v9322_v42  ;;  %vm3605_vm2 = vweird.f32 %v9332_v9 }
 0x61c   :  { %6058 = vrcp.f32 %v9329_v7  ;;  %v3735_v22 = vpop.f32.mrf.mxu0  ;;  %v3586_v48 = vpop.f32.mrf.mxu3  ;;  %vm9384_vm6 = vmor %vm3604_vm1, %vm3605_vm2  ;;  %vm3619_vm7 = vweird.f32 %v9329_v7 }
 0x61d   :  { %v3782_v40 = vadd.f32 %v3735_v22, %v11111_v5  ;;  %v3587_v52 = vadd.f32 %v3586_v48, %v3573_v58  ;;  %v3574_v58 = vpop.f32.mrf.mxu2  ;;  %v3601_v22 = vsub.f32 1.0, %v3600_v63  ;;  %v3610_v5 = vand.u32 2147483648, %v9322_v42 }
 0x61e   :  { %v3560_v26 = vpop.f32.mrf.mxu1 }
 0x61f   :  { %v6055_v57 = vpop.eup %6054  ;;  %v5551_v34 = vmul.f32 -1.442695, %v3782_v40  ;;  %v5549_v35 = vmul.f32 -1.442695, %v3587_v52  ;;  %v3611_v27 = vor.u32 1.1754944e-38, %v3610_v5 }
 0x620   :  { %v9338_v12 = vpop.eup %6056  ;;  %v9340_v29 = vadd.f32 1.0, %v6055_v57 }
 0x621   :  { %v3638_v17 = vmul.f32 %v9338_v12, %v9326_v54  ;;  %6060 = vpow2.f32 %v5551_v34  ;;  %v3575_v34 = vadd.f32 %v3574_v58, %v11110_v31  ;;  %vm3643_vm3 = vweird.f32 %v9338_v12 }
 0x622   :  { %v9344_v61 = vpop.eup %6058  ;;  %6062 = vrcp.f32 %v9340_v29  ;;  %vm9392_vm8 = vmor %vm3642_vm5, %vm3643_vm3  ;;  %vm3657_vm12 = vweird.f32 %v9340_v29 }
 0x623   :  { %v3639_v48 = vsub.f32 1.0, %v3638_v17  ;;  %6064 = vpow2.f32 %v5549_v35  ;;  %v3615_v52 = vmul.f32 %v9344_v61, %v9329_v7  ;;  %v3602_v17 = vmul.f32 %v9332_v9, %v3601_v22 }
 0x624   :  { %v3588_v40 = vpop.f32.mrf.mxu3  ;;  %v3737_v57 = vpop.f32.mrf.mxu0  ;;  %v3608_v35 = vand.u32 2147483647, %v9322_v42  ;;  %v3561_v42 = vadd.f32 %v3560_v26, %v3547_v30  ;;  %vm3620_vm11 = vweird.f32 %v9344_v61  ;;  %v11123_v30 = vld [vmem:[#allocation43_spill] sm:$0xff] }
 0x625   :  { %v3640_v63 = vmul.f32 %v9338_v12, %v3639_v48  ;;  %v3786_v58 = vadd.f32 %v3737_v57, %v11113_v39  ;;  %v3616_v31 = vsub.f32 1.0, %v3615_v52  ;;  %v3589_v22 = vadd.f32 %v3588_v40, %v3575_v34  ;;  %v11116_v57 = vld [vmem:[#allocation48_spill] sm:$0xff]  ;;  %vm9439_vm14 = vmor %vm3619_vm7, %vm3620_vm11 }
 0x626   :  { %v3749_v46 = vpop.f32.mrf.mxu1  ;;  %v3646_v48 = vand.u32 2147483647, %v9326_v54  ;;  %vm9372_vm4 = vcmp.eq.f32.partialorder %v3608_v35, 8.507059e+37  ;;  %v3649_v40 = vor.u32 1.1754944e-38, %v3648_v47 }
 0x627   :  { %v6061_v59 = vpop.eup %6060  ;;  %v3641_v52 = vadd.f32 %v9338_v12, %v3640_v63  ;;  %v3783_v39 = vadd.f32 %v3749_v46, %v11116_v57  ;;  %v5552_v34 = vmul.f32 -1.442695, %v3786_v58  ;;  %v3617_v63 = vmul.f32 %v9344_v61, %v3616_v31  ;;  %v3763_v57 = vpop.f32.mrf.mxu2 }
 0x628   :  { %v9357_v28 = vpop.eup %6062  ;;  %v9360_v23 = vadd.f32 1.0, %v6061_v59  ;;  %v3603_v59 = vadd.f32 %v9332_v9, %v3602_v17  ;;  %v5550_v46 = vmul.f32 -1.442695, %v3589_v22  ;;  %vm9396_vm9 = vcmp.eq.f32.partialorder %v3646_v48, 8.507059e+37 }
 0x629   :  { %v6065_v10 = vpop.eup %6064  ;;  %v3653_v20 = vmul.f32 %v9357_v28, %v9340_v29  ;;  %v3625_v17 = vand.u32 2147483648, %v9329_v7  ;;  %v3663_v31 = vand.u32 2147483648, %v9340_v29  ;;  %v5553_v58 = vmul.f32 -1.442695, %v3783_v39 }
 0x62a   :  { %6066 = vrcp.f32 %v9360_v23  ;;  %v9369_v5 = vadd.f32 1.0, %v6065_v10  ;;  %v3607_v35 = vsel %vm9384_vm6, %v9332_v9, %v3603_v59  ;;  %vm3658_vm10 = vweird.f32 %v9357_v28 }
 0x62b   :  { %v3654_v4 = vsub.f32 1.0, %v3653_v20  ;;  %6068 = vtanh.f32 %v3559_v16  ;;  %v3645_v16 = vsel %vm9392_vm8, %v9338_v12, %v3641_v52  ;;  %v3618_v9 = vadd.f32 %v9344_v61, %v3617_v63  ;;  %v11124_v20 = vld [vmem:[#allocation51_spill] sm:$0xff]  ;;  %vm9428_vm13 = vmor %vm3657_vm12, %vm3658_vm10 }
 0x62c   :  { %v3777_v1 = vpop.f32.mrf.mxu3  ;;  %6070 = vrcp.f32 %v9369_v5  ;;  %v3650_v52 = vsel %vm9396_vm9, %v3649_v40, %v3645_v16  ;;  %v3612_v40 = vsel %vm9372_vm4, %v3611_v27, %v3607_v35  ;;  %vm3803_vm2 = vweird.f32 %v9360_v23 }
 0x62d   :  { %v3655_v10 = vmul.f32 %v9357_v28, %v3654_v4  ;;  %6072 = vpow2.f32 %v5552_v34  ;;  %v3785_v26 = vadd.f32 %v3777_v1, %v11123_v30  ;;  %v3623_v34 = vand.u32 2147483647, %v9329_v7 }
 0x62e   :  { %v3751_v22 = vpop.f32.mrf.mxu1  ;;  %6074 = vpow2.f32 %v5550_v46  ;;  %v3661_v30 = vand.u32 2147483647, %v9340_v29  ;;  %v3626_v46 = vor.u32 1.1754944e-38, %v3625_v17  ;;  %v11129_v17 = vld [vmem:[#allocation47_spill] sm:$0xff]  ;;  %vm3682_vm6 = vweird.f32 %v9369_v5 }
 0x62f   :  { %v3656_v59 = vadd.f32 %v9357_v28, %v3655_v10  ;;  %6076 = vpow2.f32 %v5553_v58  ;;  %v5555_v39 = vmul.f32 -1.442695, %v3785_v26  ;;  %v3787_v47 = vadd.f32 %v3751_v22, %v11124_v20 }
 0x630   :  { %v9409_v48 = vpop.eup %6066  ;;  %6078 = vtanh.f32 %v3561_v42  ;;  %v3664_v58 = vor.u32 1.1754944e-38, %v3663_v31  ;;  %v3707_v22 = vmul.f32 %v3650_v52, %v9073_v24  ;;  %v3622_v42 = vsel %vm9439_vm14, %v9344_v61, %v3618_v9  ;;  %v11130_v52 = vld [vmem:[#allocation42_spill] sm:$0xff] }
 0x631   :  { %v3799_v4 = vmul.f32 %v9409_v48, %v9360_v23  ;;  %v6069_v12 = vpop.eup %6068  ;;  %v5554_v54 = vmul.f32 -1.442695, %v3787_v47  ;;  %v3660_v13 = vsel %vm9428_vm13, %v9357_v28, %v3656_v59  ;;  %6080 = vpow2.f32 %v5555_v39 }
 0x632   :  { %v9424_v63 = vpop.eup %6070  ;;  %v3709_v35 = vmul.f32 %v6069_v12, %v3612_v40  ;;  %vm3662_vm15 = vcmp.eq.f32.partialorder %v3661_v30, 8.507059e+37  ;;  %vm3624_vm0 = vcmp.eq.f32.partialorder %v3623_v34, 8.507059e+37  ;;  %v3784_v39 = vadd.f32 %v3763_v57, %v11130_v52 }
 0x633   :  { %v3800_v1 = vsub.f32 1.0, %v3799_v4  ;;  %v6073_v27 = vpop.eup %6072  ;;  %6082 = vpow2.f32 %v5554_v54  ;;  %v3678_v26 = vmul.f32 %v9424_v63, %v9369_v5  ;;  %v3665_v59 = vsel %vm3662_vm15, %v3664_v58, %v3660_v13 }
 0x634   :  { %v3779_v16 = vpop.f32.mrf.mxu3  ;;  %v6075_v7 = vpop.eup %6074  ;;  %v9453_v4 = vadd.f32 1.0, %v6073_v27  ;;  %v9458_v61 = vadd.f32 %v3709_v35, %v3707_v22  ;;  %v3627_v9 = vsel %vm3624_vm0, %v3626_v46, %v3622_v42  ;;  %vm3804_vm1 = vweird.f32 %v9409_v48  ;;  %v11134_v42 = vld [vmem:[#allocation46_spill] sm:$0xff] }
 0x635   :  { %v3801_v24 = vmul.f32 %v9409_v48, %v3800_v1  ;;  %v3789_v31 = vadd.f32 %v3779_v16, %v11129_v17  ;;  %v6077_v28 = vpop.eup %6076  ;;  %v9456_v20 = vadd.f32 1.0, %v6075_v7  ;;  %v3679_v10 = vsub.f32 1.0, %v3678_v26  ;;  %v3765_v46 = vpop.f32.mrf.mxu2  ;;  %vm9475_vm3 = vmor %vm3803_vm2, %vm3804_vm1 }
 0x636   :  { %11131 = vst [vmem:[#allocation11_spill] sm:$0xff] %v9458_v61  ;;  %6084 = vrcp.f32 %v9453_v4  ;;  %v9461_v47 = vadd.f32 1.0, %v6077_v28  ;;  %v6079_v12 = vpop.eup %6078  ;;  %v3708_v57 = vmul.f32 %v3665_v59, %v9078_v14  ;;  %v3809_v40 = vand.u32 2147483648, %v9360_v23 }
 0x637   :  { %v3802_v1 = vadd.f32 %v9409_v48, %v3801_v24  ;;  %6086 = vrcp.f32 %v9456_v20  ;;  %v5556_v34 = vmul.f32 -1.442695, %v3789_v31  ;;  %v6081_v30 = vpop.eup %6080  ;;  %v3688_v16 = vand.u32 2147483648, %v9369_v5 }
 0x638   :  { %6088 = vrcp.f32 %v9461_v47  ;;  %v3807_v58 = vand.u32 2147483647, %v9360_v23  ;;  %v3686_v22 = vand.u32 2147483647, %v9369_v5  ;;  %v3710_v29 = vmul.f32 %v6079_v12, %v3627_v9 }
 0x639   :  { %v6083_v54 = vpop.eup %6082  ;;  %6090 = vtanh.f32 %v3784_v39  ;;  %v9479_v14 = vadd.f32 1.0, %v6081_v30  ;;  %v3806_v27 = vsel %vm9475_vm3, %v9409_v48, %v3802_v1  ;;  %v3788_v24 = vadd.f32 %v3765_v46, %v11134_v42 }
 0x63a   :  { %v9485_v17 = vadd.f32 1.0, %v6083_v54  ;;  %6092 = vpow2.f32 %v5556_v34  ;;  %v3680_v31 = vmul.f32 %v9424_v63, %v3679_v10  ;;  %v9491_v7 = vadd.f32 %v3710_v29, %v3708_v57 }
 0x63b   :  { %6094 = vtanh.f32 %v9458_v61  ;;  %v3810_v35 = vor.u32 1.1754944e-38, %v3809_v40  ;;  %v9495_v28 = vor.u32 1.1754944e-38, %v3688_v16  ;;  %vm3808_vm4 = vcmp.eq.f32.partialorder %v3807_v58, 8.507059e+37 }
 0x63c   :  { %v9487_v23 = vpop.eup %6084  ;;  %11135 = vst [vmem:[#allocation15_spill] sm:$0xff] %v9491_v7  ;;  %6096 = vrcp.f32 %v9479_v14  ;;  %vm3683_vm5 = vweird.f32 %v9424_v63  ;;  %v3701_v12 = vand.u32 2147483647, %v9456_v20  ;;  %v3681_v30 = vadd.f32 %v9424_v63, %v3680_v31 }
 0x63d   :  { %v9493_v26 = vpop.eup %6086  ;;  %v3814_v48 = vmul.f32 %v9487_v23, %v9453_v4  ;;  %v3811_v52 = vsel %vm3808_vm4, %v3810_v35, %v3806_v27  ;;  %6098 = vrcp.f32 %v9485_v17  ;;  %vm3697_vm7 = vweird.f32 %v9456_v20  ;;  %vm3684_vm2 = vmor %vm3682_vm6, %vm3683_vm5 }
 0x63e   :  { %v6089_v59 = vpop.eup %6088  ;;  %v3693_v39 = vmul.f32 %v9493_v26, %v9456_v20  ;;  %6100 = vtanh.f32 %v3788_v24  ;;  %vm9510_vm8 = vcmp.eq.f32.partialorder %v3686_v22, 8.507059e+37  ;;  %v3703_v54 = vand.u32 2147483648, %v9456_v20 }
 0x63f   :  { %v3815_v9 = vsub.f32 1.0, %v3814_v48  ;;  %v3837_v1 = vmul.f32 %v6089_v59, %v9461_v47  ;;  %v6091_v34 = vpop.eup %6090  ;;  %6102 = vtanh.f32 %v9491_v7  ;;  %vm3841_vm9 = vweird.f32 %v9461_v47 }
 0x640   :  { %v3694_v10 = vsub.f32 1.0, %v3693_v39  ;;  %v6093_v57 = vpop.eup %6092  ;;  %v3908_v46 = vmul.f32 %v6091_v34, %v3811_v52  ;;  %v3847_v27 = vand.u32 2147483648, %v9461_v47  ;;  %vm9523_vm10 = vcmp.eq.f32.partialorder %v3701_v12, 8.507059e+37 }
 0x641   :  { %v3838_v16 = vsub.f32 1.0, %v3837_v1  ;;  %v3816_v58 = vmul.f32 %v9487_v23, %v3815_v9  ;;  %v6095_v29 = vpop.eup %6094  ;;  %v9519_v42 = vadd.f32 1.0, %v6093_v57  ;;  %vm3842_vm11 = vweird.f32 %v6089_v59 }
 0x642   :  { %v3695_v13 = vmul.f32 %v9493_v26, %v3694_v10  ;;  %v9521_v24 = vpop.eup %6096  ;;  %v3845_v35 = vand.u32 2147483647, %v9461_v47  ;;  %vm3818_vm12 = vweird.f32 %v9453_v4  ;;  %vm3819_vm13 = vweird.f32 %v9487_v23  ;;  %vm3843_vm15 = vmor %vm3841_vm9, %vm3842_vm11 }
 0x643   :  { %v3839_v31 = vmul.f32 %v6089_v59, %v3838_v16  ;;  %v6099_v48 = vpop.eup %6098  ;;  %v3817_v52 = vadd.f32 %v9487_v23, %v3816_v58  ;;  %v3822_v39 = vand.u32 2147483647, %v9453_v4  ;;  %6104 = vrcp.f32 %v9519_v42  ;;  %vm9546_vm1 = vmor %vm3818_vm12, %vm3819_vm13 }
 0x644   :  { %v6101_v9 = vpop.eup %6100  ;;  %v3704_v12 = vor.u32 1.1754944e-38, %v3703_v54  ;;  %v3824_v34 = vand.u32 2147483648, %v9453_v4  ;;  %v3852_v10 = vmul.f32 %v6099_v48, %v9485_v17  ;;  %v3696_v16 = vadd.f32 %v9493_v26, %v3695_v13 }
 0x645   :  { %v3840_v1 = vadd.f32 %v6089_v59, %v3839_v31  ;;  %v6103_v57 = vpop.eup %6102  ;;  %vm3698_vm14 = vweird.f32 %v9493_v26  ;;  %v3848_v58 = vor.u32 1.1754944e-38, %v3847_v27  ;;  %v3877_v7 = vmul.f32 %v9521_v24, %v9479_v14 }
 0x646   :  { %vm3846_vm0 = vcmp.eq.f32.partialorder %v3845_v35, 8.507059e+37  ;;  %v3853_v13 = vsub.f32 1.0, %v3852_v10  ;;  %v3860_v31 = vand.u32 2147483647, %v9485_v17  ;;  %vm9558_vm3 = vcmp.eq.f32.partialorder %v3822_v39, 8.507059e+37  ;;  %vm9565_vm4 = vmor %vm3697_vm7, %vm3698_vm14 }
 0x647   :  { %v3844_v61 = vsel %vm3843_vm15, %v6089_v59, %v3840_v1  ;;  %v3821_v59 = vsel %vm9546_vm1, %v9487_v23, %v3817_v52  ;;  %v3862_v4 = vand.u32 2147483648, %v9485_v17  ;;  %vm3857_vm5 = vweird.f32 %v6099_v48 }
 0x648   :  { %v3849_v47 = vsel %vm3846_vm0, %v3848_v58, %v3844_v61  ;;  %v3854_v1 = vmul.f32 %v6099_v48, %v3853_v13  ;;  %v3685_v61 = vsel %vm3684_vm2, %v9424_v63, %v3681_v30  ;;  %v3825_v23 = vor.u32 1.1754944e-38, %v3824_v34 }
 0x649   :  { %v3906_v5 = vmul.f32 %v3849_v47, %v9196_v3  ;;  %v6105_v10 = vpop.eup %6104  ;;  %v3878_v52 = vsub.f32 1.0, %v3877_v7  ;;  %v3690_v39 = vsel %vm9510_vm8, %v9495_v28, %v3685_v61  ;;  %v3700_v20 = vsel %vm9565_vm4, %v9493_v26, %v3696_v16 }
 0x64a   :  { %v3855_v58 = vadd.f32 %v6099_v48, %v3854_v1  ;;  %vm3856_vm6 = vweird.f32 %v9485_v17  ;;  %vm3861_vm7 = vcmp.eq.f32.partialorder %v3860_v31, 8.507059e+37  ;;  %v3892_v3 = vmul.f32 %v6105_v10, %v9519_v42 }
 0x64b   :  { %v9579_v54 = vadd.f32 %v3908_v46, %v3906_v5  ;;  %v3826_v63 = vsel %vm9558_vm3, %v3825_v23, %v3821_v59  ;;  %vm3858_vm9 = vmor %vm3856_vm6, %vm3857_vm5  ;;  %v3863_v7 = vor.u32 1.1754944e-38, %v3862_v4  ;;  %v3705_v28 = vsel %vm9523_vm10, %v3704_v12, %v3700_v20  ;;  %v11163_v23 = vld [vmem:[#allocation73_spill] sm:$0xff]  ;;  %v11166_v20 = vld [vmem:[#allocation75_spill] sm:$0xff] }
 0x64c   :  { %v3859_v30 = vsel %vm3858_vm9, %v6099_v48, %v3855_v58  ;;  %v3893_v40 = vsub.f32 1.0, %v3892_v3  ;;  %v3715_v34 = vmul.f32 %v6095_v29, %v3690_v39  ;;  %v3716_v26 = vmul.f32 %v6103_v57, %v3705_v28  ;;  %v11165_v39 = vld [vmem:[#allocation64_spill] sm:$0xff]  ;;  %v11167_v58 = vld [vmem:[#allocation77_spill] sm:$0xff]  ;;  %v11168_v3 = vld [vmem:[#allocation66_spill] sm:$0xff] }
 0x64d   :  { %v3879_v16 = vmul.f32 %v9521_v24, %v3878_v52  ;;  %v3864_v17 = vsel %vm3861_vm7, %v3863_v7, %v3859_v30  ;;  %v3909_v13 = vmul.f32 %v6101_v9, %v3826_v63  ;;  %6106 = vtanh.f32 %v9579_v54  ;;  %v11164_v52 = vld [vmem:[#allocation62_spill] sm:$0xff]  ;;  %v11169_v63 = vld [vmem:[#allocation68_spill] sm:$0xff]  ;;  %v11170_v7 = vld [vmem:[#allocation79_spill] sm:$0xff] }
 0x64e   :  { %v3907_v31 = vmul.f32 %v3864_v17, %v9205_v56  ;;  %v3894_v46 = vmul.f32 %v6105_v10, %v3893_v40  ;;  %v3916_v47 = vpack.c.bf16 %v3716_v26, %v3715_v34  ;;  %vm3882_vm8 = vweird.f32 %v9521_v24  ;;  %v11171_v28 = vld [vmem:[#allocation81_spill] sm:$0xff]  ;;  %v11172_v30 = vld [vmem:[#allocation70_spill] sm:$0xff]  ;;  %v11173_v40 = vld [vmem:[#allocation72_spill] sm:$0xff] }
 0x64f   :  { %v3880_v22 = vadd.f32 %v9521_v24, %v3879_v16  ;;  %vm3897_vm10 = vweird.f32 %v6105_v10  ;;  %vm3881_vm11 = vweird.f32 %v9479_v14  ;;  %v3887_v56 = vand.u32 2147483648, %v9479_v14  ;;  %v11174_v34 = vld [vmem:[#allocation83_spill] sm:$0xff]  ;;  %v11175_v26 = vld [vmem:[#allocation85_spill] sm:$0xff]  ;;  %v11176_v16 = vld [vmem:[#allocation74_spill] sm:$0xff] }
 0x650   :  { %v9589_v59 = vadd.f32 %v3909_v13, %v3907_v31  ;;  %3939 = vmatmul.bf16.vlgmr.msrb.gmra.mxu1 %v3916_v47  ;;  %3967 = vmatmul.bf16.vlgmr.msra.gmra.mxu3 %v3916_v47  ;;  %v3895_v29 = vadd.f32 %v6105_v10, %v3894_v46  ;;  %v3902_v48 = vand.u32 2147483648, %v9519_v42  ;;  %vm9598_vm12 = vmor %vm3881_vm11, %vm3882_vm8  ;;  %v3885_v12 = vand.u32 2147483647, %v9479_v14  ;;  %v11177_v17 = vld [vmem:[#allocation76_spill] sm:$0xff]  ;;  %v11178_v13 = vld [vmem:[#allocation87_spill] sm:$0xff] }
 0x651   :  { %4178 = vmatpush.bf16.msrb.mxu1 %v10816_v19  ;;  %4206 = vmatpush.bf16.msra.mxu3 %v10817_v15  ;;  %vm3896_vm13 = vweird.f32 %v9519_v42  ;;  %v3900_v19 = vand.u32 2147483647, %v9519_v42  ;;  %v3884_v15 = vsel %vm9598_vm12, %v9521_v24, %v3880_v22  ;;  %v3888_v4 = vor.u32 1.1754944e-38, %v3887_v56  ;;  %v11179_v31 = vld [vmem:[#allocation89_spill] sm:$0xff]  ;;  %v11180_v46 = vld [vmem:[#allocation90_spill] sm:$0xff]  ;;  %v11184_v56 = vld [vmem:[#allocation92_spill] sm:$0xff] }
 0x652   :  { %6108 = vtanh.f32 %v9589_v59  ;;  %vm3898_vm14 = vmor %vm3896_vm13, %vm3897_vm10  ;;  %v3903_v35 = vor.u32 1.1754944e-38, %v3902_v48  ;;  %vm3886_vm15 = vcmp.eq.f32.partialorder %v3885_v12, 8.507059e+37  ;;  %v11182_v22 = vld [vmem:[#allocation78_spill] sm:$0xff]  ;;  %v11185_v48 = vld [vmem:[#allocation93_spill] sm:$0xff] }
 0x653   :  { %v3899_v57 = vsel %vm3898_vm14, %v6105_v10, %v3895_v29  ;;  %v6107_v27 = vpop.eup %6106  ;;  %vm3901_vm0 = vcmp.eq.f32.partialorder %v3900_v19, 8.507059e+37  ;;  %v3889_v5 = vsel %vm3886_vm15, %v3888_v4, %v3884_v15  ;;  %v11162_v10 = vld [vmem:[#allocation71_spill] sm:$0xff]  ;;  %v11183_v29 = vld [vmem:[#allocation80_spill] sm:$0xff]  ;;  %v11186_v9 = vld [vmem:[#allocation82_spill] sm:$0xff] }
 0x654   :  { %v3904_v1 = vsel %vm3901_vm0, %v3903_v35, %v3899_v57  ;;  %v3914_v61 = vmul.f32 %v6107_v27, %v3889_v5  ;;  %v11187_v12 = vld [vmem:[#allocation84_spill] sm:$0xff]  ;;  %v11188_v19 = vld [vmem:[#allocation94_spill] sm:$0xff] }
 0x655   :  { %4179 = vmatpush.bf16.msrb.mxu1 %v10818_v0  ;;  %4207 = vmatpush.bf16.msra.mxu3 %v10819_v2  ;;  %v11158_v0 = vld [vmem:[#allocation113_spill] sm:$0xff]  ;;  %v11159_v2 = vld [vmem:[#allocation115_spill] sm:$0xff]  ;;  %v11189_v15 = vld [vmem:[#allocation96_spill] sm:$0xff] }
 0x656   :  { %v11190_v57 = vld [vmem:[#allocation86_spill] sm:$0xff]  ;;  %v11191_v27 = vld [vmem:[#allocation88_spill] sm:$0xff] }
 0x657   :  { %v11192_v4 = vld [vmem:[#allocation98_spill] sm:$0xff]  ;;  %v11193_v35 = vld [vmem:[#allocation100_spill] sm:$0xff] }
 0x658   :  { %v6109_v14 = vpop.eup %6108  ;;  %v11195_v5 = vld [vmem:[#allocation104_spill] sm:$0xff] }
 0x659   :  { %v3915_v42 = vmul.f32 %v6109_v14, %v3904_v1  ;;  %4180 = vmatpush.bf16.msrb.mxu1 %v10820_v21  ;;  %4208 = vmatpush.bf16.msra.mxu3 %v10821_v38  ;;  %v11160_v21 = vld [vmem:[#allocation58_spill] sm:$0xff]  ;;  %v11161_v38 = vld [vmem:[#allocation60_spill] sm:$0xff] }
 0x65a   :  { %v11194_v14 = vld [vmem:[#allocation102_spill] sm:$0xff] }
 0x65b   :  { %v4163_v24 = vpack.c.bf16 %v3915_v42, %v3914_v61  ;;  %v11196_v1 = vld [vmem:[#allocation106_spill] sm:$0xff] }
 0x65d   :  { %4181 = vmatpush.bf16.msrb.mxu1 %v10706_v33  ;;  %4209 = vmatpush.bf16.msra.mxu3 %v10707_v60  ;;  %v11151_v33 = vld [vmem:[#allocation107_spill] sm:$0xff] }
 0x65e   :  { %4172 = vmatmul.bf16.vlgmr.msra.gmra.mxu0 %v4163_v24  ;;  %4200 = vmatmul.bf16.vlgmr.msra.gmra.mxu2 %v4163_v24  ;;  %v11152_v60 = vld [vmem:[#allocation63_spill] sm:$0xff] }
 0x65f   :  { %4411 = vmatpush.bf16.msra.mxu0 %v7242_v62  ;;  %4439 = vmatpush.bf16.msra.mxu2 %v7246_v45 }
 0x660   :  { %3995 = vmatmul.bf16.vlgmr.msra.gmra.mxu1 %v3916_v47  ;;  %4023 = vmatmul.bf16.vlgmr.msrb.gmra.mxu3 %v3916_v47  ;;  %v11181_v47 = vld [vmem:[#allocation91_spill] sm:$0xff] }
 0x661   :  { %4182 = vmatpush.bf16.msrb.mxu1 %v10708_v49  ;;  %4210 = vmatpush.bf16.msra.mxu3 %v10709_v43  ;;  %v11155_v49 = vld [vmem:[#allocation111_spill] sm:$0xff] }
 0x662   :  { %v11156_v43 = vld [vmem:[#allocation67_spill] sm:$0xff] }
 0x663   :  { %4412 = vmatpush.bf16.msra.mxu0 %v7255_v44  ;;  %4440 = vmatpush.bf16.msra.mxu2 %v7261_v51 }
 0x665   :  { %4183 = vmatpush.bf16.msrb.mxu1 %v10715_v18  ;;  %4211 = vmatpush.bf16.msra.mxu3 %v7575_v25  ;;  %v11148_v25 = vld [vmem:[#allocation59_spill] sm:$0xff]  ;;  %v11157_v18 = vld [vmem:[#allocation69_spill] sm:$0xff] }
 0x667   :  { %4413 = vmatpush.bf16.msra.mxu0 %v7271_v36  ;;  %4441 = vmatpush.bf16.msra.mxu2 %v10636_v32 }
 0x669   :  { %4184 = vmatpush.bf16.msrb.mxu1 %v7587_v50  ;;  %4212 = vmatpush.bf16.msra.mxu3 %v7611_v37  ;;  %v11149_v50 = vld [vmem:[#allocation61_spill] sm:$0xff] }
 0x66a   :  { %v11150_v37 = vld [vmem:[#allocation105_spill] sm:$0xff] }
 0x66b   :  { %4414 = vmatpush.bf16.msra.mxu0 %v11038_v8  ;;  %4442 = vmatpush.bf16.msra.mxu2 %v11039_v11 }
 0x66d   :  { %4185 = vmatpush.bf16.msrb.mxu1 %v7620_v41  ;;  %4213 = vmatpush.bf16.msra.mxu3 %v7637_v53  ;;  %v11153_v41 = vld [vmem:[#allocation65_spill] sm:$0xff] }
 0x66e   :  { %4363 = vmatmul.bf16.vlgmr.msrb.gmra.mxu0 %v4163_v24  ;;  %4391 = vmatmul.bf16.vlgmr.msrb.gmra.mxu2 %v4163_v24  ;;  %v11154_v53 = vld [vmem:[#allocation109_spill] sm:$0xff] }
 0x66f   :  { %4415 = vmatpush.bf16.msra.mxu0 %v11040_v6  ;;  %4443 = vmatpush.bf16.msra.mxu2 %v11041_v55 }
 0x670   :  { %4186 = vmatmul.bf16.vlgmr.msrb.gmra.mxu1 %v4163_v24  ;;  %4214 = vmatmul.bf16.vlgmr.msra.gmra.mxu3 %v4163_v24 }
 0x671   :  { %4369 = vmatpush.bf16.msra.mxu1 %v11148_v25  ;;  %4397 = vmatpush.bf16.msrb.mxu3 %v11149_v50 }
 0x673   :  { %4416 = vmatpush.bf16.msra.mxu0 %v11150_v37  ;;  %4444 = vmatpush.bf16.msra.mxu2 %v11151_v33 }
 0x675   :  { %4370 = vmatpush.bf16.msra.mxu1 %v11152_v60  ;;  %4398 = vmatpush.bf16.msrb.mxu3 %v11153_v41 }
 0x677   :  { %4417 = vmatpush.bf16.msra.mxu0 %v11154_v53  ;;  %4445 = vmatpush.bf16.msra.mxu2 %v11155_v49 }
 0x679   :  { %4371 = vmatpush.bf16.msra.mxu1 %v11156_v43  ;;  %4399 = vmatpush.bf16.msrb.mxu3 %v11157_v18 }
 0x67b   :  { %4418 = vmatpush.bf16.msra.mxu0 %v11158_v0  ;;  %4446 = vmatpush.bf16.msra.mxu2 %v11159_v2 }
 0x67d   :  { %4372 = vmatpush.bf16.msra.mxu1 %v11162_v10  ;;  %4400 = vmatpush.bf16.msrb.mxu3 %v11163_v23 }
 0x67e   :  { %4419 = vmatmul.bf16.vlgmr.msra.gmra.mxu0 %v4163_v24  ;;  %4447 = vmatmul.bf16.vlgmr.msra.gmra.mxu2 %v4163_v24 }
 0x67f   :  { %4595 = vmatpush.bf16.msrb.mxu0 %v11160_v21  ;;  %4623 = vmatpush.bf16.msrb.mxu2 %v11161_v38  ;;  %v11203_v21 = vld [vmem:[#allocation7_spill] sm:$0xff] }
 0x681   :  { %4373 = vmatpush.bf16.msra.mxu1 %v11166_v20  ;;  %4401 = vmatpush.bf16.msrb.mxu3 %v11167_v58 }
 0x683   :  { %4596 = vmatpush.bf16.msrb.mxu0 %v11164_v52  ;;  %4624 = vmatpush.bf16.msrb.mxu2 %v11165_v39 }
 0x685   :  { %4374 = vmatpush.bf16.msra.mxu1 %v11170_v7  ;;  %4402 = vmatpush.bf16.msrb.mxu3 %v11171_v28 }
 0x687   :  { %4597 = vmatpush.bf16.msrb.mxu0 %v11168_v3  ;;  %4625 = vmatpush.bf16.msrb.mxu2 %v11169_v63 }
 0x689   :  { %4375 = vmatpush.bf16.msra.mxu1 %v11174_v34  ;;  %4403 = vmatpush.bf16.msrb.mxu3 %v11175_v26 }
 0x68b   :  { %4598 = vmatpush.bf16.msrb.mxu0 %v11172_v30  ;;  %4626 = vmatpush.bf16.msrb.mxu2 %v11173_v40 }
 0x68d   :  { %4376 = vmatpush.bf16.msra.mxu1 %v11178_v13  ;;  %4404 = vmatpush.bf16.msrb.mxu3 %v11179_v31 }
 0x68f   :  { %4599 = vmatpush.bf16.msrb.mxu0 %v11176_v16  ;;  %4627 = vmatpush.bf16.msrb.mxu2 %v11177_v17 }
 0x691   :  { %4425 = vmatpush.bf16.msrb.mxu1 %v11180_v46  ;;  %4453 = vmatpush.bf16.msra.mxu3 %v11181_v47 }
 0x693   :  { %4600 = vmatpush.bf16.msrb.mxu0 %v11182_v22  ;;  %4628 = vmatpush.bf16.msrb.mxu2 %v11183_v29 }
 0x695   :  { %4426 = vmatpush.bf16.msrb.mxu1 %v11184_v56  ;;  %4454 = vmatpush.bf16.msra.mxu3 %v11185_v48 }
 0x697   :  { %4601 = vmatpush.bf16.msrb.mxu0 %v11186_v9  ;;  %4629 = vmatpush.bf16.msrb.mxu2 %v11187_v12 }
 0x699   :  { %4427 = vmatpush.bf16.msrb.mxu1 %v11188_v19  ;;  %4455 = vmatpush.bf16.msra.mxu3 %v11189_v15 }
 0x69b   :  { %4602 = vmatpush.bf16.msrb.mxu0 %v11190_v57  ;;  %4630 = vmatpush.bf16.msrb.mxu2 %v11191_v27 }
 0x69d   :  { %4428 = vmatpush.bf16.msrb.mxu1 %v11192_v4  ;;  %4456 = vmatpush.bf16.msra.mxu3 %v11193_v35 }
 0x69f   :  { %4651 = vmatpush.bf16.msra.mxu0 %v7242_v62  ;;  %4679 = vmatpush.bf16.msra.mxu2 %v7246_v45  ;;  %v11197_v62 = vld [vmem:[#allocation108_spill] sm:$0xff]  ;;  %v11198_v45 = vld [vmem:[#allocation110_spill] sm:$0xff] }
 0x6a1   :  { %4429 = vmatpush.bf16.msrb.mxu1 %v11194_v14  ;;  %4457 = vmatpush.bf16.msra.mxu3 %v11195_v5 }
 0x6a3   :  { %4652 = vmatpush.bf16.msra.mxu0 %v7255_v44  ;;  %4680 = vmatpush.bf16.msra.mxu2 %v7261_v51  ;;  %v11199_v44 = vld [vmem:[#allocation112_spill] sm:$0xff]  ;;  %v11200_v51 = vld [vmem:[#allocation114_spill] sm:$0xff] }
 0x6a5   :  { %4430 = vmatpush.bf16.msrb.mxu1 %v11196_v1  ;;  %4458 = vmatpush.bf16.msra.mxu3 %v11197_v62 }
 0x6a7   :  { %4653 = vmatpush.bf16.msra.mxu0 %v7271_v36  ;;  %4681 = vmatpush.bf16.msra.mxu2 %v10636_v32  ;;  %v11201_v36 = vld [vmem:[#allocation116_spill] sm:$0xff]  ;;  %v3926_v32 = vpop.f32.mrf.mxu0 }
 0x6a9   :  { %4431 = vmatpush.bf16.msrb.mxu1 %v11198_v45  ;;  %4459 = vmatpush.bf16.msra.mxu3 %v11199_v44  ;;  %v11208_v44 = vld [vmem:[#allocation54_spill] sm:$0xff]  ;;  %v11218_v45 = vld [vmem:[#allocation55_spill] sm:$0xff] }
 0x6ab   :  { %4654 = vmatpush.bf16.msra.mxu0 %v11038_v8  ;;  %4682 = vmatpush.bf16.msra.mxu2 %v11039_v11 }
 0x6ad   :  { %4432 = vmatpush.bf16.msrb.mxu1 %v11200_v51  ;;  %4460 = vmatpush.bf16.msra.mxu3 %v11201_v36 }
 0x6af   :  { %4655 = vmatpush.bf16.msra.mxu0 %v11040_v6  ;;  %4683 = vmatpush.bf16.msra.mxu2 %v11041_v55  ;;  %v3928_v8 = vpop.f32.mrf.mxu0  ;;  %v3954_v6 = vpop.f32.mrf.mxu2  ;;  %v11202_v55 = vld [vmem:[#allocation95_spill] sm:$0xff] }
 0x6b0   :  { %v3927_v61 = vadd.f32 %v3926_v32, %v11202_v55 }
 0x6b3   :  { %4656 = vmatpush.bf16.msra.mxu0 %v11150_v37  ;;  %4684 = vmatpush.bf16.msra.mxu2 %v11151_v33  ;;  %v3955_v33 = vadd.f32 %v3954_v6, %v11203_v21 }
 0x6b7   :  { %4657 = vmatpush.bf16.msra.mxu0 %v11154_v53  ;;  %4685 = vmatpush.bf16.msra.mxu2 %v11155_v49  ;;  %v9702_v11 = vpop.f32.mrf.mxu0  ;;  %v3929_v49 = vadd.f32 %v3928_v8, %v11202_v55 }
 0x6bb   :  { %4658 = vmatpush.bf16.msra.mxu0 %v11158_v0  ;;  %4686 = vmatpush.bf16.msra.mxu2 %v11159_v2  ;;  %v3956_v0 = vpop.f32.mrf.mxu2 }
 0x6bc   :  { %v3957_v40 = vadd.f32 %v3956_v0, %v11203_v21 }
 0x6bf   :  { %v3984_v53 = vpop.f32.mrf.mxu0 }
 0x6c3   :  { %v4010_v27 = vpop.f32.mrf.mxu2 }
 0x6cd   :  { %v3940_v42 = vpop.f32.mrf.mxu1 }
 0x6ce   :  { %v3941_v24 = vadd.f32 %v3940_v42, %v3927_v61  ;;  %v11204_v61 = vld [vmem:[#allocation144_spill] sm:$0xff] }
 0x6cf   :  { %v4011_v42 = vadd.f32 %v4010_v27, %v11204_v61 }
 0x6d0   :  { %v5557_v37 = vmul.f32 -1.442695, %v3941_v24  ;;  %v11205_v24 = vld [vmem:[#allocation8_spill] sm:$0xff] }
 0x6d2   :  { %6110 = vpow2.f32 %v5557_v37 }
 0x6d3   :  { %v3968_v38 = vpop.f32.mrf.mxu3 }
 0x6d4   :  { %v3969_v52 = vadd.f32 %v3968_v38, %v3955_v33 }
 0x6d5   :  { %v3942_v39 = vpop.f32.mrf.mxu1 }
 0x6d6   :  { %v5559_v2 = vmul.f32 -1.442695, %v3969_v52  ;;  %v3943_v3 = vadd.f32 %v3942_v39, %v3929_v49 }
 0x6d8   :  { %v6111_v63 = vpop.eup %6110  ;;  %6112 = vpow2.f32 %v5559_v2  ;;  %v5558_v30 = vmul.f32 -1.442695, %v3943_v3 }
 0x6d9   :  { %v9708_v16 = vadd.f32 1.0, %v6111_v63 }
 0x6da   :  { %6114 = vpow2.f32 %v5558_v30 }
 0x6db   :  { %v3970_v17 = vpop.f32.mrf.mxu3  ;;  %v4173_v22 = vpop.f32.mrf.mxu0  ;;  %6116 = vrcp.f32 %v9708_v16  ;;  %vm4042_vm1 = vweird.f32 %v9708_v16  ;;  %v4046_v36 = vand.u32 2147483647, %v9708_v16 }
 0x6dc   :  { %v3971_v29 = vadd.f32 %v3970_v17, %v3957_v40  ;;  %v4220_v37 = vadd.f32 %v4173_v22, %v11205_v24  ;;  %v11206_v40 = vld [vmem:[#allocation9_spill] sm:$0xff] }
 0x6dd   :  { %v3996_v9 = vpop.f32.mrf.mxu1  ;;  %vm9765_vm5 = vcmp.eq.f32.partialorder %v4046_v36, 8.507059e+37 }
 0x6de   :  { %v6113_v12 = vpop.eup %6112  ;;  %v5560_v57 = vmul.f32 -1.442695, %v3971_v29  ;;  %v5563_v2 = vmul.f32 -1.442695, %v4220_v37 }
 0x6df   :  { %v9711_v32 = vadd.f32 1.0, %v6113_v12  ;;  %v4012_v12 = vpop.f32.mrf.mxu2 }
 0x6e0   :  { %v6115_v8 = vpop.eup %6114  ;;  %6118 = vpow2.f32 %v5560_v57 }
 0x6e1   :  { %6120 = vrcp.f32 %v9711_v32  ;;  %v9714_v6 = vadd.f32 1.0, %v6115_v8  ;;  %v9719_v52 = vpop.eup %6116  ;;  %vm4080_vm2 = vweird.f32 %v9711_v32 }
 0x6e2   :  { %v4038_v57 = vmul.f32 %v9719_v52, %v9708_v16  ;;  %vm4043_vm3 = vweird.f32 %v9719_v52 }
 0x6e3   :  { %v4024_v33 = vpop.f32.mrf.mxu3  ;;  %6122 = vrcp.f32 %v9714_v6  ;;  %v4175_v49 = vpop.f32.mrf.mxu0  ;;  %vm4057_vm6 = vweird.f32 %v9714_v6  ;;  %vm9793_vm10 = vmor %vm4042_vm1, %vm4043_vm3 }
 0x6e4   :  { %v4025_v38 = vadd.f32 %v4024_v33, %v4011_v42  ;;  %v4224_v17 = vadd.f32 %v4175_v49, %v11206_v40  ;;  %v4013_v42 = vadd.f32 %v4012_v12, %v11204_v61  ;;  %v4048_v33 = vand.u32 2147483648, %v9708_v16  ;;  %v11207_v49 = vld [vmem:[#allocation145_spill] sm:$0xff] }
 0x6e5   :  { %v3998_v0 = vpop.f32.mrf.mxu1 }
 0x6e6   :  { %v6119_v39 = vpop.eup %6118  ;;  %v5561_v3 = vmul.f32 -1.442695, %v4025_v38  ;;  %v5564_v27 = vmul.f32 -1.442695, %v4224_v17  ;;  %v9749_v51 = vor.u32 1.1754944e-38, %v4048_v33 }
 0x6e7   :  { %v9721_v63 = vpop.eup %6120  ;;  %v9723_v30 = vadd.f32 1.0, %v6119_v39  ;;  %v3983_v39 = vadd.f32 %v9702_v11, %v11207_v49 }
 0x6e8   :  { %6124 = vpow2.f32 %v5561_v3  ;;  %v4076_v22 = vmul.f32 %v9721_v63, %v9711_v32  ;;  %v4039_v3 = vsub.f32 1.0, %v4038_v57  ;;  %vm4081_vm4 = vweird.f32 %v9721_v63 }
 0x6e9   :  { %6126 = vrcp.f32 %v9723_v30  ;;  %v9729_v29 = vpop.eup %6122  ;;  %v3997_v55 = vadd.f32 %v3996_v9, %v3983_v39  ;;  %vm9780_vm9 = vmor %vm4080_vm2, %vm4081_vm4  ;;  %vm4095_vm8 = vweird.f32 %v9723_v30 }
 0x6ea   :  { %6128 = vpow2.f32 %v5563_v2  ;;  %v4077_v24 = vsub.f32 1.0, %v4076_v22  ;;  %v4053_v37 = vmul.f32 %v9729_v29, %v9714_v6  ;;  %v3985_v2 = vadd.f32 %v3984_v53, %v11207_v49 }
 0x6eb   :  { %v4026_v8 = vpop.f32.mrf.mxu3  ;;  %6130 = vpow2.f32 %v5564_v27  ;;  %vm4058_vm11 = vweird.f32 %v9729_v29 }
 0x6ec   :  { %v4027_v12 = vadd.f32 %v4026_v8, %v4013_v42  ;;  %v4078_v11 = vmul.f32 %v9721_v63, %v4077_v24  ;;  %v4054_v57 = vsub.f32 1.0, %v4053_v37  ;;  %v4040_v8 = vmul.f32 %v9719_v52, %v4039_v3  ;;  %vm9823_vm14 = vmor %vm4057_vm6, %vm4058_vm11 }
 0x6ed   :  { %v4187_v40 = vpop.f32.mrf.mxu1  ;;  %v3999_v49 = vadd.f32 %v3998_v0, %v3985_v2  ;;  %v4101_v0 = vand.u32 2147483648, %v9723_v30  ;;  %v4099_v2 = vand.u32 2147483647, %v9723_v30 }
 0x6ee   :  { %v6125_v38 = vpop.eup %6124  ;;  %v4221_v53 = vadd.f32 %v4187_v40, %v11208_v44  ;;  %v5562_v42 = vmul.f32 -1.442695, %v4027_v12  ;;  %v4084_v44 = vand.u32 2147483647, %v9711_v32  ;;  %v4079_v33 = vadd.f32 %v9721_v63, %v4078_v11  ;;  %v11224_v12 = vld [vmem:[#allocation53_spill] sm:$0xff] }
 0x6ef   :  { %v9739_v21 = vpop.eup %6126  ;;  %v9742_v17 = vadd.f32 1.0, %v6125_v38  ;;  %v4086_v38 = vand.u32 2147483648, %v9711_v32  ;;  %v4055_v39 = vmul.f32 %v9729_v29, %v4054_v57  ;;  %v4102_v1 = vor.u32 1.1754944e-38, %v4101_v0 }
 0x6f0   :  { %v6129_v22 = vpop.eup %6128  ;;  %v4091_v61 = vmul.f32 %v9739_v21, %v9723_v30  ;;  %v5565_v3 = vmul.f32 -1.442695, %v4221_v53  ;;  %vm4096_vm7 = vweird.f32 %v9739_v21  ;;  %v4083_v32 = vsel %vm9780_vm9, %v9721_v63, %v4079_v33 }
 0x6f1   :  { %6132 = vrcp.f32 %v9742_v17  ;;  %v9757_v9 = vadd.f32 1.0, %v6129_v22  ;;  %v4087_v40 = vor.u32 1.1754944e-38, %v4086_v38  ;;  %v4041_v22 = vadd.f32 %v9719_v52, %v4040_v8  ;;  %vm9804_vm12 = vmor %vm4095_vm8, %vm4096_vm7 }
 0x6f2   :  { %v4092_v27 = vsub.f32 1.0, %v4091_v61  ;;  %6134 = vtanh.f32 %v3997_v55  ;;  %v6131_v61 = vpop.eup %6130  ;;  %v4061_v55 = vand.u32 2147483647, %v9714_v6  ;;  %v4056_v8 = vadd.f32 %v9729_v29, %v4055_v39  ;;  %v4201_v39 = vpop.f32.mrf.mxu2 }
 0x6f3   :  { %v4215_v37 = vpop.f32.mrf.mxu3  ;;  %6136 = vpow2.f32 %v5562_v42  ;;  %v9787_v53 = vadd.f32 1.0, %v6131_v61  ;;  %v4045_v16 = vsel %vm9793_vm10, %v9719_v52, %v4041_v22  ;;  %vm4085_vm13 = vcmp.eq.f32.partialorder %v4084_v44, 8.507059e+37  ;;  %v11221_v22 = vld [vmem:[#allocation49_spill] sm:$0xff]  ;;  %v11222_v42 = vld [vmem:[#allocation11_spill] sm:$0xff] }
 0x6f4   :  { %v4093_v24 = vmul.f32 %v9739_v21, %v4092_v27  ;;  %6138 = vrcp.f32 %v9757_v9  ;;  %v4088_v27 = vsel %vm4085_vm13, %v4087_v40, %v4083_v32  ;;  %vm4100_vm15 = vcmp.eq.f32.partialorder %v4099_v2, 8.507059e+37 }
 0x6f5   :  { %v4189_v38 = vpop.f32.mrf.mxu1  ;;  %6140 = vpow2.f32 %v5565_v3  ;;  %v11217_v3 = vld [vmem:[#allocation50_spill] sm:$0xff]  ;;  %vm4062_vm0 = vcmp.eq.f32.partialorder %v4061_v55, 8.507059e+37  ;;  %v4050_v32 = vsel %vm9765_vm5, %v9749_v51, %v4045_v16  ;;  %vm4120_vm1 = vweird.f32 %v9742_v17 }
 0x6f6   :  { %v4094_v11 = vadd.f32 %v9739_v21, %v4093_v24  ;;  %v4063_v24 = vand.u32 2147483648, %v9714_v6  ;;  %6142 = vtanh.f32 %v3999_v49  ;;  %v4223_v36 = vadd.f32 %v4215_v37, %v11217_v3 }
 0x6f7   :  { %v9774_v57 = vpop.eup %6132  ;;  %v4225_v62 = vadd.f32 %v4189_v38, %v11218_v45  ;;  %6144 = vrcp.f32 %v9787_v53  ;;  %v4060_v45 = vsel %vm9823_vm14, %v9729_v29, %v4056_v8  ;;  %vm4241_vm5 = vweird.f32 %v9757_v9 }
 0x6f8   :  { %v6135_v30 = vpop.eup %6134  ;;  %v4116_v61 = vmul.f32 %v9774_v57, %v9742_v17  ;;  %v4098_v33 = vsel %vm9804_vm12, %v9739_v21, %v4094_v11  ;;  %v5567_v44 = vmul.f32 -1.442695, %v4223_v36  ;;  %v4064_v40 = vor.u32 1.1754944e-38, %v4063_v24 }
 0x6f9   :  { %v6137_v63 = vpop.eup %6136  ;;  %v5566_v37 = vmul.f32 -1.442695, %v4225_v62  ;;  %v4103_v6 = vsel %vm4100_vm15, %v4102_v1, %v4098_v33  ;;  %v4222_v11 = vadd.f32 %v4201_v39, %v11221_v22  ;;  %v11223_v1 = vld [vmem:[#allocation15_spill] sm:$0xff]  ;;  %v4247_v24 = vand.u32 2147483648, %v9757_v9 }
 0x6fa   :  { %v9828_v49 = vadd.f32 1.0, %v6137_v63  ;;  %v9830_v21 = vpop.eup %6138  ;;  %v4145_v63 = vmul.f32 %v4088_v27, %v11222_v42  ;;  %v4117_v3 = vsub.f32 1.0, %v4116_v61  ;;  %v4065_v55 = vsel %vm4062_vm0, %v4064_v40, %v4060_v45  ;;  %v4203_v42 = vpop.f32.mrf.mxu2 }
 0x6fb   :  { %v4217_v0 = vpop.f32.mrf.mxu3  ;;  %v6141_v38 = vpop.eup %6140  ;;  %v4237_v62 = vmul.f32 %v9830_v21, %v9757_v9  ;;  %v4146_v8 = vmul.f32 %v4103_v6, %v11223_v1  ;;  %v4147_v61 = vmul.f32 %v6135_v30, %v4050_v32  ;;  %v4124_v33 = vand.u32 2147483647, %v9742_v17 }
 0x6fc   :  { %6146 = vrcp.f32 %v9828_v49  ;;  %v6143_v29 = vpop.eup %6142  ;;  %v9843_v2 = vadd.f32 1.0, %v6141_v38  ;;  %v4227_v51 = vadd.f32 %v4217_v0, %v11224_v12  ;;  %v4126_v39 = vand.u32 2147483648, %v9742_v17 }
 0x6fd   :  { %6148 = vpow2.f32 %v5567_v44  ;;  %v9848_v16 = vpop.eup %6144  ;;  %v4118_v36 = vmul.f32 %v9774_v57, %v4117_v3  ;;  %v4148_v27 = vmul.f32 %v6143_v29, %v4065_v55  ;;  %v9854_v45 = vadd.f32 %v4147_v61, %v4145_v63 }
 0x6fe   :  { %6150 = vpow2.f32 %v5566_v37  ;;  %v5568_v52 = vmul.f32 -1.442695, %v4227_v51  ;;  %v4238_v44 = vsub.f32 1.0, %v4237_v62  ;;  %v9861_v30 = vor.u32 1.1754944e-38, %v4247_v24  ;;  %v11227_v51 = vld [vmem:[#allocation52_spill] sm:$0xff] }
 0x6ff   :  { %6152 = vrcp.f32 %v9843_v2  ;;  %v9859_v6 = vadd.f32 %v4148_v27, %v4146_v8  ;;  %v4252_v22 = vmul.f32 %v9848_v16, %v9787_v53  ;;  %vm9866_vm2 = vcmp.eq.f32.partialorder %v4124_v33, 8.507059e+37 }
 0x700   :  { %6154 = vtanh.f32 %v4222_v11  ;;  %v4127_v32 = vor.u32 1.1754944e-38, %v4126_v39  ;;  %v4119_v3 = vadd.f32 %v9774_v57, %v4118_v36  ;;  %vm4121_vm3 = vweird.f32 %v9774_v57 }
 0x701   :  { %6156 = vpow2.f32 %v5568_v52  ;;  %vm4242_vm4 = vweird.f32 %v9830_v21  ;;  %v4239_v55 = vmul.f32 %v9830_v21, %v4238_v44  ;;  %v4253_v24 = vsub.f32 1.0, %v4252_v22  ;;  %vm9889_vm6 = vmor %vm4120_vm1, %vm4121_vm3 }
 0x702   :  { %v9857_v40 = vpop.eup %6146  ;;  %6158 = vtanh.f32 %v9854_v45  ;;  %v4226_v61 = vadd.f32 %v4203_v42, %v11227_v51  ;;  %v4141_v27 = vand.u32 2147483648, %v9828_v49  ;;  %v4139_v44 = vand.u32 2147483647, %v9828_v49  ;;  %vm9933_vm0 = vmor %vm4241_vm5, %vm4242_vm4 }
 0x703   :  { %v6149_v0 = vpop.eup %6148  ;;  %v4131_v11 = vmul.f32 %v9857_v40, %v9828_v49  ;;  %6160 = vtanh.f32 %v9859_v6  ;;  %vm4136_vm7 = vweird.f32 %v9857_v40  ;;  %v4123_v17 = vsel %vm9889_vm6, %v9774_v57, %v4119_v3 }
 0x704   :  { %v6151_v63 = vpop.eup %6150  ;;  %v9875_v29 = vadd.f32 1.0, %v6149_v0  ;;  %v4240_v0 = vadd.f32 %v9830_v21, %v4239_v55  ;;  %vm4135_vm9 = vweird.f32 %v9828_v49  ;;  %v4285_v42 = vand.u32 2147483648, %v9843_v2 }
 0x705   :  { %v6153_v62 = vpop.eup %6152  ;;  %v4132_v1 = vsub.f32 1.0, %v4131_v11  ;;  %v9880_v8 = vadd.f32 1.0, %v6151_v63  ;;  %vm9906_vm8 = vmor %vm4135_vm9, %vm4136_vm7  ;;  %v4142_v57 = vor.u32 1.1754944e-38, %v4141_v27  ;;  %v4283_v3 = vand.u32 2147483647, %v9843_v2 }
 0x706   :  { %v4275_v12 = vmul.f32 %v6153_v62, %v9843_v2  ;;  %v9885_v33 = vpop.eup %6154  ;;  %6162 = vrcp.f32 %v9875_v29  ;;  %vm4280_vm10 = vweird.f32 %v6153_v62  ;;  %v4128_v55 = vsel %vm9866_vm2, %v4127_v32, %v4123_v17 }
 0x707   :  { %v4133_v36 = vmul.f32 %v9857_v40, %v4132_v1  ;;  %v6157_v52 = vpop.eup %6156  ;;  %6164 = vrcp.f32 %v9880_v8  ;;  %vm4140_vm11 = vcmp.eq.f32.partialorder %v4139_v44, 8.507059e+37  ;;  %vm4279_vm12 = vweird.f32 %v9843_v2 }
 0x708   :  { %v4276_v22 = vsub.f32 1.0, %v4275_v12  ;;  %v4254_v12 = vmul.f32 %v9848_v16, %v4253_v24  ;;  %v9911_v51 = vadd.f32 1.0, %v6157_v52  ;;  %v6159_v39 = vpop.eup %6158  ;;  %vm9923_vm13 = vmor %vm4279_vm12, %vm4280_vm10  ;;  %v4286_v52 = vor.u32 1.1754944e-38, %v4285_v42 }
 0x709   :  { %v4134_v11 = vadd.f32 %v9857_v40, %v4133_v36  ;;  %v6161_v36 = vpop.eup %6160  ;;  %vm4256_vm14 = vweird.f32 %v9787_v53  ;;  %vm4257_vm15 = vweird.f32 %v9848_v16  ;;  %vm4284_vm1 = vcmp.eq.f32.partialorder %v4283_v3, 8.507059e+37 }
 0x70a   :  { %v4277_v1 = vmul.f32 %v6153_v62, %v4276_v22  ;;  %6166 = vrcp.f32 %v9911_v51  ;;  %v4255_v44 = vadd.f32 %v9848_v16, %v4254_v12  ;;  %v4153_v22 = vmul.f32 %v6159_v39, %v4128_v55  ;;  %vm9956_vm3 = vmor %vm4256_vm14, %vm4257_vm15 }
 0x70b   :  { %v4138_v49 = vsel %vm9906_vm8, %v9857_v40, %v4134_v11  ;;  %v4244_v11 = vsel %vm9933_vm0, %v9830_v21, %v4240_v0  ;;  %v4260_v42 = vand.u32 2147483647, %v9787_v53  ;;  %6168 = vtanh.f32 %v4226_v61 }
 0x70c   :  { %v4278_v37 = vadd.f32 %v6153_v62, %v4277_v1  ;;  %v9921_v24 = vpop.eup %6162  ;;  %v4143_v38 = vsel %vm4140_vm11, %v4142_v57, %v4138_v49  ;;  %v4262_v57 = vand.u32 2147483648, %v9787_v53  ;;  %v4259_v3 = vsel %vm9956_vm3, %v9848_v16, %v4255_v44 }
 0x70d   :  { %v6165_v40 = vpop.eup %6164  ;;  %v4154_v17 = vmul.f32 %v6161_v36, %v4143_v38  ;;  %v4315_v49 = vmul.f32 %v9921_v24, %v9875_v29  ;;  %v4300_v55 = vand.u32 2147483648, %v9880_v8  ;;  %vm4261_vm5 = vcmp.eq.f32.partialorder %v4260_v42, 8.507059e+37 }
 0x70e   :  { %v4282_v32 = vsel %vm9923_vm13, %v6153_v62, %v4278_v37  ;;  %v4290_v63 = vmul.f32 %v6165_v40, %v9880_v8  ;;  %v11236_v62 = vand.u32 2147483647, %v9757_v9  ;;  %v4298_v9 = vand.u32 2147483647, %v9880_v8 }
 0x70f   :  { %v4287_v1 = vsel %vm4284_vm1, %v4286_v52, %v4282_v32  ;;  %v9948_v37 = vpack.c.bf16 %v4154_v17, %v4153_v22  ;;  %vm4295_vm4 = vweird.f32 %v6165_v40  ;;  %v4263_v16 = vor.u32 1.1754944e-38, %v4262_v57 }
 0x710   :  { %vm4246_vm2 = vcmp.eq.f32.partialorder %v11236_v62, 8.507059e+37  ;;  %v4291_v0 = vsub.f32 1.0, %v4290_v63  ;;  %v9960_v12 = vpop.eup %6166  ;;  %v4344_v53 = vmul.f32 %v4287_v1, %v9579_v54  ;;  %vm4294_vm6 = vweird.f32 %v9880_v8 }
 0x711   :  { %v4249_v39 = vsel %vm4246_vm2, %v9861_v30, %v4244_v11  ;;  %4377 = vmatmul.bf16.vlgmr.msra.gmra.mxu1 %v9948_v37  ;;  %4405 = vmatmul.bf16.vlgmr.msrb.gmra.mxu3 %v9948_v37  ;;  %v4330_v36 = vmul.f32 %v9960_v12, %v9911_v51  ;;  %v4316_v30 = vsub.f32 1.0, %v4315_v49  ;;  %v4264_v2 = vsel %vm4261_vm5, %v4263_v16, %v4259_v3  ;;  %vm4296_vm7 = vmor %vm4294_vm6, %vm4295_vm4  ;;  %v6169_v32 = vpop.eup %6168 }
 0x712   :  { %v4292_v61 = vmul.f32 %v6165_v40, %v4291_v0  ;;  %4609 = vmatpush.bf16.msra.mxu1 %v11148_v25  ;;  %4637 = vmatpush.bf16.msrb.mxu3 %v11149_v50  ;;  %v4346_v27 = vmul.f32 %v9885_v33, %v4249_v39  ;;  %v4301_v54 = vor.u32 1.1754944e-38, %v4300_v55  ;;  %vm4299_vm9 = vcmp.eq.f32.partialorder %v4298_v9, 8.507059e+37 }
 0x713   :  { %v4331_v38 = vsub.f32 1.0, %v4330_v36  ;;  %v4317_v25 = vmul.f32 %v9921_v24, %v4316_v30  ;;  %v4347_v17 = vmul.f32 %v6169_v32, %v4264_v2  ;;  %vm4320_vm8 = vweird.f32 %v9921_v24  ;;  %v11249_v32 = vld [vmem:[#allocation144_spill] sm:$0xff] }
 0x714   :  { %v4293_v52 = vadd.f32 %v6165_v40, %v4292_v61  ;;  %v4348_v22 = vadd.f32 %v4346_v27, %v4344_v53  ;;  %vm4335_vm10 = vweird.f32 %v9960_v12  ;;  %vm4319_vm11 = vweird.f32 %v9875_v29 }
 0x715   :  { %v4332_v33 = vmul.f32 %v9960_v12, %v4331_v38  ;;  %vm9991_vm12 = vmor %vm4319_vm11, %vm4320_vm8  ;;  %vm4334_vm13 = vweird.f32 %v9911_v51 }
 0x716   :  { %v4297_v44 = vsel %vm4296_vm7, %v6165_v40, %v4293_v52  ;;  %4610 = vmatpush.bf16.msra.mxu1 %v11152_v60  ;;  %4638 = vmatpush.bf16.msrb.mxu3 %v11153_v41  ;;  %6170 = vtanh.f32 %v4348_v22  ;;  %v4318_v60 = vadd.f32 %v9921_v24, %v4317_v25  ;;  %v4325_v40 = vand.u32 2147483648, %v9875_v29  ;;  %vm4336_vm14 = vmor %vm4334_vm13, %vm4335_vm10 }
 0x717   :  { %v4302_v50 = vsel %vm4299_vm9, %v4301_v54, %v4297_v44  ;;  %v4333_v41 = vadd.f32 %v9960_v12, %v4332_v33 }
 0x718   :  { %v4345_v8 = vmul.f32 %v4302_v50, %v9589_v59  ;;  %v4340_v59 = vand.u32 2147483648, %v9911_v51  ;;  %v4322_v63 = vsel %vm9991_vm12, %v9921_v24, %v4318_v60  ;;  %v4326_v49 = vor.u32 1.1754944e-38, %v4325_v40 }
 0x719   :  { %v4337_v1 = vsel %vm4336_vm14, %v9960_v12, %v4333_v41 }
 0x71a   :  { %v4349_v11 = vadd.f32 %v4347_v17, %v4345_v8  ;;  %4611 = vmatpush.bf16.msra.mxu1 %v11156_v43  ;;  %4639 = vmatpush.bf16.msrb.mxu3 %v11157_v18  ;;  %v4323_v43 = vand.u32 2147483647, %v9875_v29  ;;  %v4338_v18 = vand.u32 2147483647, %v9911_v51  ;;  %v4341_v62 = vor.u32 1.1754944e-38, %v4340_v59 }
 0x71c   :  { %6172 = vtanh.f32 %v4349_v11  ;;  %v6171_v57 = vpop.eup %6170  ;;  %vm4324_vm15 = vcmp.eq.f32.partialorder %v4323_v43, 8.507059e+37  ;;  %vm4339_vm0 = vcmp.eq.f32.partialorder %v4338_v18, 8.507059e+37 }
 0x71d   :  { %v4327_v51 = vsel %vm4324_vm15, %v4326_v49, %v4322_v63 }
 0x71e   :  { %4612 = vmatpush.bf16.msra.mxu1 %v11162_v10  ;;  %4640 = vmatpush.bf16.msrb.mxu3 %v11163_v23  ;;  %v4342_v10 = vsel %vm4339_vm0, %v4341_v62, %v4337_v1  ;;  %v4352_v23 = vmul.f32 %v6171_v57, %v4327_v51 }
 0x721   :  { %4433 = vmatmul.bf16.vlgmr.msrb.gmra.mxu1 %v9948_v37  ;;  %4461 = vmatmul.bf16.vlgmr.msra.gmra.mxu3 %v9948_v37 }
 0x722   :  { %v6173_v29 = vpop.eup %6172  ;;  %4613 = vmatpush.bf16.msra.mxu1 %v11166_v20  ;;  %4641 = vmatpush.bf16.msrb.mxu3 %v11167_v58  ;;  %v11241_v20 = vld [vmem:[#allocation106_spill] sm:$0xff]  ;;  %v11242_v58 = vld [vmem:[#allocation108_spill] sm:$0xff] }
 0x723   :  { %v4353_v24 = vmul.f32 %v6173_v29, %v4342_v10 }
 0x725   :  { %v4593_v21 = vpack.c.bf16 %v4353_v24, %v4352_v23 }
 0x726   :  { %4614 = vmatpush.bf16.msra.mxu1 %v11170_v7  ;;  %4642 = vmatpush.bf16.msrb.mxu3 %v11171_v28  ;;  %v11243_v7 = vld [vmem:[#allocation110_spill] sm:$0xff]  ;;  %v11244_v28 = vld [vmem:[#allocation112_spill] sm:$0xff] }
 0x727   :  { %4603 = vmatmul.bf16.vlgmr.msrb.gmra.mxu0 %v4593_v21  ;;  %4631 = vmatmul.bf16.vlgmr.msrb.gmra.mxu2 %v4593_v21 }
 0x72a   :  { %4615 = vmatpush.bf16.msra.mxu1 %v11174_v34  ;;  %4643 = vmatpush.bf16.msrb.mxu3 %v11175_v26  ;;  %v11245_v34 = vld [vmem:[#allocation114_spill] sm:$0xff]  ;;  %v11246_v26 = vld [vmem:[#allocation116_spill] sm:$0xff] }
 0x72e   :  { %4616 = vmatpush.bf16.msra.mxu1 %v11178_v13  ;;  %4644 = vmatpush.bf16.msrb.mxu3 %v11179_v31  ;;  %v4364_v13 = vpop.f32.mrf.mxu0  ;;  %v4392_v31 = vpop.f32.mrf.mxu2 }
 0x732   :  { %4665 = vmatpush.bf16.msrb.mxu1 %v11180_v46  ;;  %4693 = vmatpush.bf16.msra.mxu3 %v11181_v47  ;;  %v11247_v46 = vld [vmem:[#allocation95_spill] sm:$0xff] }
 0x733   :  { %v4365_v47 = vadd.f32 %v4364_v13, %v11247_v46 }
 0x736   :  { %4666 = vmatpush.bf16.msrb.mxu1 %v11184_v56  ;;  %4694 = vmatpush.bf16.msra.mxu3 %v11185_v48  ;;  %v4394_v37 = vpop.f32.mrf.mxu2 }
 0x737   :  { %4659 = vmatmul.bf16.vlgmr.msra.gmra.mxu0 %v4593_v21  ;;  %4687 = vmatmul.bf16.vlgmr.msra.gmra.mxu2 %v4593_v21 }
 0x73a   :  { %4667 = vmatpush.bf16.msrb.mxu1 %v11188_v19  ;;  %4695 = vmatpush.bf16.msra.mxu3 %v11189_v15  ;;  %v4366_v15 = vpop.f32.mrf.mxu0 }
 0x73e   :  { %4668 = vmatpush.bf16.msrb.mxu1 %v11192_v4  ;;  %4696 = vmatpush.bf16.msra.mxu3 %v11193_v35  ;;  %v11248_v4 = vld [vmem:[#allocation7_spill] sm:$0xff]  ;;  %v4448_v27 = vpop.f32.mrf.mxu2 }
 0x73f   :  { %v4393_v35 = vadd.f32 %v4392_v31, %v11248_v4  ;;  %v4395_v53 = vadd.f32 %v4394_v37, %v11248_v4  ;;  %v4449_v44 = vadd.f32 %v4448_v27, %v11249_v32 }
 0x742   :  { %4669 = vmatpush.bf16.msrb.mxu1 %v11194_v14  ;;  %4697 = vmatpush.bf16.msra.mxu3 %v11195_v5  ;;  %v4367_v5 = vadd.f32 %v4366_v15, %v11247_v46  ;;  %v4420_v22 = vpop.f32.mrf.mxu0 }
 0x746   :  { %4670 = vmatpush.bf16.msrb.mxu1 %v11241_v20  ;;  %4698 = vmatpush.bf16.msra.mxu3 %v11242_v58  ;;  %v4450_v41 = vpop.f32.mrf.mxu2 }
 0x747   :  { %v4451_v63 = vadd.f32 %v4450_v41, %v11249_v32 }
 0x74a   :  { %4671 = vmatpush.bf16.msrb.mxu1 %v11243_v7  ;;  %4699 = vmatpush.bf16.msra.mxu3 %v11244_v28  ;;  %v4422_v49 = vpop.f32.mrf.mxu0  ;;  %v11250_v7 = vld [vmem:[#allocation145_spill] sm:$0xff] }
 0x74b   :  { %v4421_v28 = vadd.f32 %v4420_v22, %v11250_v7 }
 0x74e   :  { %4672 = vmatpush.bf16.msrb.mxu1 %v11245_v34  ;;  %4700 = vmatpush.bf16.msra.mxu3 %v11246_v26  ;;  %v4423_v34 = vadd.f32 %v4422_v49, %v11250_v7 }
 0x78e   :  { %v4378_v56 = vpop.f32.mrf.mxu1 }
 0x78f   :  { %v4379_v48 = vadd.f32 %v4378_v56, %v4365_v47 }
 0x791   :  { %v5569_v19 = vmul.f32 -1.442695, %v4379_v48 }
 0x793   :  { %6174 = vpow2.f32 %v5569_v19 }
 0x794   :  { %v4406_v14 = vpop.f32.mrf.mxu3 }
 0x795   :  { %v4407_v0 = vadd.f32 %v4406_v14, %v4393_v35 }
 0x796   :  { %v4380_v12 = vpop.f32.mrf.mxu1 }
 0x797   :  { %v5571_v39 = vmul.f32 -1.442695, %v4407_v0  ;;  %v4381_v3 = vadd.f32 %v4380_v12, %v4367_v5 }
 0x799   :  { %v6175_v9 = vpop.eup %6174  ;;  %6176 = vpow2.f32 %v5571_v39  ;;  %v5570_v55 = vmul.f32 -1.442695, %v4381_v3 }
 0x79a   :  { %v10034_v61 = vadd.f32 1.0, %v6175_v9 }
 0x79b   :  { %6178 = vpow2.f32 %v5570_v55 }
 0x79c   :  { %v4408_v36 = vpop.f32.mrf.mxu3  ;;  %6180 = vrcp.f32 %v10034_v61  ;;  %v4486_v29 = vand.u32 2147483648, %v10034_v61  ;;  %vm4480_vm1 = vweird.f32 %v10034_v61  ;;  %v4484_v31 = vand.u32 2147483647, %v10034_v61 }
 0x79d   :  { %v4409_v16 = vadd.f32 %v4408_v36, %v4395_v53 }
 0x79e   :  { %v4434_v59 = vpop.f32.mrf.mxu1  ;;  %v4487_v47 = vor.u32 1.1754944e-38, %v4486_v29  ;;  %vm4485_vm15 = vcmp.eq.f32.partialorder %v4484_v31, 8.507059e+37 }
 0x79f   :  { %v6177_v30 = vpop.eup %6176  ;;  %v5572_v52 = vmul.f32 -1.442695, %v4409_v16  ;;  %v4435_v48 = vadd.f32 %v4434_v59, %v4421_v28 }
 0x7a0   :  { %v10037_v38 = vadd.f32 1.0, %v6177_v30 }
 0x7a1   :  { %v6179_v2 = vpop.eup %6178  ;;  %6182 = vpow2.f32 %v5572_v52 }
 0x7a2   :  { %6184 = vrcp.f32 %v10037_v38  ;;  %v10040_v54 = vadd.f32 1.0, %v6179_v2  ;;  %v10044_v33 = vpop.eup %6180  ;;  %vm4518_vm2 = vweird.f32 %v10037_v38  ;;  %v4524_v35 = vand.u32 2147483648, %v10037_v38 }
 0x7a3   :  { %v4476_v43 = vmul.f32 %v10044_v33, %v10034_v61  ;;  %vm4481_vm5 = vweird.f32 %v10044_v33  ;;  %v4522_v37 = vand.u32 2147483647, %v10037_v38 }
 0x7a4   :  { %6186 = vrcp.f32 %v10040_v54  ;;  %v4462_v25 = vpop.f32.mrf.mxu3  ;;  %v4525_v16 = vor.u32 1.1754944e-38, %v4524_v35  ;;  %v4501_v52 = vand.u32 2147483648, %v10040_v54  ;;  %vm10102_vm10 = vmor %vm4480_vm1, %vm4481_vm5  ;;  %vm4495_vm11 = vweird.f32 %v10040_v54 }
 0x7a5   :  { %v4463_v50 = vadd.f32 %v4462_v25, %v4449_v44  ;;  %v4477_v62 = vsub.f32 1.0, %v4476_v43  ;;  %v4499_v44 = vand.u32 2147483647, %v10040_v54  ;;  %vm4523_vm12 = vcmp.eq.f32.partialorder %v4522_v37, 8.507059e+37  ;;  %v4848_v37 = vld [vmem:[%s10267_s6 + $0x78] sm:$0xff] }
 0x7a6   :  { %v4436_v19 = vpop.f32.mrf.mxu1  ;;  %v4502_v41 = vor.u32 1.1754944e-38, %v4501_v52  ;;  %4853 = vmatpush.msrb.mxu0 %v4848_v37 }
 0x7a7   :  { %v6183_v17 = vpop.eup %6182  ;;  %v5573_v8 = vmul.f32 -1.442695, %v4463_v50  ;;  %v4478_v13 = vmul.f32 %v10044_v33, %v4477_v62  ;;  %v4437_v39 = vadd.f32 %v4436_v19, %v4423_v34  ;;  %vm4500_vm0 = vcmp.eq.f32.partialorder %v4499_v44, 8.507059e+37  ;;  %v4842_v44 = vld [vmem:[%s10267_s6 + $0x48] sm:$0xff] }
 0x7a8   :  { %v10046_v11 = vpop.eup %6184  ;;  %v10048_v60 = vadd.f32 1.0, %v6183_v17 }
 0x7a9   :  { %v4514_v40 = vmul.f32 %v10046_v11, %v10037_v38  ;;  %6188 = vpow2.f32 %v5573_v8  ;;  %vm4519_vm3 = vweird.f32 %v10046_v11  ;;  %v4479_v12 = vadd.f32 %v10044_v33, %v4478_v13 }
 0x7aa   :  { %v10052_v42 = vpop.eup %6186  ;;  %6190 = vrcp.f32 %v10048_v60  ;;  %vm4533_vm6 = vweird.f32 %v10048_v60  ;;  %v4539_v0 = vand.u32 2147483648, %v10048_v60  ;;  %vm10083_vm7 = vmor %vm4518_vm2, %vm4519_vm3  ;;  %v4537_v53 = vand.u32 2147483647, %v10048_v60 }
 0x7ab   :  { %v4491_v18 = vmul.f32 %v10052_v42, %v10040_v54  ;;  %v4515_v1 = vsub.f32 1.0, %v4514_v40  ;;  %vm4496_vm9 = vweird.f32 %v10052_v42  ;;  %v4483_v17 = vsel %vm10102_vm10, %v10044_v33, %v4479_v12  ;;  %v4847_v12 = vld [vmem:[%s10267_s6 + $0x70] sm:$0xff] }
 0x7ac   :  { %v4464_v57 = vpop.f32.mrf.mxu3  ;;  %v4540_v50 = vor.u32 1.1754944e-38, %v4539_v0  ;;  %vm10116_vm13 = vmor %vm4495_vm11, %vm4496_vm9  ;;  %vm4538_vm14 = vcmp.eq.f32.partialorder %v4537_v53, 8.507059e+37  ;;  %v4488_v33 = vsel %vm4485_vm15, %v4487_v47, %v4483_v17  ;;  %v4632_v0 = vpop.f32.mrf.mxu2  ;;  %4854 = vmatpush.msrb.mxu0 %v4847_v12  ;;  %v4841_v17 = vld [vmem:[%s10267_s6 + $0x40] sm:$0xff] }
 0x7ad   :  { %v4465_v51 = vadd.f32 %v4464_v57, %v4451_v63  ;;  %v4492_v23 = vsub.f32 1.0, %v4491_v18  ;;  %v4516_v21 = vmul.f32 %v10046_v11, %v4515_v1  ;;  %v4633_v52 = vadd.f32 %v4632_v0, %v11248_v4 }
 0x7af   :  { %v6189_v10 = vpop.eup %6188  ;;  %v5574_v58 = vmul.f32 -1.442695, %v4465_v51  ;;  %v4493_v15 = vmul.f32 %v10052_v42, %v4492_v23  ;;  %v4517_v14 = vadd.f32 %v10046_v11, %v4516_v21 }
 0x7b0   :  { %v6191_v24 = vpop.eup %6190  ;;  %v10062_v20 = vadd.f32 1.0, %v6189_v10 }
 0x7b1   :  { %v4529_v26 = vmul.f32 %v6191_v24, %v10048_v60  ;;  %vm4534_vm4 = vweird.f32 %v6191_v24  ;;  %v4494_v9 = vadd.f32 %v10052_v42, %v4493_v15  ;;  %v4521_v27 = vsel %vm10083_vm7, %v10046_v11, %v4517_v14 }
 0x7b2   :  { %6192 = vrcp.f32 %v10062_v20  ;;  %vm10090_vm8 = vmor %vm4533_vm6, %vm4534_vm4  ;;  %v4526_v8 = vsel %vm4523_vm12, %v4525_v16, %v4521_v27  ;;  %vm4558_vm2 = vweird.f32 %v10062_v20  ;;  %v4843_v27 = vld [vmem:[%s10267_s6 + $0x50] sm:$0xff] }
 0x7b3   :  { %v4530_v56 = vsub.f32 1.0, %v4529_v26  ;;  %6194 = vpow2.f32 %v5574_v58  ;;  %v4498_v54 = vsel %vm10116_vm13, %v10052_v42, %v4494_v9  ;;  %v4583_v43 = vmul.f32 %v4526_v8, %v9854_v45 }
 0x7b4   :  { %6196 = vtanh.f32 %v4435_v48  ;;  %v4503_v18 = vsel %vm4500_vm0, %v4502_v41, %v4498_v54  ;;  %v4562_v45 = vand.u32 2147483647, %v10062_v20  ;;  %v4634_v38 = vpop.f32.mrf.mxu2  ;;  %v4840_v54 = vld [vmem:[%s10267_s6 + $0x38] sm:$0xff] }
 0x7b5   :  { %v4531_v5 = vmul.f32 %v6191_v24, %v4530_v56  ;;  %6198 = vtanh.f32 %v4437_v39  ;;  %v4846_v39 = vld [vmem:[%s10267_s6 + $0x68] sm:$0xff] }
 0x7b6   :  { %vm4563_vm5 = vcmp.eq.f32.partialorder %v4562_v45, 8.507059e+37  ;;  %4855 = vmatpush.msrb.mxu0 %v4846_v39 }
 0x7b7   :  { %v4532_v55 = vadd.f32 %v6191_v24, %v4531_v5  ;;  %v4604_v5 = vpop.f32.mrf.mxu0 }
 0x7b8   :  { %v6193_v36 = vpop.eup %6192  ;;  %v4605_v3 = vadd.f32 %v4604_v5, %v11247_v46 }
 0x7b9   :  { %v4554_v2 = vmul.f32 %v6193_v36, %v10062_v20  ;;  %v4536_v22 = vsel %vm10090_vm8, %v6191_v24, %v4532_v55  ;;  %v6195_v25 = vpop.eup %6194  ;;  %vm4559_vm1 = vweird.f32 %v6193_v36  ;;  %v4564_v24 = vand.u32 2147483648, %v10062_v20  ;;  %v4845_v55 = vld [vmem:[%s10267_s6 + $0x60] sm:$0xff] }
 0x7ba   :  { %v4552_v11 = vadd.f32 1.0, %v6195_v25  ;;  %v4541_v40 = vsel %vm4538_vm14, %v4540_v50, %v4536_v22  ;;  %v6197_v59 = vpop.eup %6196  ;;  %vm4560_vm3 = vmor %vm4558_vm2, %vm4559_vm1  ;;  %4856 = vmatpush.msrb.mxu0 %v4845_v55 }
 0x7bb   :  { %v4555_v60 = vsub.f32 1.0, %v4554_v2  ;;  %v4584_v63 = vmul.f32 %v4541_v40, %v9859_v6  ;;  %v6199_v1 = vpop.eup %6198  ;;  %v4585_v57 = vmul.f32 %v6197_v59, %v4488_v33  ;;  %v4565_v26 = vor.u32 1.1754944e-38, %v4564_v24  ;;  %v4838_v59 = vld [vmem:[%s10267_s6 + $0x28] sm:$0xff] }
 0x7bc   :  { %6200 = vrcp.f32 %v4552_v11  ;;  %v4586_v62 = vmul.f32 %v6199_v1, %v4503_v18  ;;  %v4579_v21 = vand.u32 2147483648, %v4552_v11  ;;  %v4577_v28 = vand.u32 2147483647, %v4552_v11 }
 0x7bd   :  { %v4556_v49 = vmul.f32 %v6193_v36, %v4555_v60  ;;  %v10125_v42 = vadd.f32 %v4585_v57, %v4583_v43  ;;  %vm4573_vm6 = vweird.f32 %v4552_v11  ;;  %v4635_v40 = vadd.f32 %v4634_v38, %v11248_v4  ;;  %v4688_v43 = vpop.f32.mrf.mxu2 }
 0x7be   :  { %v10127_v51 = vadd.f32 %v4586_v62, %v4584_v63  ;;  %v4580_v31 = vor.u32 1.1754944e-38, %v4579_v21  ;;  %vm4578_vm9 = vcmp.eq.f32.partialorder %v4577_v28, 8.507059e+37  ;;  %v4837_v63 = vld [vmem:[%s10267_s6 + $0x20] sm:$0xff]  ;;  %v4689_v45 = vadd.f32 %v4688_v43, %v11249_v32  ;;  %v4834_v21 = vld [vmem:[%s10267_s6 + $0x8] sm:$0xff] }
 0x7bf   :  { %v4557_v10 = vadd.f32 %v6193_v36, %v4556_v49  ;;  %6202 = vtanh.f32 %v10125_v42  ;;  %v4606_v30 = vpop.f32.mrf.mxu0  ;;  %v4836_v49 = vld [vmem:[%s10267_s6 + $0x18] sm:$0xff]  ;;  %v4833_v28 = vld [vmem:[%s10267_s6] sm:$0xff] }
 0x7c0   :  { %6204 = vtanh.f32 %v10127_v51  ;;  %v4607_v22 = vadd.f32 %v4606_v30, %v11247_v46  ;;  %v4839_v46 = vld [vmem:[%s10267_s6 + $0x30] sm:$0xff] }
 0x7c1   :  { %v4561_v34 = vsel %vm4560_vm3, %v6193_v36, %v4557_v10  ;;  %v4844_v36 = vld [vmem:[%s10267_s6 + $0x58] sm:$0xff] }
 0x7c2   :  { %v6201_v29 = vpop.eup %6200  ;;  %v4566_v47 = vsel %vm4563_vm5, %v4565_v26, %v4561_v34  ;;  %4857 = vmatpush.msrb.mxu0 %v4844_v36 }
 0x7c3   :  { %v4569_v23 = vmul.f32 %v6201_v29, %v4552_v11  ;;  %vm4574_vm4 = vweird.f32 %v6201_v29 }
 0x7c4   :  { %vm4575_vm7 = vmor %vm4573_vm6, %vm4574_vm4  ;;  %4858 = vmatpush.msrb.mxu0 %v4843_v27 }
 0x7c5   :  { %v4570_v6 = vsub.f32 1.0, %v4569_v23  ;;  %v6203_v56 = vpop.eup %6202  ;;  %v4835_v23 = vld [vmem:[%s10267_s6 + $0x10] sm:$0xff] }
 0x7c6   :  { %v6205_v20 = vpop.eup %6204  ;;  %v4591_v15 = vmul.f32 %v6203_v56, %v4566_v47  ;;  %4859 = vmatpush.msrb.mxu0 %v4842_v44 }
 0x7c7   :  { %v4571_v58 = vmul.f32 %v6201_v29, %v4570_v6  ;;  %v4660_v24 = vpop.f32.mrf.mxu0 }
 0x7c8   :  { %4860 = vmatpush.msrb.mxu0 %v4841_v17 }
 0x7c9   :  { %v4572_v13 = vadd.f32 %v6201_v29, %v4571_v58 }
 0x7ca   :  { %4861 = vmatpush.msrb.mxu0 %v4840_v54 }
 0x7cb   :  { %v4576_v48 = vsel %vm4575_vm7, %v6201_v29, %v4572_v13 }
 0x7cc   :  { %v4581_v19 = vsel %vm4578_vm9, %v4580_v31, %v4576_v48  ;;  %4862 = vmatpush.msrb.mxu0 %v4839_v46  ;;  %v4690_v31 = vpop.f32.mrf.mxu2 }
 0x7cd   :  { %v4592_v35 = vmul.f32 %v6205_v20, %v4581_v19  ;;  %v4661_v19 = vadd.f32 %v4660_v24, %v11250_v7  ;;  %v4691_v5 = vadd.f32 %v4690_v31, %v11249_v32 }
 0x7ce   :  { %4863 = vmatpush.msrb.mxu0 %v4838_v59 }
 0x7cf   :  { %v4594_v14 = vpack.c.bf16 %v4592_v35, %v4591_v15 }
 0x7d0   :  { %4864 = vmatpush.msrb.mxu0 %v4837_v63 }
 0x7d1   :  { %4617 = vmatmul.bf16.vlgmr.msra.gmra.mxu1 %v4594_v14  ;;  %4645 = vmatmul.bf16.vlgmr.msrb.gmra.mxu3 %v4594_v14 }
 0x7d2   :  { %4865 = vmatpush.msrb.mxu0 %v4836_v49 }
 0x7d4   :  { %4866 = vmatpush.msrb.mxu0 %v4835_v23 }
 0x7d6   :  { %4867 = vmatpush.msrb.mxu0 %v4834_v21 }
 0x7d8   :  { %4868 = vmatpush.msrb.mxu0 %v4833_v28 }
 0x7e1   :  { %4673 = vmatmul.bf16.vlgmr.msrb.gmra.mxu1 %v4594_v14  ;;  %4701 = vmatmul.bf16.vlgmr.msra.gmra.mxu3 %v4594_v14 }
 0x84e   :  { %v4618_v9 = vpop.f32.mrf.mxu1 }
 0x84f   :  { %v4619_v53 = vadd.f32 %v4618_v9, %v4605_v3 }
 0x851   :  { %v5575_v16 = vmul.f32 -1.442695, %v4619_v53  ;;  %v4662_v53 = vpop.f32.mrf.mxu0 }
 0x853   :  { %6206 = vpow2.f32 %v5575_v16 }
 0x854   :  { %v4646_v2 = vpop.f32.mrf.mxu3 }
 0x855   :  { %v4647_v25 = vadd.f32 %v4646_v2, %v4633_v52 }
 0x856   :  { %v4620_v50 = vpop.f32.mrf.mxu1 }
 0x857   :  { %v5577_v61 = vmul.f32 -1.442695, %v4647_v25  ;;  %v4621_v8 = vadd.f32 %v4620_v50, %v4607_v22  ;;  %v4663_v50 = vadd.f32 %v4662_v53, %v11250_v7 }
 0x859   :  { %v6207_v11 = vpop.eup %6206  ;;  %6208 = vpow2.f32 %v5577_v61  ;;  %v5576_v60 = vmul.f32 -1.442695, %v4621_v8 }
 0x85a   :  { %v10164_v41 = vadd.f32 1.0, %v6207_v11 }
 0x85b   :  { %6210 = vpow2.f32 %v5576_v60 }
 0x85c   :  { %6212 = vrcp.f32 %v10164_v41  ;;  %v4648_v33 = vpop.f32.mrf.mxu3  ;;  %vm4720_vm10 = vweird.f32 %v10164_v41  ;;  %v4724_v9 = vand.u32 2147483647, %v10164_v41  ;;  %v4726_v55 = vand.u32 2147483648, %v10164_v41 }
 0x85d   :  { %v4649_v18 = vadd.f32 %v4648_v33, %v4635_v40 }
 0x85e   :  { %v4674_v47 = vpop.f32.mrf.mxu1  ;;  %v4727_v61 = vor.u32 1.1754944e-38, %v4726_v55  ;;  %vm4725_vm15 = vcmp.eq.f32.partialorder %v4724_v9, 8.507059e+37 }
 0x85f   :  { %v6209_v1 = vpop.eup %6208  ;;  %v5578_v57 = vmul.f32 -1.442695, %v4649_v18  ;;  %v4675_v37 = vadd.f32 %v4674_v47, %v4661_v19 }
 0x860   :  { %v10177_v4 = vadd.f32 1.0, %v6209_v1 }
 0x861   :  { %v6211_v62 = vpop.eup %6210  ;;  %6214 = vpow2.f32 %v5578_v57 }
 0x862   :  { %v10182_v29 = vpop.eup %6212  ;;  %6216 = vrcp.f32 %v10177_v4  ;;  %v10185_v10 = vadd.f32 1.0, %v6211_v62  ;;  %v4764_v3 = vand.u32 2147483648, %v10177_v4  ;;  %v4762_v16 = vand.u32 2147483647, %v10177_v4 }
 0x863   :  { %v4716_v6 = vmul.f32 %v10182_v29, %v10164_v41  ;;  %vm4721_vm8 = vweird.f32 %v10182_v29  ;;  %vm4758_vm13 = vweird.f32 %v10177_v4 }
 0x864   :  { %6218 = vrcp.f32 %v10185_v10  ;;  %v4702_v58 = vpop.f32.mrf.mxu3  ;;  %vm10218_vm12 = vmor %vm4720_vm10, %vm4721_vm8  ;;  %v4765_v17 = vor.u32 1.1754944e-38, %v4764_v3  ;;  %vm4763_vm0 = vcmp.eq.f32.partialorder %v4762_v16, 8.507059e+37  ;;  %v4741_v62 = vand.u32 2147483648, %v10185_v10 }
 0x865   :  { %v4717_v34 = vsub.f32 1.0, %v4716_v6  ;;  %v4703_v26 = vadd.f32 %v4702_v58, %v4689_v45  ;;  %vm4735_vm5 = vweird.f32 %v10185_v10  ;;  %v4739_v24 = vand.u32 2147483647, %v10185_v10 }
 0x866   :  { %v4676_v60 = vpop.f32.mrf.mxu1 }
 0x867   :  { %v6215_v13 = vpop.eup %6214  ;;  %v4718_v56 = vmul.f32 %v10182_v29, %v4717_v34  ;;  %v5579_v48 = vmul.f32 -1.442695, %v4703_v26  ;;  %v4677_v43 = vadd.f32 %v4676_v60, %v4663_v50  ;;  %vm4740_vm9 = vcmp.eq.f32.partialorder %v4739_v24, 8.507059e+37 }
 0x868   :  { %v6217_v20 = vpop.eup %6216  ;;  %v10202_v15 = vadd.f32 1.0, %v6215_v13 }
 0x869   :  { %v4754_v35 = vmul.f32 %v6217_v20, %v10177_v4  ;;  %6220 = vpow2.f32 %v5579_v48  ;;  %v4719_v39 = vadd.f32 %v10182_v29, %v4718_v56  ;;  %vm4759_vm11 = vweird.f32 %v6217_v20 }
 0x86a   :  { %v10205_v14 = vpop.eup %6218  ;;  %6222 = vrcp.f32 %v10202_v15  ;;  %vm4760_vm14 = vmor %vm4758_vm13, %vm4759_vm11  ;;  %v4779_v63 = vand.u32 2147483648, %v10202_v15  ;;  %v4777_v4 = vand.u32 2147483647, %v10202_v15  ;;  %vm4773_vm3 = vweird.f32 %v10202_v15 }
 0x86b   :  { %v4755_v0 = vsub.f32 1.0, %v4754_v35  ;;  %v4731_v12 = vmul.f32 %v10205_v14, %v10185_v10  ;;  %6224 = vtanh.f32 %v4675_v37  ;;  %v4723_v2 = vsel %vm10218_vm12, %v10182_v29, %v4719_v39 }
 0x86c   :  { %v4704_v32 = vpop.f32.mrf.mxu3  ;;  %v4728_v41 = vsel %vm4725_vm15, %v4727_v61, %v4723_v2  ;;  %vm4736_vm2 = vweird.f32 %v10205_v14  ;;  %v4780_v6 = vor.u32 1.1754944e-38, %v4779_v63  ;;  %vm4778_vm7 = vcmp.eq.f32.partialorder %v4777_v4, 8.507059e+37 }
 0x86d   :  { %v4756_v36 = vmul.f32 %v6217_v20, %v4755_v0  ;;  %v4705_v30 = vadd.f32 %v4704_v32, %v4691_v5  ;;  %v4732_v27 = vsub.f32 1.0, %v4731_v12  ;;  %vm10242_vm6 = vmor %vm4735_vm5, %vm4736_vm2  ;;  %v4742_v10 = vor.u32 1.1754944e-38, %v4741_v62 }
 0x86f   :  { %v6221_v38 = vpop.eup %6220  ;;  %v4757_v44 = vadd.f32 %v6217_v20, %v4756_v36  ;;  %v5580_v22 = vmul.f32 -1.442695, %v4705_v30  ;;  %v4733_v40 = vmul.f32 %v10205_v14, %v4732_v27 }
 0x870   :  { %v6223_v25 = vpop.eup %6222  ;;  %v4791_v8 = vadd.f32 1.0, %v6221_v38 }
 0x871   :  { %v4769_v54 = vmul.f32 %v6223_v25, %v10202_v15  ;;  %v4761_v11 = vsel %vm4760_vm14, %v6217_v20, %v4757_v44  ;;  %v6225_v7 = vpop.eup %6224  ;;  %vm4774_vm1 = vweird.f32 %v6223_v25  ;;  %v4734_v57 = vadd.f32 %v10205_v14, %v4733_v40  ;;  %v5789_v44 = vld [vmem:[%s10268_s7] ss:$0 sm:$0xff] }
 0x872   :  { %v4766_v46 = vsel %vm4763_vm0, %v4765_v17, %v4761_v11  ;;  %6226 = vrcp.f32 %v4791_v8  ;;  %v4825_v1 = vmul.f32 %v6225_v7, %v4728_v41  ;;  %vm10236_vm4 = vmor %vm4773_vm3, %vm4774_vm1  ;;  %v4804_v47 = vand.u32 2147483648, %v4791_v8 }
 0x873   :  { %v4770_v33 = vsub.f32 1.0, %v4769_v54  ;;  %v4823_v59 = vmul.f32 %v4766_v46, %v10125_v42  ;;  %6228 = vpow2.f32 %v5580_v22  ;;  %v4738_v34 = vsel %vm10242_vm6, %v10205_v14, %v4734_v57 }
 0x874   :  { %6230 = vtanh.f32 %v4677_v43  ;;  %v4743_v48 = vsel %vm4740_vm9, %v4742_v10, %v4738_v34  ;;  %v4802_v20 = vand.u32 2147483647, %v4791_v8  ;;  %vm4798_vm10 = vweird.f32 %v4791_v8 }
 0x875   :  { %v4771_v18 = vmul.f32 %v6223_v25, %v4770_v33  ;;  %v4827_v49 = vadd.f32 %v4825_v1, %v4823_v59  ;;  %v4805_v14 = vor.u32 1.1754944e-38, %v4804_v47  ;;  %vm4876_vm1 = vcmask 15360  }
 0x876   :  { %vm4803_vm12 = vcmp.eq.f32.partialorder %v4802_v20, 8.507059e+37 }
 0x877   :  { %v4772_v42 = vadd.f32 %v6223_v25, %v4771_v18  ;;  %6232 = vtanh.f32 %v4827_v49 }
 0x878   :  { %v6227_v29 = vpop.eup %6226 }
 0x879   :  { %v6229_v45 = vpop.eup %6228  ;;  %v4794_v21 = vmul.f32 %v6227_v29, %v4791_v8  ;;  %v4776_v28 = vsel %vm10236_vm4, %v6223_v25, %v4772_v42  ;;  %vm4799_vm8 = vweird.f32 %v6227_v29 }
 0x87a   :  { %v4792_v26 = vadd.f32 1.0, %v6229_v45  ;;  %v4781_v31 = vsel %vm4778_vm7, %v4780_v6, %v4776_v28  ;;  %v6231_v15 = vpop.eup %6230  ;;  %vm4800_vm11 = vmor %vm4798_vm10, %vm4799_vm8 }
 0x87b   :  { %v4795_v13 = vsub.f32 1.0, %v4794_v21  ;;  %v4824_v19 = vmul.f32 %v4781_v31, %v10127_v51  ;;  %v4826_v5 = vmul.f32 %v6231_v15, %v4743_v48 }
 0x87c   :  { %6234 = vrcp.f32 %v4792_v26  ;;  %v4819_v53 = vand.u32 2147483648, %v4792_v26  ;;  %v4817_v51 = vand.u32 2147483647, %v4792_v26  ;;  %vm4813_vm14 = vweird.f32 %v4792_v26 }
 0x87d   :  { %v4796_v56 = vmul.f32 %v6227_v29, %v4795_v13  ;;  %v6233_v37 = vpop.eup %6232  ;;  %v4828_v39 = vadd.f32 %v4826_v5, %v4824_v19 }
 0x87e   :  { %v4820_v30 = vor.u32 1.1754944e-38, %v4819_v53  ;;  %vm4818_vm0 = vcmp.eq.f32.partialorder %v4817_v51, 8.507059e+37 }
 0x87f   :  { %v4797_v35 = vadd.f32 %v6227_v29, %v4796_v56  ;;  %6236 = vtanh.f32 %v4828_v39 }
 0x881   :  { %v4801_v0 = vsel %vm4800_vm11, %v6227_v29, %v4797_v35 }
 0x882   :  { %v6235_v12 = vpop.eup %6234  ;;  %v4806_v3 = vsel %vm4803_vm12, %v4805_v14, %v4801_v0 }
 0x883   :  { %v4809_v9 = vmul.f32 %v6235_v12, %v4792_v26  ;;  %v4831_v55 = vmul.f32 %v6233_v37, %v4806_v3  ;;  %vm4814_vm13 = vweird.f32 %v6235_v12 }
 0x884   :  { %vm4815_vm15 = vmor %vm4813_vm14, %vm4814_vm13 }
 0x885   :  { %4869 = vmatmul.f32.vlgmr.msrb.gmra.mxu0 %v4831_v55  ;;  %v4810_v32 = vsub.f32 1.0, %v4809_v9  ;;  %v6237_v52 = vpop.eup %6236 }
 0x887   :  { %v4811_v36 = vmul.f32 %v6235_v12, %v4810_v32 }
 0x889   :  { %v4812_v16 = vadd.f32 %v6235_v12, %v4811_v36 }
 0x88b   :  { %v4816_v27 = vsel %vm4815_vm15, %v6235_v12, %v4812_v16 }
 0x88c   :  { %v4821_v38 = vsel %vm4818_vm0, %v4820_v30, %v4816_v27 }
 0x88d   :  { %v4832_v2 = vmul.f32 %v6237_v52, %v4821_v38 }
 0x88f   :  { %4872 = vmatmul.f32.gmra.mxu0 %v4832_v2 }
 0x902   :  { %v4870_v22 = vpop.f32.mrf.mxu0 }
 0x903   :  { %v4871_v25 = vadd.f32 %v5789_v44, %v4870_v22 }
 0x905   :  { %4877 = vst.msk [vmem:[%s10269_s8] sm:$0xff] %vm4876_vm1, %v4871_v25 }
 0x90c   :  { %v4873_v50 = vpop.f32.mrf.mxu0 }
 0x90d   :  { %v4874_v17 = vadd.f32 %v5789_v44, %v4873_v50 }
 0x90f   :  { %4878 = vst.msk [vmem:[%s10269_s8 + $0x8] sm:$0xff] %vm4876_vm1, %v4874_v17 }
 0x910   :  { %4883 = vsyncmov [#allocation4] }
 0x913   :  { %s4884_s14 = vpop.sfrf %4883 }
 0x914   :  { %p5581_p0 = scmp.ne.s32.totalorder %s4884_s14, 0 }
 0x916   :  { %4888 = shalt.err (%p5581_p0)  }

</bundles_post_ra>
